<compile_context>
chip_gen: v7x
topology: tpu7x:2x2x1
jax: 0.10.0
libtpu: 0.0.40
codegen_flags: <defaults>
</compile_context>

<pallas_src>
import functools
import types

import jax
import jax.numpy as jnp
from jax.experimental import pallas as pl
from jax.experimental.pallas import tpu as pltpu

ACT_DTYPE = jnp.bfloat16      # matmul operands / inter-layer activations


def _round_up(x, m):
    return (x + m - 1) // m * m


def _apply_act(v, activation):
    if activation == "relu":
        return jnp.maximum(v, 0.0)
    if activation == "lrelu":
        return jnp.where(v > 0, v, 0.2 * v)
    if activation == "tanh":
        return jnp.tanh(v)
    return v


@functools.lru_cache(maxsize=None)
def _single_buffer_supported():
    """Probe whether pipeline_mode=pl.Buffered(1) (single-buffered resident
    weights) lowers and runs on this jax/libtpu; fall back to default double
    buffering otherwise."""
    try:
        def k(x_ref, w_ref, o_ref):
            o_ref[...] = x_ref[...] + w_ref[...]

        f = pl.pallas_call(
            k,
            out_shape=jax.ShapeDtypeStruct((16, 128), jnp.float32),
            grid_spec=pltpu.PrefetchScalarGridSpec(
                num_scalar_prefetch=0,
                grid=(2,),
                in_specs=[
                    pl.BlockSpec((8, 128), lambda i: (i, 0)),
                    pl.BlockSpec((8, 128), lambda i: (0, 0),
                                 pipeline_mode=pl.Buffered(1)),
                ],
                out_specs=pl.BlockSpec((8, 128), lambda i: (i, 0)),
            ),
        )
        jax.block_until_ready(
            f(jnp.zeros((16, 128), jnp.float32),
              jnp.ones((8, 128), jnp.float32)))
        return True
    except Exception:
        return False


# --------------------------------------------------------------------------
# Pallas kernel: fused matmul + bias + (pre-)activation + residual add
# --------------------------------------------------------------------------
def _mm_kernel(*refs, activation, pre_activation, has_residual):
    if has_residual:
        a_ref, w_ref, b_ref, r_ref, o_ref = refs
    else:
        a_ref, w_ref, b_ref, o_ref = refs
        r_ref = None

    a = a_ref[...]
    if pre_activation == "lrelu":          # conv_img: leaky_relu before conv
        a = jnp.where(a > 0, a, 0.2 * a)
    acc = jnp.dot(a, w_ref[...], preferred_element_type=jnp.float32)
    acc = acc + b_ref[...]                 # (1, Np) broadcast, f32
    acc = _apply_act(acc, activation)
    if r_ref is not None:                  # residual add AFTER activation
        acc = acc + r_ref[...].astype(jnp.float32)
    o_ref[...] = acc.astype(o_ref.dtype)


def _matmul_bias_act(a, w, b, *, activation, pre_activation="none",
                     residual=None):
    """a: (M, K), w: (K, N), b: (N,), residual: (M, Cr) or None -> (M, N) bf16.

    Weight/bias blocks use a constant index map (VMEM-resident); the M axis is
    tiled and marked 'parallel'; Cout is lane-padded to a multiple of 128."""
    M, K = a.shape
    N = w.shape[1]
    a = a.astype(ACT_DTYPE)

    Np = _round_up(N, 128)
    if Np != N:
        w = jnp.pad(w, ((0, 0), (0, Np - N)))
        b = jnp.pad(b, ((0, Np - N),))
    w = w.astype(ACT_DTYPE)
    b2 = b.astype(jnp.float32).reshape(1, Np)

    # M-tile: several grid steps per core on the large layers (megacore +
    # DMA/compute overlap); tiny decoder layers stay a single step.
    if M <= 512:
        TM = max(_round_up(M, 8), 8)
    else:
        TM = 256 if Np >= 512 else 512
    Mp = _round_up(M, TM)
    if Mp != M:
        a = jnp.pad(a, ((0, Mp - M), (0, 0)))

    resident = ({"pipeline_mode": pl.Buffered(1)}
                if _single_buffer_supported() else {})

    in_specs = [
        pl.BlockSpec((TM, K), lambda i: (i, 0)),
        pl.BlockSpec((K, Np), lambda i: (0, 0), **resident),   # resident weight
        pl.BlockSpec((1, Np), lambda i: (0, 0), **resident),   # resident bias
    ]
    inputs = [a, w, b2]

    has_residual = residual is not None
    if has_residual:
        r = residual.astype(ACT_DTYPE)
        if r.shape[1] != Np:
            r = jnp.pad(r, ((0, 0), (0, Np - r.shape[1])))
        if Mp != M:
            r = jnp.pad(r, ((0, Mp - M), (0, 0)))
        in_specs.append(pl.BlockSpec((TM, Np), lambda i: (i, 0)))
        inputs.append(r)

    # Per-step VMEM estimate (clamped well below v7x's 64 MiB per-core VMEM).
    Kp = _round_up(K, 128)
    w_copies = 1 if resident else 2
    vmem = (w_copies * Kp * Np * 2 + 2 * TM * Kp * 2 + 2 * TM * Np * 2
            + (2 * TM * Np * 2 if has_residual else 0)
            + TM * Np * 4 + TM * Kp * 4 + (8 << 20))
    vmem = int(min(max(vmem, 32 << 20), 48 << 20))

    out = pl.pallas_call(
        functools.partial(_mm_kernel, activation=activation,
                          pre_activation=pre_activation,
                          has_residual=has_residual),
        out_shape=jax.ShapeDtypeStruct((Mp, Np), ACT_DTYPE),
        grid_spec=pltpu.PrefetchScalarGridSpec(
            num_scalar_prefetch=0,
            grid=(Mp // TM,),
            in_specs=in_specs,
            out_specs=pl.BlockSpec((TM, Np), lambda i: (i, 0)),
        ),
        compiler_params=pltpu.CompilerParams(
            dimension_semantics=("parallel",),
            vmem_limit_bytes=vmem,
        ),
    )(*inputs)
    return out[:M, :N]


# --------------------------------------------------------------------------
# Conv2dBlock (pad -> conv(bias) -> activation [-> + residual]), norm='none'
# --------------------------------------------------------------------------
def conv2d_block(x, w, b, *, stride=1, padding=0, pad_type="zero",
                 activation="none", pre_activation="none", residual=None):
    """x: (B, H, W, Ci) NHWC, w: (KH, KW, Ci, Co) HWIO, b: (Co,),
    residual: (B, Ho, Wo, Cr) or None.  Returns (B, Ho, Wo, Co) bf16."""
    B, H, W, Ci = x.shape
    KH, KW, _, Co = w.shape
    x = x.astype(ACT_DTYPE)
    if padding > 0:
        mode = {"reflect": "reflect", "replicate": "edge",
                "zero": "constant"}[pad_type]
        x = jnp.pad(x, ((0, 0), (padding, padding), (padding, padding), (0, 0)),
                    mode=mode)
    Hp, Wp = x.shape[1], x.shape[2]
    Ho = (Hp - KH) // stride + 1
    Wo = (Wp - KW) // stride + 1

    # im2col: fold the (kh, kw) taps into the contraction axis K = KH*KW*Ci so
    # the whole layer is one deep-K MXU dot (accumulates inside the MXU
    # pipeline instead of KH*KW separate VPU/VMEM accumulator passes).
    cols = []
    for kh in range(KH):
        for kw in range(KW):
            cols.append(x[:, kh:kh + (Ho - 1) * stride + 1:stride,
                            kw:kw + (Wo - 1) * stride + 1:stride, :])
    a = jnp.concatenate(cols, axis=-1).reshape(B * Ho * Wo, KH * KW * Ci)
    wm = w.reshape(KH * KW * Ci, Co)

    r = None
    if residual is not None:
        r = residual.reshape(B * Ho * Wo, residual.shape[-1])

    out = _matmul_bias_act(a, wm, b, activation=activation,
                           pre_activation=pre_activation, residual=r)
    return out.reshape(B, Ho, Wo, Co)


# --------------------------------------------------------------------------
# Parameter initialization (deterministic, synthetic weights)
# --------------------------------------------------------------------------
def init_conv(key, k, cin, cout):
    kw_, kb_ = jax.random.split(key)
    w = (0.02 * jax.random.normal(kw_, (k, k, cin, cout),
                                  jnp.float32)).astype(ACT_DTYPE)
    b = 0.01 * jax.random.normal(kb_, (cout,), jnp.float32)
    return {"w": w, "b": b}


def init_res_block(key, cin, cout, k):
    mid = max(cin, cout)
    k1, k2, k3 = jax.random.split(key, 3)
    return {"conv1": init_conv(k1, k, cin, mid),
            "skip": init_conv(k2, k, cin, cout),
            "conv2": init_conv(k3, 3, mid, cout)}


def init_params(key, dim=8, nf=64):
    keys = jax.random.split(key, 20)
    p = {}
    # SPADEStyleEncoder (norm='none', activ='relu', pad_type='reflect')
    p["head_0_enc"] = init_res_block(keys[0], 3, dim, 7)
    p["down_0"] = init_res_block(keys[1], dim, 2 * dim, 3)
    p["down_1"] = init_res_block(keys[2], 2 * dim, 4 * dim, 3)
    p["down_2"] = init_res_block(keys[3], 4 * dim, 8 * dim, 3)
    p["down_3"] = init_res_block(keys[4], 8 * dim, 8 * dim, 3)
    p["down_4"] = init_res_block(keys[5], 8 * dim, 8 * dim, 3)
    # fc: Conv2d(18, 8*nf, 3, padding=1)
    p["fc"] = init_conv(keys[6], 3, 18, 8 * nf)
    # SPADEResnetBlock stand-ins (definition not provided in reference source)
    p["head_0"] = init_conv(keys[7], 3, 8 * nf, 8 * nf)
    p["G_middle_0"] = init_conv(keys[8], 3, 8 * nf, 8 * nf)
    p["G_middle_1"] = init_conv(keys[9], 3, 8 * nf, 8 * nf)
    p["up_0"] = init_conv(keys[10], 3, 8 * nf, 8 * nf)
    p["up_1"] = init_conv(keys[11], 3, 8 * nf, 4 * nf)
    p["up_2"] = init_conv(keys[12], 3, 4 * nf, 2 * nf)
    p["up_3"] = init_conv(keys[13], 3, 2 * nf, 1 * nf)
    # conv_img: Conv2d(nf, 3, 3, padding=1)
    p["conv_img"] = init_conv(keys[14], 3, nf, 3)
    # EdgeContentEncoder stand-in: 1 + 18 + 18 = 37 channels -> 1 channel
    p["edge_gen"] = init_conv(keys[15], 3, 37, 1)
    return p


# --------------------------------------------------------------------------
# Module forward pieces
# --------------------------------------------------------------------------
def residual_block_fwd(p, x, k, s, pad, pad_type, activ):
    assert p["conv1"]["w"].shape[0] == k
    # conv1 and skip share the same input / ksize / stride / padding: fuse them
    # into one conv by concatenating weights along Cout, then split.
    mid = p["conv1"]["w"].shape[-1]
    co = p["skip"]["w"].shape[-1]
    w_cat = jnp.concatenate([p["conv1"]["w"].astype(ACT_DTYPE),
                             p["skip"]["w"].astype(ACT_DTYPE)], axis=-1)
    b_cat = jnp.concatenate([p["conv1"]["b"], p["skip"]["b"]], axis=0)
    y = conv2d_block(x, w_cat, b_cat, stride=s, padding=pad, pad_type=pad_type,
                     activation=activ)
    h, skip = y[..., :mid], y[..., mid:mid + co]
    # conv2 + residual add are fused into one kernel epilogue.
    return conv2d_block(h, p["conv2"]["w"], p["conv2"]["b"],
                        stride=1, padding=1, pad_type=pad_type,
                        activation=activ, residual=skip)


def spade_style_encoder(params, x, pad_type="reflect", activ="relu"):
    x = residual_block_fwd(params["head_0_enc"], x, 7, 1, 3, pad_type, activ)
    x = residual_block_fwd(params["down_0"], x, 3, 2, 1, pad_type, activ)
    x = residual_block_fwd(params["down_1"], x, 3, 2, 1, pad_type, activ)
    x = residual_block_fwd(params["down_2"], x, 3, 2, 1, pad_type, activ)
    x = residual_block_fwd(params["down_3"], x, 3, 2, 1, pad_type, activ)
    x = residual_block_fwd(params["down_4"], x, 3, 2, 1, pad_type, activ)
    return x


def nearest_resize_nhwc(x, sh, sw):
    # PyTorch F.interpolate(mode='nearest'): src = floor(dst * in / out)
    B, H, W, C = x.shape
    ih = (jnp.arange(sh) * H) // sh
    iw = (jnp.arange(sw) * W) // sw
    return x[:, ih][:, :, iw]


def bilinear_resize_nhwc(x, sh, sw):
    # matches F.interpolate(mode='bilinear', align_corners=False) (half-pixel)
    B, _, _, C = x.shape
    return jax.image.resize(x, (B, sh, sw, C), method="bilinear")


def compute_latent_vector_size(opt):
    sh = opt.fineSize // 2 ** opt.G_n_upampling
    sw = round(sh / (256.0 / 176.0))
    return sh, sw


def compute_up_size(h):
    sh = h * 2
    sw = round(sh / (256.0 / 176.0))
    return sh, sw


def spade_block_fwd(p, x):
    # TODO(synk): SPADEResnetBlock definition is not provided in the reference
    # source; stand-in is a single 3x3 conv + LeakyReLU(0.2) that ignores
    # (style, content_edge, content_pose) but preserves channel/spatial shapes.
    return conv2d_block(x, p["w"], p["b"], stride=1, padding=1,
                        pad_type="zero", activation="lrelu")


def cs_generator_forward(params, opt, input_P1, input_EP1, input_BP2,
                         input_BEP2, input_EP2):
    """Inputs are NCHW (PyTorch convention); returns (fake_EP2, x) in NCHW f32."""
    to_nhwc = lambda t: jnp.transpose(t, (0, 2, 3, 1)).astype(ACT_DTYPE)
    to_nchw = lambda t: jnp.transpose(t, (0, 3, 1, 2)).astype(jnp.float32)

    P1 = to_nhwc(input_P1)
    EP1 = to_nhwc(input_EP1)
    BP2 = to_nhwc(input_BP2)
    BEP2 = to_nhwc(input_BEP2)
    del input_EP2  # not used in the PyTorch forward either

    # TODO(synk): EdgeContentEncoder wraps ResnetGenerator + a .pth checkpoint
    # load; neither is available here.  Stand-in: one 3x3 conv (37 -> 1) + tanh
    # over concat([EP1, BP2, BEP2]) matching input_dim = 18 + 18 + 1.
    edge_in = jnp.concatenate([EP1, BP2, BEP2], axis=-1)
    fake_EP2 = conv2d_block(edge_in, params["edge_gen"]["w"],
                            params["edge_gen"]["b"], stride=1, padding=1,
                            pad_type="reflect", activation="tanh")

    # Style branch — kept for semantic parity with the PyTorch module; since
    # the SPADE stand-ins ignore `style`, XLA dead-code-eliminates it under jit.
    style = spade_style_encoder(params, P1)
    content_pose = BP2

    # opt.use_vae == False branch
    sh, sw = compute_latent_vector_size(opt)
    x = nearest_resize_nhwc(content_pose, sh, sw)
    x = conv2d_block(x, params["fc"]["w"], params["fc"]["b"],
                     stride=1, padding=1, pad_type="zero", activation="none")

    x = spade_block_fwd(params["head_0"], x)
    x = bilinear_resize_nhwc(x, *compute_up_size(x.shape[1]))
    x = spade_block_fwd(params["G_middle_0"], x)
    x = spade_block_fwd(params["G_middle_1"], x)
    x = bilinear_resize_nhwc(x, *compute_up_size(x.shape[1]))
    x = spade_block_fwd(params["up_0"], x)
    x = bilinear_resize_nhwc(x, *compute_up_size(x.shape[1]))
    x = spade_block_fwd(params["up_1"], x)
    x = bilinear_resize_nhwc(x, *compute_up_size(x.shape[1]))
    x = spade_block_fwd(params["up_2"], x)
    x = bilinear_resize_nhwc(x, *compute_up_size(x.shape[1]))
    x = spade_block_fwd(params["up_3"], x)

    # conv_img(F.leaky_relu(x, 0.2)) then tanh — leaky-relu / bias / tanh are
    # fused into the conv kernel (pre_activation + activation).
    x = conv2d_block(x, params["conv_img"]["w"], params["conv_img"]["b"],
                     stride=1, padding=1, pad_type="zero",
                     activation="tanh", pre_activation="lrelu")

    _ = style  # style path kept for shape/semantic parity
    return to_nchw(fake_EP2), to_nchw(x)


# --------------------------------------------------------------------------
# Main
# --------------------------------------------------------------------------
if __name__ == "__main__":
    opt = types.SimpleNamespace(use_vae=False, fineSize=64, G_n_upampling=5,
                                ngf=64, z_dim=256, content_weight=1.0)
    B, H, W = 2, 64, 44  # 256x176 aspect ratio at small scale

    key = jax.random.PRNGKey(0)
    k1, k2, k3, k4, k5, kp = jax.random.split(key, 6)
    input_P1 = jax.random.normal(k1, (B, 3, H, W), jnp.float32)
    input_EP1 = jax.random.normal(k2, (B, 1, H, W), jnp.float32)
    input_BP2 = jax.random.normal(k3, (B, 18, H, W), jnp.float32)
    input_BEP2 = jax.random.normal(k4, (B, 18, H, W), jnp.float32)
    input_EP2 = jax.random.normal(k5, (B, 1, H, W), jnp.float32)

    params = init_params(kp, dim=8, nf=64)

    # Populate the Buffered(1) capability probe once, outside jit tracing.
    _single_buffer_supported()

    # Explicitly exercise the style-encoder kernels (residual/reflect/stride-2
    # paths) — inside the jitted forward they may be DCE'd by XLA because the
    # SPADE stand-ins ignore `style`.
    enc_fn = jax.jit(lambda prm, x: spade_style_encoder(prm, x))
    style = enc_fn(params, jnp.transpose(input_P1, (0, 2, 3, 1)).astype(ACT_DTYPE))
    jax.block_until_ready(style)
    assert style.shape == (B, 2, 2, 64), style.shape

    fwd = jax.jit(lambda prm, a, b, c, d, e:
                  cs_generator_forward(prm, opt, a, b, c, d, e))
    fake_EP2, out = fwd(params, input_P1, input_EP1, input_BP2,
                        input_BEP2, input_EP2)
    jax.block_until_ready((fake_EP2, out))
    assert fake_EP2.shape == (B, 1, H, W), fake_EP2.shape
    assert out.shape == (B, 3, 64, 44), out.shape
    print("KERNEL_OK")
</pallas_src>

<mosaic_0001>
module attributes {stable_mosaic.version = 11 : i64} {
  func.func @k(%arg0: i32, %arg1: memref<8x128xf32, #tpu.memory_space<vmem>>, %arg2: memref<8x128xf32, #tpu.memory_space<vmem>>, %arg3: memref<8x128xf32, #tpu.memory_space<vmem>>) attributes {dimension_semantics = [#tpu.dimension_semantics<arbitrary>], iteration_bounds = array<i64: 2>, scalar_prefetch = 0 : i64, scratch_operands = 0 : i64, tpu.core_type = #tpu.core_type<tc>, window_params = [{transform_indices = @transform_0, window_bounds = array<i64: 8, 128>}, {pipeline_mode = #tpu.pipeline_mode<synchronous>, transform_indices = @transform_1, window_bounds = array<i64: 8, 128>}, {transform_indices = @transform_2, window_bounds = array<i64: 8, 128>}]} {
    %c0 = arith.constant 0 : index
    %c0_0 = arith.constant 0 : index
    %0 = vector.load %arg1[%c0, %c0_0] : memref<8x128xf32, #tpu.memory_space<vmem>>, vector<8x128xf32>
    %c0_1 = arith.constant 0 : index
    %c0_2 = arith.constant 0 : index
    %1 = vector.load %arg2[%c0_1, %c0_2] : memref<8x128xf32, #tpu.memory_space<vmem>>, vector<8x128xf32>
    %2 = arith.addf %0, %1 : vector<8x128xf32>
    %c0_3 = arith.constant 0 : index
    %c0_4 = arith.constant 0 : index
    %3 = vector.load %arg3[%c0_3, %c0_4] : memref<8x128xf32, #tpu.memory_space<vmem>>, vector<8x128xf32>
    tpu.vector_store %arg3[%c0_3, %c0_4], %2 {strides = array<i32>} : memref<8x128xf32, #tpu.memory_space<vmem>>, vector<8x128xf32>,
    return
  }
  func.func @transform_0(%arg0: i32) -> (i32, i32) {
    %c0_i32 = arith.constant 0 : i32
    %c0_i32_0 = arith.constant 0 : i32
    return %arg0, %c0_i32 : i32, i32
  }
  func.func @transform_1(%arg0: i32) -> (i32, i32) {
    %c0_i32 = arith.constant 0 : i32
    %c0_i32_0 = arith.constant 0 : i32
    %c0_i32_1 = arith.constant 0 : i32
    return %c0_i32, %c0_i32_0 : i32, i32
  }
  func.func @transform_2(%arg0: i32) -> (i32, i32) {
    %c0_i32 = arith.constant 0 : i32
    %c0_i32_0 = arith.constant 0 : i32
    return %arg0, %c0_i32 : i32, i32
  }
}

module attributes {stable_mosaic.version = 11 : i64} {
  func.func @_mm_kernel(%arg0: i32, %arg1: memref<512x147xbf16, #tpu.memory_space<vmem>>, %arg2: memref<147x128xbf16, #tpu.memory_space<vmem>>, %arg3: memref<1x128xf32, #tpu.memory_space<vmem>>, %arg4: memref<512x128xbf16, #tpu.memory_space<vmem>>) attributes {dimension_semantics = [#tpu.dimension_semantics<parallel>], iteration_bounds = array<i64: 11>, scalar_prefetch = 0 : i64, scratch_operands = 0 : i64, tpu.core_type = #tpu.core_type<tc>, window_params = [{transform_indices = @transform_0, window_bounds = array<i64: 512, 147>}, {pipeline_mode = #tpu.pipeline_mode<synchronous>, transform_indices = @transform_1, window_bounds = array<i64: 147, 128>}, {pipeline_mode = #tpu.pipeline_mode<synchronous>, transform_indices = @transform_2, window_bounds = array<i64: 1, 128>}, {transform_indices = @transform_3, window_bounds = array<i64: 512, 128>}]} {
    %c0 = arith.constant 0 : index
    %c0_0 = arith.constant 0 : index
    %0 = vector.load %arg1[%c0, %c0_0] : memref<512x147xbf16, #tpu.memory_space<vmem>>, vector<512x147xbf16>
    %c0_1 = arith.constant 0 : index
    %c0_2 = arith.constant 0 : index
    %1 = vector.load %arg2[%c0_1, %c0_2] : memref<147x128xbf16, #tpu.memory_space<vmem>>, vector<147x128xbf16>
    %cst = arith.constant dense<0.000000e+00> : vector<512x128xf32>
    %2 = tpu.matmul %0, %1, %cst {dimension_numbers = #tpu.dot_dimension_numbers<[1], [0], [0], [1], [0, 0, 1, 1], [], []>} : vector<512x147xbf16>, vector<147x128xbf16>, vector<512x128xf32> -> vector<512x128xf32>
    %c0_3 = arith.constant 0 : index
    %c0_4 = arith.constant 0 : index
    %3 = vector.load %arg3[%c0_3, %c0_4] : memref<1x128xf32, #tpu.memory_space<vmem>>, vector<1x128xf32>
    %4 = vector.broadcast %3 : vector<1x128xf32> to vector<512x128xf32>
    %5 = arith.addf %2, %4 : vector<512x128xf32>
    %cst_5 = arith.constant 0.000000e+00 : f32
    %6 = vector.broadcast %cst_5 : f32 to vector<512x128xf32>
    %7 = arith.maximumf %5, %6 : vector<512x128xf32>
    %8 = arith.truncf %7 : vector<512x128xf32> to vector<512x128xbf16>
    %c0_6 = arith.constant 0 : index
    %c0_7 = arith.constant 0 : index
    %9 = vector.load %arg4[%c0_6, %c0_7] : memref<512x128xbf16, #tpu.memory_space<vmem>>, vector<512x128xbf16>
    tpu.vector_store %arg4[%c0_6, %c0_7], %8 {strides = array<i32>} : memref<512x128xbf16, #tpu.memory_space<vmem>>, vector<512x128xbf16>,
    return
  }
  func.func @transform_0(%arg0: i32) -> (i32, i32) {
    %c0_i32 = arith.constant 0 : i32
    %c0_i32_0 = arith.constant 0 : i32
    return %arg0, %c0_i32 : i32, i32
  }
  func.func @transform_1(%arg0: i32) -> (i32, i32) {
    %c0_i32 = arith.constant 0 : i32
    %c0_i32_0 = arith.constant 0 : i32
    %c0_i32_1 = arith.constant 0 : i32
    return %c0_i32, %c0_i32_0 : i32, i32
  }
  func.func @transform_2(%arg0: i32) -> (i32, i32) {
    %c0_i32 = arith.constant 0 : i32
    %c0_i32_0 = arith.constant 0 : i32
    %c0_i32_1 = arith.constant 0 : i32
    return %c0_i32, %c0_i32_0 : i32, i32
  }
  func.func @transform_3(%arg0: i32) -> (i32, i32) {
    %c0_i32 = arith.constant 0 : i32
    %c0_i32_0 = arith.constant 0 : i32
    return %arg0, %c0_i32 : i32, i32
  }
}

module attributes {stable_mosaic.version = 11 : i64} {
  func.func @_mm_kernel(%arg0: i32, %arg1: memref<512x72xbf16, #tpu.memory_space<vmem>>, %arg2: memref<72x128xbf16, #tpu.memory_space<vmem>>, %arg3: memref<1x128xf32, #tpu.memory_space<vmem>>, %arg4: memref<512x128xbf16, #tpu.memory_space<vmem>>, %arg5: memref<512x128xbf16, #tpu.memory_space<vmem>>) attributes {dimension_semantics = [#tpu.dimension_semantics<parallel>], iteration_bounds = array<i64: 11>, scalar_prefetch = 0 : i64, scratch_operands = 0 : i64, tpu.core_type = #tpu.core_type<tc>, window_params = [{transform_indices = @transform_0, window_bounds = array<i64: 512, 72>}, {pipeline_mode = #tpu.pipeline_mode<synchronous>, transform_indices = @transform_1, window_bounds = array<i64: 72, 128>}, {pipeline_mode = #tpu.pipeline_mode<synchronous>, transform_indices = @transform_2, window_bounds = array<i64: 1, 128>}, {transform_indices = @transform_3, window_bounds = array<i64: 512, 128>}, {transform_indices = @transform_4, window_bounds = array<i64: 512, 128>}]} {
    %c0 = arith.constant 0 : index
    %c0_0 = arith.constant 0 : index
    %0 = vector.load %arg1[%c0, %c0_0] : memref<512x72xbf16, #tpu.memory_space<vmem>>, vector<512x72xbf16>
    %c0_1 = arith.constant 0 : index
    %c0_2 = arith.constant 0 : index
    %1 = vector.load %arg2[%c0_1, %c0_2] : memref<72x128xbf16, #tpu.memory_space<vmem>>, vector<72x128xbf16>
    %cst = arith.constant dense<0.000000e+00> : vector<512x128xf32>
    %2 = tpu.matmul %0, %1, %cst {dimension_numbers = #tpu.dot_dimension_numbers<[1], [0], [0], [1], [0, 0, 1, 1], [], []>} : vector<512x72xbf16>, vector<72x128xbf16>, vector<512x128xf32> -> vector<512x128xf32>
    %c0_3 = arith.constant 0 : index
    %c0_4 = arith.constant 0 : index
    %3 = vector.load %arg3[%c0_3, %c0_4] : memref<1x128xf32, #tpu.memory_space<vmem>>, vector<1x128xf32>
    %4 = vector.broadcast %3 : vector<1x128xf32> to vector<512x128xf32>
    %5 = arith.addf %2, %4 : vector<512x128xf32>
    %cst_5 = arith.constant 0.000000e+00 : f32
    %6 = vector.broadcast %cst_5 : f32 to vector<512x128xf32>
    %7 = arith.maximumf %5, %6 : vector<512x128xf32>
    %c0_6 = arith.constant 0 : index
    %c0_7 = arith.constant 0 : index
    %8 = vector.load %arg4[%c0_6, %c0_7] : memref<512x128xbf16, #tpu.memory_space<vmem>>, vector<512x128xbf16>
    %9 = arith.extf %8 : vector<512x128xbf16> to vector<512x128xf32>
    %10 = arith.addf %7, %9 : vector<512x128xf32>
    %11 = arith.truncf %10 : vector<512x128xf32> to vector<512x128xbf16>
    %c0_8 = arith.constant 0 : index
    %c0_9 = arith.constant 0 : index
    %12 = vector.load %arg5[%c0_8, %c0_9] : memref<512x128xbf16, #tpu.memory_space<vmem>>, vector<512x128xbf16>
    tpu.vector_store %arg5[%c0_8, %c0_9], %11 {strides = array<i32>} : memref<512x128xbf16, #tpu.memory_space<vmem>>, vector<512x128xbf16>,
    return
  }
  func.func @transform_0(%arg0: i32) -> (i32, i32) {
    %c0_i32 = arith.constant 0 : i32
    %c0_i32_0 = arith.constant 0 : i32
    return %arg0, %c0_i32 : i32, i32
  }
  func.func @transform_1(%arg0: i32) -> (i32, i32) {
    %c0_i32 = arith.constant 0 : i32
    %c0_i32_0 = arith.constant 0 : i32
    %c0_i32_1 = arith.constant 0 : i32
    return %c0_i32, %c0_i32_0 : i32, i32
  }
  func.func @transform_2(%arg0: i32) -> (i32, i32) {
    %c0_i32 = arith.constant 0 : i32
    %c0_i32_0 = arith.constant 0 : i32
    %c0_i32_1 = arith.constant 0 : i32
    return %c0_i32, %c0_i32_0 : i32, i32
  }
  func.func @transform_3(%arg0: i32) -> (i32, i32) {
    %c0_i32 = arith.constant 0 : i32
    %c0_i32_0 = arith.constant 0 : i32
    return %arg0, %c0_i32 : i32, i32
  }
  func.func @transform_4(%arg0: i32) -> (i32, i32) {
    %c0_i32 = arith.constant 0 : i32
    %c0_i32_0 = arith.constant 0 : i32
    return %arg0, %c0_i32 : i32, i32
  }
}

module attributes {stable_mosaic.version = 11 : i64} {
  func.func @_mm_kernel(%arg0: i32, %arg1: memref<512x72xbf16, #tpu.memory_space<vmem>>, %arg2: memref<72x128xbf16, #tpu.memory_space<vmem>>, %arg3: memref<1x128xf32, #tpu.memory_space<vmem>>, %arg4: memref<512x128xbf16, #tpu.memory_space<vmem>>) attributes {dimension_semantics = [#tpu.dimension_semantics<parallel>], iteration_bounds = array<i64: 3>, scalar_prefetch = 0 : i64, scratch_operands = 0 : i64, tpu.core_type = #tpu.core_type<tc>, window_params = [{transform_indices = @transform_0, window_bounds = array<i64: 512, 72>}, {pipeline_mode = #tpu.pipeline_mode<synchronous>, transform_indices = @transform_1, window_bounds = array<i64: 72, 128>}, {pipeline_mode = #tpu.pipeline_mode<synchronous>, transform_indices = @transform_2, window_bounds = array<i64: 1, 128>}, {transform_indices = @transform_3, window_bounds = array<i64: 512, 128>}]} {
    %c0 = arith.constant 0 : index
    %c0_0 = arith.constant 0 : index
    %0 = vector.load %arg1[%c0, %c0_0] : memref<512x72xbf16, #tpu.memory_space<vmem>>, vector<512x72xbf16>
    %c0_1 = arith.constant 0 : index
    %c0_2 = arith.constant 0 : index
    %1 = vector.load %arg2[%c0_1, %c0_2] : memref<72x128xbf16, #tpu.memory_space<vmem>>, vector<72x128xbf16>
    %cst = arith.constant dense<0.000000e+00> : vector<512x128xf32>
    %2 = tpu.matmul %0, %1, %cst {dimension_numbers = #tpu.dot_dimension_numbers<[1], [0], [0], [1], [0, 0, 1, 1], [], []>} : vector<512x72xbf16>, vector<72x128xbf16>, vector<512x128xf32> -> vector<512x128xf32>
    %c0_3 = arith.constant 0 : index
    %c0_4 = arith.constant 0 : index
    %3 = vector.load %arg3[%c0_3, %c0_4] : memref<1x128xf32, #tpu.memory_space<vmem>>, vector<1x128xf32>
    %4 = vector.broadcast %3 : vector<1x128xf32> to vector<512x128xf32>
    %5 = arith.addf %2, %4 : vector<512x128xf32>
    %cst_5 = arith.constant 0.000000e+00 : f32
    %6 = vector.broadcast %cst_5 : f32 to vector<512x128xf32>
    %7 = arith.maximumf %5, %6 : vector<512x128xf32>
    %8 = arith.truncf %7 : vector<512x128xf32> to vector<512x128xbf16>
    %c0_6 = arith.constant 0 : index
    %c0_7 = arith.constant 0 : index
    %9 = vector.load %arg4[%c0_6, %c0_7] : memref<512x128xbf16, #tpu.memory_space<vmem>>, vector<512x128xbf16>
    tpu.vector_store %arg4[%c0_6, %c0_7], %8 {strides = array<i32>} : memref<512x128xbf16, #tpu.memory_space<vmem>>, vector<512x128xbf16>,
    return
  }
  func.func @transform_0(%arg0: i32) -> (i32, i32) {
    %c0_i32 = arith.constant 0 : i32
    %c0_i32_0 = arith.constant 0 : i32
    return %arg0, %c0_i32 : i32, i32
  }
  func.func @transform_1(%arg0: i32) -> (i32, i32) {
    %c0_i32 = arith.constant 0 : i32
    %c0_i32_0 = arith.constant 0 : i32
    %c0_i32_1 = arith.constant 0 : i32
    return %c0_i32, %c0_i32_0 : i32, i32
  }
  func.func @transform_2(%arg0: i32) -> (i32, i32) {
    %c0_i32 = arith.constant 0 : i32
    %c0_i32_0 = arith.constant 0 : i32
    %c0_i32_1 = arith.constant 0 : i32
    return %c0_i32, %c0_i32_0 : i32, i32
  }
  func.func @transform_3(%arg0: i32) -> (i32, i32) {
    %c0_i32 = arith.constant 0 : i32
    %c0_i32_0 = arith.constant 0 : i32
    return %arg0, %c0_i32 : i32, i32
  }
}

module attributes {stable_mosaic.version = 11 : i64} {
  func.func @_mm_kernel(%arg0: i32, %arg1: memref<512x144xbf16, #tpu.memory_space<vmem>>, %arg2: memref<144x128xbf16, #tpu.memory_space<vmem>>, %arg3: memref<1x128xf32, #tpu.memory_space<vmem>>, %arg4: memref<512x128xbf16, #tpu.memory_space<vmem>>, %arg5: memref<512x128xbf16, #tpu.memory_space<vmem>>) attributes {dimension_semantics = [#tpu.dimension_semantics<parallel>], iteration_bounds = array<i64: 3>, scalar_prefetch = 0 : i64, scratch_operands = 0 : i64, tpu.core_type = #tpu.core_type<tc>, window_params = [{transform_indices = @transform_0, window_bounds = array<i64: 512, 144>}, {pipeline_mode = #tpu.pipeline_mode<synchronous>, transform_indices = @transform_1, window_bounds = array<i64: 144, 128>}, {pipeline_mode = #tpu.pipeline_mode<synchronous>, transform_indices = @transform_2, window_bounds = array<i64: 1, 128>}, {transform_indices = @transform_3, window_bounds = array<i64: 512, 128>}, {transform_indices = @transform_4, window_bounds = array<i64: 512, 128>}]} {
    %c0 = arith.constant 0 : index
    %c0_0 = arith.constant 0 : index
    %0 = vector.load %arg1[%c0, %c0_0] : memref<512x144xbf16, #tpu.memory_space<vmem>>, vector<512x144xbf16>
    %c0_1 = arith.constant 0 : index
    %c0_2 = arith.constant 0 : index
    %1 = vector.load %arg2[%c0_1, %c0_2] : memref<144x128xbf16, #tpu.memory_space<vmem>>, vector<144x128xbf16>
    %cst = arith.constant dense<0.000000e+00> : vector<512x128xf32>
    %2 = tpu.matmul %0, %1, %cst {dimension_numbers = #tpu.dot_dimension_numbers<[1], [0], [0], [1], [0, 0, 1, 1], [], []>} : vector<512x144xbf16>, vector<144x128xbf16>, vector<512x128xf32> -> vector<512x128xf32>
    %c0_3 = arith.constant 0 : index
    %c0_4 = arith.constant 0 : index
    %3 = vector.load %arg3[%c0_3, %c0_4] : memref<1x128xf32, #tpu.memory_space<vmem>>, vector<1x128xf32>
    %4 = vector.broadcast %3 : vector<1x128xf32> to vector<512x128xf32>
    %5 = arith.addf %2, %4 : vector<512x128xf32>
    %cst_5 = arith.constant 0.000000e+00 : f32
    %6 = vector.broadcast %cst_5 : f32 to vector<512x128xf32>
    %7 = arith.maximumf %5, %6 : vector<512x128xf32>
    %c0_6 = arith.constant 0 : index
    %c0_7 = arith.constant 0 : index
    %8 = vector.load %arg4[%c0_6, %c0_7] : memref<512x128xbf16, #tpu.memory_space<vmem>>, vector<512x128xbf16>
    %9 = arith.extf %8 : vector<512x128xbf16> to vector<512x128xf32>
    %10 = arith.addf %7, %9 : vector<512x128xf32>
    %11 = arith.truncf %10 : vector<512x128xf32> to vector<512x128xbf16>
    %c0_8 = arith.constant 0 : index
    %c0_9 = arith.constant 0 : index
    %12 = vector.load %arg5[%c0_8, %c0_9] : memref<512x128xbf16, #tpu.memory_space<vmem>>, vector<512x128xbf16>
    tpu.vector_store %arg5[%c0_8, %c0_9], %11 {strides = array<i32>} : memref<512x128xbf16, #tpu.memory_space<vmem>>, vector<512x128xbf16>,
    return
  }
  func.func @transform_0(%arg0: i32) -> (i32, i32) {
    %c0_i32 = arith.constant 0 : i32
    %c0_i32_0 = arith.constant 0 : i32
    return %arg0, %c0_i32 : i32, i32
  }
  func.func @transform_1(%arg0: i32) -> (i32, i32) {
    %c0_i32 = arith.constant 0 : i32
    %c0_i32_0 = arith.constant 0 : i32
    %c0_i32_1 = arith.constant 0 : i32
    return %c0_i32, %c0_i32_0 : i32, i32
  }
  func.func @transform_2(%arg0: i32) -> (i32, i32) {
    %c0_i32 = arith.constant 0 : i32
    %c0_i32_0 = arith.constant 0 : i32
    %c0_i32_1 = arith.constant 0 : i32
    return %c0_i32, %c0_i32_0 : i32, i32
  }
  func.func @transform_3(%arg0: i32) -> (i32, i32) {
    %c0_i32 = arith.constant 0 : i32
    %c0_i32_0 = arith.constant 0 : i32
    return %arg0, %c0_i32 : i32, i32
  }
  func.func @transform_4(%arg0: i32) -> (i32, i32) {
    %c0_i32 = arith.constant 0 : i32
    %c0_i32_0 = arith.constant 0 : i32
    return %arg0, %c0_i32 : i32, i32
  }
}

module attributes {stable_mosaic.version = 11 : i64} {
  func.func @_mm_kernel(%arg0: i32, %arg1: memref<352x144xbf16, #tpu.memory_space<vmem>>, %arg2: memref<144x128xbf16, #tpu.memory_space<vmem>>, %arg3: memref<1x128xf32, #tpu.memory_space<vmem>>, %arg4: memref<352x128xbf16, #tpu.memory_space<vmem>>) attributes {dimension_semantics = [#tpu.dimension_semantics<parallel>], iteration_bounds = array<i64: 1>, scalar_prefetch = 0 : i64, scratch_operands = 0 : i64, tpu.core_type = #tpu.core_type<tc>, window_params = [{transform_indices = @transform_0, window_bounds = array<i64: 352, 144>}, {pipeline_mode = #tpu.pipeline_mode<synchronous>, transform_indices = @transform_1, window_bounds = array<i64: 144, 128>}, {pipeline_mode = #tpu.pipeline_mode<synchronous>, transform_indices = @transform_2, window_bounds = array<i64: 1, 128>}, {transform_indices = @transform_3, window_bounds = array<i64: 352, 128>}]} {
    %c0 = arith.constant 0 : index
    %c0_0 = arith.constant 0 : index
    %0 = vector.load %arg1[%c0, %c0_0] : memref<352x144xbf16, #tpu.memory_space<vmem>>, vector<352x144xbf16>
    %c0_1 = arith.constant 0 : index
    %c0_2 = arith.constant 0 : index
    %1 = vector.load %arg2[%c0_1, %c0_2] : memref<144x128xbf16, #tpu.memory_space<vmem>>, vector<144x128xbf16>
    %cst = arith.constant dense<0.000000e+00> : vector<352x128xf32>
    %2 = tpu.matmul %0, %1, %cst {dimension_numbers = #tpu.dot_dimension_numbers<[1], [0], [0], [1], [0, 0, 1, 1], [], []>} : vector<352x144xbf16>, vector<144x128xbf16>, vector<352x128xf32> -> vector<352x128xf32>
    %c0_3 = arith.constant 0 : index
    %c0_4 = arith.constant 0 : index
    %3 = vector.load %arg3[%c0_3, %c0_4] : memref<1x128xf32, #tpu.memory_space<vmem>>, vector<1x128xf32>
    %4 = vector.broadcast %3 : vector<1x128xf32> to vector<352x128xf32>
    %5 = arith.addf %2, %4 : vector<352x128xf32>
    %cst_5 = arith.constant 0.000000e+00 : f32
    %6 = vector.broadcast %cst_5 : f32 to vector<352x128xf32>
    %7 = arith.maximumf %5, %6 : vector<352x128xf32>
    %8 = arith.truncf %7 : vector<352x128xf32> to vector<352x128xbf16>
    %c0_6 = arith.constant 0 : index
    %c0_7 = arith.constant 0 : index
    %9 = vector.load %arg4[%c0_6, %c0_7] : memref<352x128xbf16, #tpu.memory_space<vmem>>, vector<352x128xbf16>
    tpu.vector_store %arg4[%c0_6, %c0_7], %8 {strides = array<i32>} : memref<352x128xbf16, #tpu.memory_space<vmem>>, vector<352x128xbf16>,
    return
  }
  func.func @transform_0(%arg0: i32) -> (i32, i32) {
    %c0_i32 = arith.constant 0 : i32
    %c0_i32_0 = arith.constant 0 : i32
    return %arg0, %c0_i32 : i32, i32
  }
  func.func @transform_1(%arg0: i32) -> (i32, i32) {
    %c0_i32 = arith.constant 0 : i32
    %c0_i32_0 = arith.constant 0 : i32
    %c0_i32_1 = arith.constant 0 : i32
    return %c0_i32, %c0_i32_0 : i32, i32
  }
  func.func @transform_2(%arg0: i32) -> (i32, i32) {
    %c0_i32 = arith.constant 0 : i32
    %c0_i32_0 = arith.constant 0 : i32
    %c0_i32_1 = arith.constant 0 : i32
    return %c0_i32, %c0_i32_0 : i32, i32
  }
  func.func @transform_3(%arg0: i32) -> (i32, i32) {
    %c0_i32 = arith.constant 0 : i32
    %c0_i32_0 = arith.constant 0 : i32
    return %arg0, %c0_i32 : i32, i32
  }
}

module attributes {stable_mosaic.version = 11 : i64} {
  func.func @_mm_kernel(%arg0: i32, %arg1: memref<352x288xbf16, #tpu.memory_space<vmem>>, %arg2: memref<288x128xbf16, #tpu.memory_space<vmem>>, %arg3: memref<1x128xf32, #tpu.memory_space<vmem>>, %arg4: memref<352x128xbf16, #tpu.memory_space<vmem>>, %arg5: memref<352x128xbf16, #tpu.memory_space<vmem>>) attributes {dimension_semantics = [#tpu.dimension_semantics<parallel>], iteration_bounds = array<i64: 1>, scalar_prefetch = 0 : i64, scratch_operands = 0 : i64, tpu.core_type = #tpu.core_type<tc>, window_params = [{transform_indices = @transform_0, window_bounds = array<i64: 352, 288>}, {pipeline_mode = #tpu.pipeline_mode<synchronous>, transform_indices = @transform_1, window_bounds = array<i64: 288, 128>}, {pipeline_mode = #tpu.pipeline_mode<synchronous>, transform_indices = @transform_2, window_bounds = array<i64: 1, 128>}, {transform_indices = @transform_3, window_bounds = array<i64: 352, 128>}, {transform_indices = @transform_4, window_bounds = array<i64: 352, 128>}]} {
    %c0 = arith.constant 0 : index
    %c0_0 = arith.constant 0 : index
    %0 = vector.load %arg1[%c0, %c0_0] : memref<352x288xbf16, #tpu.memory_space<vmem>>, vector<352x288xbf16>
    %c0_1 = arith.constant 0 : index
    %c0_2 = arith.constant 0 : index
    %1 = vector.load %arg2[%c0_1, %c0_2] : memref<288x128xbf16, #tpu.memory_space<vmem>>, vector<288x128xbf16>
    %cst = arith.constant dense<0.000000e+00> : vector<352x128xf32>
    %2 = tpu.matmul %0, %1, %cst {dimension_numbers = #tpu.dot_dimension_numbers<[1], [0], [0], [1], [0, 0, 1, 1], [], []>} : vector<352x288xbf16>, vector<288x128xbf16>, vector<352x128xf32> -> vector<352x128xf32>
    %c0_3 = arith.constant 0 : index
    %c0_4 = arith.constant 0 : index
    %3 = vector.load %arg3[%c0_3, %c0_4] : memref<1x128xf32, #tpu.memory_space<vmem>>, vector<1x128xf32>
    %4 = vector.broadcast %3 : vector<1x128xf32> to vector<352x128xf32>
    %5 = arith.addf %2, %4 : vector<352x128xf32>
    %cst_5 = arith.constant 0.000000e+00 : f32
    %6 = vector.broadcast %cst_5 : f32 to vector<352x128xf32>
    %7 = arith.maximumf %5, %6 : vector<352x128xf32>
    %c0_6 = arith.constant 0 : index
    %c0_7 = arith.constant 0 : index
    %8 = vector.load %arg4[%c0_6, %c0_7] : memref<352x128xbf16, #tpu.memory_space<vmem>>, vector<352x128xbf16>
    %9 = arith.extf %8 : vector<352x128xbf16> to vector<352x128xf32>
    %10 = arith.addf %7, %9 : vector<352x128xf32>
    %11 = arith.truncf %10 : vector<352x128xf32> to vector<352x128xbf16>
    %c0_8 = arith.constant 0 : index
    %c0_9 = arith.constant 0 : index
    %12 = vector.load %arg5[%c0_8, %c0_9] : memref<352x128xbf16, #tpu.memory_space<vmem>>, vector<352x128xbf16>
    tpu.vector_store %arg5[%c0_8, %c0_9], %11 {strides = array<i32>} : memref<352x128xbf16, #tpu.memory_space<vmem>>, vector<352x128xbf16>,
    return
  }
  func.func @transform_0(%arg0: i32) -> (i32, i32) {
    %c0_i32 = arith.constant 0 : i32
    %c0_i32_0 = arith.constant 0 : i32
    return %arg0, %c0_i32 : i32, i32
  }
  func.func @transform_1(%arg0: i32) -> (i32, i32) {
    %c0_i32 = arith.constant 0 : i32
    %c0_i32_0 = arith.constant 0 : i32
    %c0_i32_1 = arith.constant 0 : i32
    return %c0_i32, %c0_i32_0 : i32, i32
  }
  func.func @transform_2(%arg0: i32) -> (i32, i32) {
    %c0_i32 = arith.constant 0 : i32
    %c0_i32_0 = arith.constant 0 : i32
    %c0_i32_1 = arith.constant 0 : i32
    return %c0_i32, %c0_i32_0 : i32, i32
  }
  func.func @transform_3(%arg0: i32) -> (i32, i32) {
    %c0_i32 = arith.constant 0 : i32
    %c0_i32_0 = arith.constant 0 : i32
    return %arg0, %c0_i32 : i32, i32
  }
  func.func @transform_4(%arg0: i32) -> (i32, i32) {
    %c0_i32 = arith.constant 0 : i32
    %c0_i32_0 = arith.constant 0 : i32
    return %arg0, %c0_i32 : i32, i32
  }
}

module attributes {stable_mosaic.version = 11 : i64} {
  func.func @_mm_kernel(%arg0: i32, %arg1: memref<96x288xbf16, #tpu.memory_space<vmem>>, %arg2: memref<288x128xbf16, #tpu.memory_space<vmem>>, %arg3: memref<1x128xf32, #tpu.memory_space<vmem>>, %arg4: memref<96x128xbf16, #tpu.memory_space<vmem>>) attributes {dimension_semantics = [#tpu.dimension_semantics<parallel>], iteration_bounds = array<i64: 1>, scalar_prefetch = 0 : i64, scratch_operands = 0 : i64, tpu.core_type = #tpu.core_type<tc>, window_params = [{transform_indices = @transform_0, window_bounds = array<i64: 96, 288>}, {pipeline_mode = #tpu.pipeline_mode<synchronous>, transform_indices = @transform_1, window_bounds = array<i64: 288, 128>}, {pipeline_mode = #tpu.pipeline_mode<synchronous>, transform_indices = @transform_2, window_bounds = array<i64: 1, 128>}, {transform_indices = @transform_3, window_bounds = array<i64: 96, 128>}]} {
    %c0 = arith.constant 0 : index
    %c0_0 = arith.constant 0 : index
    %0 = vector.load %arg1[%c0, %c0_0] : memref<96x288xbf16, #tpu.memory_space<vmem>>, vector<96x288xbf16>
    %c0_1 = arith.constant 0 : index
    %c0_2 = arith.constant 0 : index
    %1 = vector.load %arg2[%c0_1, %c0_2] : memref<288x128xbf16, #tpu.memory_space<vmem>>, vector<288x128xbf16>
    %cst = arith.constant dense<0.000000e+00> : vector<96x128xf32>
    %2 = tpu.matmul %0, %1, %cst {dimension_numbers = #tpu.dot_dimension_numbers<[1], [0], [0], [1], [0, 0, 1, 1], [], []>} : vector<96x288xbf16>, vector<288x128xbf16>, vector<96x128xf32> -> vector<96x128xf32>
    %c0_3 = arith.constant 0 : index
    %c0_4 = arith.constant 0 : index
    %3 = vector.load %arg3[%c0_3, %c0_4] : memref<1x128xf32, #tpu.memory_space<vmem>>, vector<1x128xf32>
    %4 = vector.broadcast %3 : vector<1x128xf32> to vector<96x128xf32>
    %5 = arith.addf %2, %4 : vector<96x128xf32>
    %cst_5 = arith.constant 0.000000e+00 : f32
    %6 = vector.broadcast %cst_5 : f32 to vector<96x128xf32>
    %7 = arith.maximumf %5, %6 : vector<96x128xf32>
    %8 = arith.truncf %7 : vector<96x128xf32> to vector<96x128xbf16>
    %c0_6 = arith.constant 0 : index
    %c0_7 = arith.constant 0 : index
    %9 = vector.load %arg4[%c0_6, %c0_7] : memref<96x128xbf16, #tpu.memory_space<vmem>>, vector<96x128xbf16>
    tpu.vector_store %arg4[%c0_6, %c0_7], %8 {strides = array<i32>} : memref<96x128xbf16, #tpu.memory_space<vmem>>, vector<96x128xbf16>,
    return
  }
  func.func @transform_0(%arg0: i32) -> (i32, i32) {
    %c0_i32 = arith.constant 0 : i32
    %c0_i32_0 = arith.constant 0 : i32
    return %arg0, %c0_i32 : i32, i32
  }
  func.func @transform_1(%arg0: i32) -> (i32, i32) {
    %c0_i32 = arith.constant 0 : i32
    %c0_i32_0 = arith.constant 0 : i32
    %c0_i32_1 = arith.constant 0 : i32
    return %c0_i32, %c0_i32_0 : i32, i32
  }
  func.func @transform_2(%arg0: i32) -> (i32, i32) {
    %c0_i32 = arith.constant 0 : i32
    %c0_i32_0 = arith.constant 0 : i32
    %c0_i32_1 = arith.constant 0 : i32
    return %c0_i32, %c0_i32_0 : i32, i32
  }
  func.func @transform_3(%arg0: i32) -> (i32, i32) {
    %c0_i32 = arith.constant 0 : i32
    %c0_i32_0 = arith.constant 0 : i32
    return %arg0, %c0_i32 : i32, i32
  }
}

module attributes {stable_mosaic.version = 11 : i64} {
  func.func @_mm_kernel(%arg0: i32, %arg1: memref<96x576xbf16, #tpu.memory_space<vmem>>, %arg2: memref<576x128xbf16, #tpu.memory_space<vmem>>, %arg3: memref<1x128xf32, #tpu.memory_space<vmem>>, %arg4: memref<96x128xbf16, #tpu.memory_space<vmem>>, %arg5: memref<96x128xbf16, #tpu.memory_space<vmem>>) attributes {dimension_semantics = [#tpu.dimension_semantics<parallel>], iteration_bounds = array<i64: 1>, scalar_prefetch = 0 : i64, scratch_operands = 0 : i64, tpu.core_type = #tpu.core_type<tc>, window_params = [{transform_indices = @transform_0, window_bounds = array<i64: 96, 576>}, {pipeline_mode = #tpu.pipeline_mode<synchronous>, transform_indices = @transform_1, window_bounds = array<i64: 576, 128>}, {pipeline_mode = #tpu.pipeline_mode<synchronous>, transform_indices = @transform_2, window_bounds = array<i64: 1, 128>}, {transform_indices = @transform_3, window_bounds = array<i64: 96, 128>}, {transform_indices = @transform_4, window_bounds = array<i64: 96, 128>}]} {
    %c0 = arith.constant 0 : index
    %c0_0 = arith.constant 0 : index
    %0 = vector.load %arg1[%c0, %c0_0] : memref<96x576xbf16, #tpu.memory_space<vmem>>, vector<96x576xbf16>
    %c0_1 = arith.constant 0 : index
    %c0_2 = arith.constant 0 : index
    %1 = vector.load %arg2[%c0_1, %c0_2] : memref<576x128xbf16, #tpu.memory_space<vmem>>, vector<576x128xbf16>
    %cst = arith.constant dense<0.000000e+00> : vector<96x128xf32>
    %2 = tpu.matmul %0, %1, %cst {dimension_numbers = #tpu.dot_dimension_numbers<[1], [0], [0], [1], [0, 0, 1, 1], [], []>} : vector<96x576xbf16>, vector<576x128xbf16>, vector<96x128xf32> -> vector<96x128xf32>
    %c0_3 = arith.constant 0 : index
    %c0_4 = arith.constant 0 : index
    %3 = vector.load %arg3[%c0_3, %c0_4] : memref<1x128xf32, #tpu.memory_space<vmem>>, vector<1x128xf32>
    %4 = vector.broadcast %3 : vector<1x128xf32> to vector<96x128xf32>
    %5 = arith.addf %2, %4 : vector<96x128xf32>
    %cst_5 = arith.constant 0.000000e+00 : f32
    %6 = vector.broadcast %cst_5 : f32 to vector<96x128xf32>
    %7 = arith.maximumf %5, %6 : vector<96x128xf32>
    %c0_6 = arith.constant 0 : index
    %c0_7 = arith.constant 0 : index
    %8 = vector.load %arg4[%c0_6, %c0_7] : memref<96x128xbf16, #tpu.memory_space<vmem>>, vector<96x128xbf16>
    %9 = arith.extf %8 : vector<96x128xbf16> to vector<96x128xf32>
    %10 = arith.addf %7, %9 : vector<96x128xf32>
    %11 = arith.truncf %10 : vector<96x128xf32> to vector<96x128xbf16>
    %c0_8 = arith.constant 0 : index
    %c0_9 = arith.constant 0 : index
    %12 = vector.load %arg5[%c0_8, %c0_9] : memref<96x128xbf16, #tpu.memory_space<vmem>>, vector<96x128xbf16>
    tpu.vector_store %arg5[%c0_8, %c0_9], %11 {strides = array<i32>} : memref<96x128xbf16, #tpu.memory_space<vmem>>, vector<96x128xbf16>,
    return
  }
  func.func @transform_0(%arg0: i32) -> (i32, i32) {
    %c0_i32 = arith.constant 0 : i32
    %c0_i32_0 = arith.constant 0 : i32
    return %arg0, %c0_i32 : i32, i32
  }
  func.func @transform_1(%arg0: i32) -> (i32, i32) {
    %c0_i32 = arith.constant 0 : i32
    %c0_i32_0 = arith.constant 0 : i32
    %c0_i32_1 = arith.constant 0 : i32
    return %c0_i32, %c0_i32_0 : i32, i32
  }
  func.func @transform_2(%arg0: i32) -> (i32, i32) {
    %c0_i32 = arith.constant 0 : i32
    %c0_i32_0 = arith.constant 0 : i32
    %c0_i32_1 = arith.constant 0 : i32
    return %c0_i32, %c0_i32_0 : i32, i32
  }
  func.func @transform_3(%arg0: i32) -> (i32, i32) {
    %c0_i32 = arith.constant 0 : i32
    %c0_i32_0 = arith.constant 0 : i32
    return %arg0, %c0_i32 : i32, i32
  }
  func.func @transform_4(%arg0: i32) -> (i32, i32) {
    %c0_i32 = arith.constant 0 : i32
    %c0_i32_0 = arith.constant 0 : i32
    return %arg0, %c0_i32 : i32, i32
  }
}

module attributes {stable_mosaic.version = 11 : i64} {
  func.func @_mm_kernel(%arg0: i32, %arg1: memref<24x576xbf16, #tpu.memory_space<vmem>>, %arg2: memref<576x128xbf16, #tpu.memory_space<vmem>>, %arg3: memref<1x128xf32, #tpu.memory_space<vmem>>, %arg4: memref<24x128xbf16, #tpu.memory_space<vmem>>) attributes {dimension_semantics = [#tpu.dimension_semantics<parallel>], iteration_bounds = array<i64: 1>, scalar_prefetch = 0 : i64, scratch_operands = 0 : i64, tpu.core_type = #tpu.core_type<tc>, window_params = [{transform_indices = @transform_0, window_bounds = array<i64: 24, 576>}, {pipeline_mode = #tpu.pipeline_mode<synchronous>, transform_indices = @transform_1, window_bounds = array<i64: 576, 128>}, {pipeline_mode = #tpu.pipeline_mode<synchronous>, transform_indices = @transform_2, window_bounds = array<i64: 1, 128>}, {transform_indices = @transform_3, window_bounds = array<i64: 24, 128>}]} {
    %c0 = arith.constant 0 : index
    %c0_0 = arith.constant 0 : index
    %0 = vector.load %arg1[%c0, %c0_0] : memref<24x576xbf16, #tpu.memory_space<vmem>>, vector<24x576xbf16>
    %c0_1 = arith.constant 0 : index
    %c0_2 = arith.constant 0 : index
    %1 = vector.load %arg2[%c0_1, %c0_2] : memref<576x128xbf16, #tpu.memory_space<vmem>>, vector<576x128xbf16>
    %cst = arith.constant dense<0.000000e+00> : vector<24x128xf32>
    %2 = tpu.matmul %0, %1, %cst {dimension_numbers = #tpu.dot_dimension_numbers<[1], [0], [0], [1], [0, 0, 1, 1], [], []>} : vector<24x576xbf16>, vector<576x128xbf16>, vector<24x128xf32> -> vector<24x128xf32>
    %c0_3 = arith.constant 0 : index
    %c0_4 = arith.constant 0 : index
    %3 = vector.load %arg3[%c0_3, %c0_4] : memref<1x128xf32, #tpu.memory_space<vmem>>, vector<1x128xf32>
    %4 = vector.broadcast %3 : vector<1x128xf32> to vector<24x128xf32>
    %5 = arith.addf %2, %4 : vector<24x128xf32>
    %cst_5 = arith.constant 0.000000e+00 : f32
    %6 = vector.broadcast %cst_5 : f32 to vector<24x128xf32>
    %7 = arith.maximumf %5, %6 : vector<24x128xf32>
    %8 = arith.truncf %7 : vector<24x128xf32> to vector<24x128xbf16>
    %c0_6 = arith.constant 0 : index
    %c0_7 = arith.constant 0 : index
    %9 = vector.load %arg4[%c0_6, %c0_7] : memref<24x128xbf16, #tpu.memory_space<vmem>>, vector<24x128xbf16>
    tpu.vector_store %arg4[%c0_6, %c0_7], %8 {strides = array<i32>} : memref<24x128xbf16, #tpu.memory_space<vmem>>, vector<24x128xbf16>,
    return
  }
  func.func @transform_0(%arg0: i32) -> (i32, i32) {
    %c0_i32 = arith.constant 0 : i32
    %c0_i32_0 = arith.constant 0 : i32
    return %arg0, %c0_i32 : i32, i32
  }
  func.func @transform_1(%arg0: i32) -> (i32, i32) {
    %c0_i32 = arith.constant 0 : i32
    %c0_i32_0 = arith.constant 0 : i32
    %c0_i32_1 = arith.constant 0 : i32
    return %c0_i32, %c0_i32_0 : i32, i32
  }
  func.func @transform_2(%arg0: i32) -> (i32, i32) {
    %c0_i32 = arith.constant 0 : i32
    %c0_i32_0 = arith.constant 0 : i32
    %c0_i32_1 = arith.constant 0 : i32
    return %c0_i32, %c0_i32_0 : i32, i32
  }
  func.func @transform_3(%arg0: i32) -> (i32, i32) {
    %c0_i32 = arith.constant 0 : i32
    %c0_i32_0 = arith.constant 0 : i32
    return %arg0, %c0_i32 : i32, i32
  }
}

module attributes {stable_mosaic.version = 11 : i64} {
  func.func @_mm_kernel(%arg0: i32, %arg1: memref<24x576xbf16, #tpu.memory_space<vmem>>, %arg2: memref<576x128xbf16, #tpu.memory_space<vmem>>, %arg3: memref<1x128xf32, #tpu.memory_space<vmem>>, %arg4: memref<24x128xbf16, #tpu.memory_space<vmem>>, %arg5: memref<24x128xbf16, #tpu.memory_space<vmem>>) attributes {dimension_semantics = [#tpu.dimension_semantics<parallel>], iteration_bounds = array<i64: 1>, scalar_prefetch = 0 : i64, scratch_operands = 0 : i64, tpu.core_type = #tpu.core_type<tc>, window_params = [{transform_indices = @transform_0, window_bounds = array<i64: 24, 576>}, {pipeline_mode = #tpu.pipeline_mode<synchronous>, transform_indices = @transform_1, window_bounds = array<i64: 576, 128>}, {pipeline_mode = #tpu.pipeline_mode<synchronous>, transform_indices = @transform_2, window_bounds = array<i64: 1, 128>}, {transform_indices = @transform_3, window_bounds = array<i64: 24, 128>}, {transform_indices = @transform_4, window_bounds = array<i64: 24, 128>}]} {
    %c0 = arith.constant 0 : index
    %c0_0 = arith.constant 0 : index
    %0 = vector.load %arg1[%c0, %c0_0] : memref<24x576xbf16, #tpu.memory_space<vmem>>, vector<24x576xbf16>
    %c0_1 = arith.constant 0 : index
    %c0_2 = arith.constant 0 : index
    %1 = vector.load %arg2[%c0_1, %c0_2] : memref<576x128xbf16, #tpu.memory_space<vmem>>, vector<576x128xbf16>
    %cst = arith.constant dense<0.000000e+00> : vector<24x128xf32>
    %2 = tpu.matmul %0, %1, %cst {dimension_numbers = #tpu.dot_dimension_numbers<[1], [0], [0], [1], [0, 0, 1, 1], [], []>} : vector<24x576xbf16>, vector<576x128xbf16>, vector<24x128xf32> -> vector<24x128xf32>
    %c0_3 = arith.constant 0 : index
    %c0_4 = arith.constant 0 : index
    %3 = vector.load %arg3[%c0_3, %c0_4] : memref<1x128xf32, #tpu.memory_space<vmem>>, vector<1x128xf32>
    %4 = vector.broadcast %3 : vector<1x128xf32> to vector<24x128xf32>
    %5 = arith.addf %2, %4 : vector<24x128xf32>
    %cst_5 = arith.constant 0.000000e+00 : f32
    %6 = vector.broadcast %cst_5 : f32 to vector<24x128xf32>
    %7 = arith.maximumf %5, %6 : vector<24x128xf32>
    %c0_6 = arith.constant 0 : index
    %c0_7 = arith.constant 0 : index
    %8 = vector.load %arg4[%c0_6, %c0_7] : memref<24x128xbf16, #tpu.memory_space<vmem>>, vector<24x128xbf16>
    %9 = arith.extf %8 : vector<24x128xbf16> to vector<24x128xf32>
    %10 = arith.addf %7, %9 : vector<24x128xf32>
    %11 = arith.truncf %10 : vector<24x128xf32> to vector<24x128xbf16>
    %c0_8 = arith.constant 0 : index
    %c0_9 = arith.constant 0 : index
    %12 = vector.load %arg5[%c0_8, %c0_9] : memref<24x128xbf16, #tpu.memory_space<vmem>>, vector<24x128xbf16>
    tpu.vector_store %arg5[%c0_8, %c0_9], %11 {strides = array<i32>} : memref<24x128xbf16, #tpu.memory_space<vmem>>, vector<24x128xbf16>,
    return
  }
  func.func @transform_0(%arg0: i32) -> (i32, i32) {
    %c0_i32 = arith.constant 0 : i32
    %c0_i32_0 = arith.constant 0 : i32
    return %arg0, %c0_i32 : i32, i32
  }
  func.func @transform_1(%arg0: i32) -> (i32, i32) {
    %c0_i32 = arith.constant 0 : i32
    %c0_i32_0 = arith.constant 0 : i32
    %c0_i32_1 = arith.constant 0 : i32
    return %c0_i32, %c0_i32_0 : i32, i32
  }
  func.func @transform_2(%arg0: i32) -> (i32, i32) {
    %c0_i32 = arith.constant 0 : i32
    %c0_i32_0 = arith.constant 0 : i32
    %c0_i32_1 = arith.constant 0 : i32
    return %c0_i32, %c0_i32_0 : i32, i32
  }
  func.func @transform_3(%arg0: i32) -> (i32, i32) {
    %c0_i32 = arith.constant 0 : i32
    %c0_i32_0 = arith.constant 0 : i32
    return %arg0, %c0_i32 : i32, i32
  }
  func.func @transform_4(%arg0: i32) -> (i32, i32) {
    %c0_i32 = arith.constant 0 : i32
    %c0_i32_0 = arith.constant 0 : i32
    return %arg0, %c0_i32 : i32, i32
  }
}

module attributes {stable_mosaic.version = 11 : i64} {
  func.func @_mm_kernel(%arg0: i32, %arg1: memref<8x576xbf16, #tpu.memory_space<vmem>>, %arg2: memref<576x128xbf16, #tpu.memory_space<vmem>>, %arg3: memref<1x128xf32, #tpu.memory_space<vmem>>, %arg4: memref<8x128xbf16, #tpu.memory_space<vmem>>) attributes {dimension_semantics = [#tpu.dimension_semantics<parallel>], iteration_bounds = array<i64: 1>, scalar_prefetch = 0 : i64, scratch_operands = 0 : i64, tpu.core_type = #tpu.core_type<tc>, window_params = [{transform_indices = @transform_0, window_bounds = array<i64: 8, 576>}, {pipeline_mode = #tpu.pipeline_mode<synchronous>, transform_indices = @transform_1, window_bounds = array<i64: 576, 128>}, {pipeline_mode = #tpu.pipeline_mode<synchronous>, transform_indices = @transform_2, window_bounds = array<i64: 1, 128>}, {transform_indices = @transform_3, window_bounds = array<i64: 8, 128>}]} {
    %c0 = arith.constant 0 : index
    %c0_0 = arith.constant 0 : index
    %0 = vector.load %arg1[%c0, %c0_0] : memref<8x576xbf16, #tpu.memory_space<vmem>>, vector<8x576xbf16>
    %c0_1 = arith.constant 0 : index
    %c0_2 = arith.constant 0 : index
    %1 = vector.load %arg2[%c0_1, %c0_2] : memref<576x128xbf16, #tpu.memory_space<vmem>>, vector<576x128xbf16>
    %cst = arith.constant dense<0.000000e+00> : vector<8x128xf32>
    %2 = tpu.matmul %0, %1, %cst {dimension_numbers = #tpu.dot_dimension_numbers<[1], [0], [0], [1], [0, 0, 1, 1], [], []>} : vector<8x576xbf16>, vector<576x128xbf16>, vector<8x128xf32> -> vector<8x128xf32>
    %c0_3 = arith.constant 0 : index
    %c0_4 = arith.constant 0 : index
    %3 = vector.load %arg3[%c0_3, %c0_4] : memref<1x128xf32, #tpu.memory_space<vmem>>, vector<1x128xf32>
    %4 = vector.broadcast %3 : vector<1x128xf32> to vector<8x128xf32>
    %5 = arith.addf %2, %4 : vector<8x128xf32>
    %cst_5 = arith.constant 0.000000e+00 : f32
    %6 = vector.broadcast %cst_5 : f32 to vector<8x128xf32>
    %7 = arith.maximumf %5, %6 : vector<8x128xf32>
    %8 = arith.truncf %7 : vector<8x128xf32> to vector<8x128xbf16>
    %c0_6 = arith.constant 0 : index
    %c0_7 = arith.constant 0 : index
    %9 = vector.load %arg4[%c0_6, %c0_7] : memref<8x128xbf16, #tpu.memory_space<vmem>>, vector<8x128xbf16>
    tpu.vector_store %arg4[%c0_6, %c0_7], %8 {strides = array<i32>} : memref<8x128xbf16, #tpu.memory_space<vmem>>, vector<8x128xbf16>,
    return
  }
  func.func @transform_0(%arg0: i32) -> (i32, i32) {
    %c0_i32 = arith.constant 0 : i32
    %c0_i32_0 = arith.constant 0 : i32
    return %arg0, %c0_i32 : i32, i32
  }
  func.func @transform_1(%arg0: i32) -> (i32, i32) {
    %c0_i32 = arith.constant 0 : i32
    %c0_i32_0 = arith.constant 0 : i32
    %c0_i32_1 = arith.constant 0 : i32
    return %c0_i32, %c0_i32_0 : i32, i32
  }
  func.func @transform_2(%arg0: i32) -> (i32, i32) {
    %c0_i32 = arith.constant 0 : i32
    %c0_i32_0 = arith.constant 0 : i32
    %c0_i32_1 = arith.constant 0 : i32
    return %c0_i32, %c0_i32_0 : i32, i32
  }
  func.func @transform_3(%arg0: i32) -> (i32, i32) {
    %c0_i32 = arith.constant 0 : i32
    %c0_i32_0 = arith.constant 0 : i32
    return %arg0, %c0_i32 : i32, i32
  }
}

module attributes {stable_mosaic.version = 11 : i64} {
  func.func @_mm_kernel(%arg0: i32, %arg1: memref<8x576xbf16, #tpu.memory_space<vmem>>, %arg2: memref<576x128xbf16, #tpu.memory_space<vmem>>, %arg3: memref<1x128xf32, #tpu.memory_space<vmem>>, %arg4: memref<8x128xbf16, #tpu.memory_space<vmem>>, %arg5: memref<8x128xbf16, #tpu.memory_space<vmem>>) attributes {dimension_semantics = [#tpu.dimension_semantics<parallel>], iteration_bounds = array<i64: 1>, scalar_prefetch = 0 : i64, scratch_operands = 0 : i64, tpu.core_type = #tpu.core_type<tc>, window_params = [{transform_indices = @transform_0, window_bounds = array<i64: 8, 576>}, {pipeline_mode = #tpu.pipeline_mode<synchronous>, transform_indices = @transform_1, window_bounds = array<i64: 576, 128>}, {pipeline_mode = #tpu.pipeline_mode<synchronous>, transform_indices = @transform_2, window_bounds = array<i64: 1, 128>}, {transform_indices = @transform_3, window_bounds = array<i64: 8, 128>}, {transform_indices = @transform_4, window_bounds = array<i64: 8, 128>}]} {
    %c0 = arith.constant 0 : index
    %c0_0 = arith.constant 0 : index
    %0 = vector.load %arg1[%c0, %c0_0] : memref<8x576xbf16, #tpu.memory_space<vmem>>, vector<8x576xbf16>
    %c0_1 = arith.constant 0 : index
    %c0_2 = arith.constant 0 : index
    %1 = vector.load %arg2[%c0_1, %c0_2] : memref<576x128xbf16, #tpu.memory_space<vmem>>, vector<576x128xbf16>
    %cst = arith.constant dense<0.000000e+00> : vector<8x128xf32>
    %2 = tpu.matmul %0, %1, %cst {dimension_numbers = #tpu.dot_dimension_numbers<[1], [0], [0], [1], [0, 0, 1, 1], [], []>} : vector<8x576xbf16>, vector<576x128xbf16>, vector<8x128xf32> -> vector<8x128xf32>
    %c0_3 = arith.constant 0 : index
    %c0_4 = arith.constant 0 : index
    %3 = vector.load %arg3[%c0_3, %c0_4] : memref<1x128xf32, #tpu.memory_space<vmem>>, vector<1x128xf32>
    %4 = vector.broadcast %3 : vector<1x128xf32> to vector<8x128xf32>
    %5 = arith.addf %2, %4 : vector<8x128xf32>
    %cst_5 = arith.constant 0.000000e+00 : f32
    %6 = vector.broadcast %cst_5 : f32 to vector<8x128xf32>
    %7 = arith.maximumf %5, %6 : vector<8x128xf32>
    %c0_6 = arith.constant 0 : index
    %c0_7 = arith.constant 0 : index
    %8 = vector.load %arg4[%c0_6, %c0_7] : memref<8x128xbf16, #tpu.memory_space<vmem>>, vector<8x128xbf16>
    %9 = arith.extf %8 : vector<8x128xbf16> to vector<8x128xf32>
    %10 = arith.addf %7, %9 : vector<8x128xf32>
    %11 = arith.truncf %10 : vector<8x128xf32> to vector<8x128xbf16>
    %c0_8 = arith.constant 0 : index
    %c0_9 = arith.constant 0 : index
    %12 = vector.load %arg5[%c0_8, %c0_9] : memref<8x128xbf16, #tpu.memory_space<vmem>>, vector<8x128xbf16>
    tpu.vector_store %arg5[%c0_8, %c0_9], %11 {strides = array<i32>} : memref<8x128xbf16, #tpu.memory_space<vmem>>, vector<8x128xbf16>,
    return
  }
  func.func @transform_0(%arg0: i32) -> (i32, i32) {
    %c0_i32 = arith.constant 0 : i32
    %c0_i32_0 = arith.constant 0 : i32
    return %arg0, %c0_i32 : i32, i32
  }
  func.func @transform_1(%arg0: i32) -> (i32, i32) {
    %c0_i32 = arith.constant 0 : i32
    %c0_i32_0 = arith.constant 0 : i32
    %c0_i32_1 = arith.constant 0 : i32
    return %c0_i32, %c0_i32_0 : i32, i32
  }
  func.func @transform_2(%arg0: i32) -> (i32, i32) {
    %c0_i32 = arith.constant 0 : i32
    %c0_i32_0 = arith.constant 0 : i32
    %c0_i32_1 = arith.constant 0 : i32
    return %c0_i32, %c0_i32_0 : i32, i32
  }
  func.func @transform_3(%arg0: i32) -> (i32, i32) {
    %c0_i32 = arith.constant 0 : i32
    %c0_i32_0 = arith.constant 0 : i32
    return %arg0, %c0_i32 : i32, i32
  }
  func.func @transform_4(%arg0: i32) -> (i32, i32) {
    %c0_i32 = arith.constant 0 : i32
    %c0_i32_0 = arith.constant 0 : i32
    return %arg0, %c0_i32 : i32, i32
  }
}

</mosaic_0001>

<bundles_post_ra>
// kernel: tpu_custom_call.1
= control target key start
LH: loop header
LB: loop body
LE: loop exit
PB: predicated region body
PF: predicated region fallthrough
CT: control target
= control target key end

     0   :  { %7 = vsyncpa [#allocation3], 0  ;;  %s690_s0 = inlined_call_operand.hbm [shape: f32[16,128], index: 0, kind: input, shape index: {}]   ;;  %s691_s1 = inlined_call_operand.hbm [shape: f32[8,128], index: 1, kind: input, shape index: {}]   ;;  %s692_s2 = inlined_call_operand.hbm [shape: f32[16,128], index: 2, kind: output, shape index: {}]  }
   0x1   :  { %9 = vsyncpa [#allocation3 + $0x1], 0 }
   0x2   :  { %10 = vsyncpa [#allocation6], 0 }
   0x3   :  { %11 = vsyncpa [#allocation4], 0 }
   0x4   :  { %13 = vsyncpa [#allocation4 + $0x1], 0  ;;  %s489_s9 = smov 0   ;;  %s491_s10 = smov 0  }
   0x5   :  { %s493_s11 = smov 0   ;;  %s495_s12 = smov 0  }
   0x6 LB: > { %s510_s13 = sadd.s32 4294967295, %s469_s12   ;;  %s270_s14 = sadd.s32 4294967294, %s469_s12   ;;  %s469_s12 = sphi %s495_s12, %s716_s12   ;;  %s465_s11 = sphi %s493_s11, %s715_s11   ;;  %s461_s10 = sphi %s491_s10, %s714_s10   ;;  %s457_s9 = sphi %s489_s9, %s713_s9  }
   0x7   : > { %p39_p0 = scmp.ne.s32.totalorder %s461_s10, %s457_s9  ;;  %p693_p1 = scmp.eq.s32.totalorder %s510_s13, 0 }
   0x8   : > { %p90_p3 = scmp.eq.s32.totalorder %s270_s14, 1  ;;  %p271_p5 = scmp.ge.s32.totalorder %s469_s12, 1 }
   0x9   : > { %p519_p4 = por %p693_p1, %p39_p0  ;;  %p97_p7 = scmp.lt.s32.totalorder %s469_s12, 3 }
   0xa   : > { %p524_p6 = por %p90_p3, %p39_p0  ;;  %s471_s18 = smov [#allocation5]  }
   0xb   : > { %s696_s15 = scalar_select %p519_p4, 1, 0 }
   0xc   : > { %s697_s16 = scalar_select %p524_p6, 1, 0 }
   0xd   : > { %p529_p8 = pnand %p271_p5, %p97_p7  ;;  %s110_s19 = sshll.u32 %s471_s18, 4  ;;  %s111_s19 = int_to_ptr.vmem [resolvable:$true] %s110_s19 }
   0xe   : > { %s537_s20 = sadd.s32 1, %s469_s12   ;;  %s26_s24 = sadd.s32 1, %s465_s11 }
   0xf   : > { %s698_s17 = scalar_select %p529_p8, 1, 0 }
  0x10   : > { %p292_p10 = pneg %p529_p8  ;;  %s23_s22 = ssub.s32 %s469_s12, %s537_s20 }
  0x11   : > { %p547_p12 = scmp.eq.s32.totalorder %s23_s22, 0  ;;  %s341_s27 = scalar_lea.hbm %s691_s1, 128 }
  0x12   : > { %p541_p11 = pnand %p292_p10, %p693_p1  ;;  %p342_p0 = scmp.ne.s32.totalorder %s691_s1, %s341_s27 }
  0x13   : > { %s700_s23 = scalar_select %p547_p12, 1, 0 }
  0x14   : > { %p343_p3 = pneg %p541_p11  ;;  %p348_p10 = scmp.lt.u32.totalorder %s341_s27, %s691_s1 }
  0x16   : > { %p344_p5 = pnand %p343_p3, %p342_p0 }
  0x18   : > { %p345_p7 = pneg %p344_p5 }
  0x1a   : > { %p350_p9 = pnand %p348_p10, %p345_p7 }
  0x1c   : > { %353 = shalt.err (!%p350_p9)
}
  0x1d   : > { %s354_s4 = scalar_lea.vmem %s111_s19, 128  ;;  %p362_p6 = scmp.lt.s32.totalorder %s111_s19, %s111_s19 }
  0x1e   : > { %p355_p1 = scmp.ne.s32.totalorder %s111_s19, %s354_s4  ;;  %p363_p4 = scmp.lt.s32.totalorder %s354_s4, %s354_s4 }
  0x20   : > { %p357_p2 = pnand %p355_p1, %p343_p3  ;;  %p364_p8 = por %p363_p4, %p362_p6 }
  0x22   : > { %p358_p13 = pneg %p357_p2 }
  0x24   : > { %p365_p12 = pnand %p364_p8, %p358_p13 }
  0x26   : > { %368 = shalt.err (!%p365_p12)
}
  0x27   : > { %295 = dma.hbm_to_vmem [thread:$0]  (!%p541_p11), %s691_s1, 128, %s111_s19, [#allocation6]  }
  0x28   : > { %p701_p1 = scmp.ne.s32.totalorder %s700_s23, 0  ;;  %p34_p2 = scmp.eq.s32.totalorder %s469_s12, 0 }
  0x29   : > { %p702_p4 = scmp.ne.s32.totalorder %s465_s11, %s461_s10  ;;  %p703_p6 = scmp.eq.s32.totalorder %s510_s13, 1 }
  0x2a   : > { %s573_s7 = scalar_select %p701_p1, %s465_s11, %s26_s24  }
  0x2b   : > { %p581_p8 = por %p703_p6, %p702_p4  ;;  %p305_p9 = scmp.lt.s32.totalorder %s469_s12, 2 }
  0x2c   : > { %s121_s14 = sand.u32 1, %s465_s11   ;;  %p705_p12 = pmov %p702_p4 }
  0x2d   : > { %s274_s18 = sshll.u32 %s121_s14, 3  ;;  %s275_s21 = sshll.u32 %s469_s12, 7 }
  0x2e   : > { %p35_p13 = por %p34_p2, %p705_p12  ;;  %s594_s19 = scalar_lea.hbm %s690_s0, %s275_s21 }
  0x2f   : > { %s125_s23 = scalar_lea.vmem [#allocation2], %s274_s18  ;;  %s122_s27 = scalar_lea.sflag [#allocation3], %s121_s14 }
  0x30   : > { %s132_s24 = sshll.u32 %s125_s23, 4  ;;  %p596_p11 = pnand %p305_p9, %p35_p13  ;;  %s600_s24 = int_to_ptr.vmem [resolvable:$true] %s132_s24 }
  0x31   : > { %s369_s28 = scalar_lea.hbm %s594_s19, 128  ;;  %s374_s3 = scalar_lea.hbm %s690_s0, 256 }
  0x32   : > { %p370_p0 = scmp.ne.s32.totalorder %s594_s19, %s369_s28  ;;  %p371_p3 = pneg %p596_p11 }
  0x33   : > { %p375_p10 = scmp.lt.u32.totalorder %s594_s19, %s690_s0  ;;  %p376_p1 = scmp.lt.u32.totalorder %s374_s3, %s369_s28 }
  0x34   : > { %p372_p5 = pnand %p371_p3, %p370_p0  ;;  %p378_p4 = scmp.lt.u32.totalorder %s369_s28, %s594_s19 }
  0x35   : > { %p377_p2 = por %p376_p1, %p375_p10 }
  0x36   : > { %p373_p7 = pneg %p372_p5 }
  0x37   : > { %p379_p6 = por %p378_p4, %p377_p2 }
  0x39   : > { %p380_p9 = pnand %p379_p6, %p373_p7 }
  0x3b   : > { %383 = shalt.err (!%p380_p9)
}
  0x3c   : > { %s384_s6 = scalar_lea.vmem %s600_s24, 128  ;;  %s472_s14 = smov [#allocation2]  }
  0x3d   : > { %p385_p12 = scmp.ne.s32.totalorder %s600_s24, %s384_s6  ;;  %s389_s18 = sshll.u32 %s472_s14, 4  ;;  %s390_s18 = int_to_ptr.vmem [resolvable:$false] %s389_s18 }
  0x3e   : > { %s391_s21 = scalar_lea.vmem %s390_s18, 256  ;;  %p392_p5 = scmp.lt.s32.totalorder %s600_s24, %s390_s18 }
  0x3f   : > { %p387_p13 = pnand %p385_p12, %p371_p3  ;;  %p393_p10 = scmp.lt.s32.totalorder %s391_s21, %s384_s6 }
  0x41   : > { %p388_p0 = pneg %p387_p13  ;;  %p394_p1 = por %p393_p10, %p392_p5 }
  0x43   : > { %p395_p2 = pnand %p394_p1, %p388_p0 }
  0x45   : > { %398 = shalt.err (!%p395_p2)
}
  0x46   : > { %299 = dma.hbm_to_vmem [thread:$0]  (!%p596_p11), %s594_s19, 128, %s600_s24, %s122_s27  }
  0x47   : > { %p707_p7 = scmp.ne.s32.totalorder %s698_s17, 0 }
  0x48   : > { %s630_s22 = sand.u32 (!%p707_p7), 1, %s461_s10   ;;  %p708_p3 = scmp.ne.s32.totalorder (!%p707_p7), %s696_s15, 0 }
  0x49   : > { %141 = sbr.rel (%p707_p7) target bundleno = 109 (0x6d), region = 28  ;;  %s277_s25 = sshll.u32 (!%p707_p7), %s630_s22, 3 }
  0x4a   : > { %s144_s23 = scalar_lea.sflag (!%p707_p7), [#allocation3], %s630_s22  ;;  %s147_s28 = scalar_lea.vmem (!%p707_p7), [#allocation2], %s277_s25 }
  0x50   : > { %444 = dma.done.wait (%p708_p3), %s144_s23, 128  }
  0x51   : > { %446 = vsyncadd (%p708_p3), %s144_s23, 4294967168  ;;  %p709_p4 = scmp.eq.s32.totalorder %s510_s13, 0 }
  0x53   : > { %448 = dma.done.wait (%p709_p4), [#allocation6], 128   ;;  %p710_p11 = pmov %p709_p4 }
  0x54   : > { %s171_s17 = scalar_lea.vmem [#allocation7], %s277_s25  ;;  %s281_s24 = sshll.u32 %s510_s13, 7  ;;  %v172_v0 = vld [vmem:[%s147_s28] sm:$0xff]  ;;  %v173_v1 = vld [vmem:[#allocation5] sm:$0xff] }
  0x55   : > { %450 = vsyncadd (%p710_p11), [#allocation6], 4294967168  ;;  %s190_s19 = sshll.u32 %s171_s17, 4  ;;  %v174_v2 = vadd.f32 %v173_v1, %v172_v0  ;;  %s648_s27 = scalar_lea.hbm %s692_s2, %s281_s24  ;;  %s643_s19 = int_to_ptr.vmem [resolvable:$true] %s190_s19 }
  0x56   : > { %s177_s29 = scalar_lea.sflag [#allocation4], %s630_s22  ;;  %s399_s30 = scalar_lea.vmem %s643_s19, 128 }
  0x57   : > { %175 = vst [vmem:[%s171_s17] sm:$0xff] %v174_v2  ;;  %p400_p6 = scmp.ne.s32.totalorder %s643_s19, %s399_s30  ;;  %s473_s13 = smov [#allocation7]  }
  0x58   : > { %s403_s3 = sshll.u32 %s473_s13, 4  ;;  %s404_s3 = int_to_ptr.vmem [resolvable:$false] %s403_s3 }
  0x59   : > { %p401_p9 = pnand %p400_p6, %p581_p8  ;;  %s405_s4 = scalar_lea.vmem %s404_s3, 256 }
  0x5a   : > { %p406_p13 = scmp.lt.s32.totalorder %s643_s19, %s404_s3  ;;  %p407_p0 = scmp.lt.s32.totalorder %s405_s4, %s399_s30 }
  0x5b   : > { %p402_p12 = pneg %p401_p9 }
  0x5c   : > { %p408_p5 = por %p407_p0, %p406_p13 }
  0x5e   : > { %p409_p10 = pnand %p408_p5, %p402_p12 }
  0x60   : > { %412 = shalt.err (!%p409_p10)
}
  0x61   : > { %s413_s5 = scalar_lea.hbm %s648_s27, 128  ;;  %s417_s18 = scalar_lea.hbm %s692_s2, 256 }
  0x62   : > { %p414_p1 = scmp.ne.s32.totalorder %s648_s27, %s413_s5  ;;  %p418_p3 = scmp.lt.u32.totalorder %s648_s27, %s692_s2 }
  0x63   : > { %p419_p4 = scmp.lt.u32.totalorder %s417_s18, %s413_s5  ;;  %p421_p6 = scmp.lt.u32.totalorder %s413_s5, %s648_s27 }
  0x64   : > { %p415_p2 = pnand %p414_p1, %p581_p8 }
  0x65   : > { %p420_p11 = por %p419_p4, %p418_p3 }
  0x66   : > { %p416_p7 = pneg %p415_p2 }
  0x67   : > { %p422_p9 = por %p421_p6, %p420_p11 }
  0x69   : > { %p423_p12 = pnand %p422_p9, %p416_p7 }
  0x6b   : > { %426 = shalt.err (!%p423_p12)
}
  0x6c   : > { %290 = dma.vmem_to_hbm [thread:$0]  (%p581_p8), %s643_s19, 128, %s648_s27, %s177_s29  }
  0x6d PF: > { %s202_s25 = sand.u32 1, %s457_s9   ;;  %p711_p13 = scmp.ne.s32.totalorder %s697_s16, 0 }
  0x6e   : > { %p712_p0 = scmp.ge.s32.totalorder %s469_s12, 2  ;;  %s203_s23 = scalar_lea.sflag [#allocation4], %s202_s25 }
  0x70   : > { %p301_p5 = pnand %p712_p0, %p711_p13 }
  0x72   : > { %452 = dma.done.wait (!%p301_p5), %s203_s23, 128  }
  0x73   : > { %454 = vsyncadd (!%p301_p5), %s203_s23, 4294967168  ;;  %p16_p10 = scmp.ge.s32.totalorder %s537_s20, 4   ;;  %s713_s9 = smov %s461_s10 }
  0x74   : > { %s714_s10 = smov %s465_s11  ;;  %s715_s11 = smov %s573_s7 }
  0x75   : > { %s716_s12 = smov %s537_s20  ;;  %18 = sbr.rel (!%p16_p10) target bundleno = 6 (0x6), region = 77 }
  0x7c   :  { %208 = vsyncpa [#allocation3], 1 }
  0x7d   :  { %210 = vsyncpa [#allocation3 + $0x1], 1 }
  0x7e   :  { %211 = vsyncpa [#allocation6], 1 }
  0x7f   :  { %212 = vsyncpa [#allocation4], 1 }
  0x80   :  { %214 = vsyncpa [#allocation4 + $0x1], 1 }

// kernel: _lambda_.12
= control target key start
LH: loop header
LB: loop body
LE: loop exit
PB: predicated region body
PF: predicated region fallthrough
CT: control target
= control target key end

     0   :  { %s2051_s12 = smov 0   ;;  %s2303_s0 = inlined_call_operand.vmem [shape: bf16[5632,147], index: 0, kind: input, shape index: {}]   ;;  %s2304_s1 = inlined_call_operand.vmem [shape: bf16[147,128], index: 1, kind: input, shape index: {}]   ;;  %s2305_s2 = inlined_call_operand.vmem [shape: f32[1,128], index: 2, kind: input, shape index: {}]   ;;  %s2306_s3 = inlined_call_operand.vmem [shape: bf16[5632,128], index: 3, kind: output, shape index: {}]  }
   0x1 LB: > { %s1446_s13 = sadd.s32 4294967295, %s2027_s12   ;;  %p1450_p0 = scmp.ge.s32.totalorder %s2027_s12, 1  ;;  %s2027_s12 = sphi %s2051_s12, %s13_s12  }
   0x2   : > { %p139_p1 = scmp.lt.s32.totalorder %s2027_s12, 12 }
   0x4   : > { %p140_p2 = pnand %p1450_p0, %p139_p1 }
   0x5   : > { %v1915_v0 = vld [vmem:[%s2304_s1] sm:$0xff] (!%p140_p2)   ;;  %v2029_v1 = vmov (!%p140_p2), 0   ;;  %v1916_v2 = vld [vmem:[%s2304_s1 + $0x8] sm:$0xff] (!%p140_p2)   ;;  %v1917_v3 = vld [vmem:[%s2304_s1 + $0x10] sm:$0xff] (!%p140_p2)   ;;  %s1451_s20 = sshll.u32 (!%p140_p2), %s1446_s13, 6  ;;  %vm613_vm0 = vcmask (!%p140_p2), 154624  }
   0x6   : > { %143 = sbr.rel (%p140_p2) target bundleno = 387 (0x183), region = 32  ;;  %717 = vmatprep.subr.bf16.mxu0 (!%p140_p2), %v2029_v1  ;;  %1885 = vmatprep.subr.bf16.mxu1 (!%p140_p2), %v2029_v1  ;;  %p165_p3 = scmp.lt.s32.totalorder (!%p140_p2), %s1451_s20, 703  ;;  %v1918_v4 = vld [vmem:[%s2304_s1 + $0x18] sm:$0xff] (!%p140_p2)   ;;  %v1919_v5 = vld [vmem:[%s2304_s1 + $0x20] sm:$0xff] (!%p140_p2)   ;;  %v1920_v8 = vld [vmem:[%s2304_s1 + $0x28] sm:$0xff] (!%p140_p2)   ;;  %vm710_vm1 = vcmask (!%p140_p2), 1040384  }
   0x7   : > { %718 = vmatpush1.bf16.msra.mxu0 (!%p140_p2), %v1915_v0  ;;  %1895 = vmatpush1.bf16.msra.mxu1 (!%p140_p2), %v1915_v0  ;;  %v1921_v9 = vld [vmem:[%s2304_s1 + $0x30] sm:$0xff] (!%p140_p2)   ;;  %v1922_v10 = vld [vmem:[%s2304_s1 + $0x38] sm:$0xff] (!%p140_p2)   ;;  %vm711_vm2 = vcmask (!%p140_p2), 1041408   ;;  %v2030_v11 = vmov (!%p140_p2), 65535   ;;  %v1923_v13 = vld [vmem:[%s2304_s1 + $0x40] sm:$0xff] (!%p140_p2)  }
   0x8   : > { %719 = vmatprep.subr.bf16.mxu0 (!%p140_p2), %v2029_v1  ;;  %1886 = vmatprep.subr.bf16.mxu1 (!%p140_p2), %v2029_v1  ;;  %v712_v12 = vsel (!%p140_p2), %vm710_vm1, 4294967295, %v2030_v11  ;;  %v1924_v14 = vld [vmem:[%s2304_s1 + $0x48] ss:$0 sps:$4 sm:$0x33] (!%p140_p2)  }
   0x9   : > { %v713_v15 = vsel (!%p140_p2), %vm711_vm2, %v712_v12, 0 }
   0xa   : > { %v715_v16 = vand.u32 (!%p140_p2), %v1924_v14, %v713_v15  ;;  %v2196_v15 = vld [vmem:[%s2305_s2] ss:$0 sm:$0xff] (!%p140_p2) }
   0xb   : > { %720 = vmatpush1.bf16.msra.mxu0 (!%p140_p2), %v1916_v2  ;;  %1896 = vmatpush1.bf16.msra.mxu1 (!%p140_p2), %v1916_v2 }
   0xc   : > { %721 = vmatprep.subr.bf16.mxu0 (!%p140_p2), %v2029_v1  ;;  %1887 = vmatprep.subr.bf16.mxu1 (!%p140_p2), %v2029_v1 }
   0xd   : > { %s2308_s20 = smov (!%p165_p3, %s1451_s20), 703 }
   0xe   : > { %s1629_s23 = sshll.u32 %s2308_s20, 3  ;;  %s1455_s15 = sshll.u32 %s2308_s20, 2 }
   0xf   : > { %722 = vmatpush1.bf16.msra.mxu0 %v1917_v3  ;;  %1897 = vmatpush1.bf16.msra.mxu1 %v1917_v3  ;;  %s2077_s26 = scalar_lea.vmem %s2303_s0, %s1629_s23  ;;  %s2206_s18 = scalar_lea.vmem %s2306_s3, %s1455_s15 }
  0x10   : > { %723 = vmatprep.subr.bf16.mxu0 %v2029_v1  ;;  %1888 = vmatprep.subr.bf16.mxu1 %v2029_v1  ;;  %v1927_v6 = vld [vmem:[%s2077_s26 + $0x4] ss:$8 sps:$4 sm:$0xff]   ;;  %v1925_v17 = vld [vmem:[%s2077_s26] ss:$8 sps:$4 sm:$0xff]   ;;  %v1931_v19 = vld [vmem:[%s2077_s26 + $0x14] ss:$8 sps:$4 sm:$0xff]  }
  0x11   : > { %v1930_v7 = vld [vmem:[%s2077_s26 + $0x104] ss:$8 sps:$4 sm:$0xff]   ;;  %1531 = vmatprep.mubr.msk.bf16.mxu0 %vm613_vm0, %v1927_v6  ;;  %v1928_v18 = vld [vmem:[%s2077_s26 + $0x100] ss:$8 sps:$4 sm:$0xff]   ;;  %v1933_v20 = vld [vmem:[%s2077_s26 + $0x114] ss:$8 sps:$4 sm:$0xff]  }
  0x12   : > { %1547 = vmatprep.mubr.msk.bf16.mxu1 %vm613_vm0, %v1930_v7  ;;  %v1935_v21 = vld [vmem:[%s2077_s26 + $0x10] ss:$8 sps:$4 sm:$0xff]   ;;  %v1937_v23 = vld [vmem:[%s2077_s26 + $0x24] ss:$8 sps:$4 sm:$0xff]   ;;  %v1941_v25 = vld [vmem:[%s2077_s26 + $0x20] ss:$8 sps:$4 sm:$0xff]  }
  0x13   : > { %724 = vmatpush1.bf16.msra.mxu0 %v1918_v4  ;;  %1898 = vmatpush1.bf16.msra.mxu1 %v1918_v4  ;;  %v1936_v22 = vld [vmem:[%s2077_s26 + $0x110] ss:$8 sps:$4 sm:$0xff]   ;;  %v1939_v24 = vld [vmem:[%s2077_s26 + $0x124] ss:$8 sps:$4 sm:$0xff]   ;;  %v1942_v26 = vld [vmem:[%s2077_s26 + $0x120] ss:$8 sps:$4 sm:$0xff]  }
  0x14   : > { %725 = vmatprep.subr.bf16.mxu0 %v2029_v1  ;;  %1889 = vmatprep.subr.bf16.mxu1 %v2029_v1  ;;  %v1943_v27 = vld [vmem:[%s2077_s26 + $0x34] ss:$8 sps:$4 sm:$0xff]   ;;  %v1947_v29 = vld [vmem:[%s2077_s26 + $0x30] ss:$8 sps:$4 sm:$0xff]   ;;  %v1949_v31 = vld [vmem:[%s2077_s26 + $0x44] ss:$8 sps:$4 sm:$0xff]  }
  0x15   : > { %v1945_v28 = vld [vmem:[%s2077_s26 + $0x134] ss:$8 sps:$4 sm:$0xff]   ;;  %v1948_v30 = vld [vmem:[%s2077_s26 + $0x130] ss:$8 sps:$4 sm:$0xff]   ;;  %v1951_v32 = vld [vmem:[%s2077_s26 + $0x144] ss:$8 sps:$4 sm:$0xff]  }
  0x16   : > { %v1953_v33 = vld [vmem:[%s2077_s26 + $0x40] ss:$8 sps:$4 sm:$0xff]   ;;  %v1955_v35 = vld [vmem:[%s2077_s26 + $0x54] ss:$8 sps:$4 sm:$0xff]   ;;  %v1959_v37 = vld [vmem:[%s2077_s26 + $0x50] ss:$8 sps:$4 sm:$0xff]  }
  0x17   : > { %726 = vmatpush1.bf16.msra.mxu0 %v1919_v5  ;;  %1899 = vmatpush1.bf16.msra.mxu1 %v1919_v5  ;;  %v1954_v34 = vld [vmem:[%s2077_s26 + $0x140] ss:$8 sps:$4 sm:$0xff]   ;;  %v1957_v36 = vld [vmem:[%s2077_s26 + $0x154] ss:$8 sps:$4 sm:$0xff]   ;;  %v1960_v38 = vld [vmem:[%s2077_s26 + $0x150] ss:$8 sps:$4 sm:$0xff]  }
  0x18   : > { %727 = vmatprep.subr.bf16.mxu0 %v2029_v1  ;;  %1890 = vmatprep.subr.bf16.mxu1 %v2029_v1  ;;  %v1961_v39 = vld [vmem:[%s2077_s26 + $0x64] ss:$8 sps:$4 sm:$0xff]   ;;  %v1965_v41 = vld [vmem:[%s2077_s26 + $0x60] ss:$8 sps:$4 sm:$0xff]   ;;  %v1967_v43 = vld [vmem:[%s2077_s26 + $0x74] ss:$8 sps:$4 sm:$0xff]  }
  0x19   : > { %v1963_v40 = vld [vmem:[%s2077_s26 + $0x164] ss:$8 sps:$4 sm:$0xff]   ;;  %v1966_v42 = vld [vmem:[%s2077_s26 + $0x160] ss:$8 sps:$4 sm:$0xff]   ;;  %v1969_v44 = vld [vmem:[%s2077_s26 + $0x174] ss:$8 sps:$4 sm:$0xff]  }
  0x1a   : > { %v1971_v45 = vld [vmem:[%s2077_s26 + $0x70] ss:$8 sps:$4 sm:$0xff]   ;;  %v1973_v47 = vld [vmem:[%s2077_s26 + $0x84] ss:$8 sps:$4 sm:$0xff]   ;;  %v1977_v49 = vld [vmem:[%s2077_s26 + $0x80] ss:$8 sps:$4 sm:$0xff]  }
  0x1b   : > { %728 = vmatpush1.bf16.msra.mxu0 %v1920_v8  ;;  %1900 = vmatpush1.bf16.msra.mxu1 %v1920_v8  ;;  %v1972_v46 = vld [vmem:[%s2077_s26 + $0x170] ss:$8 sps:$4 sm:$0xff]   ;;  %v1975_v48 = vld [vmem:[%s2077_s26 + $0x184] ss:$8 sps:$4 sm:$0xff]   ;;  %v1978_v50 = vld [vmem:[%s2077_s26 + $0x180] ss:$8 sps:$4 sm:$0xff]  }
  0x1c   : > { %729 = vmatprep.subr.bf16.mxu0 %v2029_v1  ;;  %1891 = vmatprep.subr.bf16.mxu1 %v2029_v1  ;;  %v1979_v51 = vld [vmem:[%s2077_s26 + $0x94] ss:$8 sps:$4 sm:$0xff]   ;;  %v1983_v53 = vld [vmem:[%s2077_s26 + $0x90] ss:$8 sps:$4 sm:$0xff]   ;;  %v1985_v55 = vld [vmem:[%s2077_s26 + $0xa4] ss:$8 sps:$4 sm:$0xff]  }
  0x1d   : > { %v1981_v52 = vld [vmem:[%s2077_s26 + $0x194] ss:$8 sps:$4 sm:$0xff]   ;;  %v1984_v54 = vld [vmem:[%s2077_s26 + $0x190] ss:$8 sps:$4 sm:$0xff]   ;;  %v1987_v56 = vld [vmem:[%s2077_s26 + $0x1a4] ss:$8 sps:$4 sm:$0xff]  }
  0x1e   : > { %v1989_v57 = vld [vmem:[%s2077_s26 + $0xa0] ss:$8 sps:$4 sm:$0xff]   ;;  %v1991_v59 = vld [vmem:[%s2077_s26 + $0xb4] ss:$8 sps:$4 sm:$0xff]   ;;  %v1995_v61 = vld [vmem:[%s2077_s26 + $0xb0] ss:$8 sps:$4 sm:$0xff]  }
  0x1f   : > { %730 = vmatpush1.bf16.msra.mxu0 %v1921_v9  ;;  %1901 = vmatpush1.bf16.msra.mxu1 %v1921_v9  ;;  %v1990_v58 = vld [vmem:[%s2077_s26 + $0x1a0] ss:$8 sps:$4 sm:$0xff]   ;;  %v1993_v60 = vld [vmem:[%s2077_s26 + $0x1b4] ss:$8 sps:$4 sm:$0xff]   ;;  %v1996_v62 = vld [vmem:[%s2077_s26 + $0x1b0] ss:$8 sps:$4 sm:$0xff]  }
  0x20   : > { %731 = vmatprep.subr.bf16.mxu0 %v2029_v1  ;;  %1892 = vmatprep.subr.bf16.mxu1 %v2029_v1  ;;  %v1997_v63 = vld [vmem:[%s2077_s26 + $0xc4] ss:$8 sps:$4 sm:$0xff]   ;;  %v2002_v2 = vld [vmem:[%s2077_s26 + $0x1c0] ss:$8 sps:$4 sm:$0xff]   ;;  %v2003_v3 = vld [vmem:[%s2077_s26 + $0xd4] ss:$8 sps:$4 sm:$0xff]  }
  0x21   : > { %v1999_v0 = vld [vmem:[%s2077_s26 + $0x1c4] ss:$8 sps:$4 sm:$0xff]   ;;  %v2005_v4 = vld [vmem:[%s2077_s26 + $0x1d4] ss:$8 sps:$4 sm:$0xff]   ;;  %v2007_v5 = vld [vmem:[%s2077_s26 + $0xd0] ss:$8 sps:$4 sm:$0xff]  }
  0x22   : > { %v2008_v6 = vld [vmem:[%s2077_s26 + $0x1d0] ss:$8 sps:$4 sm:$0xff]   ;;  %v2009_v7 = vld [vmem:[%s2077_s26 + $0xe4] ss:$8 sps:$4 sm:$0xff]   ;;  %v2013_v9 = vld [vmem:[%s2077_s26 + $0xe0] ss:$8 sps:$4 sm:$0xff]  }
  0x23   : > { %732 = vmatpush1.bf16.msra.mxu0 %v1922_v10  ;;  %1902 = vmatpush1.bf16.msra.mxu1 %v1922_v10  ;;  %v2011_v8 = vld [vmem:[%s2077_s26 + $0x1e4] ss:$8 sps:$4 sm:$0xff]   ;;  %v2014_v10 = vld [vmem:[%s2077_s26 + $0x1e0] ss:$8 sps:$4 sm:$0xff]   ;;  %v2015_v11 = vld [vmem:[%s2077_s26 + $0xf4] ss:$8 sps:$4 sm:$0xff]  }
  0x24   : > { %733 = vmatprep.subr.bf16.mxu0 %v2029_v1  ;;  %1893 = vmatprep.subr.bf16.mxu1 %v2029_v1  ;;  %v2017_v12 = vld [vmem:[%s2077_s26 + $0x1f4] ss:$8 sps:$4 sm:$0xff]   ;;  %v2020_v14 = vld [vmem:[%s2077_s26 + $0x1f0] ss:$8 sps:$4 sm:$0xff]  }
  0x27   : > { %734 = vmatpush1.bf16.msra.mxu0 %v1923_v13  ;;  %1903 = vmatpush1.bf16.msra.mxu1 %v1923_v13  ;;  %v2019_v13 = vld [vmem:[%s2077_s26 + $0xf0] ss:$8 sps:$4 sm:$0xff]  }
  0x28   : > { %735 = vmatprep.subr.bf16.mxu0 %v2029_v1  ;;  %1894 = vmatprep.subr.bf16.mxu1 %v2029_v1  ;;  %v2001_v1 = vld [vmem:[%s2077_s26 + $0xc0] ss:$8 sps:$4 sm:$0xff]  }
  0x2b   : > { %736 = vmatpush1.bf16.msra.mxu0 %v715_v16  ;;  %1904 = vmatpush1.bf16.msra.mxu1 %v715_v16 }
  0x2e   : > { %750 = vmatmul.mubr.bf16.vlgmr.msra.gmra.mrb[0].mxu0 %v1925_v17  ;;  %878 = vmatmul.mubr.bf16.vlgmr.msra.gmra.mrb[0].mxu1 %v1928_v18 }
  0x2f   : > { %1532 = vmatprep.mubr.msk.bf16.mxu0 %vm613_vm0, %v1931_v19  ;;  %1548 = vmatprep.mubr.msk.bf16.mxu1 %vm613_vm0, %v1933_v20 }
  0x36   : > { %758 = vmatmul.mubr.bf16.gmra.mrb[4].mxu0 %v1935_v21  ;;  %886 = vmatmul.mubr.bf16.gmra.mrb[4].mxu1 %v1936_v22 }
  0x37   : > { %1533 = vmatprep.mubr.msk.bf16.mxu0 %vm613_vm0, %v1937_v23  ;;  %1549 = vmatprep.mubr.msk.bf16.mxu1 %vm613_vm0, %v1939_v24 }
  0x3e   : > { %766 = vmatmul.mubr.bf16.gmra.mrb[8].mxu0 %v1941_v25  ;;  %894 = vmatmul.mubr.bf16.gmra.mrb[8].mxu1 %v1942_v26 }
  0x3f   : > { %1534 = vmatprep.mubr.msk.bf16.mxu0 %vm613_vm0, %v1943_v27  ;;  %1550 = vmatprep.mubr.msk.bf16.mxu1 %vm613_vm0, %v1945_v28 }
  0x46   : > { %774 = vmatmul.mubr.bf16.gmra.mrb[12].mxu0 %v1947_v29  ;;  %902 = vmatmul.mubr.bf16.gmra.mrb[12].mxu1 %v1948_v30 }
  0x47   : > { %1535 = vmatprep.mubr.msk.bf16.mxu0 %vm613_vm0, %v1949_v31  ;;  %1551 = vmatprep.mubr.msk.bf16.mxu1 %vm613_vm0, %v1951_v32 }
  0x4e   : > { %782 = vmatmul.mubr.bf16.gmra.mrb[16].mxu0 %v1953_v33  ;;  %910 = vmatmul.mubr.bf16.gmra.mrb[16].mxu1 %v1954_v34 }
  0x4f   : > { %1536 = vmatprep.mubr.msk.bf16.mxu0 %vm613_vm0, %v1955_v35  ;;  %1552 = vmatprep.mubr.msk.bf16.mxu1 %vm613_vm0, %v1957_v36 }
  0x56   : > { %790 = vmatmul.mubr.bf16.gmra.mrb[20].mxu0 %v1959_v37  ;;  %918 = vmatmul.mubr.bf16.gmra.mrb[20].mxu1 %v1960_v38 }
  0x57   : > { %1537 = vmatprep.mubr.msk.bf16.mxu0 %vm613_vm0, %v1961_v39  ;;  %1553 = vmatprep.mubr.msk.bf16.mxu1 %vm613_vm0, %v1963_v40 }
  0x5e   : > { %798 = vmatmul.mubr.bf16.gmra.mrb[24].mxu0 %v1965_v41  ;;  %926 = vmatmul.mubr.bf16.gmra.mrb[24].mxu1 %v1966_v42 }
  0x5f   : > { %1538 = vmatprep.mubr.msk.bf16.mxu0 %vm613_vm0, %v1967_v43  ;;  %1554 = vmatprep.mubr.msk.bf16.mxu1 %vm613_vm0, %v1969_v44 }
  0x66   : > { %806 = vmatmul.mubr.bf16.gmra.mrb[28].mxu0 %v1971_v45  ;;  %934 = vmatmul.mubr.bf16.gmra.mrb[28].mxu1 %v1972_v46 }
  0x67   : > { %1539 = vmatprep.mubr.msk.bf16.mxu0 %vm613_vm0, %v1973_v47  ;;  %1555 = vmatprep.mubr.msk.bf16.mxu1 %vm613_vm0, %v1975_v48 }
  0x6e   : > { %814 = vmatmul.mubr.bf16.gmra.mrb[32].mxu0 %v1977_v49  ;;  %942 = vmatmul.mubr.bf16.gmra.mrb[32].mxu1 %v1978_v50 }
  0x6f   : > { %1540 = vmatprep.mubr.msk.bf16.mxu0 %vm613_vm0, %v1979_v51  ;;  %1556 = vmatprep.mubr.msk.bf16.mxu1 %vm613_vm0, %v1981_v52 }
  0x76   : > { %822 = vmatmul.mubr.bf16.gmra.mrb[36].mxu0 %v1983_v53  ;;  %950 = vmatmul.mubr.bf16.gmra.mrb[36].mxu1 %v1984_v54 }
  0x77   : > { %1541 = vmatprep.mubr.msk.bf16.mxu0 %vm613_vm0, %v1985_v55  ;;  %1557 = vmatprep.mubr.msk.bf16.mxu1 %vm613_vm0, %v1987_v56 }
  0x7e   : > { %830 = vmatmul.mubr.bf16.gmra.mrb[40].mxu0 %v1989_v57  ;;  %958 = vmatmul.mubr.bf16.gmra.mrb[40].mxu1 %v1990_v58 }
  0x7f   : > { %1542 = vmatprep.mubr.msk.bf16.mxu0 %vm613_vm0, %v1991_v59  ;;  %1558 = vmatprep.mubr.msk.bf16.mxu1 %vm613_vm0, %v1993_v60 }
  0x86   : > { %838 = vmatmul.mubr.bf16.gmra.mrb[44].mxu0 %v1995_v61  ;;  %966 = vmatmul.mubr.bf16.gmra.mrb[44].mxu1 %v1996_v62 }
  0x87   : > { %1543 = vmatprep.mubr.msk.bf16.mxu0 %vm613_vm0, %v1997_v63  ;;  %1559 = vmatprep.mubr.msk.bf16.mxu1 %vm613_vm0, %v1999_v0 }
  0x8e   : > { %846 = vmatmul.mubr.bf16.gmra.mrb[48].mxu0 %v2001_v1  ;;  %974 = vmatmul.mubr.bf16.gmra.mrb[48].mxu1 %v2002_v2 }
  0x8f   : > { %1544 = vmatprep.mubr.msk.bf16.mxu0 %vm613_vm0, %v2003_v3  ;;  %1560 = vmatprep.mubr.msk.bf16.mxu1 %vm613_vm0, %v2005_v4 }
  0x96   : > { %854 = vmatmul.mubr.bf16.gmra.mrb[52].mxu0 %v2007_v5  ;;  %982 = vmatmul.mubr.bf16.gmra.mrb[52].mxu1 %v2008_v6 }
  0x97   : > { %1545 = vmatprep.mubr.msk.bf16.mxu0 %vm613_vm0, %v2009_v7  ;;  %1561 = vmatprep.mubr.msk.bf16.mxu1 %vm613_vm0, %v2011_v8 }
  0x9e   : > { %862 = vmatmul.mubr.bf16.gmra.mrb[56].mxu0 %v2013_v9  ;;  %990 = vmatmul.mubr.bf16.gmra.mrb[56].mxu1 %v2014_v10 }
  0x9f   : > { %1546 = vmatprep.mubr.msk.bf16.mxu0 %vm613_vm0, %v2015_v11  ;;  %1562 = vmatprep.mubr.msk.bf16.mxu1 %vm613_vm0, %v2017_v12 }
  0xa6   : > { %870 = vmatmul.mubr.bf16.gmra.mrb[60].mxu0 %v2019_v13  ;;  %998 = vmatmul.mubr.bf16.gmra.mrb[60].mxu1 %v2020_v14 }
 0x101   : > { %v751_v16 = vpop.f32.mrb[0].mxu0  ;;  %v879_v17 = vpop.f32.mrb[0].mxu1 }
 0x102   : > { %v752_v18 = vadd.f32 %v2196_v15, %v751_v16  ;;  %v880_v19 = vadd.f32 %v2196_v15, %v879_v17  ;;  %v753_v20 = vpop.f32.mrb[1].mxu0  ;;  %v881_v21 = vpop.f32.mrb[1].mxu1 }
 0x103   : > { %v754_v22 = vpop.f32.mrb[2].mxu0  ;;  %v882_v23 = vpop.f32.mrb[2].mxu1 }
 0x104   : > { %v755_v24 = vadd.f32 %v2196_v15, %v754_v22  ;;  %v883_v25 = vadd.f32 %v2196_v15, %v882_v23  ;;  %v756_v26 = vpop.f32.mrb[3].mxu0  ;;  %v884_v27 = vpop.f32.mrb[3].mxu1  ;;  %v1006_v28 = vmax.f32 %v752_v18, 0.0  ;;  %v1038_v29 = vmax.f32 %v880_v19, 0.0 }
 0x106   : > { %v1007_v30 = vmax.f32 %v755_v24, 0.0  ;;  %v1039_v31 = vmax.f32 %v883_v25, 0.0 }
 0x108   : > { %v1697_v32 = vpack.c.bf16 %v1007_v30, %v1006_v28  ;;  %v1777_v33 = vpack.c.bf16 %v1039_v31, %v1038_v29 }
 0x109   : > { %v759_v34 = vpop.f32.mrb[4].mxu0  ;;  %v887_v35 = vpop.f32.mrb[4].mxu1 }
 0x10a   : > { %1698 = vst [vmem:[%s2206_s18] sm:$0xff] %v1697_v32   ;;  %1869 = vst [vmem:[%s2206_s18 + $0x80] sm:$0xff] %v1777_v33   ;;  %v760_v36 = vadd.f32 %v2196_v15, %v759_v34  ;;  %v888_v37 = vadd.f32 %v2196_v15, %v887_v35  ;;  %v761_v38 = vpop.f32.mrb[5].mxu0  ;;  %v889_v39 = vpop.f32.mrb[5].mxu1 }
 0x10b   : > { %v762_v40 = vpop.f32.mrb[6].mxu0  ;;  %v890_v41 = vpop.f32.mrb[6].mxu1 }
 0x10c   : > { %v763_v42 = vadd.f32 %v2196_v15, %v762_v40  ;;  %v891_v43 = vadd.f32 %v2196_v15, %v890_v41  ;;  %v764_v44 = vpop.f32.mrb[7].mxu0  ;;  %v892_v45 = vpop.f32.mrb[7].mxu1  ;;  %v1008_v46 = vmax.f32 %v760_v36, 0.0  ;;  %v1040_v47 = vmax.f32 %v888_v37, 0.0 }
 0x10e   : > { %v1009_v48 = vmax.f32 %v763_v42, 0.0  ;;  %v1041_v49 = vmax.f32 %v891_v43, 0.0 }
 0x110   : > { %v1702_v50 = vpack.c.bf16 %v1009_v48, %v1008_v46  ;;  %v1782_v51 = vpack.c.bf16 %v1041_v49, %v1040_v47 }
 0x111   : > { %v767_v52 = vpop.f32.mrb[8].mxu0  ;;  %v895_v53 = vpop.f32.mrb[8].mxu1 }
 0x112   : > { %1854 = vst [vmem:[%s2206_s18 + $0x8] sm:$0xff] %v1702_v50   ;;  %1870 = vst [vmem:[%s2206_s18 + $0x88] sm:$0xff] %v1782_v51   ;;  %v768_v54 = vadd.f32 %v2196_v15, %v767_v52  ;;  %v896_v55 = vadd.f32 %v2196_v15, %v895_v53  ;;  %v769_v56 = vpop.f32.mrb[9].mxu0  ;;  %v897_v57 = vpop.f32.mrb[9].mxu1 }
 0x113   : > { %v770_v58 = vpop.f32.mrb[10].mxu0  ;;  %v898_v59 = vpop.f32.mrb[10].mxu1 }
 0x114   : > { %v771_v60 = vadd.f32 %v2196_v15, %v770_v58  ;;  %v899_v61 = vadd.f32 %v2196_v15, %v898_v59  ;;  %v772_v62 = vpop.f32.mrb[11].mxu0  ;;  %v900_v63 = vpop.f32.mrb[11].mxu1  ;;  %v1010_v0 = vmax.f32 %v768_v54, 0.0  ;;  %v1042_v1 = vmax.f32 %v896_v55, 0.0 }
 0x116   : > { %v1011_v2 = vmax.f32 %v771_v60, 0.0  ;;  %v1043_v3 = vmax.f32 %v899_v61, 0.0 }
 0x118   : > { %v1707_v4 = vpack.c.bf16 %v1011_v2, %v1010_v0  ;;  %v1787_v5 = vpack.c.bf16 %v1043_v3, %v1042_v1 }
 0x119   : > { %v775_v6 = vpop.f32.mrb[12].mxu0  ;;  %v903_v7 = vpop.f32.mrb[12].mxu1 }
 0x11a   : > { %1855 = vst [vmem:[%s2206_s18 + $0x10] sm:$0xff] %v1707_v4   ;;  %1871 = vst [vmem:[%s2206_s18 + $0x90] sm:$0xff] %v1787_v5   ;;  %v776_v8 = vadd.f32 %v2196_v15, %v775_v6  ;;  %v904_v9 = vadd.f32 %v2196_v15, %v903_v7  ;;  %v777_v10 = vpop.f32.mrb[13].mxu0  ;;  %v905_v11 = vpop.f32.mrb[13].mxu1 }
 0x11b   : > { %v778_v12 = vpop.f32.mrb[14].mxu0  ;;  %v906_v13 = vpop.f32.mrb[14].mxu1 }
 0x11c   : > { %v779_v14 = vadd.f32 %v2196_v15, %v778_v12  ;;  %v907_v16 = vadd.f32 %v2196_v15, %v906_v13  ;;  %v780_v17 = vpop.f32.mrb[15].mxu0  ;;  %v908_v18 = vpop.f32.mrb[15].mxu1  ;;  %v1012_v19 = vmax.f32 %v776_v8, 0.0  ;;  %v1044_v20 = vmax.f32 %v904_v9, 0.0 }
 0x11e   : > { %v1013_v21 = vmax.f32 %v779_v14, 0.0  ;;  %v1045_v22 = vmax.f32 %v907_v16, 0.0 }
 0x120   : > { %v1712_v23 = vpack.c.bf16 %v1013_v21, %v1012_v19  ;;  %v1792_v24 = vpack.c.bf16 %v1045_v22, %v1044_v20 }
 0x121   : > { %v783_v25 = vpop.f32.mrb[16].mxu0  ;;  %v911_v26 = vpop.f32.mrb[16].mxu1 }
 0x122   : > { %1856 = vst [vmem:[%s2206_s18 + $0x18] sm:$0xff] %v1712_v23   ;;  %1872 = vst [vmem:[%s2206_s18 + $0x98] sm:$0xff] %v1792_v24   ;;  %v784_v27 = vadd.f32 %v2196_v15, %v783_v25  ;;  %v912_v28 = vadd.f32 %v2196_v15, %v911_v26  ;;  %v785_v29 = vpop.f32.mrb[17].mxu0  ;;  %v913_v30 = vpop.f32.mrb[17].mxu1 }
 0x123   : > { %v786_v31 = vpop.f32.mrb[18].mxu0  ;;  %v914_v32 = vpop.f32.mrb[18].mxu1 }
 0x124   : > { %v787_v33 = vadd.f32 %v2196_v15, %v786_v31  ;;  %v915_v34 = vadd.f32 %v2196_v15, %v914_v32  ;;  %v788_v35 = vpop.f32.mrb[19].mxu0  ;;  %v916_v36 = vpop.f32.mrb[19].mxu1  ;;  %v1014_v37 = vmax.f32 %v784_v27, 0.0  ;;  %v1046_v38 = vmax.f32 %v912_v28, 0.0 }
 0x126   : > { %v1015_v39 = vmax.f32 %v787_v33, 0.0  ;;  %v1047_v40 = vmax.f32 %v915_v34, 0.0 }
 0x128   : > { %v1717_v41 = vpack.c.bf16 %v1015_v39, %v1014_v37  ;;  %v1797_v42 = vpack.c.bf16 %v1047_v40, %v1046_v38 }
 0x129   : > { %v791_v43 = vpop.f32.mrb[20].mxu0  ;;  %v919_v44 = vpop.f32.mrb[20].mxu1 }
 0x12a   : > { %1857 = vst [vmem:[%s2206_s18 + $0x20] sm:$0xff] %v1717_v41   ;;  %1873 = vst [vmem:[%s2206_s18 + $0xa0] sm:$0xff] %v1797_v42   ;;  %v792_v45 = vadd.f32 %v2196_v15, %v791_v43  ;;  %v920_v46 = vadd.f32 %v2196_v15, %v919_v44  ;;  %v793_v47 = vpop.f32.mrb[21].mxu0  ;;  %v921_v48 = vpop.f32.mrb[21].mxu1 }
 0x12b   : > { %v794_v49 = vpop.f32.mrb[22].mxu0  ;;  %v922_v50 = vpop.f32.mrb[22].mxu1 }
 0x12c   : > { %v795_v51 = vadd.f32 %v2196_v15, %v794_v49  ;;  %v923_v52 = vadd.f32 %v2196_v15, %v922_v50  ;;  %v796_v53 = vpop.f32.mrb[23].mxu0  ;;  %v924_v54 = vpop.f32.mrb[23].mxu1  ;;  %v1016_v55 = vmax.f32 %v792_v45, 0.0  ;;  %v1048_v56 = vmax.f32 %v920_v46, 0.0 }
 0x12e   : > { %v1017_v57 = vmax.f32 %v795_v51, 0.0  ;;  %v1049_v58 = vmax.f32 %v923_v52, 0.0 }
 0x130   : > { %v1722_v59 = vpack.c.bf16 %v1017_v57, %v1016_v55  ;;  %v1802_v60 = vpack.c.bf16 %v1049_v58, %v1048_v56 }
 0x131   : > { %v799_v61 = vpop.f32.mrb[24].mxu0  ;;  %v927_v62 = vpop.f32.mrb[24].mxu1 }
 0x132   : > { %1858 = vst [vmem:[%s2206_s18 + $0x28] sm:$0xff] %v1722_v59   ;;  %1874 = vst [vmem:[%s2206_s18 + $0xa8] sm:$0xff] %v1802_v60   ;;  %v800_v63 = vadd.f32 %v2196_v15, %v799_v61  ;;  %v928_v0 = vadd.f32 %v2196_v15, %v927_v62  ;;  %v801_v1 = vpop.f32.mrb[25].mxu0  ;;  %v929_v2 = vpop.f32.mrb[25].mxu1 }
 0x133   : > { %v802_v3 = vpop.f32.mrb[26].mxu0  ;;  %v930_v4 = vpop.f32.mrb[26].mxu1 }
 0x134   : > { %v803_v5 = vadd.f32 %v2196_v15, %v802_v3  ;;  %v931_v6 = vadd.f32 %v2196_v15, %v930_v4  ;;  %v804_v7 = vpop.f32.mrb[27].mxu0  ;;  %v932_v8 = vpop.f32.mrb[27].mxu1  ;;  %v1018_v9 = vmax.f32 %v800_v63, 0.0  ;;  %v1050_v10 = vmax.f32 %v928_v0, 0.0 }
 0x136   : > { %v1019_v11 = vmax.f32 %v803_v5, 0.0  ;;  %v1051_v12 = vmax.f32 %v931_v6, 0.0 }
 0x138   : > { %v1727_v13 = vpack.c.bf16 %v1019_v11, %v1018_v9  ;;  %v1807_v14 = vpack.c.bf16 %v1051_v12, %v1050_v10 }
 0x139   : > { %v807_v16 = vpop.f32.mrb[28].mxu0  ;;  %v935_v17 = vpop.f32.mrb[28].mxu1 }
 0x13a   : > { %1859 = vst [vmem:[%s2206_s18 + $0x30] sm:$0xff] %v1727_v13   ;;  %1875 = vst [vmem:[%s2206_s18 + $0xb0] sm:$0xff] %v1807_v14   ;;  %v808_v18 = vadd.f32 %v2196_v15, %v807_v16  ;;  %v936_v19 = vadd.f32 %v2196_v15, %v935_v17  ;;  %v809_v20 = vpop.f32.mrb[29].mxu0  ;;  %v937_v21 = vpop.f32.mrb[29].mxu1 }
 0x13b   : > { %v810_v22 = vpop.f32.mrb[30].mxu0  ;;  %v938_v23 = vpop.f32.mrb[30].mxu1 }
 0x13c   : > { %v811_v24 = vadd.f32 %v2196_v15, %v810_v22  ;;  %v939_v25 = vadd.f32 %v2196_v15, %v938_v23  ;;  %v812_v26 = vpop.f32.mrb[31].mxu0  ;;  %v940_v27 = vpop.f32.mrb[31].mxu1  ;;  %v1020_v28 = vmax.f32 %v808_v18, 0.0  ;;  %v1052_v29 = vmax.f32 %v936_v19, 0.0 }
 0x13e   : > { %v1021_v30 = vmax.f32 %v811_v24, 0.0  ;;  %v1053_v31 = vmax.f32 %v939_v25, 0.0 }
 0x140   : > { %v1732_v32 = vpack.c.bf16 %v1021_v30, %v1020_v28  ;;  %v1812_v33 = vpack.c.bf16 %v1053_v31, %v1052_v29 }
 0x141   : > { %v815_v34 = vpop.f32.mrb[32].mxu0  ;;  %v943_v35 = vpop.f32.mrb[32].mxu1 }
 0x142   : > { %1860 = vst [vmem:[%s2206_s18 + $0x38] sm:$0xff] %v1732_v32   ;;  %1876 = vst [vmem:[%s2206_s18 + $0xb8] sm:$0xff] %v1812_v33   ;;  %v816_v36 = vadd.f32 %v2196_v15, %v815_v34  ;;  %v944_v37 = vadd.f32 %v2196_v15, %v943_v35  ;;  %v817_v38 = vpop.f32.mrb[33].mxu0  ;;  %v945_v39 = vpop.f32.mrb[33].mxu1 }
 0x143   : > { %v818_v40 = vpop.f32.mrb[34].mxu0  ;;  %v946_v41 = vpop.f32.mrb[34].mxu1 }
 0x144   : > { %v819_v42 = vadd.f32 %v2196_v15, %v818_v40  ;;  %v947_v43 = vadd.f32 %v2196_v15, %v946_v41  ;;  %v820_v44 = vpop.f32.mrb[35].mxu0  ;;  %v948_v45 = vpop.f32.mrb[35].mxu1  ;;  %v1022_v46 = vmax.f32 %v816_v36, 0.0  ;;  %v1054_v47 = vmax.f32 %v944_v37, 0.0 }
 0x146   : > { %v1023_v48 = vmax.f32 %v819_v42, 0.0  ;;  %v1055_v49 = vmax.f32 %v947_v43, 0.0 }
 0x148   : > { %v1737_v50 = vpack.c.bf16 %v1023_v48, %v1022_v46  ;;  %v1817_v51 = vpack.c.bf16 %v1055_v49, %v1054_v47 }
 0x149   : > { %v823_v52 = vpop.f32.mrb[36].mxu0  ;;  %v951_v53 = vpop.f32.mrb[36].mxu1 }
 0x14a   : > { %1861 = vst [vmem:[%s2206_s18 + $0x40] sm:$0xff] %v1737_v50   ;;  %1877 = vst [vmem:[%s2206_s18 + $0xc0] sm:$0xff] %v1817_v51   ;;  %v824_v54 = vadd.f32 %v2196_v15, %v823_v52  ;;  %v952_v55 = vadd.f32 %v2196_v15, %v951_v53  ;;  %v825_v56 = vpop.f32.mrb[37].mxu0  ;;  %v953_v57 = vpop.f32.mrb[37].mxu1 }
 0x14b   : > { %v826_v58 = vpop.f32.mrb[38].mxu0  ;;  %v954_v59 = vpop.f32.mrb[38].mxu1 }
 0x14c   : > { %v827_v60 = vadd.f32 %v2196_v15, %v826_v58  ;;  %v955_v61 = vadd.f32 %v2196_v15, %v954_v59  ;;  %v828_v62 = vpop.f32.mrb[39].mxu0  ;;  %v956_v63 = vpop.f32.mrb[39].mxu1  ;;  %v1024_v0 = vmax.f32 %v824_v54, 0.0  ;;  %v1056_v1 = vmax.f32 %v952_v55, 0.0 }
 0x14e   : > { %v1025_v2 = vmax.f32 %v827_v60, 0.0  ;;  %v1057_v3 = vmax.f32 %v955_v61, 0.0 }
 0x150   : > { %v1742_v4 = vpack.c.bf16 %v1025_v2, %v1024_v0  ;;  %v1822_v5 = vpack.c.bf16 %v1057_v3, %v1056_v1 }
 0x151   : > { %v831_v6 = vpop.f32.mrb[40].mxu0  ;;  %v959_v7 = vpop.f32.mrb[40].mxu1 }
 0x152   : > { %1862 = vst [vmem:[%s2206_s18 + $0x48] sm:$0xff] %v1742_v4   ;;  %1878 = vst [vmem:[%s2206_s18 + $0xc8] sm:$0xff] %v1822_v5   ;;  %v832_v8 = vadd.f32 %v2196_v15, %v831_v6  ;;  %v960_v9 = vadd.f32 %v2196_v15, %v959_v7  ;;  %v833_v10 = vpop.f32.mrb[41].mxu0  ;;  %v961_v11 = vpop.f32.mrb[41].mxu1 }
 0x153   : > { %v834_v12 = vpop.f32.mrb[42].mxu0  ;;  %v962_v13 = vpop.f32.mrb[42].mxu1 }
 0x154   : > { %v835_v14 = vadd.f32 %v2196_v15, %v834_v12  ;;  %v963_v16 = vadd.f32 %v2196_v15, %v962_v13  ;;  %v836_v17 = vpop.f32.mrb[43].mxu0  ;;  %v964_v18 = vpop.f32.mrb[43].mxu1  ;;  %v1026_v19 = vmax.f32 %v832_v8, 0.0  ;;  %v1058_v20 = vmax.f32 %v960_v9, 0.0 }
 0x156   : > { %v1027_v21 = vmax.f32 %v835_v14, 0.0  ;;  %v1059_v22 = vmax.f32 %v963_v16, 0.0 }
 0x158   : > { %v1747_v23 = vpack.c.bf16 %v1027_v21, %v1026_v19  ;;  %v1827_v24 = vpack.c.bf16 %v1059_v22, %v1058_v20 }
 0x159   : > { %v839_v25 = vpop.f32.mrb[44].mxu0  ;;  %v967_v26 = vpop.f32.mrb[44].mxu1 }
 0x15a   : > { %1863 = vst [vmem:[%s2206_s18 + $0x50] sm:$0xff] %v1747_v23   ;;  %1879 = vst [vmem:[%s2206_s18 + $0xd0] sm:$0xff] %v1827_v24   ;;  %v840_v27 = vadd.f32 %v2196_v15, %v839_v25  ;;  %v968_v28 = vadd.f32 %v2196_v15, %v967_v26  ;;  %v841_v29 = vpop.f32.mrb[45].mxu0  ;;  %v969_v30 = vpop.f32.mrb[45].mxu1 }
 0x15b   : > { %v842_v31 = vpop.f32.mrb[46].mxu0  ;;  %v970_v32 = vpop.f32.mrb[46].mxu1 }
 0x15c   : > { %v843_v33 = vadd.f32 %v2196_v15, %v842_v31  ;;  %v971_v34 = vadd.f32 %v2196_v15, %v970_v32  ;;  %v844_v35 = vpop.f32.mrb[47].mxu0  ;;  %v972_v36 = vpop.f32.mrb[47].mxu1  ;;  %v1028_v37 = vmax.f32 %v840_v27, 0.0  ;;  %v1060_v38 = vmax.f32 %v968_v28, 0.0 }
 0x15e   : > { %v1029_v39 = vmax.f32 %v843_v33, 0.0  ;;  %v1061_v40 = vmax.f32 %v971_v34, 0.0 }
 0x160   : > { %v1752_v41 = vpack.c.bf16 %v1029_v39, %v1028_v37  ;;  %v1832_v42 = vpack.c.bf16 %v1061_v40, %v1060_v38 }
 0x161   : > { %v847_v43 = vpop.f32.mrb[48].mxu0  ;;  %v975_v44 = vpop.f32.mrb[48].mxu1 }
 0x162   : > { %1864 = vst [vmem:[%s2206_s18 + $0x58] sm:$0xff] %v1752_v41   ;;  %1880 = vst [vmem:[%s2206_s18 + $0xd8] sm:$0xff] %v1832_v42   ;;  %v848_v45 = vadd.f32 %v2196_v15, %v847_v43  ;;  %v976_v46 = vadd.f32 %v2196_v15, %v975_v44  ;;  %v849_v47 = vpop.f32.mrb[49].mxu0  ;;  %v977_v48 = vpop.f32.mrb[49].mxu1 }
 0x163   : > { %v850_v49 = vpop.f32.mrb[50].mxu0  ;;  %v978_v50 = vpop.f32.mrb[50].mxu1 }
 0x164   : > { %v851_v51 = vadd.f32 %v2196_v15, %v850_v49  ;;  %v979_v52 = vadd.f32 %v2196_v15, %v978_v50  ;;  %v852_v53 = vpop.f32.mrb[51].mxu0  ;;  %v980_v54 = vpop.f32.mrb[51].mxu1  ;;  %v1030_v55 = vmax.f32 %v848_v45, 0.0  ;;  %v1062_v56 = vmax.f32 %v976_v46, 0.0 }
 0x166   : > { %v1031_v57 = vmax.f32 %v851_v51, 0.0  ;;  %v1063_v58 = vmax.f32 %v979_v52, 0.0 }
 0x168   : > { %v1757_v59 = vpack.c.bf16 %v1031_v57, %v1030_v55  ;;  %v1837_v60 = vpack.c.bf16 %v1063_v58, %v1062_v56 }
 0x169   : > { %v855_v61 = vpop.f32.mrb[52].mxu0  ;;  %v983_v62 = vpop.f32.mrb[52].mxu1 }
 0x16a   : > { %1865 = vst [vmem:[%s2206_s18 + $0x60] sm:$0xff] %v1757_v59   ;;  %1881 = vst [vmem:[%s2206_s18 + $0xe0] sm:$0xff] %v1837_v60   ;;  %v856_v63 = vadd.f32 %v2196_v15, %v855_v61  ;;  %v984_v0 = vadd.f32 %v2196_v15, %v983_v62  ;;  %v857_v1 = vpop.f32.mrb[53].mxu0  ;;  %v985_v2 = vpop.f32.mrb[53].mxu1 }
 0x16b   : > { %v858_v3 = vpop.f32.mrb[54].mxu0  ;;  %v986_v4 = vpop.f32.mrb[54].mxu1 }
 0x16c   : > { %v859_v5 = vadd.f32 %v2196_v15, %v858_v3  ;;  %v987_v6 = vadd.f32 %v2196_v15, %v986_v4  ;;  %v860_v7 = vpop.f32.mrb[55].mxu0  ;;  %v988_v8 = vpop.f32.mrb[55].mxu1  ;;  %v1032_v9 = vmax.f32 %v856_v63, 0.0  ;;  %v1064_v10 = vmax.f32 %v984_v0, 0.0 }
 0x16e   : > { %v1033_v11 = vmax.f32 %v859_v5, 0.0  ;;  %v1065_v12 = vmax.f32 %v987_v6, 0.0 }
 0x170   : > { %v1762_v13 = vpack.c.bf16 %v1033_v11, %v1032_v9  ;;  %v1842_v14 = vpack.c.bf16 %v1065_v12, %v1064_v10 }
 0x171   : > { %v863_v16 = vpop.f32.mrb[56].mxu0  ;;  %v991_v17 = vpop.f32.mrb[56].mxu1 }
 0x172   : > { %1866 = vst [vmem:[%s2206_s18 + $0x68] sm:$0xff] %v1762_v13   ;;  %1882 = vst [vmem:[%s2206_s18 + $0xe8] sm:$0xff] %v1842_v14   ;;  %v864_v18 = vadd.f32 %v2196_v15, %v863_v16  ;;  %v992_v19 = vadd.f32 %v2196_v15, %v991_v17  ;;  %v865_v20 = vpop.f32.mrb[57].mxu0  ;;  %v993_v21 = vpop.f32.mrb[57].mxu1 }
 0x173   : > { %v866_v22 = vpop.f32.mrb[58].mxu0  ;;  %v994_v23 = vpop.f32.mrb[58].mxu1 }
 0x174   : > { %v867_v24 = vadd.f32 %v2196_v15, %v866_v22  ;;  %v995_v25 = vadd.f32 %v2196_v15, %v994_v23  ;;  %v868_v26 = vpop.f32.mrb[59].mxu0  ;;  %v996_v27 = vpop.f32.mrb[59].mxu1  ;;  %v1034_v28 = vmax.f32 %v864_v18, 0.0  ;;  %v1066_v29 = vmax.f32 %v992_v19, 0.0 }
 0x176   : > { %v1035_v30 = vmax.f32 %v867_v24, 0.0  ;;  %v1067_v31 = vmax.f32 %v995_v25, 0.0 }
 0x178   : > { %v1767_v32 = vpack.c.bf16 %v1035_v30, %v1034_v28  ;;  %v1847_v33 = vpack.c.bf16 %v1067_v31, %v1066_v29 }
 0x179   : > { %v871_v34 = vpop.f32.mrb[60].mxu0  ;;  %v999_v35 = vpop.f32.mrb[60].mxu1 }
 0x17a   : > { %1867 = vst [vmem:[%s2206_s18 + $0x70] sm:$0xff] %v1767_v32   ;;  %1883 = vst [vmem:[%s2206_s18 + $0xf0] sm:$0xff] %v1847_v33   ;;  %v872_v36 = vadd.f32 %v2196_v15, %v871_v34  ;;  %v1000_v37 = vadd.f32 %v2196_v15, %v999_v35  ;;  %v873_v38 = vpop.f32.mrb[61].mxu0  ;;  %v1001_v39 = vpop.f32.mrb[61].mxu1 }
 0x17b   : > { %v874_v40 = vpop.f32.mrb[62].mxu0  ;;  %v1002_v41 = vpop.f32.mrb[62].mxu1 }
 0x17c   : > { %v875_v42 = vadd.f32 %v2196_v15, %v874_v40  ;;  %v1003_v43 = vadd.f32 %v2196_v15, %v1002_v41  ;;  %v876_v44 = vpop.f32.mrb[63].mxu0  ;;  %v1004_v45 = vpop.f32.mrb[63].mxu1  ;;  %v1036_v46 = vmax.f32 %v872_v36, 0.0  ;;  %v1068_v47 = vmax.f32 %v1000_v37, 0.0 }
 0x17e   : > { %v1037_v48 = vmax.f32 %v875_v42, 0.0  ;;  %v1069_v49 = vmax.f32 %v1003_v43, 0.0 }
 0x180   : > { %v1772_v50 = vpack.c.bf16 %v1037_v48, %v1036_v46  ;;  %v1852_v51 = vpack.c.bf16 %v1069_v49, %v1068_v47 }
 0x182   : > { %1868 = vst [vmem:[%s2206_s18 + $0x78] sm:$0xff] %v1772_v50   ;;  %1884 = vst [vmem:[%s2206_s18 + $0xf8] sm:$0xff] %v1852_v51  }
 0x183 PF: > { %s13_s12 = sadd.s32 1, %s2027_s12  }
 0x184   : > { %p10_p4 = scmp.ge.s32.totalorder %s13_s12, 13  }
 0x186   :  { %12 = sbr.rel (!%p10_p4) target bundleno = 1 (0x1), region = 62 }

// kernel: _lambda_.13
= control target key start
LH: loop header
LB: loop body
LE: loop exit
PB: predicated region body
PF: predicated region fallthrough
CT: control target
= control target key end

     0   :  { %s2287_s15 = smov 0   ;;  %s2778_s0 = inlined_call_operand.vmem [shape: bf16[5632,72], index: 0, kind: input, shape index: {}]   ;;  %s2779_s1 = inlined_call_operand.vmem [shape: bf16[72,128], index: 1, kind: input, shape index: {}]   ;;  %s2780_s2 = inlined_call_operand.vmem [shape: f32[1,128], index: 2, kind: input, shape index: {}]   ;;  %s2781_s3 = inlined_call_operand.vmem [shape: bf16[5632,128], index: 3, kind: input, shape index: {}]   ;;  %s2782_s4 = inlined_call_operand.vmem [shape: bf16[5632,128], index: 4, kind: output, shape index: {}]  }
   0x1 LB: > { %s1525_s16 = sadd.s32 4294967295, %s2260_s15   ;;  %p1529_p0 = scmp.ge.s32.totalorder %s2260_s15, 1  ;;  %s2260_s15 = sphi %s2287_s15, %s14_s15  }
   0x2   : > { %p174_p1 = scmp.lt.s32.totalorder %s2260_s15, 12 }
   0x4   : > { %p175_p2 = pnand %p1529_p0, %p174_p1 }
   0x5   : > { %v2217_v0 = vld [vmem:[%s2779_s1] sm:$0xff] (!%p175_p2)   ;;  %v2218_v1 = vld [vmem:[%s2779_s1 + $0x8] sm:$0xff] (!%p175_p2)   ;;  %s1530_s21 = sshll.u32 (!%p175_p2), %s1525_s16, 6  ;;  %v2219_v2 = vld [vmem:[%s2779_s1 + $0x10] sm:$0xff] (!%p175_p2)   ;;  %vm491_vm0 = vcmask (!%p175_p2), 588800   ;;  %vm588_vm1 = vcmask (!%p175_p2), 1043456  }
   0x6   : > { %178 = sbr.rel (%p175_p2) target bundleno = 310 (0x136), region = 36  ;;  %2123 = vmatprep.subr.bf16.mxu0 (!%p175_p2), %v2217_v0  ;;  %2197 = vmatprep.subr.bf16.mxu1 (!%p175_p2), %v2217_v0  ;;  %p206_p3 = scmp.lt.s32.totalorder (!%p175_p2), %s1530_s21, 703  ;;  %v2220_v3 = vld [vmem:[%s2779_s1 + $0x18] sm:$0xff] (!%p175_p2)   ;;  %v2221_v6 = vld [vmem:[%s2779_s1 + $0x20] ss:$0 sps:$4 sm:$0xff] (!%p175_p2)  }
   0x7   : > { %2124 = vmatpush3.bf16.msra.mxu0 (!%p175_p2), %v2217_v0  ;;  %2202 = vmatpush3.bf16.msra.mxu1 (!%p175_p2), %v2217_v0  ;;  %v590_v7 = vsel (!%p175_p2), %vm588_vm1, %v2221_v6, 0 }
   0x8   : > { %2125 = vmatprep.subr.bf16.mxu0 (!%p175_p2), %v2218_v1  ;;  %2198 = vmatprep.subr.bf16.mxu1 (!%p175_p2), %v2218_v1 }
   0xb   : > { %2126 = vmatpush3.bf16.msra.mxu0 (!%p175_p2), %v2218_v1  ;;  %2203 = vmatpush3.bf16.msra.mxu1 (!%p175_p2), %v2218_v1 }
   0xc   : > { %2127 = vmatprep.subr.bf16.mxu0 (!%p175_p2), %v2219_v2  ;;  %2199 = vmatprep.subr.bf16.mxu1 (!%p175_p2), %v2219_v2 }
   0xd   : > { %s2797_s21 = smov (!%p206_p3, %s1530_s21), 703 }
   0xe   : > { %s2304_s24 = sshll.u32 %s2797_s21, 2 }
   0xf   : > { %s2313_s29 = scalar_lea.vmem %s2778_s0, %s2304_s24  ;;  %2128 = vmatpush3.bf16.msra.mxu0 %v2219_v2  ;;  %2204 = vmatpush3.bf16.msra.mxu1 %v2219_v2  ;;  %s2386_s8 = scalar_lea.vmem %s2781_s3, %s2304_s24 }
  0x10   : > { %v2222_v4 = vld [vmem:[%s2313_s29] sm:$0xff]   ;;  %2129 = vmatprep.subr.bf16.mxu0 %v2220_v3  ;;  %2200 = vmatprep.subr.bf16.mxu1 %v2220_v3  ;;  %v2224_v8 = vld [vmem:[%s2313_s29 + $0x8] sm:$0xff]   ;;  %v2226_v10 = vld [vmem:[%s2313_s29 + $0x10] sm:$0xff]   ;;  %s2517_s13 = scalar_lea.vmem %s2782_s4, %s2304_s24 }
  0x11   : > { %v2223_v5 = vld [vmem:[%s2313_s29 + $0x80] sm:$0xff]   ;;  %2133 = vmatprep.mubr.msk.bf16.mxu0 %vm491_vm0, %v2222_v4  ;;  %v2225_v9 = vld [vmem:[%s2313_s29 + $0x88] sm:$0xff]   ;;  %v2227_v11 = vld [vmem:[%s2313_s29 + $0x90] sm:$0xff]  }
  0x12   : > { %2165 = vmatprep.mubr.msk.bf16.mxu1 %vm491_vm0, %v2223_v5  ;;  %v2228_v12 = vld [vmem:[%s2313_s29 + $0x18] sm:$0xff]   ;;  %v2230_v14 = vld [vmem:[%s2313_s29 + $0x20] sm:$0xff]   ;;  %v2232_v16 = vld [vmem:[%s2313_s29 + $0x28] sm:$0xff]  }
  0x13   : > { %2130 = vmatpush3.bf16.msra.mxu0 %v2220_v3  ;;  %2205 = vmatpush3.bf16.msra.mxu1 %v2220_v3  ;;  %v2229_v13 = vld [vmem:[%s2313_s29 + $0x98] sm:$0xff]   ;;  %v2231_v15 = vld [vmem:[%s2313_s29 + $0xa0] sm:$0xff]   ;;  %v2233_v17 = vld [vmem:[%s2313_s29 + $0xa8] sm:$0xff]  }
  0x14   : > { %2207 = vmatprep.subr.msk.bf16.mxu0 %vm588_vm1, %v2221_v6  ;;  %2208 = vmatprep.subr.msk.bf16.mxu1 %vm588_vm1, %v2221_v6  ;;  %v2234_v18 = vld [vmem:[%s2313_s29 + $0x30] sm:$0xff]   ;;  %v2236_v20 = vld [vmem:[%s2313_s29 + $0x38] sm:$0xff]   ;;  %v2238_v22 = vld [vmem:[%s2313_s29 + $0x40] sm:$0xff]  }
  0x15   : > { %v2235_v19 = vld [vmem:[%s2313_s29 + $0xb0] sm:$0xff]   ;;  %v2237_v21 = vld [vmem:[%s2313_s29 + $0xb8] sm:$0xff]   ;;  %v2239_v23 = vld [vmem:[%s2313_s29 + $0xc0] sm:$0xff]  }
  0x16   : > { %v2240_v24 = vld [vmem:[%s2313_s29 + $0x48] sm:$0xff]   ;;  %v2242_v26 = vld [vmem:[%s2313_s29 + $0x50] sm:$0xff]   ;;  %v2244_v28 = vld [vmem:[%s2313_s29 + $0x58] sm:$0xff]  }
  0x17   : > { %2132 = vmatpush3.bf16.msra.mxu0 %v590_v7  ;;  %2206 = vmatpush3.bf16.msra.mxu1 %v590_v7  ;;  %v2241_v25 = vld [vmem:[%s2313_s29 + $0xc8] sm:$0xff]   ;;  %v2243_v27 = vld [vmem:[%s2313_s29 + $0xd0] sm:$0xff]   ;;  %v2245_v29 = vld [vmem:[%s2313_s29 + $0xd8] sm:$0xff]  }
  0x18   : > { %v2246_v30 = vld [vmem:[%s2313_s29 + $0x60] sm:$0xff]   ;;  %v2248_v32 = vld [vmem:[%s2313_s29 + $0x68] sm:$0xff]   ;;  %v2250_v34 = vld [vmem:[%s2313_s29 + $0x70] sm:$0xff]  }
  0x19   : > { %v2247_v31 = vld [vmem:[%s2313_s29 + $0xe0] sm:$0xff]   ;;  %v2249_v33 = vld [vmem:[%s2313_s29 + $0xe8] sm:$0xff]   ;;  %v2251_v35 = vld [vmem:[%s2313_s29 + $0xf0] sm:$0xff]  }
  0x1a   : > { %2134 = vmatmul.mubr.msk.bf16.vlgmr.msra.gmra.mrb[0].mxu0 %vm491_vm0, %v2224_v8  ;;  %2166 = vmatmul.mubr.msk.bf16.vlgmr.msra.gmra.mrb[0].mxu1 %vm491_vm0, %v2225_v9  ;;  %v2252_v36 = vld [vmem:[%s2313_s29 + $0x78] sm:$0xff]   ;;  %v2389_v38 = vld [vmem:[%s2386_s8 + $0x8] sm:$0xff]   ;;  %v2395_v40 = vld [vmem:[%s2386_s8] sm:$0xff]  }
  0x1b   : > { %2137 = vmatprep.mubr.msk.bf16.mxu0 %vm491_vm0, %v2226_v10  ;;  %2169 = vmatprep.mubr.msk.bf16.mxu1 %vm491_vm0, %v2227_v11  ;;  %v2253_v37 = vld [vmem:[%s2313_s29 + $0xf8] sm:$0xff]   ;;  %v2392_v39 = vld [vmem:[%s2386_s8 + $0x88] sm:$0xff]   ;;  %v2398_v41 = vld [vmem:[%s2386_s8 + $0x80] sm:$0xff]   ;;  %v1742_v46 = vunpack.c.l.bf16 %v2389_v38  ;;  %v1738_v48 = vunpack.c.l.bf16 %v2395_v40  ;;  %v1743_v51 = vunpack.c.h.bf16 %v2389_v38  ;;  %v1739_v53 = vunpack.c.h.bf16 %v2395_v40 }
  0x1c   : > { %v2401_v42 = vld [vmem:[%s2386_s8 + $0x18] sm:$0xff]   ;;  %v2407_v44 = vld [vmem:[%s2386_s8 + $0x10] sm:$0xff]   ;;  %v1806_v47 = vunpack.c.l.bf16 %v2392_v39  ;;  %v1802_v49 = vunpack.c.l.bf16 %v2398_v41  ;;  %v2417_v50 = vld [vmem:[%s2386_s8 + $0x28] sm:$0xff]   ;;  %v1807_v52 = vunpack.c.h.bf16 %v2392_v39  ;;  %v1803_v54 = vunpack.c.h.bf16 %v2398_v41 }
  0x1d   : > { %v2404_v43 = vld [vmem:[%s2386_s8 + $0x98] sm:$0xff]   ;;  %v2410_v45 = vld [vmem:[%s2386_s8 + $0x90] sm:$0xff]   ;;  %v2424_v55 = vld [vmem:[%s2386_s8 + $0xa8] sm:$0xff]   ;;  %v1750_v58 = vunpack.c.l.bf16 %v2401_v42  ;;  %v1746_v60 = vunpack.c.l.bf16 %v2407_v44  ;;  %v1751_v63 = vunpack.c.h.bf16 %v2401_v42  ;;  %v1747_v1 = vunpack.c.h.bf16 %v2407_v44 }
  0x1e   : > { %v2427_v56 = vld [vmem:[%s2386_s8 + $0x20] sm:$0xff]   ;;  %v1814_v59 = vunpack.c.l.bf16 %v2404_v43  ;;  %v1810_v61 = vunpack.c.l.bf16 %v2410_v45  ;;  %v2437_v62 = vld [vmem:[%s2386_s8 + $0x38] sm:$0xff]   ;;  %v1815_v0 = vunpack.c.h.bf16 %v2404_v43  ;;  %v1811_v2 = vunpack.c.h.bf16 %v2410_v45  ;;  %v2447_v4 = vld [vmem:[%s2386_s8 + $0x30] sm:$0xff]  }
  0x1f   : > { %v2430_v57 = vld [vmem:[%s2386_s8 + $0xa0] sm:$0xff]   ;;  %v2444_v3 = vld [vmem:[%s2386_s8 + $0xb8] sm:$0xff]   ;;  %v2450_v5 = vld [vmem:[%s2386_s8 + $0xb0] sm:$0xff]   ;;  %v1758_v6 = vunpack.c.l.bf16 %v2417_v50  ;;  %v1822_v7 = vunpack.c.l.bf16 %v2424_v55  ;;  %v1754_v8 = vunpack.c.l.bf16 %v2427_v56  ;;  %v1759_v11 = vunpack.c.h.bf16 %v2417_v50 }
  0x20   : > { %v1818_v9 = vunpack.c.l.bf16 %v2430_v57  ;;  %v2459_v10 = vld [vmem:[%s2780_s2] ss:$0 sm:$0xff] }
  0x22   : > { %2138 = vmatmul.mubr.msk.bf16.gmra.mrb[4].mxu0 %vm491_vm0, %v2228_v12  ;;  %2170 = vmatmul.mubr.msk.bf16.gmra.mrb[4].mxu1 %vm491_vm0, %v2229_v13  ;;  %v1823_v12 = vunpack.c.h.bf16 %v2424_v55  ;;  %v1755_v13 = vunpack.c.h.bf16 %v2427_v56 }
  0x23   : > { %2141 = vmatprep.mubr.msk.bf16.mxu0 %vm491_vm0, %v2230_v14  ;;  %2173 = vmatprep.mubr.msk.bf16.mxu1 %vm491_vm0, %v2231_v15  ;;  %v2466_v15 = vld [vmem:[%s2386_s8 + $0x48] sm:$0xff]  }
  0x2a   : > { %2142 = vmatmul.mubr.msk.bf16.gmra.mrb[8].mxu0 %vm491_vm0, %v2232_v16  ;;  %2174 = vmatmul.mubr.msk.bf16.gmra.mrb[8].mxu1 %vm491_vm0, %v2233_v17  ;;  %v2469_v16 = vld [vmem:[%s2386_s8 + $0xc8] sm:$0xff]  }
  0x2b   : > { %2145 = vmatprep.mubr.msk.bf16.mxu0 %vm491_vm0, %v2234_v18  ;;  %2177 = vmatprep.mubr.msk.bf16.mxu1 %vm491_vm0, %v2235_v19 }
  0x32   : > { %2146 = vmatmul.mubr.msk.bf16.gmra.mrb[12].mxu0 %vm491_vm0, %v2236_v20  ;;  %2178 = vmatmul.mubr.msk.bf16.gmra.mrb[12].mxu1 %vm491_vm0, %v2237_v21  ;;  %v2476_v21 = vld [vmem:[%s2386_s8 + $0x40] sm:$0xff]  }
  0x33   : > { %2149 = vmatprep.mubr.msk.bf16.mxu0 %vm491_vm0, %v2238_v22  ;;  %2181 = vmatprep.mubr.msk.bf16.mxu1 %vm491_vm0, %v2239_v23  ;;  %v2479_v22 = vld [vmem:[%s2386_s8 + $0xc0] sm:$0xff]  }
  0x3a   : > { %2150 = vmatmul.mubr.msk.bf16.gmra.mrb[16].mxu0 %vm491_vm0, %v2240_v24  ;;  %2182 = vmatmul.mubr.msk.bf16.gmra.mrb[16].mxu1 %vm491_vm0, %v2241_v25 }
  0x3b   : > { %2153 = vmatprep.mubr.msk.bf16.mxu0 %vm491_vm0, %v2242_v26  ;;  %2185 = vmatprep.mubr.msk.bf16.mxu1 %vm491_vm0, %v2243_v27  ;;  %v1775_v27 = vunpack.c.h.bf16 %v2466_v15 }
  0x42   : > { %2154 = vmatmul.mubr.msk.bf16.gmra.mrb[20].mxu0 %vm491_vm0, %v2244_v28  ;;  %2186 = vmatmul.mubr.msk.bf16.gmra.mrb[20].mxu1 %vm491_vm0, %v2245_v29 }
  0x43   : > { %2157 = vmatprep.mubr.msk.bf16.mxu0 %vm491_vm0, %v2246_v30  ;;  %2189 = vmatprep.mubr.msk.bf16.mxu1 %vm491_vm0, %v2247_v31 }
  0x4a   : > { %2158 = vmatmul.mubr.msk.bf16.gmra.mrb[24].mxu0 %vm491_vm0, %v2248_v32  ;;  %2190 = vmatmul.mubr.msk.bf16.gmra.mrb[24].mxu1 %vm491_vm0, %v2249_v33 }
  0x4b   : > { %2161 = vmatprep.mubr.msk.bf16.mxu0 %vm491_vm0, %v2250_v34  ;;  %2193 = vmatprep.mubr.msk.bf16.mxu1 %vm491_vm0, %v2251_v35 }
  0x52   : > { %2162 = vmatmul.mubr.msk.bf16.gmra.mrb[28].mxu0 %vm491_vm0, %v2252_v36  ;;  %2194 = vmatmul.mubr.msk.bf16.gmra.mrb[28].mxu1 %vm491_vm0, %v2253_v37 }
  0xed   : > { %v2135_v23 = vpop.f32.mrb[0].mxu0  ;;  %v2167_v24 = vpop.f32.mrb[0].mxu1 }
  0xee   : > { %v635_v29 = vadd.f32 %v2135_v23, %v2459_v10  ;;  %v763_v30 = vadd.f32 %v2167_v24, %v2459_v10  ;;  %v626_v31 = vpop.f32.mrb[1].mxu0  ;;  %v754_v32 = vpop.f32.mrb[1].mxu1 }
  0xef   : > { %v627_v35 = vadd.f32 %v2459_v10, %v626_v31  ;;  %v755_v36 = vadd.f32 %v2459_v10, %v754_v32  ;;  %v2136_v37 = vpop.f32.mrb[2].mxu0  ;;  %v2168_v20 = vpop.f32.mrb[2].mxu1 }
  0xf0   : > { %v883_v19 = vmax.f32 %v635_v29, 0.0  ;;  %v915_v23 = vmax.f32 %v763_v30, 0.0  ;;  %v638_v24 = vadd.f32 %v2136_v37, %v2459_v10  ;;  %v766_v26 = vadd.f32 %v2168_v20, %v2459_v10  ;;  %v629_v25 = vpop.f32.mrb[3].mxu0  ;;  %v757_v33 = vpop.f32.mrb[3].mxu1 }
  0xf1   : > { %v881_v18 = vmax.f32 %v627_v35, 0.0  ;;  %v913_v34 = vmax.f32 %v755_v36, 0.0  ;;  %v630_v31 = vadd.f32 %v2459_v10, %v629_v25  ;;  %v758_v32 = vadd.f32 %v2459_v10, %v757_v33 }
  0xf2   : > { %v884_v17 = vmax.f32 %v638_v24, 0.0  ;;  %v916_v14 = vmax.f32 %v766_v26, 0.0  ;;  %v1839_v29 = vunpack.c.h.bf16 %v2469_v16  ;;  %v1771_v37 = vunpack.c.h.bf16 %v2476_v21 }
  0xf3   : > { %v882_v30 = vmax.f32 %v630_v31, 0.0  ;;  %v914_v28 = vmax.f32 %v758_v32, 0.0  ;;  %v1835_v20 = vunpack.c.h.bf16 %v2479_v22  ;;  %v1075_v35 = vadd.f32 %v1742_v46, %v883_v19 }
  0xf4   : > { %v1107_v25 = vadd.f32 %v1806_v47, %v915_v23  ;;  %v1076_v33 = vadd.f32 %v1743_v51, %v884_v17  ;;  %v1108_v26 = vadd.f32 %v1807_v52, %v916_v14  ;;  %v1073_v36 = vadd.f32 %v1738_v48, %v881_v18 }
  0xf5   : > { %v1105_v24 = vadd.f32 %v1802_v49, %v913_v34  ;;  %v1074_v46 = vadd.f32 %v1739_v53, %v882_v30  ;;  %v1106_v38 = vadd.f32 %v1803_v54, %v914_v28  ;;  %v2139_v39 = vpop.f32.mrb[4].mxu0  ;;  %v2171_v47 = vpop.f32.mrb[4].mxu1  ;;  %v2528_v28 = vld [vmem:[%s2386_s8 + $0x58] sm:$0xff]  }
  0xf6   : > { %v1872_v48 = vpack.c.bf16 %v1076_v33, %v1075_v35  ;;  %v1952_v51 = vpack.c.bf16 %v1108_v26, %v1107_v25  ;;  %v651_v49 = vadd.f32 %v2139_v39, %v2459_v10  ;;  %v779_v52 = vadd.f32 %v2171_v47, %v2459_v10  ;;  %v642_v14 = vpop.f32.mrb[5].mxu0  ;;  %v770_v17 = vpop.f32.mrb[5].mxu1  ;;  %v2531_v34 = vld [vmem:[%s2386_s8 + $0xd8] sm:$0xff]   ;;  %v2538_v33 = vld [vmem:[%s2386_s8 + $0x50] sm:$0xff]  }
  0xf7   : > { %v1867_v18 = vpack.c.bf16 %v1074_v46, %v1073_v36  ;;  %v1947_v40 = vpack.c.bf16 %v1106_v38, %v1105_v24  ;;  %v643_v41 = vadd.f32 %v2459_v10, %v642_v14  ;;  %v771_v53 = vadd.f32 %v2459_v10, %v770_v17  ;;  %v2140_v54 = vpop.f32.mrb[6].mxu0  ;;  %v2172_v19 = vpop.f32.mrb[6].mxu1  ;;  %v2541_v26 = vld [vmem:[%s2386_s8 + $0xd0] sm:$0xff]  }
  0xf8   : > { %2055 = vst [vmem:[%s2517_s13 + $0x8] sm:$0xff] %v1872_v48   ;;  %2071 = vst [vmem:[%s2517_s13 + $0x88] sm:$0xff] %v1952_v51   ;;  %v887_v23 = vmax.f32 %v651_v49, 0.0  ;;  %v919_v31 = vmax.f32 %v779_v52, 0.0  ;;  %v654_v32 = vadd.f32 %v2140_v54, %v2459_v10  ;;  %v782_v30 = vadd.f32 %v2172_v19, %v2459_v10  ;;  %v645_v35 = vpop.f32.mrb[7].mxu0  ;;  %v773_v25 = vpop.f32.mrb[7].mxu1 }
  0xf9   : > { %1868 = vst [vmem:[%s2517_s13] sm:$0xff] %v1867_v18   ;;  %2070 = vst [vmem:[%s2517_s13 + $0x80] sm:$0xff] %v1947_v40   ;;  %v885_v36 = vmax.f32 %v643_v41, 0.0  ;;  %v917_v24 = vmax.f32 %v771_v53, 0.0  ;;  %v646_v46 = vadd.f32 %v2459_v10, %v645_v35  ;;  %v774_v38 = vadd.f32 %v2459_v10, %v773_v25 }
  0xfa   : > { %v888_v39 = vmax.f32 %v654_v32, 0.0  ;;  %v920_v47 = vmax.f32 %v782_v30, 0.0  ;;  %v1782_v48 = vunpack.c.l.bf16 %v2528_v28  ;;  %v1846_v51 = vunpack.c.l.bf16 %v2531_v34 }
  0xfb   : > { %v886_v49 = vmax.f32 %v646_v46, 0.0  ;;  %v918_v52 = vmax.f32 %v774_v38, 0.0  ;;  %v1778_v14 = vunpack.c.l.bf16 %v2538_v33  ;;  %v1842_v17 = vunpack.c.l.bf16 %v2541_v26 }
  0xfc   : > { %v1079_v18 = vadd.f32 %v1750_v58, %v887_v23  ;;  %v1111_v40 = vadd.f32 %v1814_v59, %v919_v31  ;;  %v1080_v41 = vadd.f32 %v1751_v63, %v888_v39  ;;  %v1112_v53 = vadd.f32 %v1815_v0, %v920_v47 }
  0xfd   : > { %v1077_v54 = vadd.f32 %v1746_v60, %v885_v36  ;;  %v1109_v19 = vadd.f32 %v1810_v61, %v917_v24  ;;  %v1078_v32 = vadd.f32 %v1747_v1, %v886_v49  ;;  %v1110_v58 = vadd.f32 %v1811_v2, %v918_v52  ;;  %v2143_v59 = vpop.f32.mrb[8].mxu0  ;;  %v2175_v42 = vpop.f32.mrb[8].mxu1 }
  0xfe   : > { %v1882_v63 = vpack.c.bf16 %v1080_v41, %v1079_v18  ;;  %v1962_v23 = vpack.c.bf16 %v1112_v53, %v1111_v40  ;;  %v667_v43 = vadd.f32 %v2143_v59, %v2459_v10  ;;  %v795_v0 = vadd.f32 %v2175_v42, %v2459_v10  ;;  %v658_v60 = vpop.f32.mrb[9].mxu0  ;;  %v786_v31 = vpop.f32.mrb[9].mxu1 }
  0xff   : > { %v1877_v61 = vpack.c.bf16 %v1078_v32, %v1077_v54  ;;  %v1957_v44 = vpack.c.bf16 %v1110_v58, %v1109_v19  ;;  %v659_v1 = vadd.f32 %v2459_v10, %v658_v60  ;;  %v787_v45 = vadd.f32 %v2459_v10, %v786_v31  ;;  %v2144_v2 = vpop.f32.mrb[10].mxu0  ;;  %v2176_v30 = vpop.f32.mrb[10].mxu1 }
 0x100   : > { %2057 = vst [vmem:[%s2517_s13 + $0x18] sm:$0xff] %v1882_v63   ;;  %2073 = vst [vmem:[%s2517_s13 + $0x98] sm:$0xff] %v1962_v23   ;;  %v891_v35 = vmax.f32 %v667_v43, 0.0  ;;  %v923_v25 = vmax.f32 %v795_v0, 0.0  ;;  %v670_v36 = vadd.f32 %v2144_v2, %v2459_v10  ;;  %v798_v24 = vadd.f32 %v2176_v30, %v2459_v10  ;;  %v661_v46 = vpop.f32.mrb[11].mxu0  ;;  %v789_v38 = vpop.f32.mrb[11].mxu1 }
 0x101   : > { %2056 = vst [vmem:[%s2517_s13 + $0x10] sm:$0xff] %v1877_v61   ;;  %2072 = vst [vmem:[%s2517_s13 + $0x90] sm:$0xff] %v1957_v44   ;;  %v889_v39 = vmax.f32 %v659_v1, 0.0  ;;  %v921_v47 = vmax.f32 %v787_v45, 0.0  ;;  %v662_v49 = vadd.f32 %v2459_v10, %v661_v46  ;;  %v790_v52 = vadd.f32 %v2459_v10, %v789_v38  ;;  %v2604_v2 = vld [vmem:[%s2386_s8 + $0x68] sm:$0xff]  }
 0x102   : > { %v892_v18 = vmax.f32 %v670_v36, 0.0  ;;  %v924_v40 = vmax.f32 %v798_v24, 0.0  ;;  %v1783_v41 = vunpack.c.h.bf16 %v2528_v28  ;;  %v1847_v53 = vunpack.c.h.bf16 %v2531_v34  ;;  %v2607_v30 = vld [vmem:[%s2386_s8 + $0xe8] sm:$0xff]  }
 0x103   : > { %v890_v54 = vmax.f32 %v662_v49, 0.0  ;;  %v922_v19 = vmax.f32 %v790_v52, 0.0  ;;  %v1779_v32 = vunpack.c.h.bf16 %v2538_v33  ;;  %v1843_v58 = vunpack.c.h.bf16 %v2541_v26 }
 0x104   : > { %v1083_v59 = vadd.f32 %v1758_v6, %v891_v35  ;;  %v1115_v42 = vadd.f32 %v1822_v7, %v923_v25  ;;  %v1084_v63 = vadd.f32 %v1759_v11, %v892_v18  ;;  %v1116_v23 = vadd.f32 %v1823_v12, %v924_v40 }
 0x105   : > { %v1081_v43 = vadd.f32 %v1754_v8, %v889_v39  ;;  %v1113_v0 = vadd.f32 %v1818_v9, %v921_v47  ;;  %v1082_v60 = vadd.f32 %v1755_v13, %v890_v54  ;;  %v2783_v6 = vunpack.c.h.bf16 %v2430_v57  ;;  %v2147_v7 = vpop.f32.mrb[12].mxu0  ;;  %v2179_v50 = vpop.f32.mrb[12].mxu1  ;;  %v2614_v39 = vld [vmem:[%s2386_s8 + $0x60] sm:$0xff]  }
 0x106   : > { %v1892_v55 = vpack.c.bf16 %v1084_v63, %v1083_v59  ;;  %v1972_v11 = vpack.c.bf16 %v1116_v23, %v1115_v42  ;;  %v683_v12 = vadd.f32 %v2147_v7, %v2459_v10  ;;  %v811_v8 = vadd.f32 %v2179_v50, %v2459_v10  ;;  %v674_v61 = vpop.f32.mrb[13].mxu0  ;;  %v802_v9 = vpop.f32.mrb[13].mxu1  ;;  %v2617_v47 = vld [vmem:[%s2386_s8 + $0xe0] sm:$0xff]  }
 0x107   : > { %v1114_v31 = vadd.f32 %v2783_v6, %v922_v19  ;;  %v1887_v44 = vpack.c.bf16 %v1082_v60, %v1081_v43  ;;  %v675_v57 = vadd.f32 %v2459_v10, %v674_v61  ;;  %v803_v13 = vadd.f32 %v2459_v10, %v802_v9  ;;  %v2148_v1 = vpop.f32.mrb[14].mxu0  ;;  %v2180_v45 = vpop.f32.mrb[14].mxu1 }
 0x108   : > { %2059 = vst [vmem:[%s2517_s13 + $0x28] sm:$0xff] %v1892_v55   ;;  %2075 = vst [vmem:[%s2517_s13 + $0xa8] sm:$0xff] %v1972_v11   ;;  %v895_v35 = vmax.f32 %v683_v12, 0.0  ;;  %v927_v25 = vmax.f32 %v811_v8, 0.0  ;;  %v686_v36 = vadd.f32 %v2148_v1, %v2459_v10  ;;  %v814_v24 = vadd.f32 %v2180_v45, %v2459_v10  ;;  %v677_v46 = vpop.f32.mrb[15].mxu0  ;;  %v805_v38 = vpop.f32.mrb[15].mxu1 }
 0x109   : > { %v1967_v56 = vpack.c.bf16 %v1114_v31, %v1113_v0  ;;  %2058 = vst [vmem:[%s2517_s13 + $0x20] sm:$0xff] %v1887_v44   ;;  %v893_v49 = vmax.f32 %v675_v57, 0.0  ;;  %v925_v52 = vmax.f32 %v803_v13, 0.0  ;;  %v678_v18 = vadd.f32 %v2459_v10, %v677_v46 }
 0x10a   : > { %v806_v40 = vadd.f32 %v2459_v10, %v805_v38  ;;  %v896_v54 = vmax.f32 %v686_v36, 0.0  ;;  %v928_v19 = vmax.f32 %v814_v24, 0.0  ;;  %v1790_v59 = vunpack.c.l.bf16 %v2604_v2 }
 0x10b   : > { %2074 = vst [vmem:[%s2517_s13 + $0xa0] sm:$0xff] %v1967_v56   ;;  %v1854_v42 = vunpack.c.l.bf16 %v2607_v30  ;;  %v894_v63 = vmax.f32 %v678_v18, 0.0  ;;  %v1786_v43 = vunpack.c.l.bf16 %v2614_v39  ;;  %v1850_v0 = vunpack.c.l.bf16 %v2617_v47 }
 0x10c   : > { %v926_v23 = vmax.f32 %v806_v40, 0.0  ;;  %v2784_v60 = vunpack.c.l.bf16 %v2437_v62  ;;  %v2785_v31 = vunpack.c.l.bf16 %v2444_v3  ;;  %v2786_v50 = vunpack.c.h.bf16 %v2437_v62 }
 0x10d   : > { %v2787_v11 = vunpack.c.h.bf16 %v2444_v3  ;;  %v2788_v8 = vunpack.c.l.bf16 %v2447_v4  ;;  %v2789_v9 = vunpack.c.l.bf16 %v2450_v5  ;;  %v2790_v56 = vunpack.c.h.bf16 %v2447_v4  ;;  %v2151_v45 = vpop.f32.mrb[16].mxu0  ;;  %v2183_v62 = vpop.f32.mrb[16].mxu1 }
 0x10e   : > { %v1087_v6 = vadd.f32 %v2784_v60, %v895_v35  ;;  %v1119_v7 = vadd.f32 %v2785_v31, %v927_v25  ;;  %v1088_v55 = vadd.f32 %v2786_v50, %v896_v54  ;;  %v2791_v13 = vunpack.c.h.bf16 %v2450_v5  ;;  %v690_v24 = vpop.f32.mrb[17].mxu0  ;;  %v818_v46 = vpop.f32.mrb[17].mxu1 }
 0x10f   : > { %v1120_v12 = vadd.f32 %v2787_v11, %v928_v19  ;;  %v1085_v61 = vadd.f32 %v2788_v8, %v893_v49  ;;  %v1117_v44 = vadd.f32 %v2789_v9, %v925_v52  ;;  %v1086_v57 = vadd.f32 %v2790_v56, %v894_v63  ;;  %v2152_v52 = vpop.f32.mrb[18].mxu0  ;;  %v2184_v18 = vpop.f32.mrb[18].mxu1 }
 0x110   : > { %v1118_v1 = vadd.f32 %v2791_v13, %v926_v23  ;;  %v1902_v35 = vpack.c.bf16 %v1088_v55, %v1087_v6  ;;  %v699_v3 = vadd.f32 %v2151_v45, %v2459_v10  ;;  %v827_v36 = vadd.f32 %v2183_v62, %v2459_v10  ;;  %v693_v23 = vpop.f32.mrb[19].mxu0  ;;  %v821_v60 = vpop.f32.mrb[19].mxu1 }
 0x111   : > { %v1982_v25 = vpack.c.bf16 %v1120_v12, %v1119_v7  ;;  %v1897_v38 = vpack.c.bf16 %v1086_v57, %v1085_v61  ;;  %v691_v49 = vadd.f32 %v2459_v10, %v690_v24  ;;  %v819_v5 = vadd.f32 %v2459_v10, %v818_v46 }
 0x112   : > { %v1977_v4 = vpack.c.bf16 %v1118_v1, %v1117_v44  ;;  %2061 = vst [vmem:[%s2517_s13 + $0x38] sm:$0xff] %v1902_v35   ;;  %v899_v40 = vmax.f32 %v699_v3, 0.0  ;;  %v931_v54 = vmax.f32 %v827_v36, 0.0  ;;  %v702_v19 = vadd.f32 %v2152_v52, %v2459_v10 }
 0x113   : > { %2077 = vst [vmem:[%s2517_s13 + $0xb8] sm:$0xff] %v1982_v25   ;;  %v830_v63 = vadd.f32 %v2184_v18, %v2459_v10  ;;  %2060 = vst [vmem:[%s2517_s13 + $0x30] sm:$0xff] %v1897_v38   ;;  %v897_v6 = vmax.f32 %v691_v49, 0.0  ;;  %v929_v31 = vmax.f32 %v819_v5, 0.0  ;;  %v694_v7 = vadd.f32 %v2459_v10, %v693_v23 }
 0x114   : > { %2076 = vst [vmem:[%s2517_s13 + $0xb0] sm:$0xff] %v1977_v4   ;;  %v822_v50 = vadd.f32 %v2459_v10, %v821_v60  ;;  %v900_v55 = vmax.f32 %v702_v19, 0.0  ;;  %v1791_v12 = vunpack.c.h.bf16 %v2604_v2  ;;  %v1855_v8 = vunpack.c.h.bf16 %v2607_v30  ;;  %v2683_v19 = vld [vmem:[%s2386_s8 + $0xf8] sm:$0xff]  }
 0x115   : > { %v932_v11 = vmax.f32 %v830_v63, 0.0  ;;  %v898_v61 = vmax.f32 %v694_v7, 0.0  ;;  %v1787_v44 = vunpack.c.h.bf16 %v2614_v39  ;;  %v1851_v56 = vunpack.c.h.bf16 %v2617_v47  ;;  %v2155_v4 = vpop.f32.mrb[20].mxu0 }
 0x116   : > { %v930_v9 = vmax.f32 %v822_v50, 0.0  ;;  %v2792_v57 = vunpack.c.l.bf16 %v2466_v15  ;;  %v2793_v1 = vunpack.c.l.bf16 %v2469_v16  ;;  %v1092_v62 = vadd.f32 %v1775_v27, %v900_v55  ;;  %v2187_v15 = vpop.f32.mrb[20].mxu1  ;;  %v706_v5 = vpop.f32.mrb[21].mxu0  ;;  %v2690_v50 = vld [vmem:[%s2386_s8 + $0x70] sm:$0xff]  }
 0x117   : > { %v1124_v35 = vadd.f32 %v1839_v29, %v932_v11  ;;  %v2794_v25 = vunpack.c.l.bf16 %v2476_v21  ;;  %v2795_v36 = vunpack.c.l.bf16 %v2479_v22  ;;  %v1090_v46 = vadd.f32 %v1771_v37, %v898_v61  ;;  %v834_v52 = vpop.f32.mrb[21].mxu1  ;;  %v2693_v55 = vld [vmem:[%s2386_s8 + $0xf0] sm:$0xff]  }
 0x118   : > { %v1091_v13 = vadd.f32 %v2792_v57, %v899_v40  ;;  %v1123_v45 = vadd.f32 %v2793_v1, %v931_v54  ;;  %v1122_v38 = vadd.f32 %v1835_v20, %v930_v9  ;;  %v715_v29 = vadd.f32 %v2155_v4, %v2459_v10  ;;  %v2156_v20 = vpop.f32.mrb[22].mxu0  ;;  %v2188_v40 = vpop.f32.mrb[22].mxu1  ;;  %v2680_v54 = vld [vmem:[%s2386_s8 + $0x78] sm:$0xff]  }
 0x119   : > { %v1089_v3 = vadd.f32 %v2794_v25, %v897_v6  ;;  %v1121_v24 = vadd.f32 %v2795_v36, %v929_v31  ;;  %v843_v49 = vadd.f32 %v2187_v15, %v2459_v10  ;;  %v707_v22 = vadd.f32 %v2459_v10, %v706_v5  ;;  %v709_v31 = vpop.f32.mrb[23].mxu0  ;;  %v837_v7 = vpop.f32.mrb[23].mxu1 }
 0x11a   : > { %v1912_v16 = vpack.c.bf16 %v1092_v62, %v1091_v13  ;;  %v1992_v27 = vpack.c.bf16 %v1124_v35, %v1123_v45  ;;  %v835_v37 = vadd.f32 %v2459_v10, %v834_v52  ;;  %v903_v63 = vmax.f32 %v715_v29, 0.0 }
 0x11b   : > { %v1907_v18 = vpack.c.bf16 %v1090_v46, %v1089_v3  ;;  %v1987_v21 = vpack.c.bf16 %v1122_v38, %v1121_v24  ;;  %v935_v23 = vmax.f32 %v843_v49, 0.0  ;;  %v718_v60 = vadd.f32 %v2156_v20, %v2459_v10 }
 0x11c   : > { %2063 = vst [vmem:[%s2517_s13 + $0x48] sm:$0xff] %v1912_v16   ;;  %2079 = vst [vmem:[%s2517_s13 + $0xc8] sm:$0xff] %v1992_v27   ;;  %v846_v6 = vadd.f32 %v2188_v40, %v2459_v10  ;;  %v901_v11 = vmax.f32 %v707_v22, 0.0  ;;  %v933_v61 = vmax.f32 %v835_v37, 0.0  ;;  %v710_v9 = vadd.f32 %v2459_v10, %v709_v31 }
 0x11d   : > { %2062 = vst [vmem:[%s2517_s13 + $0x40] sm:$0xff] %v1907_v18   ;;  %2078 = vst [vmem:[%s2517_s13 + $0xc0] sm:$0xff] %v1987_v21   ;;  %v838_v57 = vadd.f32 %v2459_v10, %v837_v7  ;;  %v904_v13 = vmax.f32 %v718_v60, 0.0  ;;  %v1798_v45 = vunpack.c.l.bf16 %v2680_v54  ;;  %v1862_v62 = vunpack.c.l.bf16 %v2683_v19  ;;  %v2191_v28 = vpop.f32.mrb[24].mxu1 }
 0x11e   : > { %v936_v1 = vmax.f32 %v846_v6, 0.0  ;;  %v902_v35 = vmax.f32 %v710_v9, 0.0  ;;  %v1794_v3 = vunpack.c.l.bf16 %v2690_v50  ;;  %v1858_v36 = vunpack.c.l.bf16 %v2693_v55  ;;  %v850_v49 = vpop.f32.mrb[25].mxu1 }
 0x11f   : > { %v934_v25 = vmax.f32 %v838_v57, 0.0  ;;  %v1095_v24 = vadd.f32 %v1782_v48, %v903_v63  ;;  %v1127_v46 = vadd.f32 %v1846_v51, %v935_v23  ;;  %v1096_v38 = vadd.f32 %v1783_v41, %v904_v13  ;;  %v2159_v51 = vpop.f32.mrb[24].mxu0  ;;  %v2192_v5 = vpop.f32.mrb[26].mxu1 }
 0x120   : > { %v1128_v4 = vadd.f32 %v1847_v53, %v936_v1  ;;  %v1093_v15 = vadd.f32 %v1778_v14, %v901_v11  ;;  %v1125_v16 = vadd.f32 %v1842_v17, %v933_v61  ;;  %v1094_v27 = vadd.f32 %v1779_v32, %v902_v35  ;;  %v722_v14 = vpop.f32.mrb[25].mxu0  ;;  %v853_v20 = vpop.f32.mrb[27].mxu1 }
 0x121   : > { %v1126_v48 = vadd.f32 %v1843_v58, %v934_v25  ;;  %v1922_v41 = vpack.c.bf16 %v1096_v38, %v1095_v24  ;;  %v731_v34 = vadd.f32 %v2159_v51, %v2459_v10  ;;  %v859_v53 = vadd.f32 %v2191_v28, %v2459_v10  ;;  %v2160_v58 = vpop.f32.mrb[26].mxu0 }
 0x122   : > { %v2002_v29 = vpack.c.bf16 %v1128_v4, %v1127_v46  ;;  %v1917_v17 = vpack.c.bf16 %v1094_v27, %v1093_v15  ;;  %v723_v32 = vadd.f32 %v2459_v10, %v722_v14  ;;  %v851_v26 = vadd.f32 %v2459_v10, %v850_v49  ;;  %v725_v37 = vpop.f32.mrb[27].mxu0 }
 0x123   : > { %v1997_v33 = vpack.c.bf16 %v1126_v48, %v1125_v16  ;;  %2065 = vst [vmem:[%s2517_s13 + $0x58] sm:$0xff] %v1922_v41   ;;  %v907_v52 = vmax.f32 %v731_v34, 0.0  ;;  %v939_v18 = vmax.f32 %v859_v53, 0.0  ;;  %v734_v21 = vadd.f32 %v2160_v58, %v2459_v10 }
 0x124   : > { %2081 = vst [vmem:[%s2517_s13 + $0xd8] sm:$0xff] %v2002_v29   ;;  %v862_v22 = vadd.f32 %v2192_v5, %v2459_v10  ;;  %2064 = vst [vmem:[%s2517_s13 + $0x50] sm:$0xff] %v1917_v17   ;;  %v905_v40 = vmax.f32 %v723_v32, 0.0  ;;  %v937_v63 = vmax.f32 %v851_v26, 0.0  ;;  %v726_v23 = vadd.f32 %v2459_v10, %v725_v37 }
 0x125   : > { %2080 = vst [vmem:[%s2517_s13 + $0xd0] sm:$0xff] %v1997_v33   ;;  %v854_v60 = vadd.f32 %v2459_v10, %v853_v20  ;;  %v908_v6 = vmax.f32 %v734_v21, 0.0  ;;  %v1799_v7 = vunpack.c.h.bf16 %v2680_v54  ;;  %v1863_v11 = vunpack.c.h.bf16 %v2683_v19  ;;  %v2195_v2 = vpop.f32.mrb[28].mxu1 }
 0x126   : > { %v940_v31 = vmax.f32 %v862_v22, 0.0  ;;  %v906_v61 = vmax.f32 %v726_v23, 0.0  ;;  %v1795_v57 = vunpack.c.h.bf16 %v2690_v50  ;;  %v1859_v13 = vunpack.c.h.bf16 %v2693_v55  ;;  %v866_v16 = vpop.f32.mrb[29].mxu1 }
 0x127   : > { %v938_v9 = vmax.f32 %v854_v60, 0.0  ;;  %v1099_v1 = vadd.f32 %v1790_v59, %v907_v52  ;;  %v1131_v35 = vadd.f32 %v1854_v42, %v939_v18  ;;  %v1100_v25 = vadd.f32 %v1791_v12, %v908_v6  ;;  %v2163_v42 = vpop.f32.mrb[28].mxu0  ;;  %v2196_v27 = vpop.f32.mrb[30].mxu1 }
 0x128   : > { %v1132_v24 = vadd.f32 %v1855_v8, %v940_v31  ;;  %v1097_v46 = vadd.f32 %v1786_v43, %v905_v40  ;;  %v1129_v38 = vadd.f32 %v1850_v0, %v937_v63  ;;  %v1098_v4 = vadd.f32 %v1787_v44, %v906_v61  ;;  %v738_v43 = vpop.f32.mrb[29].mxu0  ;;  %v869_v34 = vpop.f32.mrb[31].mxu1 }
 0x129   : > { %v1130_v59 = vadd.f32 %v1851_v56, %v938_v9  ;;  %v1932_v12 = vpack.c.bf16 %v1100_v25, %v1099_v1  ;;  %v747_v30 = vadd.f32 %v2163_v42, %v2459_v10  ;;  %v875_v8 = vadd.f32 %v2195_v2, %v2459_v10  ;;  %v2164_v56 = vpop.f32.mrb[30].mxu0 }
 0x12a   : > { %v2012_v15 = vpack.c.bf16 %v1132_v24, %v1131_v35  ;;  %v1927_v0 = vpack.c.bf16 %v1098_v4, %v1097_v46  ;;  %v739_v44 = vadd.f32 %v2459_v10, %v738_v43  ;;  %v867_v47 = vadd.f32 %v2459_v10, %v866_v16  ;;  %v741_v29 = vpop.f32.mrb[31].mxu0 }
 0x12b   : > { %v2007_v39 = vpack.c.bf16 %v1130_v59, %v1129_v38  ;;  %2067 = vst [vmem:[%s2517_s13 + $0x68] sm:$0xff] %v1932_v12   ;;  %v911_v48 = vmax.f32 %v747_v30, 0.0  ;;  %v943_v51 = vmax.f32 %v875_v8, 0.0  ;;  %v750_v28 = vadd.f32 %v2164_v56, %v2459_v10 }
 0x12c   : > { %2083 = vst [vmem:[%s2517_s13 + $0xe8] sm:$0xff] %v2012_v15   ;;  %v878_v41 = vadd.f32 %v2196_v27, %v2459_v10  ;;  %2066 = vst [vmem:[%s2517_s13 + $0x60] sm:$0xff] %v1927_v0   ;;  %v909_v53 = vmax.f32 %v739_v44, 0.0  ;;  %v941_v14 = vmax.f32 %v867_v47, 0.0  ;;  %v742_v49 = vadd.f32 %v2459_v10, %v741_v29 }
 0x12d   : > { %2082 = vst [vmem:[%s2517_s13 + $0xe0] sm:$0xff] %v2007_v39   ;;  %v870_v17 = vadd.f32 %v2459_v10, %v869_v34  ;;  %v912_v33 = vmax.f32 %v750_v28, 0.0  ;;  %v1103_v5 = vadd.f32 %v1798_v45, %v911_v48  ;;  %v1135_v52 = vadd.f32 %v1862_v62, %v943_v51 }
 0x12e   : > { %v944_v32 = vmax.f32 %v878_v41, 0.0  ;;  %v910_v26 = vmax.f32 %v742_v49, 0.0  ;;  %v1101_v22 = vadd.f32 %v1794_v3, %v909_v53  ;;  %v1133_v10 = vadd.f32 %v1858_v36, %v941_v14 }
 0x12f   : > { %v942_v58 = vmax.f32 %v870_v17, 0.0  ;;  %v1104_v18 = vadd.f32 %v1799_v7, %v912_v33 }
 0x130   : > { %v1136_v21 = vadd.f32 %v1863_v11, %v944_v32  ;;  %v1102_v37 = vadd.f32 %v1795_v57, %v910_v26 }
 0x131   : > { %v1134_v20 = vadd.f32 %v1859_v13, %v942_v58  ;;  %v1942_v40 = vpack.c.bf16 %v1104_v18, %v1103_v5 }
 0x132   : > { %v2022_v63 = vpack.c.bf16 %v1136_v21, %v1135_v52  ;;  %v1937_v23 = vpack.c.bf16 %v1102_v37, %v1101_v22 }
 0x133   : > { %v2017_v60 = vpack.c.bf16 %v1134_v20, %v1133_v10  ;;  %2069 = vst [vmem:[%s2517_s13 + $0x78] sm:$0xff] %v1942_v40  }
 0x134   : > { %2085 = vst [vmem:[%s2517_s13 + $0xf8] sm:$0xff] %v2022_v63   ;;  %2068 = vst [vmem:[%s2517_s13 + $0x70] sm:$0xff] %v1937_v23  }
 0x135   : > { %2084 = vst [vmem:[%s2517_s13 + $0xf0] sm:$0xff] %v2017_v60  }
 0x136 PF: > { %s14_s15 = sadd.s32 1, %s2260_s15  }
 0x137   : > { %p11_p4 = scmp.ge.s32.totalorder %s14_s15, 13  }
 0x139   :  { %13 = sbr.rel (!%p11_p4) target bundleno = 1 (0x1), region = 69 }

// kernel: _lambda_.14
= control target key start
LH: loop header
LB: loop body
LE: loop exit
PB: predicated region body
PF: predicated region fallthrough
CT: control target
= control target key end

     0   :  { %s1868_s12 = smov 0   ;;  %s2076_s0 = inlined_call_operand.vmem [shape: bf16[1536,72], index: 0, kind: input, shape index: {}]   ;;  %s2077_s1 = inlined_call_operand.vmem [shape: bf16[72,128], index: 1, kind: input, shape index: {}]   ;;  %s2078_s2 = inlined_call_operand.vmem [shape: f32[1,128], index: 2, kind: input, shape index: {}]   ;;  %s2079_s3 = inlined_call_operand.vmem [shape: bf16[1536,128], index: 3, kind: output, shape index: {}]  }
   0x1 LB: > { %s1272_s13 = sadd.s32 4294967295, %s1846_s12   ;;  %p1276_p0 = scmp.ge.s32.totalorder %s1846_s12, 1  ;;  %s1846_s12 = sphi %s1868_s12, %s13_s12  }
   0x2   : > { %p138_p1 = scmp.lt.s32.totalorder %s1846_s12, 4 }
   0x4   : > { %p139_p2 = pnand %p1276_p0, %p138_p1 }
   0x5   : > { %v1803_v0 = vld [vmem:[%s2077_s1] sm:$0xff] (!%p139_p2)   ;;  %v1804_v1 = vld [vmem:[%s2077_s1 + $0x8] sm:$0xff] (!%p139_p2)   ;;  %s1277_s18 = sshll.u32 (!%p139_p2), %s1272_s13, 6  ;;  %v1805_v2 = vld [vmem:[%s2077_s1 + $0x10] sm:$0xff] (!%p139_p2)   ;;  %vm442_vm0 = vcmask (!%p139_p2), 588800   ;;  %vm539_vm1 = vcmask (!%p139_p2), 1043456  }
   0x6   : > { %142 = sbr.rel (%p139_p2) target bundleno = 304 (0x130), region = 32  ;;  %1709 = vmatprep.subr.bf16.mxu0 (!%p139_p2), %v1803_v0  ;;  %1783 = vmatprep.subr.bf16.mxu1 (!%p139_p2), %v1803_v0  ;;  %p163_p3 = scmp.lt.s32.totalorder (!%p139_p2), %s1277_s18, 191  ;;  %v1806_v3 = vld [vmem:[%s2077_s1 + $0x18] sm:$0xff] (!%p139_p2)   ;;  %v1807_v6 = vld [vmem:[%s2077_s1 + $0x20] ss:$0 sps:$4 sm:$0xff] (!%p139_p2)  }
   0x7   : > { %1710 = vmatpush3.bf16.msra.mxu0 (!%p139_p2), %v1803_v0  ;;  %1788 = vmatpush3.bf16.msra.mxu1 (!%p139_p2), %v1803_v0  ;;  %v541_v7 = vsel (!%p139_p2), %vm539_vm1, %v1807_v6, 0  ;;  %v1968_v38 = vld [vmem:[%s2078_s2] ss:$0 sm:$0xff] (!%p139_p2) }
   0x8   : > { %1711 = vmatprep.subr.bf16.mxu0 (!%p139_p2), %v1804_v1  ;;  %1784 = vmatprep.subr.bf16.mxu1 (!%p139_p2), %v1804_v1 }
   0xb   : > { %1712 = vmatpush3.bf16.msra.mxu0 (!%p139_p2), %v1804_v1  ;;  %1789 = vmatpush3.bf16.msra.mxu1 (!%p139_p2), %v1804_v1 }
   0xc   : > { %1713 = vmatprep.subr.bf16.mxu0 (!%p139_p2), %v1805_v2  ;;  %1785 = vmatprep.subr.bf16.mxu1 (!%p139_p2), %v1805_v2 }
   0xd   : > { %s2081_s18 = smov (!%p163_p3, %s1277_s18), 191 }
   0xe   : > { %s1278_s21 = sshll.u32 %s2081_s18, 2 }
   0xf   : > { %s1896_s26 = scalar_lea.vmem %s2076_s0, %s1278_s21  ;;  %1714 = vmatpush3.bf16.msra.mxu0 %v1805_v2  ;;  %1790 = vmatpush3.bf16.msra.mxu1 %v1805_v2  ;;  %s1983_s6 = scalar_lea.vmem %s2079_s3, %s1278_s21 }
  0x10   : > { %v1808_v4 = vld [vmem:[%s1896_s26] sm:$0xff]   ;;  %1715 = vmatprep.subr.bf16.mxu0 %v1806_v3  ;;  %1786 = vmatprep.subr.bf16.mxu1 %v1806_v3  ;;  %v1810_v8 = vld [vmem:[%s1896_s26 + $0x8] sm:$0xff]   ;;  %v1812_v10 = vld [vmem:[%s1896_s26 + $0x10] sm:$0xff]  }
  0x11   : > { %v1809_v5 = vld [vmem:[%s1896_s26 + $0x80] sm:$0xff]   ;;  %1719 = vmatprep.mubr.msk.bf16.mxu0 %vm442_vm0, %v1808_v4  ;;  %v1811_v9 = vld [vmem:[%s1896_s26 + $0x88] sm:$0xff]   ;;  %v1813_v11 = vld [vmem:[%s1896_s26 + $0x90] sm:$0xff]  }
  0x12   : > { %1751 = vmatprep.mubr.msk.bf16.mxu1 %vm442_vm0, %v1809_v5  ;;  %v1814_v12 = vld [vmem:[%s1896_s26 + $0x18] sm:$0xff]   ;;  %v1816_v14 = vld [vmem:[%s1896_s26 + $0x20] sm:$0xff]   ;;  %v1818_v16 = vld [vmem:[%s1896_s26 + $0x28] sm:$0xff]  }
  0x13   : > { %1716 = vmatpush3.bf16.msra.mxu0 %v1806_v3  ;;  %1791 = vmatpush3.bf16.msra.mxu1 %v1806_v3  ;;  %v1815_v13 = vld [vmem:[%s1896_s26 + $0x98] sm:$0xff]   ;;  %v1817_v15 = vld [vmem:[%s1896_s26 + $0xa0] sm:$0xff]   ;;  %v1819_v17 = vld [vmem:[%s1896_s26 + $0xa8] sm:$0xff]  }
  0x14   : > { %1793 = vmatprep.subr.msk.bf16.mxu0 %vm539_vm1, %v1807_v6  ;;  %1794 = vmatprep.subr.msk.bf16.mxu1 %vm539_vm1, %v1807_v6  ;;  %v1820_v18 = vld [vmem:[%s1896_s26 + $0x30] sm:$0xff]   ;;  %v1822_v20 = vld [vmem:[%s1896_s26 + $0x38] sm:$0xff]   ;;  %v1824_v22 = vld [vmem:[%s1896_s26 + $0x40] sm:$0xff]  }
  0x15   : > { %v1821_v19 = vld [vmem:[%s1896_s26 + $0xb0] sm:$0xff]   ;;  %v1823_v21 = vld [vmem:[%s1896_s26 + $0xb8] sm:$0xff]   ;;  %v1825_v23 = vld [vmem:[%s1896_s26 + $0xc0] sm:$0xff]  }
  0x16   : > { %v1826_v24 = vld [vmem:[%s1896_s26 + $0x48] sm:$0xff]   ;;  %v1828_v26 = vld [vmem:[%s1896_s26 + $0x50] sm:$0xff]   ;;  %v1830_v28 = vld [vmem:[%s1896_s26 + $0x58] sm:$0xff]  }
  0x17   : > { %1718 = vmatpush3.bf16.msra.mxu0 %v541_v7  ;;  %1792 = vmatpush3.bf16.msra.mxu1 %v541_v7  ;;  %v1827_v25 = vld [vmem:[%s1896_s26 + $0xc8] sm:$0xff]   ;;  %v1829_v27 = vld [vmem:[%s1896_s26 + $0xd0] sm:$0xff]   ;;  %v1831_v29 = vld [vmem:[%s1896_s26 + $0xd8] sm:$0xff]  }
  0x18   : > { %v1832_v30 = vld [vmem:[%s1896_s26 + $0x60] sm:$0xff]   ;;  %v1834_v32 = vld [vmem:[%s1896_s26 + $0x68] sm:$0xff]   ;;  %v1836_v34 = vld [vmem:[%s1896_s26 + $0x70] sm:$0xff]  }
  0x19   : > { %v1833_v31 = vld [vmem:[%s1896_s26 + $0xe0] sm:$0xff]   ;;  %v1835_v33 = vld [vmem:[%s1896_s26 + $0xe8] sm:$0xff]   ;;  %v1837_v35 = vld [vmem:[%s1896_s26 + $0xf0] sm:$0xff]  }
  0x1a   : > { %1720 = vmatmul.mubr.msk.bf16.vlgmr.msra.gmra.mrb[0].mxu0 %vm442_vm0, %v1810_v8  ;;  %1752 = vmatmul.mubr.msk.bf16.vlgmr.msra.gmra.mrb[0].mxu1 %vm442_vm0, %v1811_v9  ;;  %v1838_v36 = vld [vmem:[%s1896_s26 + $0x78] sm:$0xff]  }
  0x1b   : > { %1723 = vmatprep.mubr.msk.bf16.mxu0 %vm442_vm0, %v1812_v10  ;;  %1755 = vmatprep.mubr.msk.bf16.mxu1 %vm442_vm0, %v1813_v11  ;;  %v1839_v37 = vld [vmem:[%s1896_s26 + $0xf8] sm:$0xff]  }
  0x22   : > { %1724 = vmatmul.mubr.msk.bf16.gmra.mrb[4].mxu0 %vm442_vm0, %v1814_v12  ;;  %1756 = vmatmul.mubr.msk.bf16.gmra.mrb[4].mxu1 %vm442_vm0, %v1815_v13 }
  0x23   : > { %1727 = vmatprep.mubr.msk.bf16.mxu0 %vm442_vm0, %v1816_v14  ;;  %1759 = vmatprep.mubr.msk.bf16.mxu1 %vm442_vm0, %v1817_v15 }
  0x2a   : > { %1728 = vmatmul.mubr.msk.bf16.gmra.mrb[8].mxu0 %vm442_vm0, %v1818_v16  ;;  %1760 = vmatmul.mubr.msk.bf16.gmra.mrb[8].mxu1 %vm442_vm0, %v1819_v17 }
  0x2b   : > { %1731 = vmatprep.mubr.msk.bf16.mxu0 %vm442_vm0, %v1820_v18  ;;  %1763 = vmatprep.mubr.msk.bf16.mxu1 %vm442_vm0, %v1821_v19 }
  0x32   : > { %1732 = vmatmul.mubr.msk.bf16.gmra.mrb[12].mxu0 %vm442_vm0, %v1822_v20  ;;  %1764 = vmatmul.mubr.msk.bf16.gmra.mrb[12].mxu1 %vm442_vm0, %v1823_v21 }
  0x33   : > { %1735 = vmatprep.mubr.msk.bf16.mxu0 %vm442_vm0, %v1824_v22  ;;  %1767 = vmatprep.mubr.msk.bf16.mxu1 %vm442_vm0, %v1825_v23 }
  0x3a   : > { %1736 = vmatmul.mubr.msk.bf16.gmra.mrb[16].mxu0 %vm442_vm0, %v1826_v24  ;;  %1768 = vmatmul.mubr.msk.bf16.gmra.mrb[16].mxu1 %vm442_vm0, %v1827_v25 }
  0x3b   : > { %1739 = vmatprep.mubr.msk.bf16.mxu0 %vm442_vm0, %v1828_v26  ;;  %1771 = vmatprep.mubr.msk.bf16.mxu1 %vm442_vm0, %v1829_v27 }
  0x42   : > { %1740 = vmatmul.mubr.msk.bf16.gmra.mrb[20].mxu0 %vm442_vm0, %v1830_v28  ;;  %1772 = vmatmul.mubr.msk.bf16.gmra.mrb[20].mxu1 %vm442_vm0, %v1831_v29 }
  0x43   : > { %1743 = vmatprep.mubr.msk.bf16.mxu0 %vm442_vm0, %v1832_v30  ;;  %1775 = vmatprep.mubr.msk.bf16.mxu1 %vm442_vm0, %v1833_v31 }
  0x4a   : > { %1744 = vmatmul.mubr.msk.bf16.gmra.mrb[24].mxu0 %vm442_vm0, %v1834_v32  ;;  %1776 = vmatmul.mubr.msk.bf16.gmra.mrb[24].mxu1 %vm442_vm0, %v1835_v33 }
  0x4b   : > { %1747 = vmatprep.mubr.msk.bf16.mxu0 %vm442_vm0, %v1836_v34  ;;  %1779 = vmatprep.mubr.msk.bf16.mxu1 %vm442_vm0, %v1837_v35 }
  0x52   : > { %1748 = vmatmul.mubr.msk.bf16.gmra.mrb[28].mxu0 %vm442_vm0, %v1838_v36  ;;  %1780 = vmatmul.mubr.msk.bf16.gmra.mrb[28].mxu1 %vm442_vm0, %v1839_v37 }
  0xed   : > { %v1721_v39 = vpop.f32.mrb[0].mxu0  ;;  %v1753_v40 = vpop.f32.mrb[0].mxu1 }
  0xee   : > { %v586_v41 = vadd.f32 %v1721_v39, %v1968_v38  ;;  %v714_v42 = vadd.f32 %v1753_v40, %v1968_v38  ;;  %v577_v43 = vpop.f32.mrb[1].mxu0  ;;  %v705_v44 = vpop.f32.mrb[1].mxu1 }
  0xef   : > { %v578_v45 = vadd.f32 %v1968_v38, %v577_v43  ;;  %v706_v46 = vadd.f32 %v1968_v38, %v705_v44  ;;  %v1722_v47 = vpop.f32.mrb[2].mxu0  ;;  %v1754_v48 = vpop.f32.mrb[2].mxu1 }
  0xf0   : > { %v589_v49 = vadd.f32 %v1722_v47, %v1968_v38  ;;  %v717_v50 = vadd.f32 %v1754_v48, %v1968_v38  ;;  %v580_v51 = vpop.f32.mrb[3].mxu0  ;;  %v708_v52 = vpop.f32.mrb[3].mxu1  ;;  %v834_v55 = vmax.f32 %v586_v41, 0.0  ;;  %v866_v56 = vmax.f32 %v714_v42, 0.0 }
  0xf1   : > { %v581_v53 = vadd.f32 %v1968_v38, %v580_v51  ;;  %v709_v54 = vadd.f32 %v1968_v38, %v708_v52  ;;  %v832_v59 = vmax.f32 %v578_v45, 0.0  ;;  %v864_v60 = vmax.f32 %v706_v46, 0.0 }
  0xf2   : > { %v835_v57 = vmax.f32 %v589_v49, 0.0  ;;  %v867_v58 = vmax.f32 %v717_v50, 0.0 }
  0xf3   : > { %v833_v61 = vmax.f32 %v581_v53, 0.0  ;;  %v865_v62 = vmax.f32 %v709_v54, 0.0 }
  0xf4   : > { %v1489_v63 = vpack.c.bf16 %v835_v57, %v834_v55  ;;  %v1569_v0 = vpack.c.bf16 %v867_v58, %v866_v56 }
  0xf5   : > { %v1484_v1 = vpack.c.bf16 %v833_v61, %v832_v59  ;;  %v1564_v2 = vpack.c.bf16 %v865_v62, %v864_v60  ;;  %v1725_v3 = vpop.f32.mrb[4].mxu0  ;;  %v1757_v4 = vpop.f32.mrb[4].mxu1 }
  0xf6   : > { %1641 = vst [vmem:[%s1983_s6 + $0x8] sm:$0xff] %v1489_v63   ;;  %1657 = vst [vmem:[%s1983_s6 + $0x88] sm:$0xff] %v1569_v0   ;;  %v602_v5 = vadd.f32 %v1725_v3, %v1968_v38  ;;  %v730_v6 = vadd.f32 %v1757_v4, %v1968_v38  ;;  %v593_v7 = vpop.f32.mrb[5].mxu0  ;;  %v721_v8 = vpop.f32.mrb[5].mxu1 }
  0xf7   : > { %1485 = vst [vmem:[%s1983_s6] sm:$0xff] %v1484_v1   ;;  %1656 = vst [vmem:[%s1983_s6 + $0x80] sm:$0xff] %v1564_v2   ;;  %v594_v9 = vadd.f32 %v1968_v38, %v593_v7  ;;  %v722_v10 = vadd.f32 %v1968_v38, %v721_v8  ;;  %v1726_v11 = vpop.f32.mrb[6].mxu0  ;;  %v1758_v12 = vpop.f32.mrb[6].mxu1 }
  0xf8   : > { %v605_v13 = vadd.f32 %v1726_v11, %v1968_v38  ;;  %v733_v14 = vadd.f32 %v1758_v12, %v1968_v38  ;;  %v596_v15 = vpop.f32.mrb[7].mxu0  ;;  %v724_v16 = vpop.f32.mrb[7].mxu1  ;;  %v838_v19 = vmax.f32 %v602_v5, 0.0  ;;  %v870_v20 = vmax.f32 %v730_v6, 0.0 }
  0xf9   : > { %v597_v17 = vadd.f32 %v1968_v38, %v596_v15  ;;  %v725_v18 = vadd.f32 %v1968_v38, %v724_v16  ;;  %v836_v23 = vmax.f32 %v594_v9, 0.0  ;;  %v868_v24 = vmax.f32 %v722_v10, 0.0 }
  0xfa   : > { %v839_v21 = vmax.f32 %v605_v13, 0.0  ;;  %v871_v22 = vmax.f32 %v733_v14, 0.0 }
  0xfb   : > { %v837_v25 = vmax.f32 %v597_v17, 0.0  ;;  %v869_v26 = vmax.f32 %v725_v18, 0.0 }
  0xfc   : > { %v1499_v27 = vpack.c.bf16 %v839_v21, %v838_v19  ;;  %v1579_v28 = vpack.c.bf16 %v871_v22, %v870_v20 }
  0xfd   : > { %v1494_v29 = vpack.c.bf16 %v837_v25, %v836_v23  ;;  %v1574_v30 = vpack.c.bf16 %v869_v26, %v868_v24  ;;  %v1729_v31 = vpop.f32.mrb[8].mxu0  ;;  %v1761_v32 = vpop.f32.mrb[8].mxu1 }
  0xfe   : > { %1643 = vst [vmem:[%s1983_s6 + $0x18] sm:$0xff] %v1499_v27   ;;  %1659 = vst [vmem:[%s1983_s6 + $0x98] sm:$0xff] %v1579_v28   ;;  %v618_v33 = vadd.f32 %v1729_v31, %v1968_v38  ;;  %v746_v34 = vadd.f32 %v1761_v32, %v1968_v38  ;;  %v609_v35 = vpop.f32.mrb[9].mxu0  ;;  %v737_v36 = vpop.f32.mrb[9].mxu1 }
  0xff   : > { %1642 = vst [vmem:[%s1983_s6 + $0x10] sm:$0xff] %v1494_v29   ;;  %1658 = vst [vmem:[%s1983_s6 + $0x90] sm:$0xff] %v1574_v30   ;;  %v610_v37 = vadd.f32 %v1968_v38, %v609_v35  ;;  %v738_v39 = vadd.f32 %v1968_v38, %v737_v36  ;;  %v1730_v40 = vpop.f32.mrb[10].mxu0  ;;  %v1762_v41 = vpop.f32.mrb[10].mxu1 }
 0x100   : > { %v621_v42 = vadd.f32 %v1730_v40, %v1968_v38  ;;  %v749_v43 = vadd.f32 %v1762_v41, %v1968_v38  ;;  %v612_v44 = vpop.f32.mrb[11].mxu0  ;;  %v740_v45 = vpop.f32.mrb[11].mxu1  ;;  %v842_v48 = vmax.f32 %v618_v33, 0.0  ;;  %v874_v49 = vmax.f32 %v746_v34, 0.0 }
 0x101   : > { %v613_v46 = vadd.f32 %v1968_v38, %v612_v44  ;;  %v741_v47 = vadd.f32 %v1968_v38, %v740_v45  ;;  %v840_v52 = vmax.f32 %v610_v37, 0.0  ;;  %v872_v53 = vmax.f32 %v738_v39, 0.0 }
 0x102   : > { %v843_v50 = vmax.f32 %v621_v42, 0.0  ;;  %v875_v51 = vmax.f32 %v749_v43, 0.0 }
 0x103   : > { %v841_v54 = vmax.f32 %v613_v46, 0.0  ;;  %v873_v55 = vmax.f32 %v741_v47, 0.0 }
 0x104   : > { %v1509_v56 = vpack.c.bf16 %v843_v50, %v842_v48  ;;  %v1589_v57 = vpack.c.bf16 %v875_v51, %v874_v49 }
 0x105   : > { %v1504_v58 = vpack.c.bf16 %v841_v54, %v840_v52  ;;  %v1584_v59 = vpack.c.bf16 %v873_v55, %v872_v53  ;;  %v1733_v60 = vpop.f32.mrb[12].mxu0  ;;  %v1765_v61 = vpop.f32.mrb[12].mxu1 }
 0x106   : > { %1645 = vst [vmem:[%s1983_s6 + $0x28] sm:$0xff] %v1509_v56   ;;  %1661 = vst [vmem:[%s1983_s6 + $0xa8] sm:$0xff] %v1589_v57   ;;  %v634_v62 = vadd.f32 %v1733_v60, %v1968_v38  ;;  %v762_v63 = vadd.f32 %v1765_v61, %v1968_v38  ;;  %v625_v0 = vpop.f32.mrb[13].mxu0  ;;  %v753_v1 = vpop.f32.mrb[13].mxu1 }
 0x107   : > { %1644 = vst [vmem:[%s1983_s6 + $0x20] sm:$0xff] %v1504_v58   ;;  %1660 = vst [vmem:[%s1983_s6 + $0xa0] sm:$0xff] %v1584_v59   ;;  %v626_v2 = vadd.f32 %v1968_v38, %v625_v0  ;;  %v754_v3 = vadd.f32 %v1968_v38, %v753_v1  ;;  %v1734_v4 = vpop.f32.mrb[14].mxu0  ;;  %v1766_v5 = vpop.f32.mrb[14].mxu1 }
 0x108   : > { %v637_v6 = vadd.f32 %v1734_v4, %v1968_v38  ;;  %v765_v7 = vadd.f32 %v1766_v5, %v1968_v38  ;;  %v628_v8 = vpop.f32.mrb[15].mxu0  ;;  %v756_v9 = vpop.f32.mrb[15].mxu1  ;;  %v846_v12 = vmax.f32 %v634_v62, 0.0  ;;  %v878_v13 = vmax.f32 %v762_v63, 0.0 }
 0x109   : > { %v629_v10 = vadd.f32 %v1968_v38, %v628_v8  ;;  %v757_v11 = vadd.f32 %v1968_v38, %v756_v9  ;;  %v844_v16 = vmax.f32 %v626_v2, 0.0  ;;  %v876_v17 = vmax.f32 %v754_v3, 0.0 }
 0x10a   : > { %v847_v14 = vmax.f32 %v637_v6, 0.0  ;;  %v879_v15 = vmax.f32 %v765_v7, 0.0 }
 0x10b   : > { %v845_v18 = vmax.f32 %v629_v10, 0.0  ;;  %v877_v19 = vmax.f32 %v757_v11, 0.0 }
 0x10c   : > { %v1519_v20 = vpack.c.bf16 %v847_v14, %v846_v12  ;;  %v1599_v21 = vpack.c.bf16 %v879_v15, %v878_v13 }
 0x10d   : > { %v1514_v22 = vpack.c.bf16 %v845_v18, %v844_v16  ;;  %v1594_v23 = vpack.c.bf16 %v877_v19, %v876_v17  ;;  %v1737_v24 = vpop.f32.mrb[16].mxu0  ;;  %v1769_v25 = vpop.f32.mrb[16].mxu1 }
 0x10e   : > { %1647 = vst [vmem:[%s1983_s6 + $0x38] sm:$0xff] %v1519_v20   ;;  %1663 = vst [vmem:[%s1983_s6 + $0xb8] sm:$0xff] %v1599_v21   ;;  %v650_v26 = vadd.f32 %v1737_v24, %v1968_v38  ;;  %v778_v27 = vadd.f32 %v1769_v25, %v1968_v38  ;;  %v641_v28 = vpop.f32.mrb[17].mxu0  ;;  %v769_v29 = vpop.f32.mrb[17].mxu1 }
 0x10f   : > { %1646 = vst [vmem:[%s1983_s6 + $0x30] sm:$0xff] %v1514_v22   ;;  %1662 = vst [vmem:[%s1983_s6 + $0xb0] sm:$0xff] %v1594_v23   ;;  %v642_v30 = vadd.f32 %v1968_v38, %v641_v28  ;;  %v770_v31 = vadd.f32 %v1968_v38, %v769_v29  ;;  %v1738_v32 = vpop.f32.mrb[18].mxu0  ;;  %v1770_v33 = vpop.f32.mrb[18].mxu1 }
 0x110   : > { %v653_v34 = vadd.f32 %v1738_v32, %v1968_v38  ;;  %v781_v35 = vadd.f32 %v1770_v33, %v1968_v38  ;;  %v644_v36 = vpop.f32.mrb[19].mxu0  ;;  %v772_v37 = vpop.f32.mrb[19].mxu1  ;;  %v850_v41 = vmax.f32 %v650_v26, 0.0  ;;  %v882_v42 = vmax.f32 %v778_v27, 0.0 }
 0x111   : > { %v645_v39 = vadd.f32 %v1968_v38, %v644_v36  ;;  %v773_v40 = vadd.f32 %v1968_v38, %v772_v37  ;;  %v848_v45 = vmax.f32 %v642_v30, 0.0  ;;  %v880_v46 = vmax.f32 %v770_v31, 0.0 }
 0x112   : > { %v851_v43 = vmax.f32 %v653_v34, 0.0  ;;  %v883_v44 = vmax.f32 %v781_v35, 0.0 }
 0x113   : > { %v849_v47 = vmax.f32 %v645_v39, 0.0  ;;  %v881_v48 = vmax.f32 %v773_v40, 0.0 }
 0x114   : > { %v1529_v49 = vpack.c.bf16 %v851_v43, %v850_v41  ;;  %v1609_v50 = vpack.c.bf16 %v883_v44, %v882_v42 }
 0x115   : > { %v1524_v51 = vpack.c.bf16 %v849_v47, %v848_v45  ;;  %v1604_v52 = vpack.c.bf16 %v881_v48, %v880_v46  ;;  %v1741_v53 = vpop.f32.mrb[20].mxu0  ;;  %v1773_v54 = vpop.f32.mrb[20].mxu1 }
 0x116   : > { %1649 = vst [vmem:[%s1983_s6 + $0x48] sm:$0xff] %v1529_v49   ;;  %1665 = vst [vmem:[%s1983_s6 + $0xc8] sm:$0xff] %v1609_v50   ;;  %v666_v55 = vadd.f32 %v1741_v53, %v1968_v38  ;;  %v794_v56 = vadd.f32 %v1773_v54, %v1968_v38  ;;  %v657_v57 = vpop.f32.mrb[21].mxu0  ;;  %v785_v58 = vpop.f32.mrb[21].mxu1 }
 0x117   : > { %1648 = vst [vmem:[%s1983_s6 + $0x40] sm:$0xff] %v1524_v51   ;;  %1664 = vst [vmem:[%s1983_s6 + $0xc0] sm:$0xff] %v1604_v52   ;;  %v658_v59 = vadd.f32 %v1968_v38, %v657_v57  ;;  %v786_v60 = vadd.f32 %v1968_v38, %v785_v58  ;;  %v1742_v61 = vpop.f32.mrb[22].mxu0  ;;  %v1774_v62 = vpop.f32.mrb[22].mxu1 }
 0x118   : > { %v669_v63 = vadd.f32 %v1742_v61, %v1968_v38  ;;  %v797_v0 = vadd.f32 %v1774_v62, %v1968_v38  ;;  %v660_v1 = vpop.f32.mrb[23].mxu0  ;;  %v788_v2 = vpop.f32.mrb[23].mxu1  ;;  %v854_v5 = vmax.f32 %v666_v55, 0.0  ;;  %v886_v6 = vmax.f32 %v794_v56, 0.0 }
 0x119   : > { %v661_v3 = vadd.f32 %v1968_v38, %v660_v1  ;;  %v789_v4 = vadd.f32 %v1968_v38, %v788_v2  ;;  %v852_v9 = vmax.f32 %v658_v59, 0.0  ;;  %v884_v10 = vmax.f32 %v786_v60, 0.0 }
 0x11a   : > { %v855_v7 = vmax.f32 %v669_v63, 0.0  ;;  %v887_v8 = vmax.f32 %v797_v0, 0.0 }
 0x11b   : > { %v853_v11 = vmax.f32 %v661_v3, 0.0  ;;  %v885_v12 = vmax.f32 %v789_v4, 0.0 }
 0x11c   : > { %v1539_v13 = vpack.c.bf16 %v855_v7, %v854_v5  ;;  %v1619_v14 = vpack.c.bf16 %v887_v8, %v886_v6 }
 0x11d   : > { %v1534_v15 = vpack.c.bf16 %v853_v11, %v852_v9  ;;  %v1614_v16 = vpack.c.bf16 %v885_v12, %v884_v10  ;;  %v1745_v17 = vpop.f32.mrb[24].mxu0  ;;  %v1777_v18 = vpop.f32.mrb[24].mxu1 }
 0x11e   : > { %1651 = vst [vmem:[%s1983_s6 + $0x58] sm:$0xff] %v1539_v13   ;;  %1667 = vst [vmem:[%s1983_s6 + $0xd8] sm:$0xff] %v1619_v14   ;;  %v682_v19 = vadd.f32 %v1745_v17, %v1968_v38  ;;  %v810_v20 = vadd.f32 %v1777_v18, %v1968_v38  ;;  %v673_v21 = vpop.f32.mrb[25].mxu0  ;;  %v801_v22 = vpop.f32.mrb[25].mxu1 }
 0x11f   : > { %1650 = vst [vmem:[%s1983_s6 + $0x50] sm:$0xff] %v1534_v15   ;;  %1666 = vst [vmem:[%s1983_s6 + $0xd0] sm:$0xff] %v1614_v16   ;;  %v674_v23 = vadd.f32 %v1968_v38, %v673_v21  ;;  %v802_v24 = vadd.f32 %v1968_v38, %v801_v22  ;;  %v1746_v25 = vpop.f32.mrb[26].mxu0  ;;  %v1778_v26 = vpop.f32.mrb[26].mxu1 }
 0x120   : > { %v685_v27 = vadd.f32 %v1746_v25, %v1968_v38  ;;  %v813_v28 = vadd.f32 %v1778_v26, %v1968_v38  ;;  %v676_v29 = vpop.f32.mrb[27].mxu0  ;;  %v804_v30 = vpop.f32.mrb[27].mxu1  ;;  %v858_v33 = vmax.f32 %v682_v19, 0.0  ;;  %v890_v34 = vmax.f32 %v810_v20, 0.0 }
 0x121   : > { %v677_v31 = vadd.f32 %v1968_v38, %v676_v29  ;;  %v805_v32 = vadd.f32 %v1968_v38, %v804_v30  ;;  %v856_v37 = vmax.f32 %v674_v23, 0.0  ;;  %v888_v39 = vmax.f32 %v802_v24, 0.0 }
 0x122   : > { %v859_v35 = vmax.f32 %v685_v27, 0.0  ;;  %v891_v36 = vmax.f32 %v813_v28, 0.0 }
 0x123   : > { %v857_v40 = vmax.f32 %v677_v31, 0.0  ;;  %v889_v41 = vmax.f32 %v805_v32, 0.0 }
 0x124   : > { %v1549_v42 = vpack.c.bf16 %v859_v35, %v858_v33  ;;  %v1629_v43 = vpack.c.bf16 %v891_v36, %v890_v34 }
 0x125   : > { %v1544_v44 = vpack.c.bf16 %v857_v40, %v856_v37  ;;  %v1624_v45 = vpack.c.bf16 %v889_v41, %v888_v39  ;;  %v1749_v46 = vpop.f32.mrb[28].mxu0  ;;  %v1781_v47 = vpop.f32.mrb[28].mxu1 }
 0x126   : > { %1653 = vst [vmem:[%s1983_s6 + $0x68] sm:$0xff] %v1549_v42   ;;  %1669 = vst [vmem:[%s1983_s6 + $0xe8] sm:$0xff] %v1629_v43   ;;  %v698_v48 = vadd.f32 %v1749_v46, %v1968_v38  ;;  %v826_v49 = vadd.f32 %v1781_v47, %v1968_v38  ;;  %v689_v50 = vpop.f32.mrb[29].mxu0  ;;  %v817_v51 = vpop.f32.mrb[29].mxu1 }
 0x127   : > { %1652 = vst [vmem:[%s1983_s6 + $0x60] sm:$0xff] %v1544_v44   ;;  %1668 = vst [vmem:[%s1983_s6 + $0xe0] sm:$0xff] %v1624_v45   ;;  %v690_v52 = vadd.f32 %v1968_v38, %v689_v50  ;;  %v818_v53 = vadd.f32 %v1968_v38, %v817_v51  ;;  %v1750_v54 = vpop.f32.mrb[30].mxu0  ;;  %v1782_v55 = vpop.f32.mrb[30].mxu1 }
 0x128   : > { %v701_v56 = vadd.f32 %v1750_v54, %v1968_v38  ;;  %v829_v57 = vadd.f32 %v1782_v55, %v1968_v38  ;;  %v692_v58 = vpop.f32.mrb[31].mxu0  ;;  %v820_v59 = vpop.f32.mrb[31].mxu1  ;;  %v862_v62 = vmax.f32 %v698_v48, 0.0  ;;  %v894_v63 = vmax.f32 %v826_v49, 0.0 }
 0x129   : > { %v693_v60 = vadd.f32 %v1968_v38, %v692_v58  ;;  %v821_v61 = vadd.f32 %v1968_v38, %v820_v59  ;;  %v860_v2 = vmax.f32 %v690_v52, 0.0  ;;  %v892_v3 = vmax.f32 %v818_v53, 0.0 }
 0x12a   : > { %v863_v0 = vmax.f32 %v701_v56, 0.0  ;;  %v895_v1 = vmax.f32 %v829_v57, 0.0 }
 0x12b   : > { %v861_v4 = vmax.f32 %v693_v60, 0.0  ;;  %v893_v5 = vmax.f32 %v821_v61, 0.0 }
 0x12c   : > { %v1559_v6 = vpack.c.bf16 %v863_v0, %v862_v62  ;;  %v1639_v7 = vpack.c.bf16 %v895_v1, %v894_v63 }
 0x12d   : > { %v1554_v8 = vpack.c.bf16 %v861_v4, %v860_v2  ;;  %v1634_v9 = vpack.c.bf16 %v893_v5, %v892_v3 }
 0x12e   : > { %1655 = vst [vmem:[%s1983_s6 + $0x78] sm:$0xff] %v1559_v6   ;;  %1671 = vst [vmem:[%s1983_s6 + $0xf8] sm:$0xff] %v1639_v7  }
 0x12f   : > { %1654 = vst [vmem:[%s1983_s6 + $0x70] sm:$0xff] %v1554_v8   ;;  %1670 = vst [vmem:[%s1983_s6 + $0xf0] sm:$0xff] %v1634_v9  }
 0x130 PF: > { %s13_s12 = sadd.s32 1, %s1846_s12  }
 0x131   : > { %p10_p4 = scmp.ge.s32.totalorder %s13_s12, 5  }
 0x133   :  { %12 = sbr.rel (!%p10_p4) target bundleno = 1 (0x1), region = 62 }

// kernel: _lambda_.15
= control target key start
LH: loop header
LB: loop body
LE: loop exit
PB: predicated region body
PF: predicated region fallthrough
CT: control target
= control target key end

     0   :  { %s2453_s15 = smov 0   ;;  %s2743_s0 = inlined_call_operand.vmem [shape: bf16[1536,144], index: 0, kind: input, shape index: {}]   ;;  %s2744_s1 = inlined_call_operand.vmem [shape: bf16[144,128], index: 1, kind: input, shape index: {}]   ;;  %s2745_s2 = inlined_call_operand.vmem [shape: f32[1,128], index: 2, kind: input, shape index: {}]   ;;  %s2746_s3 = inlined_call_operand.vmem [shape: bf16[1536,128], index: 3, kind: input, shape index: {}]   ;;  %s2747_s4 = inlined_call_operand.vmem [shape: bf16[1536,128], index: 4, kind: output, shape index: {}]  }
   0x1 LB: > { %s1688_s16 = sadd.s32 4294967295, %s2425_s15   ;;  %p1692_p0 = scmp.ge.s32.totalorder %s2425_s15, 1  ;;  %s2425_s15 = sphi %s2453_s15, %s14_s15  }
   0x2   : > { %p175_p1 = scmp.lt.s32.totalorder %s2425_s15, 4 }
   0x4   : > { %p176_p2 = pnand %p1692_p0, %p175_p1 }
   0x5   : > { %v2314_v0 = vld [vmem:[%s2744_s1] sm:$0xff] (!%p176_p2)   ;;  %v2427_v1 = vmov (!%p176_p2), 0   ;;  %s1693_s19 = sshll.u32 (!%p176_p2), %s1688_s16, 6  ;;  %v2315_v2 = vld [vmem:[%s2744_s1 + $0x8] sm:$0xff] (!%p176_p2)   ;;  %v2316_v3 = vld [vmem:[%s2744_s1 + $0x10] sm:$0xff] (!%p176_p2)   ;;  %vm658_vm0 = vcmask (!%p176_p2), 130048  }
   0x6   : > { %179 = sbr.rel (%p176_p2) target bundleno = 385 (0x181), region = 36  ;;  %755 = vmatprep.subr.bf16.mxu0 (!%p176_p2), %v2427_v1  ;;  %2287 = vmatprep.subr.bf16.mxu1 (!%p176_p2), %v2427_v1  ;;  %p208_p3 = scmp.lt.s32.totalorder (!%p176_p2), %s1693_s19, 191  ;;  %v2317_v4 = vld [vmem:[%s2744_s1 + $0x18] sm:$0xff] (!%p176_p2)   ;;  %v2318_v7 = vld [vmem:[%s2744_s1 + $0x20] sm:$0xff] (!%p176_p2)   ;;  %v2319_v8 = vld [vmem:[%s2744_s1 + $0x28] sm:$0xff] (!%p176_p2)  }
   0x7   : > { %756 = vmatpush1.bf16.msra.mxu0 (!%p176_p2), %v2314_v0  ;;  %2296 = vmatpush1.bf16.msra.mxu1 (!%p176_p2), %v2314_v0  ;;  %v2320_v9 = vld [vmem:[%s2744_s1 + $0x30] sm:$0xff] (!%p176_p2)   ;;  %v2321_v10 = vld [vmem:[%s2744_s1 + $0x38] sm:$0xff] (!%p176_p2)   ;;  %v2322_v11 = vld [vmem:[%s2744_s1 + $0x40] sm:$0xff] (!%p176_p2)  }
   0x8   : > { %757 = vmatprep.subr.bf16.mxu0 (!%p176_p2), %v2427_v1  ;;  %2288 = vmatprep.subr.bf16.mxu1 (!%p176_p2), %v2427_v1 }
   0xb   : > { %758 = vmatpush1.bf16.msra.mxu0 (!%p176_p2), %v2315_v2  ;;  %2297 = vmatpush1.bf16.msra.mxu1 (!%p176_p2), %v2315_v2 }
   0xc   : > { %759 = vmatprep.subr.bf16.mxu0 (!%p176_p2), %v2427_v1  ;;  %2289 = vmatprep.subr.bf16.mxu1 (!%p176_p2), %v2427_v1 }
   0xd   : > { %s2749_s19 = smov (!%p208_p3, %s1693_s19), 191 }
   0xe   : > { %s1872_s24 = sshll.u32 %s2749_s19, 3  ;;  %s1697_s14 = sshll.u32 %s2749_s19, 2 }
   0xf   : > { %s2476_s27 = scalar_lea.vmem %s2743_s0, %s1872_s24  ;;  %760 = vmatpush1.bf16.msra.mxu0 %v2316_v3  ;;  %2298 = vmatpush1.bf16.msra.mxu1 %v2316_v3  ;;  %s2598_s18 = scalar_lea.vmem %s2746_s3, %s1697_s14 }
  0x10   : > { %v2325_v5 = vld [vmem:[%s2476_s27 + $0x4] ss:$8 sps:$4 sm:$0xff]   ;;  %761 = vmatprep.subr.bf16.mxu0 %v2427_v1  ;;  %2290 = vmatprep.subr.bf16.mxu1 %v2427_v1  ;;  %v2323_v12 = vld [vmem:[%s2476_s27] ss:$8 sps:$4 sm:$0xff]   ;;  %v2329_v14 = vld [vmem:[%s2476_s27 + $0x14] ss:$8 sps:$4 sm:$0xff]   ;;  %s2618_s24 = scalar_lea.vmem %s2747_s4, %s1697_s14 }
  0x11   : > { %v2328_v6 = vld [vmem:[%s2476_s27 + $0x104] ss:$8 sps:$4 sm:$0xff]   ;;  %1774 = vmatprep.mubr.msk.bf16.mxu0 %vm658_vm0, %v2325_v5  ;;  %v2326_v13 = vld [vmem:[%s2476_s27 + $0x100] ss:$8 sps:$4 sm:$0xff]   ;;  %v2331_v15 = vld [vmem:[%s2476_s27 + $0x114] ss:$8 sps:$4 sm:$0xff]  }
  0x12   : > { %1790 = vmatprep.mubr.msk.bf16.mxu1 %vm658_vm0, %v2328_v6  ;;  %v2333_v16 = vld [vmem:[%s2476_s27 + $0x10] ss:$8 sps:$4 sm:$0xff]   ;;  %v2335_v18 = vld [vmem:[%s2476_s27 + $0x24] ss:$8 sps:$4 sm:$0xff]   ;;  %v2339_v20 = vld [vmem:[%s2476_s27 + $0x20] ss:$8 sps:$4 sm:$0xff]  }
  0x13   : > { %762 = vmatpush1.bf16.msra.mxu0 %v2317_v4  ;;  %2299 = vmatpush1.bf16.msra.mxu1 %v2317_v4  ;;  %v2334_v17 = vld [vmem:[%s2476_s27 + $0x110] ss:$8 sps:$4 sm:$0xff]   ;;  %v2337_v19 = vld [vmem:[%s2476_s27 + $0x124] ss:$8 sps:$4 sm:$0xff]   ;;  %v2340_v21 = vld [vmem:[%s2476_s27 + $0x120] ss:$8 sps:$4 sm:$0xff]  }
  0x14   : > { %763 = vmatprep.subr.bf16.mxu0 %v2427_v1  ;;  %2291 = vmatprep.subr.bf16.mxu1 %v2427_v1  ;;  %v2341_v22 = vld [vmem:[%s2476_s27 + $0x34] ss:$8 sps:$4 sm:$0xff]   ;;  %v2345_v24 = vld [vmem:[%s2476_s27 + $0x30] ss:$8 sps:$4 sm:$0xff]   ;;  %v2347_v26 = vld [vmem:[%s2476_s27 + $0x44] ss:$8 sps:$4 sm:$0xff]  }
  0x15   : > { %v2343_v23 = vld [vmem:[%s2476_s27 + $0x134] ss:$8 sps:$4 sm:$0xff]   ;;  %v2346_v25 = vld [vmem:[%s2476_s27 + $0x130] ss:$8 sps:$4 sm:$0xff]   ;;  %v2349_v27 = vld [vmem:[%s2476_s27 + $0x144] ss:$8 sps:$4 sm:$0xff]  }
  0x16   : > { %v2351_v28 = vld [vmem:[%s2476_s27 + $0x40] ss:$8 sps:$4 sm:$0xff]   ;;  %v2353_v30 = vld [vmem:[%s2476_s27 + $0x54] ss:$8 sps:$4 sm:$0xff]   ;;  %v2357_v32 = vld [vmem:[%s2476_s27 + $0x50] ss:$8 sps:$4 sm:$0xff]  }
  0x17   : > { %764 = vmatpush1.bf16.msra.mxu0 %v2318_v7  ;;  %2300 = vmatpush1.bf16.msra.mxu1 %v2318_v7  ;;  %v2352_v29 = vld [vmem:[%s2476_s27 + $0x140] ss:$8 sps:$4 sm:$0xff]   ;;  %v2355_v31 = vld [vmem:[%s2476_s27 + $0x154] ss:$8 sps:$4 sm:$0xff]   ;;  %v2358_v33 = vld [vmem:[%s2476_s27 + $0x150] ss:$8 sps:$4 sm:$0xff]  }
  0x18   : > { %765 = vmatprep.subr.bf16.mxu0 %v2427_v1  ;;  %2292 = vmatprep.subr.bf16.mxu1 %v2427_v1  ;;  %v2359_v34 = vld [vmem:[%s2476_s27 + $0x64] ss:$8 sps:$4 sm:$0xff]   ;;  %v2363_v36 = vld [vmem:[%s2476_s27 + $0x60] ss:$8 sps:$4 sm:$0xff]   ;;  %v2365_v38 = vld [vmem:[%s2476_s27 + $0x74] ss:$8 sps:$4 sm:$0xff]  }
  0x19   : > { %v2361_v35 = vld [vmem:[%s2476_s27 + $0x164] ss:$8 sps:$4 sm:$0xff]   ;;  %v2364_v37 = vld [vmem:[%s2476_s27 + $0x160] ss:$8 sps:$4 sm:$0xff]   ;;  %v2367_v39 = vld [vmem:[%s2476_s27 + $0x174] ss:$8 sps:$4 sm:$0xff]  }
  0x1a   : > { %v2369_v40 = vld [vmem:[%s2476_s27 + $0x70] ss:$8 sps:$4 sm:$0xff]   ;;  %v2371_v42 = vld [vmem:[%s2476_s27 + $0x84] ss:$8 sps:$4 sm:$0xff]   ;;  %v2375_v44 = vld [vmem:[%s2476_s27 + $0x80] ss:$8 sps:$4 sm:$0xff]  }
  0x1b   : > { %766 = vmatpush1.bf16.msra.mxu0 %v2319_v8  ;;  %2301 = vmatpush1.bf16.msra.mxu1 %v2319_v8  ;;  %v2370_v41 = vld [vmem:[%s2476_s27 + $0x170] ss:$8 sps:$4 sm:$0xff]   ;;  %v2373_v43 = vld [vmem:[%s2476_s27 + $0x184] ss:$8 sps:$4 sm:$0xff]   ;;  %v2376_v45 = vld [vmem:[%s2476_s27 + $0x180] ss:$8 sps:$4 sm:$0xff]  }
  0x1c   : > { %767 = vmatprep.subr.bf16.mxu0 %v2427_v1  ;;  %2293 = vmatprep.subr.bf16.mxu1 %v2427_v1  ;;  %v2377_v46 = vld [vmem:[%s2476_s27 + $0x94] ss:$8 sps:$4 sm:$0xff]   ;;  %v2381_v48 = vld [vmem:[%s2476_s27 + $0x90] ss:$8 sps:$4 sm:$0xff]   ;;  %v2383_v50 = vld [vmem:[%s2476_s27 + $0xa4] ss:$8 sps:$4 sm:$0xff]  }
  0x1d   : > { %v2379_v47 = vld [vmem:[%s2476_s27 + $0x194] ss:$8 sps:$4 sm:$0xff]   ;;  %v2382_v49 = vld [vmem:[%s2476_s27 + $0x190] ss:$8 sps:$4 sm:$0xff]   ;;  %v2385_v51 = vld [vmem:[%s2476_s27 + $0x1a4] ss:$8 sps:$4 sm:$0xff]  }
  0x1e   : > { %v2387_v52 = vld [vmem:[%s2476_s27 + $0xa0] ss:$8 sps:$4 sm:$0xff]   ;;  %v2389_v54 = vld [vmem:[%s2476_s27 + $0xb4] ss:$8 sps:$4 sm:$0xff]   ;;  %v2393_v56 = vld [vmem:[%s2476_s27 + $0xb0] ss:$8 sps:$4 sm:$0xff]  }
  0x1f   : > { %768 = vmatpush1.bf16.msra.mxu0 %v2320_v9  ;;  %2302 = vmatpush1.bf16.msra.mxu1 %v2320_v9  ;;  %v2388_v53 = vld [vmem:[%s2476_s27 + $0x1a0] ss:$8 sps:$4 sm:$0xff]   ;;  %v2391_v55 = vld [vmem:[%s2476_s27 + $0x1b4] ss:$8 sps:$4 sm:$0xff]   ;;  %v2394_v57 = vld [vmem:[%s2476_s27 + $0x1b0] ss:$8 sps:$4 sm:$0xff]  }
  0x20   : > { %769 = vmatprep.subr.bf16.mxu0 %v2427_v1  ;;  %2294 = vmatprep.subr.bf16.mxu1 %v2427_v1  ;;  %v2395_v58 = vld [vmem:[%s2476_s27 + $0xc4] ss:$8 sps:$4 sm:$0xff]   ;;  %v2399_v60 = vld [vmem:[%s2476_s27 + $0xc0] ss:$8 sps:$4 sm:$0xff]   ;;  %v2401_v62 = vld [vmem:[%s2476_s27 + $0xd4] ss:$8 sps:$4 sm:$0xff]  }
  0x21   : > { %v2397_v59 = vld [vmem:[%s2476_s27 + $0x1c4] ss:$8 sps:$4 sm:$0xff]   ;;  %v2400_v61 = vld [vmem:[%s2476_s27 + $0x1c0] ss:$8 sps:$4 sm:$0xff]   ;;  %v2403_v63 = vld [vmem:[%s2476_s27 + $0x1d4] ss:$8 sps:$4 sm:$0xff]  }
  0x22   : > { %v2405_v0 = vld [vmem:[%s2476_s27 + $0xd0] ss:$8 sps:$4 sm:$0xff]   ;;  %v2407_v2 = vld [vmem:[%s2476_s27 + $0xe4] ss:$8 sps:$4 sm:$0xff]   ;;  %v2411_v4 = vld [vmem:[%s2476_s27 + $0xe0] ss:$8 sps:$4 sm:$0xff]  }
  0x23   : > { %770 = vmatpush1.bf16.msra.mxu0 %v2321_v10  ;;  %2303 = vmatpush1.bf16.msra.mxu1 %v2321_v10  ;;  %v2409_v3 = vld [vmem:[%s2476_s27 + $0x1e4] ss:$8 sps:$4 sm:$0xff]   ;;  %v2412_v5 = vld [vmem:[%s2476_s27 + $0x1e0] ss:$8 sps:$4 sm:$0xff]   ;;  %v2413_v6 = vld [vmem:[%s2476_s27 + $0xf4] ss:$8 sps:$4 sm:$0xff]  }
  0x24   : > { %771 = vmatprep.subr.bf16.mxu0 %v2427_v1  ;;  %2295 = vmatprep.subr.bf16.mxu1 %v2427_v1  ;;  %v2406_v1 = vld [vmem:[%s2476_s27 + $0x1d0] ss:$8 sps:$4 sm:$0xff]   ;;  %v2415_v7 = vld [vmem:[%s2476_s27 + $0x1f4] ss:$8 sps:$4 sm:$0xff]   ;;  %v2603_v10 = vld [vmem:[%s2745_s2] ss:$0 sm:$0xff] }
  0x25   : > { %v2417_v8 = vld [vmem:[%s2476_s27 + $0xf0] ss:$8 sps:$4 sm:$0xff]  }
  0x26   : > { %v2418_v9 = vld [vmem:[%s2476_s27 + $0x1f0] ss:$8 sps:$4 sm:$0xff]  }
  0x27   : > { %772 = vmatpush1.bf16.msra.mxu0 %v2322_v11  ;;  %2304 = vmatpush1.bf16.msra.mxu1 %v2322_v11  ;;  %v1938_v11 = vld [vmem:[%s2598_s18] sm:$0xff]  }
  0x2a   : > { %788 = vmatmul.mubr.bf16.vlgmr.msra.gmra.mrb[0].mxu0 %v2323_v12  ;;  %916 = vmatmul.mubr.bf16.vlgmr.msra.gmra.mrb[0].mxu1 %v2326_v13  ;;  %v2240_v12 = vld [vmem:[%s2598_s18 + $0x80] sm:$0xff]  }
  0x2b   : > { %1775 = vmatprep.mubr.msk.bf16.mxu0 %vm658_vm0, %v2329_v14  ;;  %1791 = vmatprep.mubr.msk.bf16.mxu1 %vm658_vm0, %v2331_v15 }
  0x32   : > { %796 = vmatmul.mubr.bf16.gmra.mrb[4].mxu0 %v2333_v16  ;;  %924 = vmatmul.mubr.bf16.gmra.mrb[4].mxu1 %v2334_v17 }
  0x33   : > { %1776 = vmatprep.mubr.msk.bf16.mxu0 %vm658_vm0, %v2335_v18  ;;  %1792 = vmatprep.mubr.msk.bf16.mxu1 %vm658_vm0, %v2337_v19  ;;  %v1939_v19 = vunpack.c.l.bf16 %v1938_v11 }
  0x3a   : > { %804 = vmatmul.mubr.bf16.gmra.mrb[8].mxu0 %v2339_v20  ;;  %932 = vmatmul.mubr.bf16.gmra.mrb[8].mxu1 %v2340_v21  ;;  %v2003_v20 = vunpack.c.l.bf16 %v2240_v12 }
  0x3b   : > { %1777 = vmatprep.mubr.msk.bf16.mxu0 %vm658_vm0, %v2341_v22  ;;  %1793 = vmatprep.mubr.msk.bf16.mxu1 %vm658_vm0, %v2343_v23  ;;  %v1940_v22 = vunpack.c.h.bf16 %v1938_v11 }
  0x42   : > { %812 = vmatmul.mubr.bf16.gmra.mrb[12].mxu0 %v2345_v24  ;;  %940 = vmatmul.mubr.bf16.gmra.mrb[12].mxu1 %v2346_v25  ;;  %v2004_v24 = vunpack.c.h.bf16 %v2240_v12 }
  0x43   : > { %1778 = vmatprep.mubr.msk.bf16.mxu0 %vm658_vm0, %v2347_v26  ;;  %1794 = vmatprep.mubr.msk.bf16.mxu1 %vm658_vm0, %v2349_v27 }
  0x4a   : > { %820 = vmatmul.mubr.bf16.gmra.mrb[16].mxu0 %v2351_v28  ;;  %948 = vmatmul.mubr.bf16.gmra.mrb[16].mxu1 %v2352_v29 }
  0x4b   : > { %1779 = vmatprep.mubr.msk.bf16.mxu0 %vm658_vm0, %v2353_v30  ;;  %1795 = vmatprep.mubr.msk.bf16.mxu1 %vm658_vm0, %v2355_v31 }
  0x52   : > { %828 = vmatmul.mubr.bf16.gmra.mrb[20].mxu0 %v2357_v32  ;;  %956 = vmatmul.mubr.bf16.gmra.mrb[20].mxu1 %v2358_v33 }
  0x53   : > { %1780 = vmatprep.mubr.msk.bf16.mxu0 %vm658_vm0, %v2359_v34  ;;  %1796 = vmatprep.mubr.msk.bf16.mxu1 %vm658_vm0, %v2361_v35 }
  0x5a   : > { %836 = vmatmul.mubr.bf16.gmra.mrb[24].mxu0 %v2363_v36  ;;  %964 = vmatmul.mubr.bf16.gmra.mrb[24].mxu1 %v2364_v37  ;;  %v2225_v37 = vld [vmem:[%s2598_s18 + $0x8] sm:$0xff]  }
  0x5b   : > { %1781 = vmatprep.mubr.msk.bf16.mxu0 %vm658_vm0, %v2365_v38  ;;  %1797 = vmatprep.mubr.msk.bf16.mxu1 %vm658_vm0, %v2367_v39  ;;  %v2241_v38 = vld [vmem:[%s2598_s18 + $0x88] sm:$0xff]  }
  0x62   : > { %844 = vmatmul.mubr.bf16.gmra.mrb[28].mxu0 %v2369_v40  ;;  %972 = vmatmul.mubr.bf16.gmra.mrb[28].mxu1 %v2370_v41 }
  0x63   : > { %1782 = vmatprep.mubr.msk.bf16.mxu0 %vm658_vm0, %v2371_v42  ;;  %1798 = vmatprep.mubr.msk.bf16.mxu1 %vm658_vm0, %v2373_v43 }
  0x6a   : > { %852 = vmatmul.mubr.bf16.gmra.mrb[32].mxu0 %v2375_v44  ;;  %980 = vmatmul.mubr.bf16.gmra.mrb[32].mxu1 %v2376_v45 }
  0x6b   : > { %1783 = vmatprep.mubr.msk.bf16.mxu0 %vm658_vm0, %v2377_v46  ;;  %1799 = vmatprep.mubr.msk.bf16.mxu1 %vm658_vm0, %v2379_v47  ;;  %v1943_v47 = vunpack.c.l.bf16 %v2225_v37 }
  0x72   : > { %860 = vmatmul.mubr.bf16.gmra.mrb[36].mxu0 %v2381_v48  ;;  %988 = vmatmul.mubr.bf16.gmra.mrb[36].mxu1 %v2382_v49  ;;  %v2007_v48 = vunpack.c.l.bf16 %v2241_v38 }
  0x73   : > { %1784 = vmatprep.mubr.msk.bf16.mxu0 %vm658_vm0, %v2383_v50  ;;  %1800 = vmatprep.mubr.msk.bf16.mxu1 %vm658_vm0, %v2385_v51  ;;  %v1944_v50 = vunpack.c.h.bf16 %v2225_v37 }
  0x7a   : > { %868 = vmatmul.mubr.bf16.gmra.mrb[40].mxu0 %v2387_v52  ;;  %996 = vmatmul.mubr.bf16.gmra.mrb[40].mxu1 %v2388_v53  ;;  %v2008_v52 = vunpack.c.h.bf16 %v2241_v38 }
  0x7b   : > { %1785 = vmatprep.mubr.msk.bf16.mxu0 %vm658_vm0, %v2389_v54  ;;  %1801 = vmatprep.mubr.msk.bf16.mxu1 %vm658_vm0, %v2391_v55 }
  0x82   : > { %876 = vmatmul.mubr.bf16.gmra.mrb[44].mxu0 %v2393_v56  ;;  %1004 = vmatmul.mubr.bf16.gmra.mrb[44].mxu1 %v2394_v57 }
  0x83   : > { %1786 = vmatprep.mubr.msk.bf16.mxu0 %vm658_vm0, %v2395_v58  ;;  %1802 = vmatprep.mubr.msk.bf16.mxu1 %vm658_vm0, %v2397_v59 }
  0x8a   : > { %884 = vmatmul.mubr.bf16.gmra.mrb[48].mxu0 %v2399_v60  ;;  %1012 = vmatmul.mubr.bf16.gmra.mrb[48].mxu1 %v2400_v61 }
  0x8b   : > { %1787 = vmatprep.mubr.msk.bf16.mxu0 %vm658_vm0, %v2401_v62  ;;  %1803 = vmatprep.mubr.msk.bf16.mxu1 %vm658_vm0, %v2403_v63 }
  0x92   : > { %892 = vmatmul.mubr.bf16.gmra.mrb[52].mxu0 %v2405_v0  ;;  %1020 = vmatmul.mubr.bf16.gmra.mrb[52].mxu1 %v2406_v1  ;;  %v2226_v1 = vld [vmem:[%s2598_s18 + $0x10] sm:$0xff]  }
  0x93   : > { %1788 = vmatprep.mubr.msk.bf16.mxu0 %vm658_vm0, %v2407_v2  ;;  %1804 = vmatprep.mubr.msk.bf16.mxu1 %vm658_vm0, %v2409_v3  ;;  %v2242_v2 = vld [vmem:[%s2598_s18 + $0x90] sm:$0xff]   ;;  %v1947_v12 = vunpack.c.l.bf16 %v2226_v1 }
  0x9a   : > { %900 = vmatmul.mubr.bf16.gmra.mrb[56].mxu0 %v2411_v4  ;;  %1028 = vmatmul.mubr.bf16.gmra.mrb[56].mxu1 %v2412_v5 }
  0x9b   : > { %1789 = vmatprep.mubr.msk.bf16.mxu0 %vm658_vm0, %v2413_v6  ;;  %1805 = vmatprep.mubr.msk.bf16.mxu1 %vm658_vm0, %v2415_v7 }
  0xa2   : > { %908 = vmatmul.mubr.bf16.gmra.mrb[60].mxu0 %v2417_v8  ;;  %1036 = vmatmul.mubr.bf16.gmra.mrb[60].mxu1 %v2418_v9 }
  0xfd   : > { %v789_v13 = vpop.f32.mrb[0].mxu0  ;;  %v917_v14 = vpop.f32.mrb[0].mxu1 }
  0xfe   : > { %v790_v15 = vadd.f32 %v2603_v10, %v789_v13  ;;  %v918_v16 = vadd.f32 %v2603_v10, %v917_v14  ;;  %v791_v17 = vpop.f32.mrb[1].mxu0  ;;  %v919_v18 = vpop.f32.mrb[1].mxu1  ;;  %v2011_v13 = vunpack.c.l.bf16 %v2242_v2 }
  0xff   : > { %v792_v21 = vpop.f32.mrb[2].mxu0  ;;  %v920_v23 = vpop.f32.mrb[2].mxu1  ;;  %v2012_v17 = vunpack.c.h.bf16 %v2242_v2 }
 0x100   : > { %v1044_v25 = vmax.f32 %v790_v15, 0.0  ;;  %v1076_v26 = vmax.f32 %v918_v16, 0.0  ;;  %v793_v27 = vadd.f32 %v2603_v10, %v792_v21  ;;  %v921_v28 = vadd.f32 %v2603_v10, %v920_v23  ;;  %v794_v29 = vpop.f32.mrb[3].mxu0  ;;  %v922_v30 = vpop.f32.mrb[3].mxu1 }
 0x101   : > { %v1948_v15 = vunpack.c.h.bf16 %v2226_v1  ;;  %v2227_v30 = vld [vmem:[%s2598_s18 + $0x18] sm:$0xff]  }
 0x102   : > { %v1045_v31 = vmax.f32 %v793_v27, 0.0  ;;  %v1077_v32 = vmax.f32 %v921_v28, 0.0  ;;  %v1236_v33 = vadd.f32 %v1939_v19, %v1044_v25  ;;  %v1268_v34 = vadd.f32 %v2003_v20, %v1076_v26 }
 0x104   : > { %v1237_v35 = vadd.f32 %v1940_v22, %v1045_v31  ;;  %v1269_v36 = vadd.f32 %v2004_v24, %v1077_v32  ;;  %v2243_v31 = vld [vmem:[%s2598_s18 + $0x98] sm:$0xff]  }
 0x105   : > { %v797_v39 = vpop.f32.mrb[4].mxu0  ;;  %v925_v40 = vpop.f32.mrb[4].mxu1 }
 0x106   : > { %v2068_v41 = vpack.c.bf16 %v1237_v35, %v1236_v33  ;;  %v2148_v42 = vpack.c.bf16 %v1269_v36, %v1268_v34  ;;  %v798_v43 = vadd.f32 %v2603_v10, %v797_v39  ;;  %v926_v44 = vadd.f32 %v2603_v10, %v925_v40  ;;  %v799_v45 = vpop.f32.mrb[5].mxu0  ;;  %v927_v46 = vpop.f32.mrb[5].mxu1 }
 0x107   : > { %v800_v49 = vpop.f32.mrb[6].mxu0  ;;  %v928_v51 = vpop.f32.mrb[6].mxu1  ;;  %v1951_v40 = vunpack.c.l.bf16 %v2227_v30  ;;  %v2016_v45 = vunpack.c.h.bf16 %v2243_v31 }
 0x108   : > { %2069 = vst [vmem:[%s2618_s24] sm:$0xff] %v2068_v41   ;;  %2271 = vst [vmem:[%s2618_s24 + $0x80] sm:$0xff] %v2148_v42   ;;  %v1046_v53 = vmax.f32 %v798_v43, 0.0  ;;  %v1078_v54 = vmax.f32 %v926_v44, 0.0  ;;  %v801_v55 = vadd.f32 %v2603_v10, %v800_v49  ;;  %v929_v56 = vadd.f32 %v2603_v10, %v928_v51  ;;  %v802_v57 = vpop.f32.mrb[7].mxu0  ;;  %v930_v58 = vpop.f32.mrb[7].mxu1 }
 0x109   : > { %v2015_v41 = vunpack.c.l.bf16 %v2243_v31  ;;  %v1952_v43 = vunpack.c.h.bf16 %v2227_v30  ;;  %v2228_v58 = vld [vmem:[%s2598_s18 + $0x20] sm:$0xff]  }
 0x10a   : > { %v1047_v59 = vmax.f32 %v801_v55, 0.0  ;;  %v1079_v60 = vmax.f32 %v929_v56, 0.0  ;;  %v1238_v61 = vadd.f32 %v1943_v47, %v1046_v53  ;;  %v1270_v62 = vadd.f32 %v2007_v48, %v1078_v54 }
 0x10c   : > { %v1239_v63 = vadd.f32 %v1944_v50, %v1047_v59  ;;  %v1271_v0 = vadd.f32 %v2008_v52, %v1079_v60  ;;  %v2244_v59 = vld [vmem:[%s2598_s18 + $0xa0] sm:$0xff]  }
 0x10d   : > { %v805_v3 = vpop.f32.mrb[8].mxu0  ;;  %v933_v4 = vpop.f32.mrb[8].mxu1 }
 0x10e   : > { %v2073_v5 = vpack.c.bf16 %v1239_v63, %v1238_v61  ;;  %v2153_v6 = vpack.c.bf16 %v1271_v0, %v1270_v62  ;;  %v806_v7 = vadd.f32 %v2603_v10, %v805_v3  ;;  %v934_v8 = vadd.f32 %v2603_v10, %v933_v4  ;;  %v807_v9 = vpop.f32.mrb[9].mxu0  ;;  %v935_v11 = vpop.f32.mrb[9].mxu1 }
 0x10f   : > { %v808_v14 = vpop.f32.mrb[10].mxu0  ;;  %v936_v16 = vpop.f32.mrb[10].mxu1  ;;  %v1955_v4 = vunpack.c.l.bf16 %v2228_v58  ;;  %v2020_v9 = vunpack.c.h.bf16 %v2244_v59 }
 0x110   : > { %2256 = vst [vmem:[%s2618_s24 + $0x8] sm:$0xff] %v2073_v5   ;;  %2272 = vst [vmem:[%s2618_s24 + $0x88] sm:$0xff] %v2153_v6   ;;  %v1048_v18 = vmax.f32 %v806_v7, 0.0  ;;  %v1080_v19 = vmax.f32 %v934_v8, 0.0  ;;  %v809_v20 = vadd.f32 %v2603_v10, %v808_v14  ;;  %v937_v21 = vadd.f32 %v2603_v10, %v936_v16  ;;  %v810_v22 = vpop.f32.mrb[11].mxu0  ;;  %v938_v23 = vpop.f32.mrb[11].mxu1 }
 0x111   : > { %v2019_v5 = vunpack.c.l.bf16 %v2244_v59  ;;  %v1956_v7 = vunpack.c.h.bf16 %v2228_v58  ;;  %v2229_v23 = vld [vmem:[%s2598_s18 + $0x28] sm:$0xff]  }
 0x112   : > { %v1049_v24 = vmax.f32 %v809_v20, 0.0  ;;  %v1081_v25 = vmax.f32 %v937_v21, 0.0  ;;  %v1240_v26 = vadd.f32 %v1947_v12, %v1048_v18  ;;  %v1272_v27 = vadd.f32 %v2011_v13, %v1080_v19 }
 0x114   : > { %v1241_v28 = vadd.f32 %v1948_v15, %v1049_v24  ;;  %v1273_v29 = vadd.f32 %v2012_v17, %v1081_v25  ;;  %v2245_v24 = vld [vmem:[%s2598_s18 + $0xa8] sm:$0xff]  }
 0x115   : > { %v813_v32 = vpop.f32.mrb[12].mxu0  ;;  %v941_v33 = vpop.f32.mrb[12].mxu1 }
 0x116   : > { %v2078_v34 = vpack.c.bf16 %v1241_v28, %v1240_v26  ;;  %v2158_v35 = vpack.c.bf16 %v1273_v29, %v1272_v27  ;;  %v814_v36 = vadd.f32 %v2603_v10, %v813_v32  ;;  %v942_v37 = vadd.f32 %v2603_v10, %v941_v33  ;;  %v815_v38 = vpop.f32.mrb[13].mxu0  ;;  %v943_v39 = vpop.f32.mrb[13].mxu1 }
 0x117   : > { %v816_v42 = vpop.f32.mrb[14].mxu0  ;;  %v944_v44 = vpop.f32.mrb[14].mxu1  ;;  %v1959_v33 = vunpack.c.l.bf16 %v2229_v23  ;;  %v2024_v38 = vunpack.c.h.bf16 %v2245_v24 }
 0x118   : > { %2257 = vst [vmem:[%s2618_s24 + $0x10] sm:$0xff] %v2078_v34   ;;  %2273 = vst [vmem:[%s2618_s24 + $0x90] sm:$0xff] %v2158_v35   ;;  %v1050_v46 = vmax.f32 %v814_v36, 0.0  ;;  %v1082_v47 = vmax.f32 %v942_v37, 0.0  ;;  %v817_v48 = vadd.f32 %v2603_v10, %v816_v42  ;;  %v945_v49 = vadd.f32 %v2603_v10, %v944_v44  ;;  %v818_v50 = vpop.f32.mrb[15].mxu0  ;;  %v946_v51 = vpop.f32.mrb[15].mxu1 }
 0x119   : > { %v2023_v34 = vunpack.c.l.bf16 %v2245_v24  ;;  %v1960_v36 = vunpack.c.h.bf16 %v2229_v23  ;;  %v2230_v51 = vld [vmem:[%s2598_s18 + $0x30] sm:$0xff]  }
 0x11a   : > { %v1051_v52 = vmax.f32 %v817_v48, 0.0  ;;  %v1083_v53 = vmax.f32 %v945_v49, 0.0  ;;  %v1242_v54 = vadd.f32 %v1951_v40, %v1050_v46  ;;  %v1274_v55 = vadd.f32 %v2015_v41, %v1082_v47 }
 0x11c   : > { %v1243_v56 = vadd.f32 %v1952_v43, %v1051_v52  ;;  %v1275_v57 = vadd.f32 %v2016_v45, %v1083_v53  ;;  %v2246_v52 = vld [vmem:[%s2598_s18 + $0xb0] sm:$0xff]  }
 0x11d   : > { %v821_v60 = vpop.f32.mrb[16].mxu0  ;;  %v949_v61 = vpop.f32.mrb[16].mxu1 }
 0x11e   : > { %v2083_v62 = vpack.c.bf16 %v1243_v56, %v1242_v54  ;;  %v2163_v63 = vpack.c.bf16 %v1275_v57, %v1274_v55  ;;  %v822_v0 = vadd.f32 %v2603_v10, %v821_v60  ;;  %v950_v1 = vadd.f32 %v2603_v10, %v949_v61  ;;  %v823_v2 = vpop.f32.mrb[17].mxu0  ;;  %v951_v3 = vpop.f32.mrb[17].mxu1 }
 0x11f   : > { %v824_v6 = vpop.f32.mrb[18].mxu0  ;;  %v952_v8 = vpop.f32.mrb[18].mxu1  ;;  %v1963_v61 = vunpack.c.l.bf16 %v2230_v51  ;;  %v2028_v2 = vunpack.c.h.bf16 %v2246_v52 }
 0x120   : > { %2258 = vst [vmem:[%s2618_s24 + $0x18] sm:$0xff] %v2083_v62   ;;  %2274 = vst [vmem:[%s2618_s24 + $0x98] sm:$0xff] %v2163_v63   ;;  %v1052_v11 = vmax.f32 %v822_v0, 0.0  ;;  %v1084_v12 = vmax.f32 %v950_v1, 0.0  ;;  %v825_v13 = vadd.f32 %v2603_v10, %v824_v6  ;;  %v953_v14 = vadd.f32 %v2603_v10, %v952_v8  ;;  %v826_v15 = vpop.f32.mrb[19].mxu0  ;;  %v954_v16 = vpop.f32.mrb[19].mxu1 }
 0x121   : > { %v2027_v62 = vunpack.c.l.bf16 %v2246_v52  ;;  %v1964_v0 = vunpack.c.h.bf16 %v2230_v51  ;;  %v2231_v16 = vld [vmem:[%s2598_s18 + $0x38] sm:$0xff]  }
 0x122   : > { %v1053_v17 = vmax.f32 %v825_v13, 0.0  ;;  %v1085_v18 = vmax.f32 %v953_v14, 0.0  ;;  %v1244_v19 = vadd.f32 %v1955_v4, %v1052_v11  ;;  %v1276_v20 = vadd.f32 %v2019_v5, %v1084_v12 }
 0x124   : > { %v1245_v21 = vadd.f32 %v1956_v7, %v1053_v17  ;;  %v1277_v22 = vadd.f32 %v2020_v9, %v1085_v18  ;;  %v2247_v17 = vld [vmem:[%s2598_s18 + $0xb8] sm:$0xff]  }
 0x125   : > { %v829_v25 = vpop.f32.mrb[20].mxu0  ;;  %v957_v26 = vpop.f32.mrb[20].mxu1 }
 0x126   : > { %v2088_v27 = vpack.c.bf16 %v1245_v21, %v1244_v19  ;;  %v2168_v28 = vpack.c.bf16 %v1277_v22, %v1276_v20  ;;  %v830_v29 = vadd.f32 %v2603_v10, %v829_v25  ;;  %v958_v30 = vadd.f32 %v2603_v10, %v957_v26  ;;  %v831_v31 = vpop.f32.mrb[21].mxu0  ;;  %v959_v32 = vpop.f32.mrb[21].mxu1 }
 0x127   : > { %v832_v35 = vpop.f32.mrb[22].mxu0  ;;  %v960_v37 = vpop.f32.mrb[22].mxu1  ;;  %v1967_v26 = vunpack.c.l.bf16 %v2231_v16  ;;  %v2032_v31 = vunpack.c.h.bf16 %v2247_v17 }
 0x128   : > { %2259 = vst [vmem:[%s2618_s24 + $0x20] sm:$0xff] %v2088_v27   ;;  %2275 = vst [vmem:[%s2618_s24 + $0xa0] sm:$0xff] %v2168_v28   ;;  %v1054_v39 = vmax.f32 %v830_v29, 0.0  ;;  %v1086_v40 = vmax.f32 %v958_v30, 0.0  ;;  %v833_v41 = vadd.f32 %v2603_v10, %v832_v35  ;;  %v961_v42 = vadd.f32 %v2603_v10, %v960_v37  ;;  %v834_v43 = vpop.f32.mrb[23].mxu0  ;;  %v962_v44 = vpop.f32.mrb[23].mxu1 }
 0x129   : > { %v2031_v27 = vunpack.c.l.bf16 %v2247_v17  ;;  %v1968_v29 = vunpack.c.h.bf16 %v2231_v16  ;;  %v2232_v44 = vld [vmem:[%s2598_s18 + $0x40] sm:$0xff]  }
 0x12a   : > { %v1055_v45 = vmax.f32 %v833_v41, 0.0  ;;  %v1087_v46 = vmax.f32 %v961_v42, 0.0  ;;  %v1246_v47 = vadd.f32 %v1959_v33, %v1054_v39  ;;  %v1278_v48 = vadd.f32 %v2023_v34, %v1086_v40 }
 0x12c   : > { %v1247_v49 = vadd.f32 %v1960_v36, %v1055_v45  ;;  %v1279_v50 = vadd.f32 %v2024_v38, %v1087_v46  ;;  %v2248_v45 = vld [vmem:[%s2598_s18 + $0xc0] sm:$0xff]  }
 0x12d   : > { %v837_v53 = vpop.f32.mrb[24].mxu0  ;;  %v965_v54 = vpop.f32.mrb[24].mxu1 }
 0x12e   : > { %v2093_v55 = vpack.c.bf16 %v1247_v49, %v1246_v47  ;;  %v2173_v56 = vpack.c.bf16 %v1279_v50, %v1278_v48  ;;  %v838_v57 = vadd.f32 %v2603_v10, %v837_v53  ;;  %v966_v58 = vadd.f32 %v2603_v10, %v965_v54  ;;  %v839_v59 = vpop.f32.mrb[25].mxu0  ;;  %v967_v60 = vpop.f32.mrb[25].mxu1 }
 0x12f   : > { %v840_v63 = vpop.f32.mrb[26].mxu0  ;;  %v968_v1 = vpop.f32.mrb[26].mxu1  ;;  %v1971_v54 = vunpack.c.l.bf16 %v2232_v44  ;;  %v2036_v59 = vunpack.c.h.bf16 %v2248_v45 }
 0x130   : > { %2260 = vst [vmem:[%s2618_s24 + $0x28] sm:$0xff] %v2093_v55   ;;  %2276 = vst [vmem:[%s2618_s24 + $0xa8] sm:$0xff] %v2173_v56   ;;  %v1056_v3 = vmax.f32 %v838_v57, 0.0  ;;  %v1088_v4 = vmax.f32 %v966_v58, 0.0  ;;  %v841_v5 = vadd.f32 %v2603_v10, %v840_v63  ;;  %v969_v6 = vadd.f32 %v2603_v10, %v968_v1  ;;  %v842_v7 = vpop.f32.mrb[27].mxu0  ;;  %v970_v8 = vpop.f32.mrb[27].mxu1 }
 0x131   : > { %v2035_v55 = vunpack.c.l.bf16 %v2248_v45  ;;  %v1972_v57 = vunpack.c.h.bf16 %v2232_v44  ;;  %v2233_v8 = vld [vmem:[%s2598_s18 + $0x48] sm:$0xff]  }
 0x132   : > { %v1057_v9 = vmax.f32 %v841_v5, 0.0  ;;  %v1089_v11 = vmax.f32 %v969_v6, 0.0  ;;  %v1248_v12 = vadd.f32 %v1963_v61, %v1056_v3  ;;  %v1280_v13 = vadd.f32 %v2027_v62, %v1088_v4 }
 0x134   : > { %v1249_v14 = vadd.f32 %v1964_v0, %v1057_v9  ;;  %v1281_v15 = vadd.f32 %v2028_v2, %v1089_v11  ;;  %v2249_v9 = vld [vmem:[%s2598_s18 + $0xc8] sm:$0xff]  }
 0x135   : > { %v845_v18 = vpop.f32.mrb[28].mxu0  ;;  %v973_v19 = vpop.f32.mrb[28].mxu1 }
 0x136   : > { %v2098_v20 = vpack.c.bf16 %v1249_v14, %v1248_v12  ;;  %v2178_v21 = vpack.c.bf16 %v1281_v15, %v1280_v13  ;;  %v846_v22 = vadd.f32 %v2603_v10, %v845_v18  ;;  %v974_v23 = vadd.f32 %v2603_v10, %v973_v19  ;;  %v847_v24 = vpop.f32.mrb[29].mxu0  ;;  %v975_v25 = vpop.f32.mrb[29].mxu1 }
 0x137   : > { %v848_v28 = vpop.f32.mrb[30].mxu0  ;;  %v976_v30 = vpop.f32.mrb[30].mxu1  ;;  %v1975_v19 = vunpack.c.l.bf16 %v2233_v8  ;;  %v2040_v24 = vunpack.c.h.bf16 %v2249_v9 }
 0x138   : > { %2261 = vst [vmem:[%s2618_s24 + $0x30] sm:$0xff] %v2098_v20   ;;  %2277 = vst [vmem:[%s2618_s24 + $0xb0] sm:$0xff] %v2178_v21   ;;  %v1058_v32 = vmax.f32 %v846_v22, 0.0  ;;  %v1090_v33 = vmax.f32 %v974_v23, 0.0  ;;  %v849_v34 = vadd.f32 %v2603_v10, %v848_v28  ;;  %v977_v35 = vadd.f32 %v2603_v10, %v976_v30  ;;  %v850_v36 = vpop.f32.mrb[31].mxu0  ;;  %v978_v37 = vpop.f32.mrb[31].mxu1 }
 0x139   : > { %v2039_v20 = vunpack.c.l.bf16 %v2249_v9  ;;  %v1976_v22 = vunpack.c.h.bf16 %v2233_v8  ;;  %v2234_v37 = vld [vmem:[%s2598_s18 + $0x50] sm:$0xff]  }
 0x13a   : > { %v1059_v38 = vmax.f32 %v849_v34, 0.0  ;;  %v1091_v39 = vmax.f32 %v977_v35, 0.0  ;;  %v1250_v40 = vadd.f32 %v1967_v26, %v1058_v32  ;;  %v1282_v41 = vadd.f32 %v2031_v27, %v1090_v33 }
 0x13c   : > { %v1251_v42 = vadd.f32 %v1968_v29, %v1059_v38  ;;  %v1283_v43 = vadd.f32 %v2032_v31, %v1091_v39  ;;  %v2250_v38 = vld [vmem:[%s2598_s18 + $0xd0] sm:$0xff]  }
 0x13d   : > { %v853_v46 = vpop.f32.mrb[32].mxu0  ;;  %v981_v47 = vpop.f32.mrb[32].mxu1 }
 0x13e   : > { %v2103_v48 = vpack.c.bf16 %v1251_v42, %v1250_v40  ;;  %v2183_v49 = vpack.c.bf16 %v1283_v43, %v1282_v41  ;;  %v854_v50 = vadd.f32 %v2603_v10, %v853_v46  ;;  %v982_v51 = vadd.f32 %v2603_v10, %v981_v47  ;;  %v855_v52 = vpop.f32.mrb[33].mxu0  ;;  %v983_v53 = vpop.f32.mrb[33].mxu1 }
 0x13f   : > { %v856_v56 = vpop.f32.mrb[34].mxu0  ;;  %v984_v58 = vpop.f32.mrb[34].mxu1  ;;  %v1979_v47 = vunpack.c.l.bf16 %v2234_v37  ;;  %v2044_v52 = vunpack.c.h.bf16 %v2250_v38 }
 0x140   : > { %2262 = vst [vmem:[%s2618_s24 + $0x38] sm:$0xff] %v2103_v48   ;;  %2278 = vst [vmem:[%s2618_s24 + $0xb8] sm:$0xff] %v2183_v49   ;;  %v1060_v60 = vmax.f32 %v854_v50, 0.0  ;;  %v1092_v61 = vmax.f32 %v982_v51, 0.0  ;;  %v857_v62 = vadd.f32 %v2603_v10, %v856_v56  ;;  %v985_v63 = vadd.f32 %v2603_v10, %v984_v58  ;;  %v858_v0 = vpop.f32.mrb[35].mxu0  ;;  %v986_v1 = vpop.f32.mrb[35].mxu1 }
 0x141   : > { %v2043_v48 = vunpack.c.l.bf16 %v2250_v38  ;;  %v1980_v50 = vunpack.c.h.bf16 %v2234_v37  ;;  %v2235_v1 = vld [vmem:[%s2598_s18 + $0x58] sm:$0xff]  }
 0x142   : > { %v1061_v2 = vmax.f32 %v857_v62, 0.0  ;;  %v1093_v3 = vmax.f32 %v985_v63, 0.0  ;;  %v1252_v4 = vadd.f32 %v1971_v54, %v1060_v60  ;;  %v1284_v5 = vadd.f32 %v2035_v55, %v1092_v61 }
 0x144   : > { %v1253_v6 = vadd.f32 %v1972_v57, %v1061_v2  ;;  %v1285_v7 = vadd.f32 %v2036_v59, %v1093_v3  ;;  %v2251_v2 = vld [vmem:[%s2598_s18 + $0xd8] sm:$0xff]  }
 0x145   : > { %v861_v11 = vpop.f32.mrb[36].mxu0  ;;  %v989_v12 = vpop.f32.mrb[36].mxu1 }
 0x146   : > { %v2108_v13 = vpack.c.bf16 %v1253_v6, %v1252_v4  ;;  %v2188_v14 = vpack.c.bf16 %v1285_v7, %v1284_v5  ;;  %v862_v15 = vadd.f32 %v2603_v10, %v861_v11  ;;  %v990_v16 = vadd.f32 %v2603_v10, %v989_v12  ;;  %v863_v17 = vpop.f32.mrb[37].mxu0  ;;  %v991_v18 = vpop.f32.mrb[37].mxu1 }
 0x147   : > { %v864_v21 = vpop.f32.mrb[38].mxu0  ;;  %v992_v23 = vpop.f32.mrb[38].mxu1  ;;  %v1983_v12 = vunpack.c.l.bf16 %v2235_v1  ;;  %v2048_v17 = vunpack.c.h.bf16 %v2251_v2 }
 0x148   : > { %2263 = vst [vmem:[%s2618_s24 + $0x40] sm:$0xff] %v2108_v13   ;;  %2279 = vst [vmem:[%s2618_s24 + $0xc0] sm:$0xff] %v2188_v14   ;;  %v1062_v25 = vmax.f32 %v862_v15, 0.0  ;;  %v1094_v26 = vmax.f32 %v990_v16, 0.0  ;;  %v865_v27 = vadd.f32 %v2603_v10, %v864_v21  ;;  %v993_v28 = vadd.f32 %v2603_v10, %v992_v23  ;;  %v866_v29 = vpop.f32.mrb[39].mxu0  ;;  %v994_v30 = vpop.f32.mrb[39].mxu1 }
 0x149   : > { %v2047_v13 = vunpack.c.l.bf16 %v2251_v2  ;;  %v1984_v15 = vunpack.c.h.bf16 %v2235_v1  ;;  %v2236_v30 = vld [vmem:[%s2598_s18 + $0x60] sm:$0xff]  }
 0x14a   : > { %v1063_v31 = vmax.f32 %v865_v27, 0.0  ;;  %v1095_v32 = vmax.f32 %v993_v28, 0.0  ;;  %v1254_v33 = vadd.f32 %v1975_v19, %v1062_v25  ;;  %v1286_v34 = vadd.f32 %v2039_v20, %v1094_v26 }
 0x14c   : > { %v1255_v35 = vadd.f32 %v1976_v22, %v1063_v31  ;;  %v1287_v36 = vadd.f32 %v2040_v24, %v1095_v32  ;;  %v2252_v31 = vld [vmem:[%s2598_s18 + $0xe0] sm:$0xff]  }
 0x14d   : > { %v869_v39 = vpop.f32.mrb[40].mxu0  ;;  %v997_v40 = vpop.f32.mrb[40].mxu1 }
 0x14e   : > { %v2113_v41 = vpack.c.bf16 %v1255_v35, %v1254_v33  ;;  %v2193_v42 = vpack.c.bf16 %v1287_v36, %v1286_v34  ;;  %v870_v43 = vadd.f32 %v2603_v10, %v869_v39  ;;  %v998_v44 = vadd.f32 %v2603_v10, %v997_v40  ;;  %v871_v45 = vpop.f32.mrb[41].mxu0  ;;  %v999_v46 = vpop.f32.mrb[41].mxu1 }
 0x14f   : > { %v872_v49 = vpop.f32.mrb[42].mxu0  ;;  %v1000_v51 = vpop.f32.mrb[42].mxu1  ;;  %v1987_v40 = vunpack.c.l.bf16 %v2236_v30  ;;  %v2052_v45 = vunpack.c.h.bf16 %v2252_v31 }
 0x150   : > { %2264 = vst [vmem:[%s2618_s24 + $0x48] sm:$0xff] %v2113_v41   ;;  %2280 = vst [vmem:[%s2618_s24 + $0xc8] sm:$0xff] %v2193_v42   ;;  %v1064_v53 = vmax.f32 %v870_v43, 0.0  ;;  %v1096_v54 = vmax.f32 %v998_v44, 0.0  ;;  %v873_v55 = vadd.f32 %v2603_v10, %v872_v49  ;;  %v1001_v56 = vadd.f32 %v2603_v10, %v1000_v51  ;;  %v874_v57 = vpop.f32.mrb[43].mxu0  ;;  %v1002_v58 = vpop.f32.mrb[43].mxu1 }
 0x151   : > { %v2051_v41 = vunpack.c.l.bf16 %v2252_v31  ;;  %v1988_v43 = vunpack.c.h.bf16 %v2236_v30  ;;  %v2237_v58 = vld [vmem:[%s2598_s18 + $0x68] sm:$0xff]  }
 0x152   : > { %v1065_v59 = vmax.f32 %v873_v55, 0.0  ;;  %v1097_v60 = vmax.f32 %v1001_v56, 0.0  ;;  %v1256_v61 = vadd.f32 %v1979_v47, %v1064_v53  ;;  %v1288_v62 = vadd.f32 %v2043_v48, %v1096_v54 }
 0x154   : > { %v1257_v63 = vadd.f32 %v1980_v50, %v1065_v59  ;;  %v1289_v0 = vadd.f32 %v2044_v52, %v1097_v60  ;;  %v2253_v59 = vld [vmem:[%s2598_s18 + $0xe8] sm:$0xff]  }
 0x155   : > { %v877_v3 = vpop.f32.mrb[44].mxu0  ;;  %v1005_v4 = vpop.f32.mrb[44].mxu1 }
 0x156   : > { %v2118_v5 = vpack.c.bf16 %v1257_v63, %v1256_v61  ;;  %v2198_v6 = vpack.c.bf16 %v1289_v0, %v1288_v62  ;;  %v878_v7 = vadd.f32 %v2603_v10, %v877_v3  ;;  %v1006_v8 = vadd.f32 %v2603_v10, %v1005_v4  ;;  %v879_v9 = vpop.f32.mrb[45].mxu0  ;;  %v1007_v11 = vpop.f32.mrb[45].mxu1 }
 0x157   : > { %v880_v14 = vpop.f32.mrb[46].mxu0  ;;  %v1008_v16 = vpop.f32.mrb[46].mxu1  ;;  %v1991_v4 = vunpack.c.l.bf16 %v2237_v58  ;;  %v2056_v9 = vunpack.c.h.bf16 %v2253_v59 }
 0x158   : > { %2265 = vst [vmem:[%s2618_s24 + $0x50] sm:$0xff] %v2118_v5   ;;  %2281 = vst [vmem:[%s2618_s24 + $0xd0] sm:$0xff] %v2198_v6   ;;  %v1066_v18 = vmax.f32 %v878_v7, 0.0  ;;  %v1098_v19 = vmax.f32 %v1006_v8, 0.0  ;;  %v881_v20 = vadd.f32 %v2603_v10, %v880_v14  ;;  %v1009_v21 = vadd.f32 %v2603_v10, %v1008_v16  ;;  %v882_v22 = vpop.f32.mrb[47].mxu0  ;;  %v1010_v23 = vpop.f32.mrb[47].mxu1 }
 0x159   : > { %v2055_v5 = vunpack.c.l.bf16 %v2253_v59  ;;  %v1992_v7 = vunpack.c.h.bf16 %v2237_v58  ;;  %v2238_v23 = vld [vmem:[%s2598_s18 + $0x70] sm:$0xff]  }
 0x15a   : > { %v1067_v24 = vmax.f32 %v881_v20, 0.0  ;;  %v1099_v25 = vmax.f32 %v1009_v21, 0.0  ;;  %v1258_v26 = vadd.f32 %v1983_v12, %v1066_v18  ;;  %v1290_v27 = vadd.f32 %v2047_v13, %v1098_v19 }
 0x15c   : > { %v1259_v28 = vadd.f32 %v1984_v15, %v1067_v24  ;;  %v1291_v29 = vadd.f32 %v2048_v17, %v1099_v25  ;;  %v2254_v24 = vld [vmem:[%s2598_s18 + $0xf0] sm:$0xff]  }
 0x15d   : > { %v885_v32 = vpop.f32.mrb[48].mxu0  ;;  %v1013_v33 = vpop.f32.mrb[48].mxu1 }
 0x15e   : > { %v2123_v34 = vpack.c.bf16 %v1259_v28, %v1258_v26  ;;  %v2203_v35 = vpack.c.bf16 %v1291_v29, %v1290_v27  ;;  %v886_v36 = vadd.f32 %v2603_v10, %v885_v32  ;;  %v1014_v37 = vadd.f32 %v2603_v10, %v1013_v33  ;;  %v887_v38 = vpop.f32.mrb[49].mxu0  ;;  %v1015_v39 = vpop.f32.mrb[49].mxu1 }
 0x15f   : > { %v888_v42 = vpop.f32.mrb[50].mxu0  ;;  %v1016_v44 = vpop.f32.mrb[50].mxu1  ;;  %v1995_v33 = vunpack.c.l.bf16 %v2238_v23  ;;  %v2060_v38 = vunpack.c.h.bf16 %v2254_v24 }
 0x160   : > { %2266 = vst [vmem:[%s2618_s24 + $0x58] sm:$0xff] %v2123_v34   ;;  %2282 = vst [vmem:[%s2618_s24 + $0xd8] sm:$0xff] %v2203_v35   ;;  %v1068_v46 = vmax.f32 %v886_v36, 0.0  ;;  %v1100_v47 = vmax.f32 %v1014_v37, 0.0  ;;  %v889_v48 = vadd.f32 %v2603_v10, %v888_v42  ;;  %v1017_v49 = vadd.f32 %v2603_v10, %v1016_v44  ;;  %v890_v50 = vpop.f32.mrb[51].mxu0  ;;  %v1018_v51 = vpop.f32.mrb[51].mxu1 }
 0x161   : > { %v2059_v34 = vunpack.c.l.bf16 %v2254_v24  ;;  %v1996_v36 = vunpack.c.h.bf16 %v2238_v23  ;;  %v2239_v51 = vld [vmem:[%s2598_s18 + $0x78] sm:$0xff]  }
 0x162   : > { %v1069_v52 = vmax.f32 %v889_v48, 0.0  ;;  %v1101_v53 = vmax.f32 %v1017_v49, 0.0  ;;  %v1260_v54 = vadd.f32 %v1987_v40, %v1068_v46  ;;  %v1292_v55 = vadd.f32 %v2051_v41, %v1100_v47 }
 0x164   : > { %v1261_v56 = vadd.f32 %v1988_v43, %v1069_v52  ;;  %v1293_v57 = vadd.f32 %v2052_v45, %v1101_v53  ;;  %v2255_v52 = vld [vmem:[%s2598_s18 + $0xf8] sm:$0xff]  }
 0x165   : > { %v893_v60 = vpop.f32.mrb[52].mxu0  ;;  %v1021_v61 = vpop.f32.mrb[52].mxu1 }
 0x166   : > { %v2128_v62 = vpack.c.bf16 %v1261_v56, %v1260_v54  ;;  %v2208_v63 = vpack.c.bf16 %v1293_v57, %v1292_v55  ;;  %v894_v0 = vadd.f32 %v2603_v10, %v893_v60  ;;  %v1022_v1 = vadd.f32 %v2603_v10, %v1021_v61  ;;  %v895_v2 = vpop.f32.mrb[53].mxu0  ;;  %v1023_v3 = vpop.f32.mrb[53].mxu1 }
 0x167   : > { %v896_v6 = vpop.f32.mrb[54].mxu0  ;;  %v1024_v8 = vpop.f32.mrb[54].mxu1  ;;  %v1999_v61 = vunpack.c.l.bf16 %v2239_v51  ;;  %v2064_v2 = vunpack.c.h.bf16 %v2255_v52 }
 0x168   : > { %2267 = vst [vmem:[%s2618_s24 + $0x60] sm:$0xff] %v2128_v62   ;;  %2283 = vst [vmem:[%s2618_s24 + $0xe0] sm:$0xff] %v2208_v63   ;;  %v1070_v11 = vmax.f32 %v894_v0, 0.0  ;;  %v1102_v12 = vmax.f32 %v1022_v1, 0.0  ;;  %v897_v13 = vadd.f32 %v2603_v10, %v896_v6  ;;  %v1025_v14 = vadd.f32 %v2603_v10, %v1024_v8  ;;  %v898_v15 = vpop.f32.mrb[55].mxu0  ;;  %v1026_v16 = vpop.f32.mrb[55].mxu1 }
 0x169   : > { %v2063_v62 = vunpack.c.l.bf16 %v2255_v52  ;;  %v2000_v0 = vunpack.c.h.bf16 %v2239_v51 }
 0x16a   : > { %v1071_v17 = vmax.f32 %v897_v13, 0.0  ;;  %v1103_v18 = vmax.f32 %v1025_v14, 0.0  ;;  %v1262_v19 = vadd.f32 %v1991_v4, %v1070_v11  ;;  %v1294_v20 = vadd.f32 %v2055_v5, %v1102_v12 }
 0x16c   : > { %v1263_v21 = vadd.f32 %v1992_v7, %v1071_v17  ;;  %v1295_v22 = vadd.f32 %v2056_v9, %v1103_v18 }
 0x16d   : > { %v901_v25 = vpop.f32.mrb[56].mxu0  ;;  %v1029_v26 = vpop.f32.mrb[56].mxu1 }
 0x16e   : > { %v2133_v27 = vpack.c.bf16 %v1263_v21, %v1262_v19  ;;  %v2213_v28 = vpack.c.bf16 %v1295_v22, %v1294_v20  ;;  %v902_v29 = vadd.f32 %v2603_v10, %v901_v25  ;;  %v1030_v30 = vadd.f32 %v2603_v10, %v1029_v26  ;;  %v903_v31 = vpop.f32.mrb[57].mxu0  ;;  %v1031_v32 = vpop.f32.mrb[57].mxu1 }
 0x16f   : > { %v904_v35 = vpop.f32.mrb[58].mxu0  ;;  %v1032_v37 = vpop.f32.mrb[58].mxu1 }
 0x170   : > { %2268 = vst [vmem:[%s2618_s24 + $0x68] sm:$0xff] %v2133_v27   ;;  %2284 = vst [vmem:[%s2618_s24 + $0xe8] sm:$0xff] %v2213_v28   ;;  %v1072_v39 = vmax.f32 %v902_v29, 0.0  ;;  %v1104_v40 = vmax.f32 %v1030_v30, 0.0  ;;  %v905_v41 = vadd.f32 %v2603_v10, %v904_v35  ;;  %v1033_v42 = vadd.f32 %v2603_v10, %v1032_v37  ;;  %v906_v43 = vpop.f32.mrb[59].mxu0  ;;  %v1034_v44 = vpop.f32.mrb[59].mxu1 }
 0x172   : > { %v1073_v45 = vmax.f32 %v905_v41, 0.0  ;;  %v1105_v46 = vmax.f32 %v1033_v42, 0.0  ;;  %v1264_v47 = vadd.f32 %v1995_v33, %v1072_v39  ;;  %v1296_v48 = vadd.f32 %v2059_v34, %v1104_v40 }
 0x174   : > { %v1265_v49 = vadd.f32 %v1996_v36, %v1073_v45  ;;  %v1297_v50 = vadd.f32 %v2060_v38, %v1105_v46 }
 0x175   : > { %v909_v53 = vpop.f32.mrb[60].mxu0  ;;  %v1037_v54 = vpop.f32.mrb[60].mxu1 }
 0x176   : > { %v2138_v55 = vpack.c.bf16 %v1265_v49, %v1264_v47  ;;  %v2218_v56 = vpack.c.bf16 %v1297_v50, %v1296_v48  ;;  %v910_v57 = vadd.f32 %v2603_v10, %v909_v53  ;;  %v1038_v58 = vadd.f32 %v2603_v10, %v1037_v54  ;;  %v911_v59 = vpop.f32.mrb[61].mxu0  ;;  %v1039_v60 = vpop.f32.mrb[61].mxu1 }
 0x177   : > { %v912_v63 = vpop.f32.mrb[62].mxu0  ;;  %v1040_v1 = vpop.f32.mrb[62].mxu1 }
 0x178   : > { %2269 = vst [vmem:[%s2618_s24 + $0x70] sm:$0xff] %v2138_v55   ;;  %2285 = vst [vmem:[%s2618_s24 + $0xf0] sm:$0xff] %v2218_v56   ;;  %v1074_v3 = vmax.f32 %v910_v57, 0.0  ;;  %v1106_v4 = vmax.f32 %v1038_v58, 0.0  ;;  %v913_v5 = vadd.f32 %v2603_v10, %v912_v63  ;;  %v1041_v6 = vadd.f32 %v2603_v10, %v1040_v1  ;;  %v914_v7 = vpop.f32.mrb[63].mxu0  ;;  %v1042_v8 = vpop.f32.mrb[63].mxu1 }
 0x17a   : > { %v1075_v9 = vmax.f32 %v913_v5, 0.0  ;;  %v1107_v11 = vmax.f32 %v1041_v6, 0.0  ;;  %v1266_v12 = vadd.f32 %v1999_v61, %v1074_v3  ;;  %v1298_v13 = vadd.f32 %v2063_v62, %v1106_v4 }
 0x17c   : > { %v1267_v14 = vadd.f32 %v2000_v0, %v1075_v9  ;;  %v1299_v15 = vadd.f32 %v2064_v2, %v1107_v11 }
 0x17e   : > { %v2143_v16 = vpack.c.bf16 %v1267_v14, %v1266_v12  ;;  %v2223_v17 = vpack.c.bf16 %v1299_v15, %v1298_v13 }
 0x180   : > { %2270 = vst [vmem:[%s2618_s24 + $0x78] sm:$0xff] %v2143_v16   ;;  %2286 = vst [vmem:[%s2618_s24 + $0xf8] sm:$0xff] %v2223_v17  }
 0x181 PF: > { %s14_s15 = sadd.s32 1, %s2425_s15  }
 0x182   : > { %p11_p4 = scmp.ge.s32.totalorder %s14_s15, 5  }
 0x184   :  { %13 = sbr.rel (!%p11_p4) target bundleno = 1 (0x1), region = 69 }

// kernel: _lambda_.16
= control target key start
LH: loop header
LB: loop body
LE: loop exit
PB: predicated region body
PF: predicated region fallthrough
CT: control target
= control target key end

     0   :  { %v1269_v0 = vmov 0   ;;  %vm336_vm0 = vcmask 130048   ;;  %s1586_s1 = inlined_call_operand.vmem [shape: bf16[144,128], index: 1, kind: input, shape index: {}]   ;;  %s1587_s0 = inlined_call_operand.vmem [shape: bf16[352,144], index: 0, kind: input, shape index: {}]   ;;  %s1588_s2 = inlined_call_operand.vmem [shape: f32[1,128], index: 2, kind: input, shape index: {}]   ;;  %s1589_s3 = inlined_call_operand.vmem [shape: bf16[352,128], index: 3, kind: output, shape index: {}]  }
   0x1   :  { %403 = vmatprep.subr.bf16.mxu0 %v1269_v0  ;;  %1175 = vmatprep.subr.bf16.mxu1 %v1269_v0  ;;  %v1194_v1 = vld [vmem:[%s1586_s1] sm:$0xff]   ;;  %v1195_v2 = vld [vmem:[%s1586_s1 + $0x8] sm:$0xff]   ;;  %v1196_v3 = vld [vmem:[%s1586_s1 + $0x10] sm:$0xff]  }
   0x2   :  { %404 = vmatpush1.bf16.msra.mxu0 %v1194_v1  ;;  %1184 = vmatpush1.bf16.msra.mxu1 %v1194_v1  ;;  %v1197_v4 = vld [vmem:[%s1586_s1 + $0x18] sm:$0xff]   ;;  %v1205_v5 = vld [vmem:[%s1587_s0 + $0x4] ss:$8 sps:$4 sm:$0xff]   ;;  %v1200_v9 = vld [vmem:[%s1586_s1 + $0x30] sm:$0xff]  }
   0x3   :  { %405 = vmatprep.subr.bf16.mxu0 %v1269_v0  ;;  %1176 = vmatprep.subr.bf16.mxu1 %v1269_v0  ;;  %v1208_v6 = vld [vmem:[%s1587_s0 + $0xb4] ss:$8 sps:$4 sm:$0xff]   ;;  %v1198_v7 = vld [vmem:[%s1586_s1 + $0x20] sm:$0xff]   ;;  %v1199_v8 = vld [vmem:[%s1586_s1 + $0x28] sm:$0xff]  }
   0x4   :  { %934 = vmatprep.mubr.msk.bf16.mxu0 %vm336_vm0, %v1205_v5  ;;  %945 = vmatprep.mubr.msk.bf16.mxu1 %vm336_vm0, %v1208_v6  ;;  %v1201_v10 = vld [vmem:[%s1586_s1 + $0x38] sm:$0xff]   ;;  %v1202_v11 = vld [vmem:[%s1586_s1 + $0x40] sm:$0xff]  }
   0x5   :  { %v1203_v12 = vld [vmem:[%s1587_s0] ss:$8 sps:$4 sm:$0xff]   ;;  %v1206_v13 = vld [vmem:[%s1587_s0 + $0xb0] ss:$8 sps:$4 sm:$0xff]   ;;  %v1209_v14 = vld [vmem:[%s1587_s0 + $0x14] ss:$8 sps:$4 sm:$0xff]  }
   0x6   :  { %406 = vmatpush1.bf16.msra.mxu0 %v1195_v2  ;;  %1185 = vmatpush1.bf16.msra.mxu1 %v1195_v2  ;;  %v1211_v15 = vld [vmem:[%s1587_s0 + $0xc4] ss:$8 sps:$4 sm:$0xff]   ;;  %v1213_v16 = vld [vmem:[%s1587_s0 + $0x10] ss:$8 sps:$4 sm:$0xff]   ;;  %v1214_v17 = vld [vmem:[%s1587_s0 + $0xc0] ss:$8 sps:$4 sm:$0xff]  }
   0x7   :  { %407 = vmatprep.subr.bf16.mxu0 %v1269_v0  ;;  %1177 = vmatprep.subr.bf16.mxu1 %v1269_v0  ;;  %v1215_v18 = vld [vmem:[%s1587_s0 + $0x24] ss:$8 sps:$4 sm:$0xff]   ;;  %v1217_v19 = vld [vmem:[%s1587_s0 + $0xd4] ss:$8 sps:$4 sm:$0xff]   ;;  %v1219_v20 = vld [vmem:[%s1587_s0 + $0x20] ss:$8 sps:$4 sm:$0xff]  }
   0x8   :  { %v1220_v21 = vld [vmem:[%s1587_s0 + $0xd0] ss:$8 sps:$4 sm:$0xff]   ;;  %v1221_v22 = vld [vmem:[%s1587_s0 + $0x34] ss:$8 sps:$4 sm:$0xff]   ;;  %v1223_v23 = vld [vmem:[%s1587_s0 + $0xe4] ss:$8 sps:$4 sm:$0xff]  }
   0x9   :  { %v1225_v24 = vld [vmem:[%s1587_s0 + $0x30] ss:$8 sps:$4 sm:$0xff]   ;;  %v1226_v25 = vld [vmem:[%s1587_s0 + $0xe0] ss:$8 sps:$4 sm:$0xff]   ;;  %v1227_v26 = vld [vmem:[%s1587_s0 + $0x44] ss:$8 sps:$4 sm:$0xff]  }
   0xa   :  { %408 = vmatpush1.bf16.msra.mxu0 %v1196_v3  ;;  %1186 = vmatpush1.bf16.msra.mxu1 %v1196_v3  ;;  %v1229_v27 = vld [vmem:[%s1587_s0 + $0xf4] ss:$8 sps:$4 sm:$0xff]   ;;  %v1231_v28 = vld [vmem:[%s1587_s0 + $0x40] ss:$8 sps:$4 sm:$0xff]   ;;  %v1232_v29 = vld [vmem:[%s1587_s0 + $0xf0] ss:$8 sps:$4 sm:$0xff]  }
   0xb   :  { %409 = vmatprep.subr.bf16.mxu0 %v1269_v0  ;;  %1178 = vmatprep.subr.bf16.mxu1 %v1269_v0  ;;  %v1233_v30 = vld [vmem:[%s1587_s0 + $0x54] ss:$8 sps:$4 sm:$0xff]   ;;  %v1235_v31 = vld [vmem:[%s1587_s0 + $0x104] ss:$8 sps:$4 sm:$0xff]   ;;  %v1237_v32 = vld [vmem:[%s1587_s0 + $0x50] ss:$8 sps:$4 sm:$0xff]  }
   0xc   :  { %v1238_v33 = vld [vmem:[%s1587_s0 + $0x100] ss:$8 sps:$4 sm:$0xff]   ;;  %v1239_v34 = vld [vmem:[%s1587_s0 + $0x64] ss:$8 sps:$4 sm:$0xff]   ;;  %v1241_v35 = vld [vmem:[%s1587_s0 + $0x114] ss:$8 sps:$4 sm:$0xff]  }
   0xd   :  { %v1243_v36 = vld [vmem:[%s1587_s0 + $0x60] ss:$8 sps:$4 sm:$0xff]   ;;  %v1244_v37 = vld [vmem:[%s1587_s0 + $0x110] ss:$8 sps:$4 sm:$0xff]   ;;  %v1245_v38 = vld [vmem:[%s1587_s0 + $0x74] ss:$8 sps:$4 sm:$0xff]  }
   0xe   :  { %410 = vmatpush1.bf16.msra.mxu0 %v1197_v4  ;;  %1187 = vmatpush1.bf16.msra.mxu1 %v1197_v4  ;;  %v1247_v39 = vld [vmem:[%s1587_s0 + $0x124] ss:$8 sps:$4 sm:$0xff]   ;;  %v1249_v40 = vld [vmem:[%s1587_s0 + $0x70] ss:$8 sps:$4 sm:$0xff]   ;;  %v1250_v41 = vld [vmem:[%s1587_s0 + $0x120] ss:$8 sps:$4 sm:$0xff]  }
   0xf   :  { %411 = vmatprep.subr.bf16.mxu0 %v1269_v0  ;;  %1179 = vmatprep.subr.bf16.mxu1 %v1269_v0  ;;  %v1251_v42 = vld [vmem:[%s1587_s0 + $0x84] ss:$8 sps:$4 sm:$0xff]   ;;  %v1253_v43 = vld [vmem:[%s1587_s0 + $0x134] ss:$8 sps:$4 sm:$0xff]   ;;  %v1255_v44 = vld [vmem:[%s1587_s0 + $0x80] ss:$8 sps:$4 sm:$0xff]  }
  0x10   :  { %v1256_v45 = vld [vmem:[%s1587_s0 + $0x130] ss:$8 sps:$4 sm:$0xff]   ;;  %v1257_v46 = vld [vmem:[%s1587_s0 + $0x94] ss:$8 sps:$4 sm:$0xff]   ;;  %v1259_v47 = vld [vmem:[%s1587_s0 + $0x144] ss:$8 sps:$4 sm:$0xff]  }
  0x11   :  { %v1261_v48 = vld [vmem:[%s1587_s0 + $0x90] ss:$8 sps:$4 sm:$0xff]   ;;  %v1262_v49 = vld [vmem:[%s1587_s0 + $0x140] ss:$8 sps:$4 sm:$0xff]   ;;  %v1263_v50 = vld [vmem:[%s1587_s0 + $0xa4] ss:$8 sps:$4 sm:$0xff]  }
  0x12   :  { %412 = vmatpush1.bf16.msra.mxu0 %v1198_v7  ;;  %1188 = vmatpush1.bf16.msra.mxu1 %v1198_v7  ;;  %v1265_v51 = vld [vmem:[%s1587_s0 + $0x154] ss:$8 sps:$4 sm:$0xff]   ;;  %v1267_v52 = vld [vmem:[%s1587_s0 + $0xa0] ss:$8 sps:$4 sm:$0xff]   ;;  %v1268_v53 = vld [vmem:[%s1587_s0 + $0x150] ss:$8 sps:$4 sm:$0xff]  }
  0x13   :  { %413 = vmatprep.subr.bf16.mxu0 %v1269_v0  ;;  %1180 = vmatprep.subr.bf16.mxu1 %v1269_v0  ;;  %v1474_v54 = vld [vmem:[%s1588_s2] ss:$0 sm:$0xff] }
  0x16   :  { %414 = vmatpush1.bf16.msra.mxu0 %v1199_v8  ;;  %1189 = vmatpush1.bf16.msra.mxu1 %v1199_v8 }
  0x17   :  { %415 = vmatprep.subr.bf16.mxu0 %v1269_v0  ;;  %1181 = vmatprep.subr.bf16.mxu1 %v1269_v0 }
  0x1a   :  { %416 = vmatpush1.bf16.msra.mxu0 %v1200_v9  ;;  %1190 = vmatpush1.bf16.msra.mxu1 %v1200_v9 }
  0x1b   :  { %417 = vmatprep.subr.bf16.mxu0 %v1269_v0  ;;  %1182 = vmatprep.subr.bf16.mxu1 %v1269_v0 }
  0x1e   :  { %418 = vmatpush1.bf16.msra.mxu0 %v1201_v10  ;;  %1191 = vmatpush1.bf16.msra.mxu1 %v1201_v10 }
  0x1f   :  { %419 = vmatprep.subr.bf16.mxu0 %v1269_v0  ;;  %1183 = vmatprep.subr.bf16.mxu1 %v1269_v0 }
  0x22   :  { %420 = vmatpush1.bf16.msra.mxu0 %v1202_v11  ;;  %1192 = vmatpush1.bf16.msra.mxu1 %v1202_v11 }
  0x25   :  { %436 = vmatmul.mubr.bf16.vlgmr.msra.gmra.mrb[0].mxu0 %v1203_v12  ;;  %524 = vmatmul.mubr.bf16.vlgmr.msra.gmra.mrb[0].mxu1 %v1206_v13 }
  0x26   :  { %935 = vmatprep.mubr.msk.bf16.mxu0 %vm336_vm0, %v1209_v14  ;;  %946 = vmatprep.mubr.msk.bf16.mxu1 %vm336_vm0, %v1211_v15 }
  0x2d   :  { %444 = vmatmul.mubr.bf16.gmra.mrb[4].mxu0 %v1213_v16  ;;  %532 = vmatmul.mubr.bf16.gmra.mrb[4].mxu1 %v1214_v17 }
  0x2e   :  { %936 = vmatprep.mubr.msk.bf16.mxu0 %vm336_vm0, %v1215_v18  ;;  %947 = vmatprep.mubr.msk.bf16.mxu1 %vm336_vm0, %v1217_v19 }
  0x35   :  { %452 = vmatmul.mubr.bf16.gmra.mrb[8].mxu0 %v1219_v20  ;;  %540 = vmatmul.mubr.bf16.gmra.mrb[8].mxu1 %v1220_v21 }
  0x36   :  { %937 = vmatprep.mubr.msk.bf16.mxu0 %vm336_vm0, %v1221_v22  ;;  %948 = vmatprep.mubr.msk.bf16.mxu1 %vm336_vm0, %v1223_v23 }
  0x3d   :  { %460 = vmatmul.mubr.bf16.gmra.mrb[12].mxu0 %v1225_v24  ;;  %548 = vmatmul.mubr.bf16.gmra.mrb[12].mxu1 %v1226_v25 }
  0x3e   :  { %938 = vmatprep.mubr.msk.bf16.mxu0 %vm336_vm0, %v1227_v26  ;;  %949 = vmatprep.mubr.msk.bf16.mxu1 %vm336_vm0, %v1229_v27 }
  0x45   :  { %468 = vmatmul.mubr.bf16.gmra.mrb[16].mxu0 %v1231_v28  ;;  %556 = vmatmul.mubr.bf16.gmra.mrb[16].mxu1 %v1232_v29 }
  0x46   :  { %939 = vmatprep.mubr.msk.bf16.mxu0 %vm336_vm0, %v1233_v30  ;;  %950 = vmatprep.mubr.msk.bf16.mxu1 %vm336_vm0, %v1235_v31 }
  0x4d   :  { %476 = vmatmul.mubr.bf16.gmra.mrb[20].mxu0 %v1237_v32  ;;  %564 = vmatmul.mubr.bf16.gmra.mrb[20].mxu1 %v1238_v33 }
  0x4e   :  { %940 = vmatprep.mubr.msk.bf16.mxu0 %vm336_vm0, %v1239_v34  ;;  %951 = vmatprep.mubr.msk.bf16.mxu1 %vm336_vm0, %v1241_v35 }
  0x55   :  { %484 = vmatmul.mubr.bf16.gmra.mrb[24].mxu0 %v1243_v36  ;;  %572 = vmatmul.mubr.bf16.gmra.mrb[24].mxu1 %v1244_v37 }
  0x56   :  { %941 = vmatprep.mubr.msk.bf16.mxu0 %vm336_vm0, %v1245_v38  ;;  %952 = vmatprep.mubr.msk.bf16.mxu1 %vm336_vm0, %v1247_v39 }
  0x5d   :  { %492 = vmatmul.mubr.bf16.gmra.mrb[28].mxu0 %v1249_v40  ;;  %580 = vmatmul.mubr.bf16.gmra.mrb[28].mxu1 %v1250_v41 }
  0x5e   :  { %942 = vmatprep.mubr.msk.bf16.mxu0 %vm336_vm0, %v1251_v42  ;;  %953 = vmatprep.mubr.msk.bf16.mxu1 %vm336_vm0, %v1253_v43 }
  0x65   :  { %500 = vmatmul.mubr.bf16.gmra.mrb[32].mxu0 %v1255_v44  ;;  %588 = vmatmul.mubr.bf16.gmra.mrb[32].mxu1 %v1256_v45 }
  0x66   :  { %943 = vmatprep.mubr.msk.bf16.mxu0 %vm336_vm0, %v1257_v46  ;;  %954 = vmatprep.mubr.msk.bf16.mxu1 %vm336_vm0, %v1259_v47 }
  0x6d   :  { %508 = vmatmul.mubr.bf16.gmra.mrb[36].mxu0 %v1261_v48  ;;  %596 = vmatmul.mubr.bf16.gmra.mrb[36].mxu1 %v1262_v49 }
  0x6e   :  { %944 = vmatprep.mubr.msk.bf16.mxu0 %vm336_vm0, %v1263_v50  ;;  %955 = vmatprep.mubr.msk.bf16.mxu1 %vm336_vm0, %v1265_v51 }
  0x75   :  { %516 = vmatmul.mubr.bf16.gmra.mrb[40].mxu0 %v1267_v52  ;;  %604 = vmatmul.mubr.bf16.gmra.mrb[40].mxu1 %v1268_v53 }
  0xf8   :  { %v437_v55 = vpop.f32.mrb[0].mxu0  ;;  %v525_v56 = vpop.f32.mrb[0].mxu1 }
  0xf9   :  { %v438_v57 = vadd.f32 %v1474_v54, %v437_v55  ;;  %v526_v58 = vadd.f32 %v1474_v54, %v525_v56  ;;  %v439_v59 = vpop.f32.mrb[1].mxu0  ;;  %v527_v60 = vpop.f32.mrb[1].mxu1 }
  0xfa   :  { %v440_v61 = vpop.f32.mrb[2].mxu0  ;;  %v528_v62 = vpop.f32.mrb[2].mxu1 }
  0xfb   :  { %v441_v63 = vadd.f32 %v1474_v54, %v440_v61  ;;  %v529_v0 = vadd.f32 %v1474_v54, %v528_v62  ;;  %v442_v1 = vpop.f32.mrb[3].mxu0  ;;  %v530_v2 = vpop.f32.mrb[3].mxu1  ;;  %v612_v3 = vmax.f32 %v438_v57, 0.0  ;;  %v634_v4 = vmax.f32 %v526_v58, 0.0 }
  0xfd   :  { %v613_v5 = vmax.f32 %v441_v63, 0.0  ;;  %v635_v6 = vmax.f32 %v529_v0, 0.0 }
  0xff   :  { %v1047_v7 = vpack.c.bf16 %v613_v5, %v612_v3  ;;  %v1102_v8 = vpack.c.bf16 %v635_v6, %v634_v4 }
 0x100   :  { %v445_v9 = vpop.f32.mrb[4].mxu0  ;;  %v533_v10 = vpop.f32.mrb[4].mxu1 }
 0x101   :  { %1048 = vst [vmem:[%s1589_s3] sm:$0xff] %v1047_v7   ;;  %1164 = vst [vmem:[%s1589_s3 + $0x58] sm:$0xff] %v1102_v8   ;;  %v446_v11 = vadd.f32 %v1474_v54, %v445_v9  ;;  %v534_v12 = vadd.f32 %v1474_v54, %v533_v10  ;;  %v447_v13 = vpop.f32.mrb[5].mxu0  ;;  %v535_v14 = vpop.f32.mrb[5].mxu1 }
 0x102   :  { %v448_v15 = vpop.f32.mrb[6].mxu0  ;;  %v536_v16 = vpop.f32.mrb[6].mxu1 }
 0x103   :  { %v449_v17 = vadd.f32 %v1474_v54, %v448_v15  ;;  %v537_v18 = vadd.f32 %v1474_v54, %v536_v16  ;;  %v450_v19 = vpop.f32.mrb[7].mxu0  ;;  %v538_v20 = vpop.f32.mrb[7].mxu1  ;;  %v614_v21 = vmax.f32 %v446_v11, 0.0  ;;  %v636_v22 = vmax.f32 %v534_v12, 0.0 }
 0x105   :  { %v615_v23 = vmax.f32 %v449_v17, 0.0  ;;  %v637_v24 = vmax.f32 %v537_v18, 0.0 }
 0x107   :  { %v1052_v25 = vpack.c.bf16 %v615_v23, %v614_v21  ;;  %v1107_v26 = vpack.c.bf16 %v637_v24, %v636_v22 }
 0x108   :  { %v453_v27 = vpop.f32.mrb[8].mxu0  ;;  %v541_v28 = vpop.f32.mrb[8].mxu1 }
 0x109   :  { %1154 = vst [vmem:[%s1589_s3 + $0x8] sm:$0xff] %v1052_v25   ;;  %1165 = vst [vmem:[%s1589_s3 + $0x60] sm:$0xff] %v1107_v26   ;;  %v454_v29 = vadd.f32 %v1474_v54, %v453_v27  ;;  %v542_v30 = vadd.f32 %v1474_v54, %v541_v28  ;;  %v455_v31 = vpop.f32.mrb[9].mxu0  ;;  %v543_v32 = vpop.f32.mrb[9].mxu1 }
 0x10a   :  { %v456_v33 = vpop.f32.mrb[10].mxu0  ;;  %v544_v34 = vpop.f32.mrb[10].mxu1 }
 0x10b   :  { %v457_v35 = vadd.f32 %v1474_v54, %v456_v33  ;;  %v545_v36 = vadd.f32 %v1474_v54, %v544_v34  ;;  %v458_v37 = vpop.f32.mrb[11].mxu0  ;;  %v546_v38 = vpop.f32.mrb[11].mxu1  ;;  %v616_v39 = vmax.f32 %v454_v29, 0.0  ;;  %v638_v40 = vmax.f32 %v542_v30, 0.0 }
 0x10d   :  { %v617_v41 = vmax.f32 %v457_v35, 0.0  ;;  %v639_v42 = vmax.f32 %v545_v36, 0.0 }
 0x10f   :  { %v1057_v43 = vpack.c.bf16 %v617_v41, %v616_v39  ;;  %v1112_v44 = vpack.c.bf16 %v639_v42, %v638_v40 }
 0x110   :  { %v461_v45 = vpop.f32.mrb[12].mxu0  ;;  %v549_v46 = vpop.f32.mrb[12].mxu1 }
 0x111   :  { %1155 = vst [vmem:[%s1589_s3 + $0x10] sm:$0xff] %v1057_v43   ;;  %1166 = vst [vmem:[%s1589_s3 + $0x68] sm:$0xff] %v1112_v44   ;;  %v462_v47 = vadd.f32 %v1474_v54, %v461_v45  ;;  %v550_v48 = vadd.f32 %v1474_v54, %v549_v46  ;;  %v463_v49 = vpop.f32.mrb[13].mxu0  ;;  %v551_v50 = vpop.f32.mrb[13].mxu1 }
 0x112   :  { %v464_v51 = vpop.f32.mrb[14].mxu0  ;;  %v552_v52 = vpop.f32.mrb[14].mxu1 }
 0x113   :  { %v465_v53 = vadd.f32 %v1474_v54, %v464_v51  ;;  %v553_v55 = vadd.f32 %v1474_v54, %v552_v52  ;;  %v466_v56 = vpop.f32.mrb[15].mxu0  ;;  %v554_v57 = vpop.f32.mrb[15].mxu1  ;;  %v618_v58 = vmax.f32 %v462_v47, 0.0  ;;  %v640_v59 = vmax.f32 %v550_v48, 0.0 }
 0x115   :  { %v619_v60 = vmax.f32 %v465_v53, 0.0  ;;  %v641_v61 = vmax.f32 %v553_v55, 0.0 }
 0x117   :  { %v1062_v62 = vpack.c.bf16 %v619_v60, %v618_v58  ;;  %v1117_v63 = vpack.c.bf16 %v641_v61, %v640_v59 }
 0x118   :  { %v469_v0 = vpop.f32.mrb[16].mxu0  ;;  %v557_v1 = vpop.f32.mrb[16].mxu1 }
 0x119   :  { %1156 = vst [vmem:[%s1589_s3 + $0x18] sm:$0xff] %v1062_v62   ;;  %1167 = vst [vmem:[%s1589_s3 + $0x70] sm:$0xff] %v1117_v63   ;;  %v470_v2 = vadd.f32 %v1474_v54, %v469_v0  ;;  %v558_v3 = vadd.f32 %v1474_v54, %v557_v1  ;;  %v471_v4 = vpop.f32.mrb[17].mxu0  ;;  %v559_v5 = vpop.f32.mrb[17].mxu1 }
 0x11a   :  { %v472_v6 = vpop.f32.mrb[18].mxu0  ;;  %v560_v7 = vpop.f32.mrb[18].mxu1 }
 0x11b   :  { %v473_v8 = vadd.f32 %v1474_v54, %v472_v6  ;;  %v561_v9 = vadd.f32 %v1474_v54, %v560_v7  ;;  %v474_v10 = vpop.f32.mrb[19].mxu0  ;;  %v562_v11 = vpop.f32.mrb[19].mxu1  ;;  %v620_v12 = vmax.f32 %v470_v2, 0.0  ;;  %v642_v13 = vmax.f32 %v558_v3, 0.0 }
 0x11d   :  { %v621_v14 = vmax.f32 %v473_v8, 0.0  ;;  %v643_v15 = vmax.f32 %v561_v9, 0.0 }
 0x11f   :  { %v1067_v16 = vpack.c.bf16 %v621_v14, %v620_v12  ;;  %v1122_v17 = vpack.c.bf16 %v643_v15, %v642_v13 }
 0x120   :  { %v477_v18 = vpop.f32.mrb[20].mxu0  ;;  %v565_v19 = vpop.f32.mrb[20].mxu1 }
 0x121   :  { %1157 = vst [vmem:[%s1589_s3 + $0x20] sm:$0xff] %v1067_v16   ;;  %1168 = vst [vmem:[%s1589_s3 + $0x78] sm:$0xff] %v1122_v17   ;;  %v478_v20 = vadd.f32 %v1474_v54, %v477_v18  ;;  %v566_v21 = vadd.f32 %v1474_v54, %v565_v19  ;;  %v479_v22 = vpop.f32.mrb[21].mxu0  ;;  %v567_v23 = vpop.f32.mrb[21].mxu1 }
 0x122   :  { %v480_v24 = vpop.f32.mrb[22].mxu0  ;;  %v568_v25 = vpop.f32.mrb[22].mxu1 }
 0x123   :  { %v481_v26 = vadd.f32 %v1474_v54, %v480_v24  ;;  %v569_v27 = vadd.f32 %v1474_v54, %v568_v25  ;;  %v482_v28 = vpop.f32.mrb[23].mxu0  ;;  %v570_v29 = vpop.f32.mrb[23].mxu1  ;;  %v622_v30 = vmax.f32 %v478_v20, 0.0  ;;  %v644_v31 = vmax.f32 %v566_v21, 0.0 }
 0x125   :  { %v623_v32 = vmax.f32 %v481_v26, 0.0  ;;  %v645_v33 = vmax.f32 %v569_v27, 0.0 }
 0x127   :  { %v1072_v34 = vpack.c.bf16 %v623_v32, %v622_v30  ;;  %v1127_v35 = vpack.c.bf16 %v645_v33, %v644_v31 }
 0x128   :  { %v485_v36 = vpop.f32.mrb[24].mxu0  ;;  %v573_v37 = vpop.f32.mrb[24].mxu1 }
 0x129   :  { %1158 = vst [vmem:[%s1589_s3 + $0x28] sm:$0xff] %v1072_v34   ;;  %1169 = vst [vmem:[%s1589_s3 + $0x80] sm:$0xff] %v1127_v35   ;;  %v486_v38 = vadd.f32 %v1474_v54, %v485_v36  ;;  %v574_v39 = vadd.f32 %v1474_v54, %v573_v37  ;;  %v487_v40 = vpop.f32.mrb[25].mxu0  ;;  %v575_v41 = vpop.f32.mrb[25].mxu1 }
 0x12a   :  { %v488_v42 = vpop.f32.mrb[26].mxu0  ;;  %v576_v43 = vpop.f32.mrb[26].mxu1 }
 0x12b   :  { %v489_v44 = vadd.f32 %v1474_v54, %v488_v42  ;;  %v577_v45 = vadd.f32 %v1474_v54, %v576_v43  ;;  %v490_v46 = vpop.f32.mrb[27].mxu0  ;;  %v578_v47 = vpop.f32.mrb[27].mxu1  ;;  %v624_v48 = vmax.f32 %v486_v38, 0.0  ;;  %v646_v49 = vmax.f32 %v574_v39, 0.0 }
 0x12d   :  { %v625_v50 = vmax.f32 %v489_v44, 0.0  ;;  %v647_v51 = vmax.f32 %v577_v45, 0.0 }
 0x12f   :  { %v1077_v52 = vpack.c.bf16 %v625_v50, %v624_v48  ;;  %v1132_v53 = vpack.c.bf16 %v647_v51, %v646_v49 }
 0x130   :  { %v493_v55 = vpop.f32.mrb[28].mxu0  ;;  %v581_v56 = vpop.f32.mrb[28].mxu1 }
 0x131   :  { %1159 = vst [vmem:[%s1589_s3 + $0x30] sm:$0xff] %v1077_v52   ;;  %1170 = vst [vmem:[%s1589_s3 + $0x88] sm:$0xff] %v1132_v53   ;;  %v494_v57 = vadd.f32 %v1474_v54, %v493_v55  ;;  %v582_v58 = vadd.f32 %v1474_v54, %v581_v56  ;;  %v495_v59 = vpop.f32.mrb[29].mxu0  ;;  %v583_v60 = vpop.f32.mrb[29].mxu1 }
 0x132   :  { %v496_v61 = vpop.f32.mrb[30].mxu0  ;;  %v584_v62 = vpop.f32.mrb[30].mxu1 }
 0x133   :  { %v497_v63 = vadd.f32 %v1474_v54, %v496_v61  ;;  %v585_v0 = vadd.f32 %v1474_v54, %v584_v62  ;;  %v498_v1 = vpop.f32.mrb[31].mxu0  ;;  %v586_v2 = vpop.f32.mrb[31].mxu1  ;;  %v626_v3 = vmax.f32 %v494_v57, 0.0  ;;  %v648_v4 = vmax.f32 %v582_v58, 0.0 }
 0x135   :  { %v627_v5 = vmax.f32 %v497_v63, 0.0  ;;  %v649_v6 = vmax.f32 %v585_v0, 0.0 }
 0x137   :  { %v1082_v7 = vpack.c.bf16 %v627_v5, %v626_v3  ;;  %v1137_v8 = vpack.c.bf16 %v649_v6, %v648_v4 }
 0x138   :  { %v501_v9 = vpop.f32.mrb[32].mxu0  ;;  %v589_v10 = vpop.f32.mrb[32].mxu1 }
 0x139   :  { %1160 = vst [vmem:[%s1589_s3 + $0x38] sm:$0xff] %v1082_v7   ;;  %1171 = vst [vmem:[%s1589_s3 + $0x90] sm:$0xff] %v1137_v8   ;;  %v502_v11 = vadd.f32 %v1474_v54, %v501_v9  ;;  %v590_v12 = vadd.f32 %v1474_v54, %v589_v10  ;;  %v503_v13 = vpop.f32.mrb[33].mxu0  ;;  %v591_v14 = vpop.f32.mrb[33].mxu1 }
 0x13a   :  { %v504_v15 = vpop.f32.mrb[34].mxu0  ;;  %v592_v16 = vpop.f32.mrb[34].mxu1 }
 0x13b   :  { %v505_v17 = vadd.f32 %v1474_v54, %v504_v15  ;;  %v593_v18 = vadd.f32 %v1474_v54, %v592_v16  ;;  %v506_v19 = vpop.f32.mrb[35].mxu0  ;;  %v594_v20 = vpop.f32.mrb[35].mxu1  ;;  %v628_v21 = vmax.f32 %v502_v11, 0.0  ;;  %v650_v22 = vmax.f32 %v590_v12, 0.0 }
 0x13d   :  { %v629_v23 = vmax.f32 %v505_v17, 0.0  ;;  %v651_v24 = vmax.f32 %v593_v18, 0.0 }
 0x13f   :  { %v1087_v25 = vpack.c.bf16 %v629_v23, %v628_v21  ;;  %v1142_v26 = vpack.c.bf16 %v651_v24, %v650_v22 }
 0x140   :  { %v509_v27 = vpop.f32.mrb[36].mxu0  ;;  %v597_v28 = vpop.f32.mrb[36].mxu1 }
 0x141   :  { %1161 = vst [vmem:[%s1589_s3 + $0x40] sm:$0xff] %v1087_v25   ;;  %1172 = vst [vmem:[%s1589_s3 + $0x98] sm:$0xff] %v1142_v26   ;;  %v510_v29 = vadd.f32 %v1474_v54, %v509_v27  ;;  %v598_v30 = vadd.f32 %v1474_v54, %v597_v28  ;;  %v511_v31 = vpop.f32.mrb[37].mxu0  ;;  %v599_v32 = vpop.f32.mrb[37].mxu1 }
 0x142   :  { %v512_v33 = vpop.f32.mrb[38].mxu0  ;;  %v600_v34 = vpop.f32.mrb[38].mxu1 }
 0x143   :  { %v513_v35 = vadd.f32 %v1474_v54, %v512_v33  ;;  %v601_v36 = vadd.f32 %v1474_v54, %v600_v34  ;;  %v514_v37 = vpop.f32.mrb[39].mxu0  ;;  %v602_v38 = vpop.f32.mrb[39].mxu1  ;;  %v630_v39 = vmax.f32 %v510_v29, 0.0  ;;  %v652_v40 = vmax.f32 %v598_v30, 0.0 }
 0x145   :  { %v631_v41 = vmax.f32 %v513_v35, 0.0  ;;  %v653_v42 = vmax.f32 %v601_v36, 0.0 }
 0x147   :  { %v1092_v43 = vpack.c.bf16 %v631_v41, %v630_v39  ;;  %v1147_v44 = vpack.c.bf16 %v653_v42, %v652_v40 }
 0x148   :  { %v517_v45 = vpop.f32.mrb[40].mxu0  ;;  %v605_v46 = vpop.f32.mrb[40].mxu1 }
 0x149   :  { %1162 = vst [vmem:[%s1589_s3 + $0x48] sm:$0xff] %v1092_v43   ;;  %1173 = vst [vmem:[%s1589_s3 + $0xa0] sm:$0xff] %v1147_v44   ;;  %v518_v47 = vadd.f32 %v1474_v54, %v517_v45  ;;  %v606_v48 = vadd.f32 %v1474_v54, %v605_v46  ;;  %v519_v49 = vpop.f32.mrb[41].mxu0  ;;  %v607_v50 = vpop.f32.mrb[41].mxu1 }
 0x14a   :  { %v520_v51 = vpop.f32.mrb[42].mxu0  ;;  %v608_v52 = vpop.f32.mrb[42].mxu1 }
 0x14b   :  { %v521_v53 = vadd.f32 %v1474_v54, %v520_v51  ;;  %v609_v55 = vadd.f32 %v1474_v54, %v608_v52  ;;  %v522_v56 = vpop.f32.mrb[43].mxu0  ;;  %v610_v57 = vpop.f32.mrb[43].mxu1  ;;  %v632_v58 = vmax.f32 %v518_v47, 0.0  ;;  %v654_v59 = vmax.f32 %v606_v48, 0.0 }
 0x14d   :  { %v633_v60 = vmax.f32 %v521_v53, 0.0  ;;  %v655_v61 = vmax.f32 %v609_v55, 0.0 }
 0x14f   :  { %v1097_v62 = vpack.c.bf16 %v633_v60, %v632_v58  ;;  %v1152_v63 = vpack.c.bf16 %v655_v61, %v654_v59 }
 0x151   :  { %1163 = vst [vmem:[%s1589_s3 + $0x50] sm:$0xff] %v1097_v62   ;;  %1174 = vst [vmem:[%s1589_s3 + $0xa8] sm:$0xff] %v1152_v63  }

// kernel: _lambda_.17
= control target key start
LH: loop header
LB: loop body
LE: loop exit
PB: predicated region body
PF: predicated region fallthrough
CT: control target
= control target key end

     0   :  { %v2118_v0 = vmov 0   ;;  %vm587_vm0 = vcmask 261120   ;;  %s2706_s1 = inlined_call_operand.vmem [shape: bf16[288,128], index: 1, kind: input, shape index: {}]   ;;  %s2707_s0 = inlined_call_operand.vmem [shape: bf16[352,288], index: 0, kind: input, shape index: {}]   ;;  %s2708_s2 = inlined_call_operand.vmem [shape: f32[1,128], index: 2, kind: input, shape index: {}]   ;;  %s2709_s3 = inlined_call_operand.vmem [shape: bf16[352,128], index: 3, kind: input, shape index: {}]   ;;  %s2710_s4 = inlined_call_operand.vmem [shape: bf16[352,128], index: 4, kind: output, shape index: {}]  }
   0x1   :  { %654 = vmatprep.subr.bf16.mxu0 %v2118_v0  ;;  %1979 = vmatprep.subr.bf16.mxu1 %v2118_v0  ;;  %v2012_v1 = vld [vmem:[%s2706_s1] sm:$0xff]   ;;  %v2013_v2 = vld [vmem:[%s2706_s1 + $0x8] sm:$0xff]   ;;  %v2014_v3 = vld [vmem:[%s2706_s1 + $0x10] sm:$0xff]  }
   0x2   :  { %655 = vmatpush1.bf16.msra.mxu0 %v2012_v1  ;;  %1995 = vmatpush1.bf16.msra.mxu1 %v2012_v1  ;;  %v2015_v4 = vld [vmem:[%s2706_s1 + $0x18] sm:$0xff]   ;;  %v2016_v5 = vld [vmem:[%s2706_s1 + $0x20] sm:$0xff]   ;;  %v2017_v7 = vld [vmem:[%s2706_s1 + $0x28] sm:$0xff]  }
   0x3   :  { %656 = vmatprep.subr.bf16.mxu0 %v2118_v0  ;;  %1980 = vmatprep.subr.bf16.mxu1 %v2118_v0  ;;  %v2030_v6 = vld [vmem:[%s2707_s0 + $0x4] ss:$12 sps:$4 sm:$0xff]   ;;  %v2033_v8 = vld [vmem:[%s2707_s0 + $0x19c] ss:$12 sps:$4 sm:$0xff]   ;;  %v2028_v19 = vld [vmem:[%s2707_s0] ss:$12 sps:$4 sm:$0xff]  }
   0x4   :  { %686 = vmatprep.mubr.bf16.mxu0 %v2030_v6  ;;  %822 = vmatprep.mubr.bf16.mxu1 %v2033_v8  ;;  %v2018_v9 = vld [vmem:[%s2706_s1 + $0x30] sm:$0xff]   ;;  %v2019_v10 = vld [vmem:[%s2706_s1 + $0x38] sm:$0xff]   ;;  %v2020_v11 = vld [vmem:[%s2706_s1 + $0x40] sm:$0xff]  }
   0x5   :  { %v2021_v12 = vld [vmem:[%s2706_s1 + $0x48] sm:$0xff]   ;;  %v2022_v13 = vld [vmem:[%s2706_s1 + $0x50] sm:$0xff]   ;;  %v2023_v14 = vld [vmem:[%s2706_s1 + $0x58] sm:$0xff]  }
   0x6   :  { %657 = vmatpush1.bf16.msra.mxu0 %v2013_v2  ;;  %1996 = vmatpush1.bf16.msra.mxu1 %v2013_v2  ;;  %v2024_v15 = vld [vmem:[%s2706_s1 + $0x60] sm:$0xff]   ;;  %v2025_v16 = vld [vmem:[%s2706_s1 + $0x68] sm:$0xff]   ;;  %v2026_v17 = vld [vmem:[%s2706_s1 + $0x70] sm:$0xff]  }
   0x7   :  { %658 = vmatprep.subr.bf16.mxu0 %v2118_v0  ;;  %1981 = vmatprep.subr.bf16.mxu1 %v2118_v0  ;;  %v2027_v18 = vld [vmem:[%s2706_s1 + $0x78] sm:$0xff]   ;;  %v2040_v20 = vld [vmem:[%s2706_s1 + $0x80] sm:$0xff]   ;;  %v2053_v24 = vld [vmem:[%s2706_s1 + $0x88] sm:$0xff]  }
   0x8   :  { %v2031_v21 = vld [vmem:[%s2707_s0 + $0x198] ss:$12 sps:$4 sm:$0xff]   ;;  %v2034_v22 = vld [vmem:[%s2707_s0 + $0x1c] ss:$12 sps:$4 sm:$0xff]   ;;  %v2036_v23 = vld [vmem:[%s2707_s0 + $0x1b4] ss:$12 sps:$4 sm:$0xff]  }
   0x9   :  { %v2038_v25 = vld [vmem:[%s2707_s0 + $0x18] ss:$12 sps:$4 sm:$0xff]   ;;  %v2039_v26 = vld [vmem:[%s2707_s0 + $0x1b0] ss:$12 sps:$4 sm:$0xff]   ;;  %v2041_v27 = vld [vmem:[%s2707_s0 + $0x34] ss:$12 sps:$4 sm:$0xff]  }
   0xa   :  { %659 = vmatpush1.bf16.msra.mxu0 %v2014_v3  ;;  %1997 = vmatpush1.bf16.msra.mxu1 %v2014_v3  ;;  %v2043_v28 = vld [vmem:[%s2707_s0 + $0x1cc] ss:$12 sps:$4 sm:$0xff]   ;;  %v2045_v29 = vld [vmem:[%s2707_s0 + $0x30] ss:$12 sps:$4 sm:$0xff]   ;;  %v2046_v30 = vld [vmem:[%s2707_s0 + $0x1c8] ss:$12 sps:$4 sm:$0xff]  }
   0xb   :  { %660 = vmatprep.subr.bf16.mxu0 %v2118_v0  ;;  %1982 = vmatprep.subr.bf16.mxu1 %v2118_v0  ;;  %v2047_v31 = vld [vmem:[%s2707_s0 + $0x4c] ss:$12 sps:$4 sm:$0xff]   ;;  %v2049_v32 = vld [vmem:[%s2707_s0 + $0x1e4] ss:$12 sps:$4 sm:$0xff]   ;;  %v2051_v33 = vld [vmem:[%s2707_s0 + $0x48] ss:$12 sps:$4 sm:$0xff]  }
   0xc   :  { %v2052_v34 = vld [vmem:[%s2707_s0 + $0x1e0] ss:$12 sps:$4 sm:$0xff]   ;;  %v2054_v35 = vld [vmem:[%s2707_s0 + $0x64] ss:$12 sps:$4 sm:$0xff]   ;;  %v2056_v36 = vld [vmem:[%s2707_s0 + $0x1fc] ss:$12 sps:$4 sm:$0xff]  }
   0xd   :  { %v2058_v37 = vld [vmem:[%s2707_s0 + $0x60] ss:$12 sps:$4 sm:$0xff]   ;;  %v2059_v38 = vld [vmem:[%s2707_s0 + $0x1f8] ss:$12 sps:$4 sm:$0xff]   ;;  %v2060_v39 = vld [vmem:[%s2707_s0 + $0x7c] ss:$12 sps:$4 sm:$0xff]  }
   0xe   :  { %661 = vmatpush1.bf16.msra.mxu0 %v2015_v4  ;;  %1998 = vmatpush1.bf16.msra.mxu1 %v2015_v4  ;;  %v2062_v40 = vld [vmem:[%s2707_s0 + $0x8] ss:$12 sps:$4 sm:$0xff]   ;;  %v2063_v41 = vld [vmem:[%s2707_s0 + $0x78] ss:$12 sps:$4 sm:$0xff]   ;;  %v2064_v42 = vld [vmem:[%s2707_s0 + $0x20] ss:$12 sps:$4 sm:$0xff]  }
   0xf   :  { %662 = vmatprep.subr.bf16.mxu0 %v2118_v0  ;;  %1983 = vmatprep.subr.bf16.mxu1 %v2118_v0  ;;  %v2065_v43 = vld [vmem:[%s2707_s0 + $0x94] ss:$12 sps:$4 sm:$0xff]   ;;  %v2067_v44 = vld [vmem:[%s2707_s0 + $0x38] ss:$12 sps:$4 sm:$0xff]   ;;  %v2068_v45 = vld [vmem:[%s2707_s0 + $0x90] ss:$12 sps:$4 sm:$0xff]  }
  0x10   :  { %v2069_v46 = vld [vmem:[%s2707_s0 + $0x50] ss:$12 sps:$4 sm:$0xff]   ;;  %v2070_v47 = vld [vmem:[%s2707_s0 + $0xac] ss:$12 sps:$4 sm:$0xff]   ;;  %v2072_v48 = vld [vmem:[%s2707_s0 + $0x68] ss:$12 sps:$4 sm:$0xff]  }
  0x11   :  { %v2073_v49 = vld [vmem:[%s2707_s0 + $0xa8] ss:$12 sps:$4 sm:$0xff]   ;;  %v2074_v50 = vld [vmem:[%s2707_s0 + $0x80] ss:$12 sps:$4 sm:$0xff]   ;;  %v2075_v51 = vld [vmem:[%s2707_s0 + $0xc4] ss:$12 sps:$4 sm:$0xff]  }
  0x12   :  { %663 = vmatpush1.bf16.msra.mxu0 %v2016_v5  ;;  %1999 = vmatpush1.bf16.msra.mxu1 %v2016_v5  ;;  %v2077_v52 = vld [vmem:[%s2707_s0 + $0x98] ss:$12 sps:$4 sm:$0xff]   ;;  %v2078_v53 = vld [vmem:[%s2707_s0 + $0xc0] ss:$12 sps:$4 sm:$0xff]   ;;  %v2079_v54 = vld [vmem:[%s2707_s0 + $0xb0] ss:$12 sps:$4 sm:$0xff]  }
  0x13   :  { %664 = vmatprep.subr.bf16.mxu0 %v2118_v0  ;;  %1984 = vmatprep.subr.bf16.mxu1 %v2118_v0  ;;  %v2080_v55 = vld [vmem:[%s2707_s0 + $0xdc] ss:$12 sps:$4 sm:$0xff]   ;;  %v2083_v57 = vld [vmem:[%s2707_s0 + $0xd8] ss:$12 sps:$4 sm:$0xff]   ;;  %v2084_v58 = vld [vmem:[%s2707_s0 + $0xe0] ss:$12 sps:$4 sm:$0xff]  }
  0x14   :  { %v2082_v56 = vld [vmem:[%s2707_s0 + $0xc8] ss:$12 sps:$4 sm:$0xff]   ;;  %v2087_v60 = vld [vmem:[%s2707_s0 + $0xf8] ss:$12 sps:$4 sm:$0xff]   ;;  %v2088_v61 = vld [vmem:[%s2707_s0 + $0xf0] ss:$12 sps:$4 sm:$0xff]  }
  0x15   :  { %v2085_v59 = vld [vmem:[%s2707_s0 + $0xf4] ss:$12 sps:$4 sm:$0xff]   ;;  %v2089_v62 = vld [vmem:[%s2707_s0 + $0x110] ss:$12 sps:$4 sm:$0xff]   ;;  %v2090_v63 = vld [vmem:[%s2707_s0 + $0x10c] ss:$12 sps:$4 sm:$0xff]  }
  0x16   :  { %665 = vmatpush1.bf16.msra.mxu0 %v2017_v7  ;;  %2000 = vmatpush1.bf16.msra.mxu1 %v2017_v7  ;;  %v2093_v1 = vld [vmem:[%s2707_s0 + $0x108] ss:$12 sps:$4 sm:$0xff]   ;;  %v2094_v2 = vld [vmem:[%s2707_s0 + $0x140] ss:$12 sps:$4 sm:$0xff]   ;;  %v2095_v3 = vld [vmem:[%s2707_s0 + $0x124] ss:$12 sps:$4 sm:$0xff]  }
  0x17   :  { %666 = vmatprep.subr.bf16.mxu0 %v2118_v0  ;;  %1985 = vmatprep.subr.bf16.mxu1 %v2118_v0  ;;  %v2097_v4 = vld [vmem:[%s2707_s0 + $0x158] ss:$12 sps:$4 sm:$0xff]   ;;  %v2098_v5 = vld [vmem:[%s2707_s0 + $0x120] ss:$12 sps:$4 sm:$0xff]   ;;  %v2099_v6 = vld [vmem:[%s2707_s0 + $0x170] ss:$12 sps:$4 sm:$0xff]  }
  0x18   :  { %v2100_v7 = vld [vmem:[%s2707_s0 + $0x13c] ss:$12 sps:$4 sm:$0xff]  }
  0x19   :  { %v2102_v8 = vld [vmem:[%s2707_s0 + $0x188] ss:$12 sps:$4 sm:$0xff]  }
  0x1a   :  { %667 = vmatpush1.bf16.msra.mxu0 %v2018_v9  ;;  %2001 = vmatpush1.bf16.msra.mxu1 %v2018_v9  ;;  %v2103_v9 = vld [vmem:[%s2707_s0 + $0x138] ss:$12 sps:$4 sm:$0xff]  }
  0x1b   :  { %668 = vmatprep.subr.bf16.mxu0 %v2118_v0  ;;  %1986 = vmatprep.subr.bf16.mxu1 %v2118_v0 }
  0x1e   :  { %669 = vmatpush1.bf16.msra.mxu0 %v2019_v10  ;;  %2002 = vmatpush1.bf16.msra.mxu1 %v2019_v10  ;;  %v2104_v10 = vld [vmem:[%s2707_s0 + $0x1a0] ss:$12 sps:$4 sm:$0xff]  }
  0x1f   :  { %670 = vmatprep.subr.bf16.mxu0 %v2118_v0  ;;  %1987 = vmatprep.subr.bf16.mxu1 %v2118_v0 }
  0x22   :  { %671 = vmatpush1.bf16.msra.mxu0 %v2020_v11  ;;  %2003 = vmatpush1.bf16.msra.mxu1 %v2020_v11  ;;  %v2105_v11 = vld [vmem:[%s2707_s0 + $0x154] ss:$12 sps:$4 sm:$0xff]  }
  0x23   :  { %672 = vmatprep.subr.bf16.mxu0 %v2118_v0  ;;  %1988 = vmatprep.subr.bf16.mxu1 %v2118_v0 }
  0x26   :  { %673 = vmatpush1.bf16.msra.mxu0 %v2021_v12  ;;  %2004 = vmatpush1.bf16.msra.mxu1 %v2021_v12  ;;  %v2107_v12 = vld [vmem:[%s2707_s0 + $0x1b8] ss:$12 sps:$4 sm:$0xff]  }
  0x27   :  { %674 = vmatprep.subr.bf16.mxu0 %v2118_v0  ;;  %1989 = vmatprep.subr.bf16.mxu1 %v2118_v0 }
  0x2a   :  { %675 = vmatpush1.bf16.msra.mxu0 %v2022_v13  ;;  %2005 = vmatpush1.bf16.msra.mxu1 %v2022_v13  ;;  %v2108_v13 = vld [vmem:[%s2707_s0 + $0x150] ss:$12 sps:$4 sm:$0xff]  }
  0x2b   :  { %676 = vmatprep.subr.bf16.mxu0 %v2118_v0  ;;  %1990 = vmatprep.subr.bf16.mxu1 %v2118_v0 }
  0x2e   :  { %677 = vmatpush1.bf16.msra.mxu0 %v2023_v14  ;;  %2006 = vmatpush1.bf16.msra.mxu1 %v2023_v14  ;;  %v2109_v14 = vld [vmem:[%s2707_s0 + $0x1d0] ss:$12 sps:$4 sm:$0xff]  }
  0x2f   :  { %678 = vmatprep.subr.bf16.mxu0 %v2118_v0  ;;  %1991 = vmatprep.subr.bf16.mxu1 %v2118_v0 }
  0x32   :  { %679 = vmatpush1.bf16.msra.mxu0 %v2024_v15  ;;  %2007 = vmatpush1.bf16.msra.mxu1 %v2024_v15  ;;  %v2110_v15 = vld [vmem:[%s2707_s0 + $0x16c] ss:$12 sps:$4 sm:$0xff]  }
  0x33   :  { %680 = vmatprep.subr.bf16.mxu0 %v2118_v0  ;;  %1992 = vmatprep.subr.bf16.mxu1 %v2118_v0 }
  0x36   :  { %681 = vmatpush1.bf16.msra.mxu0 %v2025_v16  ;;  %2008 = vmatpush1.bf16.msra.mxu1 %v2025_v16  ;;  %v2112_v16 = vld [vmem:[%s2707_s0 + $0x1e8] ss:$12 sps:$4 sm:$0xff]  }
  0x37   :  { %682 = vmatprep.subr.bf16.mxu0 %v2118_v0  ;;  %1993 = vmatprep.subr.bf16.mxu1 %v2118_v0 }
  0x3a   :  { %683 = vmatpush1.bf16.msra.mxu0 %v2026_v17  ;;  %2009 = vmatpush1.bf16.msra.mxu1 %v2026_v17  ;;  %v2113_v17 = vld [vmem:[%s2707_s0 + $0x168] ss:$12 sps:$4 sm:$0xff]  }
  0x3b   :  { %684 = vmatprep.subr.bf16.mxu0 %v2118_v0  ;;  %1994 = vmatprep.subr.bf16.mxu1 %v2118_v0  ;;  %v2092_v0 = vld [vmem:[%s2707_s0 + $0x128] ss:$12 sps:$4 sm:$0xff]  }
  0x3e   :  { %685 = vmatpush1.bf16.msra.mxu0 %v2027_v18  ;;  %2010 = vmatpush1.bf16.msra.mxu1 %v2027_v18  ;;  %v2114_v18 = vld [vmem:[%s2707_s0 + $0x200] ss:$12 sps:$4 sm:$0xff]  }
  0x3f   :  { %1931 = vmatprep.subr.bf16.mxu1 %v2040_v20 }
  0x41   :  { %687 = vmatmul.mubr.bf16.vlgmr.msra.gmra.mrb[0].mxu0 %v2028_v19  ;;  %823 = vmatmul.mubr.bf16.vlgmr.msra.gmra.mrb[0].mxu1 %v2031_v21  ;;  %v2115_v19 = vld [vmem:[%s2707_s0 + $0x184] ss:$12 sps:$4 sm:$0xff]  }
  0x42   :  { %694 = vmatprep.mubr.bf16.mxu0 %v2034_v22  ;;  %830 = vmatprep.mubr.bf16.mxu1 %v2036_v23 }
  0x43   :  { %1932 = vmatpush3.bf16.msra.mxu1 %v2040_v20  ;;  %v2117_v20 = vld [vmem:[%s2707_s0 + $0x180] ss:$12 sps:$4 sm:$0xff]  }
  0x44   :  { %1933 = vmatprep.subr.bf16.mxu1 %v2053_v24 }
  0x47   :  { %1934 = vmatpush3.bf16.msra.mxu1 %v2053_v24 }
  0x49   :  { %695 = vmatmul.mubr.bf16.gmra.mrb[4].mxu0 %v2038_v25  ;;  %831 = vmatmul.mubr.bf16.gmra.mrb[4].mxu1 %v2039_v26 }
  0x4a   :  { %702 = vmatprep.mubr.bf16.mxu0 %v2041_v27  ;;  %838 = vmatprep.mubr.bf16.mxu1 %v2043_v28 }
  0x51   :  { %703 = vmatmul.mubr.bf16.gmra.mrb[8].mxu0 %v2045_v29  ;;  %839 = vmatmul.mubr.bf16.gmra.mrb[8].mxu1 %v2046_v30 }
  0x52   :  { %710 = vmatprep.mubr.bf16.mxu0 %v2047_v31  ;;  %846 = vmatprep.mubr.bf16.mxu1 %v2049_v32 }
  0x59   :  { %711 = vmatmul.mubr.bf16.gmra.mrb[12].mxu0 %v2051_v33  ;;  %847 = vmatmul.mubr.bf16.gmra.mrb[12].mxu1 %v2052_v34 }
  0x5a   :  { %718 = vmatprep.mubr.bf16.mxu0 %v2054_v35  ;;  %854 = vmatprep.mubr.bf16.mxu1 %v2056_v36 }
  0x61   :  { %719 = vmatmul.mubr.bf16.gmra.mrb[16].mxu0 %v2058_v37  ;;  %855 = vmatmul.mubr.bf16.gmra.mrb[16].mxu1 %v2059_v38 }
  0x62   :  { %726 = vmatprep.mubr.bf16.mxu0 %v2060_v39  ;;  %1935 = vmatprep.mubr.msk.bf16.mxu1 %vm587_vm0, %v2062_v40 }
  0x69   :  { %727 = vmatmul.mubr.bf16.gmra.mrb[20].mxu0 %v2063_v41  ;;  %1936 = vmatmul.mubr.msk.bf16.vlgmr.msra.gmra.mrb[20].mxu1 %vm587_vm0, %v2064_v42 }
  0x6a   :  { %734 = vmatprep.mubr.bf16.mxu0 %v2065_v43  ;;  %1939 = vmatprep.mubr.msk.bf16.mxu1 %vm587_vm0, %v2067_v44 }
  0x71   :  { %735 = vmatmul.mubr.bf16.gmra.mrb[24].mxu0 %v2068_v45  ;;  %1940 = vmatmul.mubr.msk.bf16.gmra.mrb[24].mxu1 %vm587_vm0, %v2069_v46 }
  0x72   :  { %742 = vmatprep.mubr.bf16.mxu0 %v2070_v47  ;;  %1943 = vmatprep.mubr.msk.bf16.mxu1 %vm587_vm0, %v2072_v48 }
  0x79   :  { %743 = vmatmul.mubr.bf16.gmra.mrb[28].mxu0 %v2073_v49  ;;  %1944 = vmatmul.mubr.msk.bf16.gmra.mrb[28].mxu1 %vm587_vm0, %v2074_v50 }
  0x7a   :  { %750 = vmatprep.mubr.bf16.mxu0 %v2075_v51  ;;  %1947 = vmatprep.mubr.msk.bf16.mxu1 %vm587_vm0, %v2077_v52 }
  0x81   :  { %751 = vmatmul.mubr.bf16.gmra.mrb[32].mxu0 %v2078_v53  ;;  %1948 = vmatmul.mubr.msk.bf16.gmra.mrb[32].mxu1 %vm587_vm0, %v2079_v54 }
  0x82   :  { %758 = vmatprep.mubr.bf16.mxu0 %v2080_v55  ;;  %1951 = vmatprep.mubr.msk.bf16.mxu1 %vm587_vm0, %v2082_v56 }
  0x89   :  { %759 = vmatmul.mubr.bf16.gmra.mrb[36].mxu0 %v2083_v57  ;;  %1952 = vmatmul.mubr.msk.bf16.gmra.mrb[36].mxu1 %vm587_vm0, %v2084_v58 }
  0x8a   :  { %766 = vmatprep.mubr.bf16.mxu0 %v2085_v59  ;;  %1955 = vmatprep.mubr.msk.bf16.mxu1 %vm587_vm0, %v2087_v60 }
  0x91   :  { %767 = vmatmul.mubr.bf16.gmra.mrb[40].mxu0 %v2088_v61  ;;  %1956 = vmatmul.mubr.msk.bf16.gmra.mrb[40].mxu1 %vm587_vm0, %v2089_v62  ;;  %v2479_v61 = vld [vmem:[%s2708_s2] ss:$0 sm:$0xff] }
  0x92   :  { %774 = vmatprep.mubr.bf16.mxu0 %v2090_v63  ;;  %1959 = vmatprep.mubr.msk.bf16.mxu1 %vm587_vm0, %v2092_v0 }
  0x99   :  { %775 = vmatmul.mubr.bf16.gmra.mrb[44].mxu0 %v2093_v1  ;;  %1960 = vmatmul.mubr.msk.bf16.gmra.mrb[44].mxu1 %vm587_vm0, %v2094_v2  ;;  %v1865_v2 = vld [vmem:[%s2709_s3 + $0x8] sm:$0xff]  }
  0x9a   :  { %782 = vmatprep.mubr.bf16.mxu0 %v2095_v3  ;;  %1963 = vmatprep.mubr.msk.bf16.mxu1 %vm587_vm0, %v2097_v4 }
  0xa1   :  { %783 = vmatmul.mubr.bf16.gmra.mrb[48].mxu0 %v2098_v5  ;;  %1964 = vmatmul.mubr.msk.bf16.gmra.mrb[48].mxu1 %vm587_vm0, %v2099_v6 }
  0xa2   :  { %790 = vmatprep.mubr.bf16.mxu0 %v2100_v7  ;;  %1967 = vmatprep.mubr.msk.bf16.mxu1 %vm587_vm0, %v2102_v8  ;;  %v1668_v7 = vld [vmem:[%s2709_s3] sm:$0xff]  }
  0xa9   :  { %791 = vmatmul.mubr.bf16.gmra.mrb[52].mxu0 %v2103_v9  ;;  %1968 = vmatmul.mubr.msk.bf16.gmra.mrb[52].mxu1 %vm587_vm0, %v2104_v10 }
  0xaa   :  { %798 = vmatprep.mubr.bf16.mxu0 %v2105_v11  ;;  %1971 = vmatprep.mubr.msk.bf16.mxu1 %vm587_vm0, %v2107_v12 }
  0xb1   :  { %799 = vmatmul.mubr.bf16.gmra.mrb[56].mxu0 %v2108_v13  ;;  %1972 = vmatmul.mubr.msk.bf16.gmra.mrb[56].mxu1 %vm587_vm0, %v2109_v14  ;;  %v1673_v13 = vunpack.c.l.bf16 %v1865_v2 }
  0xb2   :  { %806 = vmatprep.mubr.bf16.mxu0 %v2110_v15  ;;  %1975 = vmatprep.mubr.msk.bf16.mxu1 %vm587_vm0, %v2112_v16  ;;  %v1674_v15 = vunpack.c.h.bf16 %v1865_v2 }
  0xb9   :  { %807 = vmatmul.mubr.bf16.gmra.mrb[60].mxu0 %v2113_v17  ;;  %1976 = vmatmul.mubr.msk.bf16.gmra.mrb[60].mxu1 %vm587_vm0, %v2114_v18 }
  0xba   :  { %814 = vmatprep.mubr.bf16.mxu0 %v2115_v19  ;;  %v1669_v19 = vunpack.c.l.bf16 %v1668_v7 }
  0xc1   :  { %815 = vmatmul.mubr.bf16.gmra.mrb[64].mxu0 %v2117_v20 }
 0x114   :  { %v688_v21 = vpop.f32.mrb[0].mxu0  ;;  %v2450_v22 = vpop.f32.mrb[0].mxu1 }
 0x115   :  { %v690_v23 = vpop.f32.mrb[1].mxu0  ;;  %v826_v24 = vpop.f32.mrb[1].mxu1  ;;  %v689_v63 = vadd.f32 %v2479_v61, %v688_v21  ;;  %v1670_v21 = vunpack.c.h.bf16 %v1668_v7 }
 0x116   :  { %v691_v25 = vpop.f32.mrb[2].mxu0  ;;  %v2452_v26 = vpop.f32.mrb[2].mxu1 }
 0x117   :  { %v693_v27 = vpop.f32.mrb[3].mxu0  ;;  %v829_v28 = vpop.f32.mrb[3].mxu1  ;;  %v692_v8 = vadd.f32 %v2479_v61, %v691_v25 }
 0x11c   :  { %v696_v29 = vpop.f32.mrb[4].mxu0  ;;  %v2454_v30 = vpop.f32.mrb[4].mxu1 }
 0x11d   :  { %v698_v31 = vpop.f32.mrb[5].mxu0  ;;  %v834_v32 = vpop.f32.mrb[5].mxu1  ;;  %v697_v62 = vadd.f32 %v2479_v61, %v696_v29 }
 0x11e   :  { %v699_v33 = vpop.f32.mrb[6].mxu0  ;;  %v2456_v34 = vpop.f32.mrb[6].mxu1 }
 0x11f   :  { %v701_v35 = vpop.f32.mrb[7].mxu0  ;;  %v837_v36 = vpop.f32.mrb[7].mxu1  ;;  %v700_v3 = vadd.f32 %v2479_v61, %v699_v33 }
 0x120   :  { %v1867_v36 = vld [vmem:[%s2709_s3 + $0x18] sm:$0xff]  }
 0x124   :  { %v704_v37 = vpop.f32.mrb[8].mxu0  ;;  %v2458_v38 = vpop.f32.mrb[8].mxu1 }
 0x125   :  { %v706_v39 = vpop.f32.mrb[9].mxu0  ;;  %v842_v40 = vpop.f32.mrb[9].mxu1  ;;  %v705_v25 = vadd.f32 %v2479_v61, %v704_v37 }
 0x126   :  { %v2460_v41 = vpop.f32.mrb[10].mxu0  ;;  %v2462_v42 = vpop.f32.mrb[10].mxu1 }
 0x127   :  { %v709_v43 = vpop.f32.mrb[11].mxu0  ;;  %v845_v44 = vpop.f32.mrb[11].mxu1  ;;  %v708_v37 = vadd.f32 %v2479_v61, %v2460_v41 }
 0x12c   :  { %v712_v45 = vpop.f32.mrb[12].mxu0  ;;  %v2464_v46 = vpop.f32.mrb[12].mxu1 }
 0x12d   :  { %v714_v47 = vpop.f32.mrb[13].mxu0  ;;  %v850_v48 = vpop.f32.mrb[13].mxu1  ;;  %v713_v27 = vadd.f32 %v2479_v61, %v712_v45  ;;  %v1866_v45 = vld [vmem:[%s2709_s3 + $0x10] sm:$0xff]  }
 0x12e   :  { %v715_v49 = vpop.f32.mrb[14].mxu0  ;;  %v2466_v50 = vpop.f32.mrb[14].mxu1 }
 0x12f   :  { %v717_v51 = vpop.f32.mrb[15].mxu0  ;;  %v853_v52 = vpop.f32.mrb[15].mxu1  ;;  %v716_v39 = vadd.f32 %v2479_v61, %v715_v49 }
 0x134   :  { %v2468_v53 = vpop.f32.mrb[16].mxu0  ;;  %v2470_v54 = vpop.f32.mrb[16].mxu1 }
 0x135   :  { %v722_v55 = vpop.f32.mrb[17].mxu0  ;;  %v858_v56 = vpop.f32.mrb[17].mxu1 }
 0x136   :  { %v2472_v57 = vpop.f32.mrb[18].mxu0  ;;  %v2474_v58 = vpop.f32.mrb[18].mxu1  ;;  %v1681_v56 = vunpack.c.l.bf16 %v1867_v36 }
 0x137   :  { %v725_v59 = vpop.f32.mrb[19].mxu0  ;;  %v861_v60 = vpop.f32.mrb[19].mxu1 }
 0x138   :  { %v1682_v60 = vunpack.c.h.bf16 %v1867_v36 }
 0x13c   :  { %v728_v0 = vpop.f32.mrb[20].mxu0  ;;  %v1937_v1 = vpop.f32.mrb[20].mxu1 }
 0x13d   :  { %v906_v4 = vadd.f32 %v1937_v1, %v697_v62  ;;  %v730_v5 = vpop.f32.mrb[21].mxu0  ;;  %v897_v6 = vpop.f32.mrb[21].mxu1  ;;  %v1677_v1 = vunpack.c.l.bf16 %v1866_v45 }
 0x13e   :  { %v898_v9 = vadd.f32 %v897_v6, %v689_v63  ;;  %v731_v10 = vpop.f32.mrb[22].mxu0  ;;  %v1938_v11 = vpop.f32.mrb[22].mxu1  ;;  %v729_v6 = vadd.f32 %v2479_v61, %v728_v0  ;;  %v1868_v0 = vld [vmem:[%s2709_s3 + $0x20] sm:$0xff]  }
 0x13f   :  { %v1074_v12 = vmax.f32 %v906_v4, 0.0  ;;  %v909_v14 = vadd.f32 %v1938_v11, %v700_v3  ;;  %v733_v16 = vpop.f32.mrb[23].mxu0  ;;  %v900_v17 = vpop.f32.mrb[23].mxu1  ;;  %v1678_v3 = vunpack.c.h.bf16 %v1866_v45 }
 0x140   :  { %v1072_v18 = vmax.f32 %v898_v9, 0.0  ;;  %v901_v20 = vadd.f32 %v900_v17, %v692_v8  ;;  %v721_v9 = vadd.f32 %v2479_v61, %v2468_v53  ;;  %v732_v16 = vadd.f32 %v2479_v61, %v731_v10 }
 0x141   :  { %v1075_v23 = vmax.f32 %v909_v14, 0.0  ;;  %v1206_v28 = vadd.f32 %v1673_v13, %v1074_v12  ;;  %v724_v53 = vadd.f32 %v2479_v61, %v2472_v57  ;;  %v1685_v57 = vunpack.c.l.bf16 %v1868_v0 }
 0x142   :  { %v1073_v24 = vmax.f32 %v901_v20, 0.0  ;;  %v1204_v31 = vadd.f32 %v1669_v19, %v1072_v18 }
 0x143   :  { %v1207_v29 = vadd.f32 %v1674_v15, %v1075_v23  ;;  %v1869_v15 = vld [vmem:[%s2709_s3 + $0x28] sm:$0xff]  }
 0x144   :  { %v1205_v32 = vadd.f32 %v1670_v21, %v1073_v24  ;;  %v2493_v33 = vpop.f32.mrb[24].mxu0  ;;  %v1941_v35 = vpop.f32.mrb[24].mxu1 }
 0x145   :  { %v1763_v40 = vpack.c.bf16 %v1207_v29, %v1206_v28  ;;  %v922_v43 = vadd.f32 %v1941_v35, %v713_v27  ;;  %v738_v44 = vpop.f32.mrb[25].mxu0  ;;  %v913_v47 = vpop.f32.mrb[25].mxu1  ;;  %v1689_v28 = vunpack.c.l.bf16 %v1869_v15 }
 0x146   :  { %v1758_v48 = vpack.c.bf16 %v1205_v32, %v1204_v31  ;;  %v914_v51 = vadd.f32 %v913_v47, %v705_v25  ;;  %v2504_v52 = vpop.f32.mrb[26].mxu0  ;;  %v1942_v55 = vpop.f32.mrb[26].mxu1  ;;  %v1690_v25 = vunpack.c.h.bf16 %v1869_v15 }
 0x147   :  { %1886 = vst [vmem:[%s2710_s4 + $0x8] sm:$0xff] %v1763_v40   ;;  %v1078_v49 = vmax.f32 %v922_v43, 0.0  ;;  %v925_v59 = vadd.f32 %v1942_v55, %v716_v39  ;;  %v741_v62 = vpop.f32.mrb[27].mxu0  ;;  %v916_v63 = vpop.f32.mrb[27].mxu1  ;;  %v1686_v39 = vunpack.c.h.bf16 %v1868_v0 }
 0x148   :  { %1759 = vst [vmem:[%s2710_s4] sm:$0xff] %v1758_v48   ;;  %v1076_v41 = vmax.f32 %v914_v51, 0.0  ;;  %v917_v2 = vadd.f32 %v916_v63, %v708_v37  ;;  %v737_v37 = vadd.f32 %v2479_v61, %v2493_v33  ;;  %v740_v33 = vadd.f32 %v2479_v61, %v2504_v52 }
 0x149   :  { %v1079_v4 = vmax.f32 %v925_v59, 0.0  ;;  %v1210_v7 = vadd.f32 %v1681_v56, %v1078_v49  ;;  %v1871_v56 = vld [vmem:[%s2709_s3 + $0x38] sm:$0xff]  }
 0x14a   :  { %v1077_v5 = vmax.f32 %v917_v2, 0.0  ;;  %v1208_v11 = vadd.f32 %v1677_v1, %v1076_v41  ;;  %v1870_v1 = vld [vmem:[%s2709_s3 + $0x30] sm:$0xff]  }
 0x14b   :  { %v1211_v8 = vadd.f32 %v1682_v60, %v1079_v4  ;;  %v1693_v52 = vunpack.c.l.bf16 %v1870_v1  ;;  %v1694_v15 = vunpack.c.h.bf16 %v1870_v1 }
 0x14c   :  { %v1209_v12 = vadd.f32 %v1678_v3, %v1077_v5  ;;  %v744_v13 = vpop.f32.mrb[28].mxu0  ;;  %v1945_v14 = vpop.f32.mrb[28].mxu1 }
 0x14d   :  { %v1773_v17 = vpack.c.bf16 %v1211_v8, %v1210_v7  ;;  %v938_v18 = vadd.f32 %v1945_v14, %v729_v6  ;;  %v746_v19 = vpop.f32.mrb[29].mxu0  ;;  %v929_v20 = vpop.f32.mrb[29].mxu1  ;;  %v745_v44 = vadd.f32 %v2479_v61, %v744_v13  ;;  %v1697_v7 = vunpack.c.l.bf16 %v1871_v56 }
 0x14e   :  { %v1768_v21 = vpack.c.bf16 %v1209_v12, %v1208_v11  ;;  %v930_v23 = vadd.f32 %v929_v20, %v721_v9  ;;  %v747_v24 = vpop.f32.mrb[30].mxu0  ;;  %v1946_v27 = vpop.f32.mrb[30].mxu1  ;;  %v1698_v9 = vunpack.c.h.bf16 %v1871_v56 }
 0x14f   :  { %1888 = vst [vmem:[%s2710_s4 + $0x18] sm:$0xff] %v1773_v17   ;;  %v1082_v10 = vmax.f32 %v938_v18, 0.0  ;;  %v941_v29 = vadd.f32 %v1946_v27, %v732_v16  ;;  %v749_v31 = vpop.f32.mrb[31].mxu0  ;;  %v932_v32 = vpop.f32.mrb[31].mxu1  ;;  %v748_v59 = vadd.f32 %v2479_v61, %v747_v24 }
 0x150   :  { %1887 = vst [vmem:[%s2710_s4 + $0x10] sm:$0xff] %v1768_v21   ;;  %v1080_v35 = vmax.f32 %v930_v23, 0.0  ;;  %v933_v36 = vadd.f32 %v932_v32, %v724_v53  ;;  %v1873_v32 = vld [vmem:[%s2709_s3 + $0x48] sm:$0xff]  }
 0x151   :  { %v1083_v40 = vmax.f32 %v941_v29, 0.0  ;;  %v1214_v47 = vadd.f32 %v1689_v28, %v1082_v10  ;;  %v1872_v29 = vld [vmem:[%s2709_s3 + $0x40] sm:$0xff]   ;;  %v1706_v56 = vunpack.c.h.bf16 %v1873_v32 }
 0x152   :  { %v1081_v43 = vmax.f32 %v933_v36, 0.0  ;;  %v1212_v48 = vadd.f32 %v1685_v57, %v1080_v35 }
 0x153   :  { %v1215_v45 = vadd.f32 %v1690_v25, %v1083_v40 }
 0x154   :  { %v1213_v51 = vadd.f32 %v1686_v39, %v1081_v43  ;;  %v752_v55 = vpop.f32.mrb[32].mxu0  ;;  %v1949_v49 = vpop.f32.mrb[32].mxu1 }
 0x155   :  { %v1783_v60 = vpack.c.bf16 %v1215_v45, %v1214_v47  ;;  %v954_v62 = vadd.f32 %v1949_v49, %v745_v44  ;;  %v754_v63 = vpop.f32.mrb[33].mxu0  ;;  %v945_v41 = vpop.f32.mrb[33].mxu1  ;;  %v753_v20 = vadd.f32 %v2479_v61, %v752_v55  ;;  %v1701_v45 = vunpack.c.l.bf16 %v1872_v29 }
 0x156   :  { %v1778_v2 = vpack.c.bf16 %v1213_v51, %v1212_v48  ;;  %v946_v3 = vadd.f32 %v945_v41, %v737_v37  ;;  %v755_v4 = vpop.f32.mrb[34].mxu0  ;;  %v1950_v5 = vpop.f32.mrb[34].mxu1  ;;  %v1702_v48 = vunpack.c.h.bf16 %v1872_v29  ;;  %v1705_v55 = vunpack.c.l.bf16 %v1873_v32 }
 0x157   :  { %1890 = vst [vmem:[%s2710_s4 + $0x28] sm:$0xff] %v1783_v60   ;;  %v1086_v6 = vmax.f32 %v954_v62, 0.0  ;;  %v957_v8 = vadd.f32 %v1950_v5, %v748_v59  ;;  %v757_v11 = vpop.f32.mrb[35].mxu0  ;;  %v948_v12 = vpop.f32.mrb[35].mxu1  ;;  %v756_v25 = vadd.f32 %v2479_v61, %v755_v4 }
 0x158   :  { %1889 = vst [vmem:[%s2710_s4 + $0x20] sm:$0xff] %v1778_v2   ;;  %v1084_v13 = vmax.f32 %v946_v3, 0.0  ;;  %v949_v14 = vadd.f32 %v948_v12, %v740_v33 }
 0x159   :  { %v1087_v16 = vmax.f32 %v957_v8, 0.0  ;;  %v1218_v18 = vadd.f32 %v1697_v7, %v1086_v6  ;;  %v1874_v8 = vld [vmem:[%s2709_s3 + $0x50] sm:$0xff]  }
 0x15a   :  { %v1085_v17 = vmax.f32 %v949_v14, 0.0  ;;  %v1216_v0 = vadd.f32 %v1693_v52, %v1084_v13 }
 0x15b   :  { %v1219_v19 = vadd.f32 %v1698_v9, %v1087_v16  ;;  %v1709_v16 = vunpack.c.l.bf16 %v1874_v8 }
 0x15c   :  { %v1217_v53 = vadd.f32 %v1694_v15, %v1085_v17  ;;  %v760_v21 = vpop.f32.mrb[36].mxu0  ;;  %v1953_v23 = vpop.f32.mrb[36].mxu1 }
 0x15d   :  { %v1793_v24 = vpack.c.bf16 %v1219_v19, %v1218_v18  ;;  %v761_v27 = vadd.f32 %v2479_v61, %v760_v21  ;;  %v762_v10 = vpop.f32.mrb[37].mxu0  ;;  %v961_v28 = vpop.f32.mrb[37].mxu1  ;;  %v1710_v18 = vunpack.c.h.bf16 %v1874_v8 }
 0x15e   :  { %v1788_v31 = vpack.c.bf16 %v1217_v53, %v1216_v0  ;;  %v962_v35 = vadd.f32 %v961_v28, %v753_v20  ;;  %v763_v57 = vpop.f32.mrb[38].mxu0  ;;  %v1954_v36 = vpop.f32.mrb[38].mxu1  ;;  %v1875_v10 = vld [vmem:[%s2709_s3 + $0x58] sm:$0xff]  }
 0x15f   :  { %1892 = vst [vmem:[%s2710_s4 + $0x38] sm:$0xff] %v1793_v24   ;;  %v970_v39 = vadd.f32 %v1953_v23, %v761_v27  ;;  %v764_v40 = vadd.f32 %v2479_v61, %v763_v57  ;;  %v765_v43 = vpop.f32.mrb[39].mxu0  ;;  %v964_v44 = vpop.f32.mrb[39].mxu1 }
 0x160   :  { %1891 = vst [vmem:[%s2710_s4 + $0x30] sm:$0xff] %v1788_v31   ;;  %v1088_v47 = vmax.f32 %v962_v35, 0.0  ;;  %v965_v37 = vadd.f32 %v964_v44, %v756_v25  ;;  %v1714_v43 = vunpack.c.h.bf16 %v1875_v10 }
 0x161   :  { %v1090_v51 = vmax.f32 %v970_v39, 0.0  ;;  %v973_v49 = vadd.f32 %v1954_v36, %v764_v40  ;;  %v1713_v39 = vunpack.c.l.bf16 %v1875_v10 }
 0x162   :  { %v1089_v59 = vmax.f32 %v965_v37, 0.0  ;;  %v1220_v62 = vadd.f32 %v1701_v45, %v1088_v47 }
 0x163   :  { %v1091_v60 = vmax.f32 %v973_v49, 0.0  ;;  %v1222_v33 = vadd.f32 %v1705_v55, %v1090_v51 }
 0x164   :  { %v1221_v63 = vadd.f32 %v1702_v48, %v1089_v59  ;;  %v768_v41 = vpop.f32.mrb[40].mxu0  ;;  %v1957_v1 = vpop.f32.mrb[40].mxu1 }
 0x165   :  { %v1223_v2 = vadd.f32 %v1706_v56, %v1091_v60  ;;  %v769_v3 = vadd.f32 %v2479_v61, %v768_v41  ;;  %v770_v4 = vpop.f32.mrb[41].mxu0  ;;  %v977_v5 = vpop.f32.mrb[41].mxu1  ;;  %v1876_v56 = vld [vmem:[%s2709_s3 + $0x60] sm:$0xff]  }
 0x166   :  { %v1798_v6 = vpack.c.bf16 %v1221_v63, %v1220_v62  ;;  %v771_v7 = vpop.f32.mrb[42].mxu0  ;;  %v1958_v9 = vpop.f32.mrb[42].mxu1 }
 0x167   :  { %v1803_v11 = vpack.c.bf16 %v1223_v2, %v1222_v33  ;;  %v772_v12 = vadd.f32 %v2479_v61, %v771_v7  ;;  %v978_v13 = vadd.f32 %v977_v5, %v769_v3  ;;  %v773_v52 = vpop.f32.mrb[43].mxu0  ;;  %v980_v14 = vpop.f32.mrb[43].mxu1  ;;  %v1717_v3 = vunpack.c.l.bf16 %v1876_v56 }
 0x168   :  { %1893 = vst [vmem:[%s2710_s4 + $0x40] sm:$0xff] %v1798_v6   ;;  %v1718_v5 = vunpack.c.h.bf16 %v1876_v56  ;;  %v825_v6 = vadd.f32 %v2479_v61, %v2450_v22  ;;  %v1877_v22 = vld [vmem:[%s2709_s3 + $0x68] sm:$0xff]  }
 0x169   :  { %1894 = vst [vmem:[%s2710_s4 + $0x48] sm:$0xff] %v1803_v11   ;;  %v1092_v15 = vmax.f32 %v978_v13, 0.0  ;;  %v981_v17 = vadd.f32 %v980_v14, %v772_v12  ;;  %v1881_v14 = vld [vmem:[%s2709_s3 + $0x88] sm:$0xff]  }
 0x16b   :  { %v1093_v19 = vmax.f32 %v981_v17, 0.0  ;;  %v1224_v53 = vadd.f32 %v1709_v16, %v1092_v15  ;;  %v828_v17 = vadd.f32 %v2479_v61, %v2452_v26  ;;  %v1737_v26 = vunpack.c.l.bf16 %v1881_v14 }
 0x16c   :  { %v776_v20 = vpop.f32.mrb[44].mxu0  ;;  %v1961_v0 = vpop.f32.mrb[44].mxu1 }
 0x16d   :  { %v1225_v21 = vadd.f32 %v1710_v18, %v1093_v19  ;;  %v777_v23 = vadd.f32 %v2479_v61, %v776_v20  ;;  %v778_v24 = vpop.f32.mrb[45].mxu0  ;;  %v993_v27 = vpop.f32.mrb[45].mxu1 }
 0x16e   :  { %v779_v28 = vpop.f32.mrb[46].mxu0  ;;  %v1962_v29 = vpop.f32.mrb[46].mxu1 }
 0x16f   :  { %v1808_v25 = vpack.c.bf16 %v1225_v21, %v1224_v53  ;;  %v986_v31 = vadd.f32 %v1957_v1, %v777_v23  ;;  %v780_v32 = vadd.f32 %v2479_v61, %v779_v28  ;;  %v781_v35 = vpop.f32.mrb[47].mxu0  ;;  %v996_v57 = vpop.f32.mrb[47].mxu1 }
 0x170   :  { %v1721_v35 = vunpack.c.l.bf16 %v1877_v22 }
 0x171   :  { %1895 = vst [vmem:[%s2710_s4 + $0x50] sm:$0xff] %v1808_v25   ;;  %v1094_v36 = vmax.f32 %v986_v31, 0.0  ;;  %v989_v40 = vadd.f32 %v1958_v9, %v780_v32  ;;  %v1738_v25 = vunpack.c.h.bf16 %v1881_v14  ;;  %v2623_v31 = vld [vmem:[%s2709_s3 + $0x70] sm:$0xff]  }
 0x173   :  { %v1095_v44 = vmax.f32 %v989_v40, 0.0  ;;  %v1226_v37 = vadd.f32 %v1713_v39, %v1094_v36  ;;  %v1722_v36 = vunpack.c.h.bf16 %v1877_v22 }
 0x174   :  { %v784_v47 = vpop.f32.mrb[48].mxu0  ;;  %v2583_v45 = vpop.f32.mrb[48].mxu1 }
 0x175   :  { %v1227_v48 = vadd.f32 %v1714_v43, %v1095_v44  ;;  %v785_v51 = vadd.f32 %v2479_v61, %v784_v47  ;;  %v786_v55 = vpop.f32.mrb[49].mxu0  ;;  %v2586_v49 = vpop.f32.mrb[49].mxu1  ;;  %v841_v43 = vadd.f32 %v2479_v61, %v2458_v38  ;;  %v1725_v47 = vunpack.c.l.bf16 %v2623_v31 }
 0x176   :  { %v787_v59 = vpop.f32.mrb[50].mxu0  ;;  %v2591_v60 = vpop.f32.mrb[50].mxu1 }
 0x177   :  { %v1813_v62 = vpack.c.bf16 %v1227_v48, %v1226_v37  ;;  %v994_v63 = vadd.f32 %v993_v27, %v785_v51  ;;  %v788_v41 = vadd.f32 %v2479_v61, %v787_v59  ;;  %v789_v1 = vpop.f32.mrb[51].mxu0  ;;  %v2594_v33 = vpop.f32.mrb[51].mxu1  ;;  %v2618_v27 = vld [vmem:[%s2709_s3 + $0x98] sm:$0xff]   ;;  %v833_v48 = vadd.f32 %v2479_v61, %v2454_v30 }
 0x178   :  { %v1745_v40 = vunpack.c.l.bf16 %v2618_v27 }
 0x179   :  { %1896 = vst [vmem:[%s2710_s4 + $0x58] sm:$0xff] %v1813_v62   ;;  %v1096_v2 = vmax.f32 %v994_v63, 0.0  ;;  %v997_v4 = vadd.f32 %v996_v57, %v788_v41 }
 0x17b   :  { %v1097_v7 = vmax.f32 %v997_v4, 0.0  ;;  %v1228_v11 = vadd.f32 %v1717_v3, %v1096_v2  ;;  %v836_v3 = vadd.f32 %v2479_v61, %v2456_v34  ;;  %v844_v4 = vadd.f32 %v2479_v61, %v2462_v42  ;;  %v1884_v42 = vld [vmem:[%s2709_s3 + $0xa0] sm:$0xff]  }
 0x17c   :  { %v792_v8 = vpop.f32.mrb[52].mxu0  ;;  %v1969_v9 = vpop.f32.mrb[52].mxu1 }
 0x17d   :  { %v1229_v12 = vadd.f32 %v1718_v5, %v1097_v7  ;;  %v793_v13 = vadd.f32 %v2479_v61, %v792_v8  ;;  %v1034_v52 = vadd.f32 %v1969_v9, %v825_v6  ;;  %v794_v15 = vpop.f32.mrb[53].mxu0  ;;  %v2605_v16 = vpop.f32.mrb[53].mxu1  ;;  %v2646_v8 = vld [vmem:[%s2709_s3 + $0xa8] sm:$0xff]  }
 0x17e   :  { %v795_v18 = vpop.f32.mrb[54].mxu0  ;;  %v1970_v19 = vpop.f32.mrb[54].mxu1 }
 0x17f   :  { %v1818_v20 = vpack.c.bf16 %v1229_v12, %v1228_v11  ;;  %v1002_v53 = vadd.f32 %v1961_v0, %v793_v13  ;;  %v796_v21 = vadd.f32 %v2479_v61, %v795_v18  ;;  %v797_v23 = vpop.f32.mrb[55].mxu0  ;;  %v2613_v24 = vpop.f32.mrb[55].mxu1  ;;  %v1106_v10 = vmax.f32 %v1034_v52, 0.0  ;;  %v1882_v0 = vld [vmem:[%s2709_s3 + $0x90] sm:$0xff]  }
 0x180   :  { %v1037_v28 = vadd.f32 %v1970_v19, %v828_v17  ;;  %v1741_v37 = vunpack.c.l.bf16 %v1882_v0  ;;  %v1742_v34 = vunpack.c.h.bf16 %v1882_v0  ;;  %v1726_v19 = vunpack.c.h.bf16 %v2623_v31 }
 0x181   :  { %1897 = vst [vmem:[%s2710_s4 + $0x60] sm:$0xff] %v1818_v20   ;;  %v1098_v32 = vmax.f32 %v1002_v53, 0.0  ;;  %v1005_v57 = vadd.f32 %v1962_v29, %v796_v21  ;;  %v1238_v51 = vadd.f32 %v1737_v26, %v1106_v10  ;;  %v1746_v29 = vunpack.c.h.bf16 %v2618_v27 }
 0x182   :  { %v1107_v39 = vmax.f32 %v1037_v28, 0.0  ;;  %v1753_v20 = vunpack.c.l.bf16 %v2646_v8  ;;  %v1749_v23 = vunpack.c.l.bf16 %v1884_v42  ;;  %v1754_v27 = vunpack.c.h.bf16 %v2646_v8 }
 0x183   :  { %v1099_v44 = vmax.f32 %v1005_v57, 0.0  ;;  %v1230_v62 = vadd.f32 %v1721_v35, %v1098_v32  ;;  %v849_v10 = vadd.f32 %v2479_v61, %v2464_v46  ;;  %v852_v26 = vadd.f32 %v2479_v61, %v2466_v50 }
 0x184   :  { %v1239_v55 = vadd.f32 %v1738_v25, %v1107_v39  ;;  %v800_v56 = vpop.f32.mrb[56].mxu0  ;;  %v1973_v59 = vpop.f32.mrb[56].mxu1  ;;  %v857_v28 = vadd.f32 %v2479_v61, %v2470_v54  ;;  %v860_v50 = vadd.f32 %v2479_v61, %v2474_v58  ;;  %v1879_v54 = vld [vmem:[%s2709_s3 + $0x78] sm:$0xff]  }
 0x185   :  { %v1231_v63 = vadd.f32 %v1722_v36, %v1099_v44  ;;  %v801_v41 = vadd.f32 %v2479_v61, %v800_v56  ;;  %v1050_v1 = vadd.f32 %v1973_v59, %v841_v43  ;;  %v802_v2 = vpop.f32.mrb[57].mxu0  ;;  %v1041_v38 = vpop.f32.mrb[57].mxu1 }
 0x186   :  { %v1843_v30 = vpack.c.bf16 %v1239_v55, %v1238_v51  ;;  %v1042_v5 = vadd.f32 %v1041_v38, %v833_v48  ;;  %v803_v6 = vpop.f32.mrb[58].mxu0  ;;  %v1974_v7 = vpop.f32.mrb[58].mxu1 }
 0x187   :  { %v1823_v9 = vpack.c.bf16 %v1231_v63, %v1230_v62  ;;  %v1010_v11 = vadd.f32 %v2586_v49, %v801_v41  ;;  %v804_v12 = vadd.f32 %v2479_v61, %v803_v6  ;;  %v805_v13 = vpop.f32.mrb[59].mxu0  ;;  %v1044_v52 = vpop.f32.mrb[59].mxu1  ;;  %v1110_v14 = vmax.f32 %v1050_v1, 0.0 }
 0x188   :  { %1902 = vst [vmem:[%s2710_s4 + $0x88] sm:$0xff] %v1843_v30   ;;  %v1108_v15 = vmax.f32 %v1042_v5, 0.0  ;;  %v1053_v17 = vadd.f32 %v1974_v7, %v844_v4  ;;  %v1045_v22 = vadd.f32 %v1044_v52, %v836_v3  ;;  %v1750_v41 = vunpack.c.h.bf16 %v1884_v42 }
 0x189   :  { %1898 = vst [vmem:[%s2710_s4 + $0x68] sm:$0xff] %v1823_v9   ;;  %v1100_v49 = vmax.f32 %v1010_v11, 0.0  ;;  %v1013_v18 = vadd.f32 %v2594_v33, %v804_v12  ;;  %v1242_v33 = vadd.f32 %v1745_v40, %v1110_v14  ;;  %v1729_v3 = vunpack.c.l.bf16 %v1879_v54 }
 0x18a   :  { %v1111_v53 = vmax.f32 %v1053_v17, 0.0  ;;  %v1109_v21 = vmax.f32 %v1045_v22, 0.0  ;;  %v1240_v0 = vadd.f32 %v1741_v37, %v1108_v15  ;;  %v1730_v30 = vunpack.c.h.bf16 %v1879_v54 }
 0x18b   :  { %v1101_v25 = vmax.f32 %v1013_v18, 0.0  ;;  %v1232_v36 = vadd.f32 %v1725_v47, %v1100_v49 }
 0x18c   :  { %v1243_v31 = vadd.f32 %v1746_v29, %v1111_v53  ;;  %v1241_v32 = vadd.f32 %v1742_v34, %v1109_v21  ;;  %v808_v35 = vpop.f32.mrb[60].mxu0  ;;  %v1977_v57 = vpop.f32.mrb[60].mxu1 }
 0x18d   :  { %v1233_v39 = vadd.f32 %v1726_v19, %v1101_v25  ;;  %v809_v43 = vadd.f32 %v2479_v61, %v808_v35  ;;  %v1066_v44 = vadd.f32 %v1977_v57, %v857_v28  ;;  %v810_v48 = vpop.f32.mrb[61].mxu0  ;;  %v1057_v46 = vpop.f32.mrb[61].mxu1 }
 0x18e   :  { %v1853_v51 = vpack.c.bf16 %v1243_v31, %v1242_v33  ;;  %v1848_v55 = vpack.c.bf16 %v1241_v32, %v1240_v0  ;;  %v1058_v40 = vadd.f32 %v1057_v46, %v849_v10  ;;  %v811_v37 = vpop.f32.mrb[62].mxu0  ;;  %v1978_v56 = vpop.f32.mrb[62].mxu1 }
 0x18f   :  { %v1828_v59 = vpack.c.bf16 %v1233_v39, %v1232_v36  ;;  %v1018_v47 = vadd.f32 %v2583_v45, %v809_v43  ;;  %v812_v29 = vadd.f32 %v2479_v61, %v811_v37  ;;  %v813_v62 = vpop.f32.mrb[63].mxu0  ;;  %v1060_v63 = vpop.f32.mrb[63].mxu1  ;;  %v1114_v58 = vmax.f32 %v1066_v44, 0.0 }
 0x190   :  { %1904 = vst [vmem:[%s2710_s4 + $0x98] sm:$0xff] %v1853_v51   ;;  %1903 = vst [vmem:[%s2710_s4 + $0x90] sm:$0xff] %v1848_v55   ;;  %v1112_v1 = vmax.f32 %v1058_v40, 0.0  ;;  %v1069_v2 = vadd.f32 %v1978_v56, %v860_v50  ;;  %v1061_v38 = vadd.f32 %v1060_v63, %v852_v26 }
 0x191   :  { %1899 = vst [vmem:[%s2710_s4 + $0x70] sm:$0xff] %v1828_v59   ;;  %v1102_v45 = vmax.f32 %v1018_v47, 0.0  ;;  %v1021_v4 = vadd.f32 %v2591_v60, %v812_v29  ;;  %v1246_v8 = vadd.f32 %v1753_v20, %v1114_v58  ;;  %v1880_v60 = vld [vmem:[%s2709_s3 + $0x80] sm:$0xff]  }
 0x192   :  { %v1115_v5 = vmax.f32 %v1069_v2, 0.0  ;;  %v1113_v6 = vmax.f32 %v1061_v38, 0.0  ;;  %v1244_v9 = vadd.f32 %v1749_v23, %v1112_v1  ;;  %v1733_v21 = vunpack.c.l.bf16 %v1880_v60 }
 0x193   :  { %v1103_v7 = vmax.f32 %v1021_v4, 0.0  ;;  %v1234_v52 = vadd.f32 %v1729_v3, %v1102_v45 }
 0x194   :  { %v1247_v11 = vadd.f32 %v1754_v27, %v1115_v5  ;;  %v1245_v12 = vadd.f32 %v1750_v41, %v1113_v6  ;;  %v816_v13 = vpop.f32.mrb[64].mxu0 }
 0x195   :  { %v1235_v34 = vadd.f32 %v1730_v30, %v1103_v7  ;;  %v817_v42 = vadd.f32 %v2479_v61, %v816_v13  ;;  %v818_v14 = vpop.f32.mrb[65].mxu0 }
 0x196   :  { %v1863_v15 = vpack.c.bf16 %v1247_v11, %v1246_v8  ;;  %v1858_v17 = vpack.c.bf16 %v1245_v12, %v1244_v9  ;;  %v819_v22 = vpop.f32.mrb[66].mxu0 }
 0x197   :  { %v1833_v49 = vpack.c.bf16 %v1235_v34, %v1234_v52  ;;  %v1026_v18 = vadd.f32 %v2605_v16, %v817_v42  ;;  %v820_v19 = vadd.f32 %v2479_v61, %v819_v22  ;;  %v821_v20 = vpop.f32.mrb[67].mxu0  ;;  %v1734_v16 = vunpack.c.h.bf16 %v1880_v60 }
 0x198   :  { %1906 = vst [vmem:[%s2710_s4 + $0xa8] sm:$0xff] %v1863_v15   ;;  %1905 = vst [vmem:[%s2710_s4 + $0xa0] sm:$0xff] %v1858_v17  }
 0x199   :  { %1900 = vst [vmem:[%s2710_s4 + $0x78] sm:$0xff] %v1833_v49   ;;  %v1104_v53 = vmax.f32 %v1026_v18, 0.0  ;;  %v1029_v23 = vadd.f32 %v2613_v24, %v820_v19 }
 0x19b   :  { %v1105_v27 = vmax.f32 %v1029_v23, 0.0  ;;  %v1236_v61 = vadd.f32 %v1733_v21, %v1104_v53 }
 0x19d   :  { %v1237_v10 = vadd.f32 %v1734_v16, %v1105_v27 }
 0x19f   :  { %v1838_v26 = vpack.c.bf16 %v1237_v10, %v1236_v61 }
 0x1a1   :  { %1901 = vst [vmem:[%s2710_s4 + $0x80] sm:$0xff] %v1838_v26  }

// kernel: _lambda_.18
= control target key start
LH: loop header
LB: loop body
LE: loop exit
PB: predicated region body
PF: predicated region fallthrough
CT: control target
= control target key end

     0   :  { %vm280_vm0 = vcmask 261120   ;;  %s942_s1 = inlined_call_operand.vmem [shape: bf16[288,128], index: 1, kind: input, shape index: {}]   ;;  %s943_s0 = inlined_call_operand.vmem [shape: bf16[96,288], index: 0, kind: input, shape index: {}]   ;;  %s944_s2 = inlined_call_operand.vmem [shape: f32[1,128], index: 2, kind: input, shape index: {}]   ;;  %s945_s3 = inlined_call_operand.vmem [shape: bf16[96,128], index: 3, kind: output, shape index: {}]  }
   0x1   :  { %v731_v0 = vld [vmem:[%s942_s1 + $0x40] sm:$0xff]   ;;  %v733_v2 = vld [vmem:[%s942_s1 + $0x48] sm:$0xff]   ;;  %v735_v4 = vld [vmem:[%s942_s1 + $0x50] sm:$0xff]  }
   0x2   :  { %v732_v1 = vld [vmem:[%s942_s1] sm:$0xff]   ;;  %639 = vmatprep.subr.bf16.mxu0 %v731_v0  ;;  %715 = vmatprep.subr.bf16.mxu1 %v731_v0  ;;  %v734_v3 = vld [vmem:[%s942_s1 + $0x8] sm:$0xff]   ;;  %v736_v5 = vld [vmem:[%s942_s1 + $0x10] sm:$0xff]  }
   0x3   :  { %640 = vmatpush3.bf16.msra.mxu0 %v732_v1  ;;  %723 = vmatpush3.bf16.msra.mxu1 %v732_v1  ;;  %v737_v6 = vld [vmem:[%s942_s1 + $0x58] sm:$0xff]   ;;  %v739_v8 = vld [vmem:[%s942_s1 + $0x60] sm:$0xff]   ;;  %v741_v10 = vld [vmem:[%s942_s1 + $0x68] sm:$0xff]  }
   0x4   :  { %641 = vmatprep.subr.bf16.mxu0 %v733_v2  ;;  %716 = vmatprep.subr.bf16.mxu1 %v733_v2  ;;  %v738_v7 = vld [vmem:[%s942_s1 + $0x18] sm:$0xff]   ;;  %v740_v9 = vld [vmem:[%s942_s1 + $0x20] sm:$0xff]   ;;  %v742_v13 = vld [vmem:[%s942_s1 + $0x28] sm:$0xff]  }
   0x5   :  { %v749_v11 = vld [vmem:[%s943_s0 + $0x4] ss:$12 sps:$4 sm:$0xff]   ;;  %v752_v12 = vld [vmem:[%s943_s0 + $0x7c] ss:$12 sps:$4 sm:$0xff]   ;;  %v747_v19 = vld [vmem:[%s943_s0] ss:$12 sps:$4 sm:$0xff]  }
   0x6   :  { %v743_v14 = vld [vmem:[%s942_s1 + $0x70] sm:$0xff]   ;;  %331 = vmatprep.mubr.bf16.mxu0 %v749_v11  ;;  %371 = vmatprep.mubr.bf16.mxu1 %v752_v12  ;;  %v745_v16 = vld [vmem:[%s942_s1 + $0x78] sm:$0xff]   ;;  %v753_v18 = vld [vmem:[%s942_s1 + $0x80] sm:$0xff]  }
   0x7   :  { %642 = vmatpush3.bf16.msra.mxu0 %v734_v3  ;;  %724 = vmatpush3.bf16.msra.mxu1 %v734_v3  ;;  %v744_v15 = vld [vmem:[%s942_s1 + $0x30] sm:$0xff]   ;;  %v746_v17 = vld [vmem:[%s942_s1 + $0x38] sm:$0xff]   ;;  %v754_v22 = vld [vmem:[%s942_s1 + $0x88] sm:$0xff]  }
   0x8   :  { %643 = vmatprep.subr.bf16.mxu0 %v735_v4  ;;  %717 = vmatprep.subr.bf16.mxu1 %v735_v4  ;;  %v750_v20 = vld [vmem:[%s943_s0 + $0x78] ss:$12 sps:$4 sm:$0xff]   ;;  %v755_v21 = vld [vmem:[%s943_s0 + $0x1c] ss:$12 sps:$4 sm:$0xff]   ;;  %v759_v25 = vld [vmem:[%s943_s0 + $0x20] ss:$12 sps:$4 sm:$0xff]  }
   0x9   :  { %v757_v23 = vld [vmem:[%s943_s0 + $0x8] ss:$12 sps:$4 sm:$0xff]   ;;  %v758_v24 = vld [vmem:[%s943_s0 + $0x18] ss:$12 sps:$4 sm:$0xff]   ;;  %v763_v28 = vld [vmem:[%s943_s0 + $0x30] ss:$12 sps:$4 sm:$0xff]  }
   0xa   :  { %v760_v26 = vld [vmem:[%s943_s0 + $0x34] ss:$12 sps:$4 sm:$0xff]   ;;  %v762_v27 = vld [vmem:[%s943_s0 + $0x38] ss:$12 sps:$4 sm:$0xff]   ;;  %v764_v29 = vld [vmem:[%s943_s0 + $0x50] ss:$12 sps:$4 sm:$0xff]  }
   0xb   :  { %644 = vmatpush3.bf16.msra.mxu0 %v736_v5  ;;  %725 = vmatpush3.bf16.msra.mxu1 %v736_v5  ;;  %v765_v30 = vld [vmem:[%s943_s0 + $0x4c] ss:$12 sps:$4 sm:$0xff]   ;;  %v767_v31 = vld [vmem:[%s943_s0 + $0x68] ss:$12 sps:$4 sm:$0xff]   ;;  %v770_v34 = vld [vmem:[%s943_s0 + $0x64] ss:$12 sps:$4 sm:$0xff]  }
   0xc   :  { %645 = vmatprep.subr.bf16.mxu0 %v737_v6  ;;  %718 = vmatprep.subr.bf16.mxu1 %v737_v6  ;;  %v768_v32 = vld [vmem:[%s943_s0 + $0x48] ss:$12 sps:$4 sm:$0xff]   ;;  %v769_v33 = vld [vmem:[%s943_s0 + $0x80] ss:$12 sps:$4 sm:$0xff]  }
   0xd   :  { %v772_v35 = vld [vmem:[%s943_s0 + $0x60] ss:$12 sps:$4 sm:$0xff]  }
   0xe   :  { %v910_v48 = vld [vmem:[%s944_s2] ss:$0 sm:$0xff] }
   0xf   :  { %646 = vmatpush3.bf16.msra.mxu0 %v738_v7  ;;  %726 = vmatpush3.bf16.msra.mxu1 %v738_v7 }
  0x10   :  { %647 = vmatprep.subr.bf16.mxu0 %v739_v8  ;;  %719 = vmatprep.subr.bf16.mxu1 %v739_v8 }
  0x13   :  { %648 = vmatpush3.bf16.msra.mxu0 %v740_v9  ;;  %727 = vmatpush3.bf16.msra.mxu1 %v740_v9 }
  0x14   :  { %649 = vmatprep.subr.bf16.mxu0 %v741_v10  ;;  %720 = vmatprep.subr.bf16.mxu1 %v741_v10 }
  0x17   :  { %650 = vmatpush3.bf16.msra.mxu0 %v742_v13  ;;  %728 = vmatpush3.bf16.msra.mxu1 %v742_v13 }
  0x18   :  { %651 = vmatprep.subr.bf16.mxu0 %v743_v14  ;;  %721 = vmatprep.subr.bf16.mxu1 %v743_v14 }
  0x1b   :  { %652 = vmatpush3.bf16.msra.mxu0 %v744_v15  ;;  %729 = vmatpush3.bf16.msra.mxu1 %v744_v15 }
  0x1c   :  { %653 = vmatprep.subr.bf16.mxu0 %v745_v16  ;;  %722 = vmatprep.subr.bf16.mxu1 %v745_v16 }
  0x1f   :  { %654 = vmatpush3.bf16.msra.mxu0 %v746_v17  ;;  %730 = vmatpush3.bf16.msra.mxu1 %v746_v17 }
  0x20   :  { %699 = vmatprep.subr.bf16.mxu1 %v753_v18 }
  0x22   :  { %332 = vmatmul.mubr.bf16.vlgmr.msra.gmra.mrb[0].mxu0 %v747_v19  ;;  %372 = vmatmul.mubr.bf16.vlgmr.msra.gmra.mrb[0].mxu1 %v750_v20 }
  0x23   :  { %700 = vmatpush3.bf16.msra.mxu1 %v753_v18  ;;  %339 = vmatprep.mubr.bf16.mxu0 %v755_v21 }
  0x24   :  { %701 = vmatprep.subr.bf16.mxu1 %v754_v22  ;;  %703 = vmatprep.mubr.msk.bf16.mxu1 %vm280_vm0, %v757_v23 }
  0x27   :  { %702 = vmatpush3.bf16.msra.mxu1 %v754_v22 }
  0x2a   :  { %340 = vmatmul.mubr.bf16.gmra.mrb[4].mxu0 %v758_v24  ;;  %704 = vmatmul.mubr.msk.bf16.vlgmr.msra.gmra.mrb[4].mxu1 %vm280_vm0, %v759_v25 }
  0x2b   :  { %347 = vmatprep.mubr.bf16.mxu0 %v760_v26  ;;  %707 = vmatprep.mubr.msk.bf16.mxu1 %vm280_vm0, %v762_v27 }
  0x32   :  { %348 = vmatmul.mubr.bf16.gmra.mrb[8].mxu0 %v763_v28  ;;  %708 = vmatmul.mubr.msk.bf16.gmra.mrb[8].mxu1 %vm280_vm0, %v764_v29 }
  0x33   :  { %355 = vmatprep.mubr.bf16.mxu0 %v765_v30  ;;  %711 = vmatprep.mubr.msk.bf16.mxu1 %vm280_vm0, %v767_v31 }
  0x3a   :  { %356 = vmatmul.mubr.bf16.gmra.mrb[12].mxu0 %v768_v32  ;;  %712 = vmatmul.mubr.msk.bf16.gmra.mrb[12].mxu1 %vm280_vm0, %v769_v33 }
  0x3b   :  { %363 = vmatprep.mubr.bf16.mxu0 %v770_v34 }
  0x42   :  { %364 = vmatmul.mubr.bf16.gmra.mrb[16].mxu0 %v772_v35 }
  0xf5   :  { %v655_v36 = vpop.f32.mrb[0].mxu0  ;;  %v685_v37 = vpop.f32.mrb[0].mxu1 }
  0xf6   :  { %v656_v38 = vpop.f32.mrb[1].mxu0  ;;  %v686_v39 = vpop.f32.mrb[1].mxu1 }
  0xf7   :  { %v657_v40 = vadd.f32 %v656_v38, %v655_v36  ;;  %v658_v41 = vpop.f32.mrb[2].mxu0  ;;  %v687_v42 = vadd.f32 %v686_v39, %v685_v37  ;;  %v688_v43 = vpop.f32.mrb[2].mxu1 }
  0xf8   :  { %v659_v44 = vpop.f32.mrb[3].mxu0  ;;  %v689_v45 = vpop.f32.mrb[3].mxu1 }
  0xf9   :  { %v660_v46 = vadd.f32 %v659_v44, %v658_v41  ;;  %v690_v47 = vadd.f32 %v689_v45, %v688_v43  ;;  %v334_v51 = vadd.f32 %v657_v40, %v910_v48  ;;  %v374_v22 = vadd.f32 %v687_v42, %v910_v48 }
  0xfb   :  { %v337_v58 = vadd.f32 %v660_v46, %v910_v48  ;;  %v377_v29 = vadd.f32 %v690_v47, %v910_v48 }
  0xfd   :  { %v661_v49 = vpop.f32.mrb[4].mxu0  ;;  %v705_v50 = vpop.f32.mrb[4].mxu1 }
  0xfe   :  { %v662_v52 = vpop.f32.mrb[5].mxu0  ;;  %v414_v53 = vpop.f32.mrb[5].mxu1 }
  0xff   :  { %v663_v54 = vadd.f32 %v662_v52, %v661_v49  ;;  %v415_v55 = vadd.f32 %v414_v53, %v334_v51  ;;  %v664_v56 = vpop.f32.mrb[6].mxu0  ;;  %v706_v57 = vpop.f32.mrb[6].mxu1 }
 0x100   :  { %v665_v59 = vpop.f32.mrb[7].mxu0  ;;  %v417_v60 = vpop.f32.mrb[7].mxu1 }
 0x101   :  { %v342_v61 = vadd.f32 %v663_v54, %v910_v48  ;;  %v666_v62 = vadd.f32 %v665_v59, %v664_v56  ;;  %v418_v63 = vadd.f32 %v417_v60, %v337_v58  ;;  %v461_v1 = vmax.f32 %v415_v55, 0.0 }
 0x103   :  { %v423_v0 = vadd.f32 %v705_v50, %v342_v61  ;;  %v345_v2 = vadd.f32 %v666_v62, %v910_v48  ;;  %v462_v3 = vmax.f32 %v418_v63, 0.0 }
 0x105   :  { %v426_v4 = vadd.f32 %v706_v57, %v345_v2  ;;  %v607_v5 = vpack.c.bf16 %v462_v3, %v461_v1  ;;  %v667_v6 = vpop.f32.mrb[8].mxu0  ;;  %v709_v7 = vpop.f32.mrb[8].mxu1  ;;  %v463_v10 = vmax.f32 %v423_v0, 0.0 }
 0x106   :  { %v668_v8 = vpop.f32.mrb[9].mxu0  ;;  %v430_v9 = vpop.f32.mrb[9].mxu1 }
 0x107   :  { %v464_v11 = vmax.f32 %v426_v4, 0.0  ;;  %608 = vst [vmem:[%s945_s3] sm:$0xff] %v607_v5   ;;  %v669_v12 = vadd.f32 %v668_v8, %v667_v6  ;;  %v670_v13 = vpop.f32.mrb[10].mxu0  ;;  %v710_v14 = vpop.f32.mrb[10].mxu1 }
 0x108   :  { %v671_v15 = vpop.f32.mrb[11].mxu0  ;;  %v433_v16 = vpop.f32.mrb[11].mxu1 }
 0x109   :  { %v612_v17 = vpack.c.bf16 %v464_v11, %v463_v10  ;;  %v672_v18 = vadd.f32 %v671_v15, %v670_v13  ;;  %v350_v19 = vadd.f32 %v669_v12, %v910_v48 }
 0x10b   :  { %634 = vst [vmem:[%s945_s3 + $0x8] sm:$0xff] %v612_v17   ;;  %v431_v20 = vadd.f32 %v430_v9, %v350_v19  ;;  %v353_v21 = vadd.f32 %v672_v18, %v910_v48 }
 0x10d   :  { %v434_v23 = vadd.f32 %v433_v16, %v353_v21  ;;  %v673_v24 = vpop.f32.mrb[12].mxu0  ;;  %v713_v25 = vpop.f32.mrb[12].mxu1  ;;  %v465_v30 = vmax.f32 %v431_v20, 0.0 }
 0x10e   :  { %v455_v26 = vadd.f32 %v713_v25, %v374_v22  ;;  %v674_v27 = vpop.f32.mrb[13].mxu0  ;;  %v446_v28 = vpop.f32.mrb[13].mxu1 }
 0x10f   :  { %v466_v31 = vmax.f32 %v434_v23, 0.0  ;;  %v675_v32 = vadd.f32 %v674_v27, %v673_v24  ;;  %v676_v33 = vpop.f32.mrb[14].mxu0  ;;  %v714_v34 = vpop.f32.mrb[14].mxu1 }
 0x110   :  { %v458_v35 = vadd.f32 %v714_v34, %v377_v29  ;;  %v677_v36 = vpop.f32.mrb[15].mxu0  ;;  %v449_v37 = vpop.f32.mrb[15].mxu1  ;;  %v471_v41 = vmax.f32 %v455_v26, 0.0 }
 0x111   :  { %v617_v38 = vpack.c.bf16 %v466_v31, %v465_v30  ;;  %v358_v39 = vadd.f32 %v675_v32, %v910_v48  ;;  %v678_v40 = vadd.f32 %v677_v36, %v676_v33 }
 0x112   :  { %v472_v42 = vmax.f32 %v458_v35, 0.0 }
 0x113   :  { %635 = vst [vmem:[%s945_s3 + $0x10] sm:$0xff] %v617_v38   ;;  %v439_v43 = vadd.f32 %v709_v7, %v358_v39  ;;  %v361_v44 = vadd.f32 %v678_v40, %v910_v48 }
 0x114   :  { %v632_v45 = vpack.c.bf16 %v472_v42, %v471_v41 }
 0x115   :  { %v442_v46 = vadd.f32 %v710_v14, %v361_v44  ;;  %v679_v47 = vpop.f32.mrb[16].mxu0  ;;  %v467_v50 = vmax.f32 %v439_v43, 0.0 }
 0x116   :  { %638 = vst [vmem:[%s945_s3 + $0x28] sm:$0xff] %v632_v45   ;;  %v680_v49 = vpop.f32.mrb[17].mxu0 }
 0x117   :  { %v468_v51 = vmax.f32 %v442_v46, 0.0  ;;  %v681_v52 = vadd.f32 %v680_v49, %v679_v47  ;;  %v682_v53 = vpop.f32.mrb[18].mxu0 }
 0x118   :  { %v683_v54 = vpop.f32.mrb[19].mxu0 }
 0x119   :  { %v622_v55 = vpack.c.bf16 %v468_v51, %v467_v50  ;;  %v366_v56 = vadd.f32 %v681_v52, %v910_v48  ;;  %v684_v57 = vadd.f32 %v683_v54, %v682_v53 }
 0x11b   :  { %636 = vst [vmem:[%s945_s3 + $0x18] sm:$0xff] %v622_v55   ;;  %v447_v58 = vadd.f32 %v446_v28, %v366_v56  ;;  %v369_v59 = vadd.f32 %v684_v57, %v910_v48 }
 0x11d   :  { %v450_v60 = vadd.f32 %v449_v37, %v369_v59  ;;  %v469_v61 = vmax.f32 %v447_v58, 0.0 }
 0x11f   :  { %v470_v62 = vmax.f32 %v450_v60, 0.0 }
 0x121   :  { %v627_v63 = vpack.c.bf16 %v470_v62, %v469_v61 }
 0x123   :  { %637 = vst [vmem:[%s945_s3 + $0x20] sm:$0xff] %v627_v63  }

// kernel: _lambda_.19
= control target key start
LH: loop header
LB: loop body
LE: loop exit
PB: predicated region body
PF: predicated region fallthrough
CT: control target
= control target key end

     0   :  { %vm499_vm0 = vcmask 523264   ;;  %s1554_s1 = inlined_call_operand.vmem [shape: bf16[576,128], index: 1, kind: input, shape index: {}]   ;;  %s1555_s0 = inlined_call_operand.vmem [shape: bf16[96,576], index: 0, kind: input, shape index: {}]   ;;  %s1556_s2 = inlined_call_operand.vmem [shape: f32[1,128], index: 2, kind: input, shape index: {}]   ;;  %s1557_s3 = inlined_call_operand.vmem [shape: bf16[96,128], index: 3, kind: input, shape index: {}]   ;;  %s1558_s4 = inlined_call_operand.vmem [shape: bf16[96,128], index: 4, kind: output, shape index: {}]  }
   0x1   :  { %v1176_v0 = vld [vmem:[%s1554_s1 + $0x40] sm:$0xff]   ;;  %v1180_v4 = vld [vmem:[%s1554_s1 + $0x48] sm:$0xff]   ;;  %v1184_v8 = vld [vmem:[%s1554_s1 + $0x50] sm:$0xff]  }
   0x2   :  { %v1177_v1 = vld [vmem:[%s1554_s1 + $0xc0] sm:$0xff]   ;;  %1034 = vmatprep.subr.bf16.mxu0 %v1176_v0  ;;  %v1181_v5 = vld [vmem:[%s1554_s1 + $0xc8] sm:$0xff]   ;;  %v1185_v9 = vld [vmem:[%s1554_s1 + $0xd0] sm:$0xff]  }
   0x3   :  { %v1178_v2 = vld [vmem:[%s1554_s1] sm:$0xff]   ;;  %1086 = vmatprep.subr.bf16.mxu1 %v1177_v1  ;;  %v1182_v6 = vld [vmem:[%s1554_s1 + $0x8] sm:$0xff]   ;;  %v1186_v10 = vld [vmem:[%s1554_s1 + $0x10] sm:$0xff]  }
   0x4   :  { %v1179_v3 = vld [vmem:[%s1554_s1 + $0x80] sm:$0xff]   ;;  %1035 = vmatpush3.bf16.msra.mxu0 %v1178_v2  ;;  %v1183_v7 = vld [vmem:[%s1554_s1 + $0x88] sm:$0xff]   ;;  %v1187_v11 = vld [vmem:[%s1554_s1 + $0x90] sm:$0xff]  }
   0x5   :  { %1087 = vmatpush3.bf16.msra.mxu1 %v1179_v3  ;;  %1036 = vmatprep.subr.bf16.mxu0 %v1180_v4  ;;  %v1188_v12 = vld [vmem:[%s1554_s1 + $0x58] sm:$0xff]   ;;  %v1192_v16 = vld [vmem:[%s1554_s1 + $0x60] sm:$0xff]   ;;  %v1196_v20 = vld [vmem:[%s1554_s1 + $0x68] sm:$0xff]  }
   0x6   :  { %1088 = vmatprep.subr.bf16.mxu1 %v1181_v5  ;;  %v1189_v13 = vld [vmem:[%s1554_s1 + $0xd8] sm:$0xff]   ;;  %v1193_v17 = vld [vmem:[%s1554_s1 + $0xe0] sm:$0xff]   ;;  %v1197_v21 = vld [vmem:[%s1554_s1 + $0xe8] sm:$0xff]  }
   0x7   :  { %v1190_v14 = vld [vmem:[%s1554_s1 + $0x18] sm:$0xff]   ;;  %v1194_v18 = vld [vmem:[%s1554_s1 + $0x20] sm:$0xff]   ;;  %v1198_v22 = vld [vmem:[%s1554_s1 + $0x28] sm:$0xff]  }
   0x8   :  { %1037 = vmatpush3.bf16.msra.mxu0 %v1182_v6  ;;  %v1191_v15 = vld [vmem:[%s1554_s1 + $0x98] sm:$0xff]   ;;  %v1195_v19 = vld [vmem:[%s1554_s1 + $0xa0] sm:$0xff]   ;;  %v1199_v23 = vld [vmem:[%s1554_s1 + $0xa8] sm:$0xff]  }
   0x9   :  { %1089 = vmatpush3.bf16.msra.mxu1 %v1183_v7  ;;  %1038 = vmatprep.subr.bf16.mxu0 %v1184_v8  ;;  %v1200_v24 = vld [vmem:[%s1554_s1 + $0x70] sm:$0xff]   ;;  %v1204_v28 = vld [vmem:[%s1554_s1 + $0x78] sm:$0xff]   ;;  %v1213_v35 = vld [vmem:[%s1555_s0 + $0xc] ss:$20 sps:$4 sm:$0xff]  }
   0xa   :  { %1090 = vmatprep.subr.bf16.mxu1 %v1185_v9  ;;  %v1201_v25 = vld [vmem:[%s1554_s1 + $0xf0] sm:$0xff]   ;;  %v1205_v29 = vld [vmem:[%s1554_s1 + $0xf8] sm:$0xff]   ;;  %v1214_v36 = vld [vmem:[%s1554_s1 + $0x100] sm:$0xff]   ;;  %631 = vmatprep.mubr.bf16.mxu1 %v1213_v35 }
   0xb   :  { %v1202_v26 = vld [vmem:[%s1554_s1 + $0x30] sm:$0xff]   ;;  %v1206_v30 = vld [vmem:[%s1554_s1 + $0x38] sm:$0xff]   ;;  %v1215_v37 = vld [vmem:[%s1555_s0 + $0x2c] ss:$20 sps:$4 sm:$0xff]  }
   0xc   :  { %1039 = vmatpush3.bf16.msra.mxu0 %v1186_v10  ;;  %v1203_v27 = vld [vmem:[%s1554_s1 + $0xb0] sm:$0xff]   ;;  %v1207_v31 = vld [vmem:[%s1554_s1 + $0xb8] sm:$0xff]   ;;  %v1221_v39 = vld [vmem:[%s1554_s1 + $0x108] sm:$0xff]  }
   0xd   :  { %1091 = vmatpush3.bf16.msra.mxu1 %v1187_v11  ;;  %1040 = vmatprep.subr.bf16.mxu0 %v1188_v12  ;;  %v1208_v32 = vld [vmem:[%s1555_s0] ss:$20 sps:$4 sm:$0xff]   ;;  %v1210_v33 = vld [vmem:[%s1555_s0 + $0x4] ss:$20 sps:$4 sm:$0xff]   ;;  %v1211_v34 = vld [vmem:[%s1555_s0 + $0x8] ss:$20 sps:$4 sm:$0xff]  }
   0xe   :  { %1092 = vmatprep.subr.bf16.mxu1 %v1189_v13  ;;  %550 = vmatprep.mubr.bf16.mxu0 %v1210_v33  ;;  %v1217_v38 = vld [vmem:[%s1555_s0 + $0x34] ss:$20 sps:$4 sm:$0xff]   ;;  %v1220_v41 = vld [vmem:[%s1555_s0 + $0x30] ss:$20 sps:$4 sm:$0xff]   ;;  %v1227_v46 = vld [vmem:[%s1555_s0 + $0x58] ss:$20 sps:$4 sm:$0xff]  }
   0xf   :  { %v1219_v40 = vld [vmem:[%s1555_s0 + $0x28] ss:$20 sps:$4 sm:$0xff]   ;;  %v1234_v44 = vld [vmem:[%s1554_s1 + $0x110] sm:$0xff]   ;;  %v1230_v49 = vld [vmem:[%s1555_s0 + $0x84] ss:$20 sps:$4 sm:$0xff]  }
  0x10   :  { %1041 = vmatpush3.bf16.msra.mxu0 %v1190_v14  ;;  %v1222_v42 = vld [vmem:[%s1555_s0 + $0x54] ss:$20 sps:$4 sm:$0xff]   ;;  %v1224_v43 = vld [vmem:[%s1555_s0 + $0x5c] ss:$20 sps:$4 sm:$0xff]   ;;  %v1232_v50 = vld [vmem:[%s1555_s0 + $0x78] ss:$20 sps:$4 sm:$0xff]  }
  0x11   :  { %1093 = vmatpush3.bf16.msra.mxu1 %v1191_v15  ;;  %1042 = vmatprep.subr.bf16.mxu0 %v1192_v16  ;;  %v1226_v45 = vld [vmem:[%s1555_s0 + $0x50] ss:$20 sps:$4 sm:$0xff]   ;;  %v1241_v48 = vld [vmem:[%s1554_s1 + $0x118] sm:$0xff]   ;;  %v1233_v51 = vld [vmem:[%s1555_s0 + $0x80] ss:$20 sps:$4 sm:$0xff]  }
  0x12   :  { %1094 = vmatprep.subr.bf16.mxu1 %v1193_v17  ;;  %v1228_v47 = vld [vmem:[%s1555_s0 + $0x7c] ss:$20 sps:$4 sm:$0xff]   ;;  %v1235_v52 = vld [vmem:[%s1555_s0 + $0xa4] ss:$20 sps:$4 sm:$0xff]   ;;  %v1237_v53 = vld [vmem:[%s1555_s0 + $0xac] ss:$20 sps:$4 sm:$0xff]  }
  0x13   :  { %v1239_v54 = vld [vmem:[%s1555_s0 + $0xa0] ss:$20 sps:$4 sm:$0xff]   ;;  %v1240_v55 = vld [vmem:[%s1555_s0 + $0xa8] ss:$20 sps:$4 sm:$0xff]   ;;  %v1247_v59 = vld [vmem:[%s1555_s0 + $0xd0] ss:$20 sps:$4 sm:$0xff]  }
  0x14   :  { %1043 = vmatpush3.bf16.msra.mxu0 %v1194_v18  ;;  %v1242_v56 = vld [vmem:[%s1555_s0 + $0xcc] ss:$20 sps:$4 sm:$0xff]   ;;  %v1244_v57 = vld [vmem:[%s1555_s0 + $0xd4] ss:$20 sps:$4 sm:$0xff]   ;;  %v1248_v60 = vld [vmem:[%s1555_s0 + $0x10] ss:$20 sps:$4 sm:$0xff]  }
  0x15   :  { %1095 = vmatpush3.bf16.msra.mxu1 %v1195_v19  ;;  %1044 = vmatprep.subr.bf16.mxu0 %v1196_v20  ;;  %v1246_v58 = vld [vmem:[%s1555_s0 + $0xc8] ss:$20 sps:$4 sm:$0xff]   ;;  %v1249_v61 = vld [vmem:[%s1555_s0 + $0x60] ss:$20 sps:$4 sm:$0xff]   ;;  %v1250_v62 = vld [vmem:[%s1555_s0 + $0x38] ss:$20 sps:$4 sm:$0xff]  }
  0x16   :  { %1096 = vmatprep.subr.bf16.mxu1 %v1197_v21  ;;  %v1251_v63 = vld [vmem:[%s1555_s0 + $0x88] ss:$20 sps:$4 sm:$0xff]   ;;  %v1252_v0 = vld [vmem:[%s1555_s0 + $0xb0] ss:$20 sps:$4 sm:$0xff]   ;;  %v1253_v1 = vld [vmem:[%s1555_s0 + $0xd8] ss:$20 sps:$4 sm:$0xff]  }
  0x17   :  { %v1480_v4 = vld [vmem:[%s1556_s2] ss:$0 sm:$0xff] }
  0x18   :  { %1045 = vmatpush3.bf16.msra.mxu0 %v1198_v22 }
  0x19   :  { %1097 = vmatpush3.bf16.msra.mxu1 %v1199_v23  ;;  %1046 = vmatprep.subr.bf16.mxu0 %v1200_v24 }
  0x1a   :  { %1098 = vmatprep.subr.bf16.mxu1 %v1201_v25 }
  0x1c   :  { %1047 = vmatpush3.bf16.msra.mxu0 %v1202_v26 }
  0x1d   :  { %1099 = vmatpush3.bf16.msra.mxu1 %v1203_v27  ;;  %1048 = vmatprep.subr.bf16.mxu0 %v1204_v28 }
  0x1e   :  { %1100 = vmatprep.subr.bf16.mxu1 %v1205_v29 }
  0x20   :  { %1049 = vmatpush3.bf16.msra.mxu0 %v1206_v30 }
  0x21   :  { %1101 = vmatpush3.bf16.msra.mxu1 %v1207_v31  ;;  %1148 = vmatprep.subr.bf16.mxu0 %v1214_v36 }
  0x22   :  { %1168 = vmatprep.subr.bf16.mxu1 %v1214_v36 }
  0x23   :  { %551 = vmatmul.mubr.bf16.vlgmr.msra.gmra.mrb[0].mxu0 %v1208_v32 }
  0x24   :  { %632 = vmatmul.mubr.bf16.vlgmr.msra.gmra.mrb[0].mxu1 %v1211_v34  ;;  %558 = vmatprep.mubr.bf16.mxu0 %v1215_v37 }
  0x25   :  { %1172 = vmatpush3.bf16.msra.mxu1 %v1214_v36  ;;  %639 = vmatprep.mubr.bf16.mxu1 %v1217_v38 }
  0x26   :  { %1149 = vmatpush3.bf16.msra.mxu0 %v1214_v36  ;;  %1169 = vmatprep.subr.bf16.mxu1 %v1221_v39 }
  0x27   :  { %1150 = vmatprep.subr.bf16.mxu0 %v1221_v39 }
  0x29   :  { %1173 = vmatpush3.bf16.msra.mxu1 %v1221_v39 }
  0x2a   :  { %1151 = vmatpush3.bf16.msra.mxu0 %v1221_v39  ;;  %1170 = vmatprep.subr.bf16.mxu1 %v1234_v44 }
  0x2b   :  { %559 = vmatmul.mubr.bf16.gmra.mrb[4].mxu0 %v1219_v40  ;;  %1152 = vmatprep.subr.bf16.mxu0 %v1234_v44 }
  0x2c   :  { %640 = vmatmul.mubr.bf16.gmra.mrb[4].mxu1 %v1220_v41  ;;  %566 = vmatprep.mubr.bf16.mxu0 %v1222_v42 }
  0x2d   :  { %647 = vmatprep.mubr.bf16.mxu1 %v1224_v43  ;;  %1174 = vmatpush3.bf16.msra.mxu1 %v1234_v44 }
  0x2e   :  { %1153 = vmatpush3.bf16.msra.mxu0 %v1234_v44  ;;  %1171 = vmatprep.subr.bf16.mxu1 %v1241_v48 }
  0x2f   :  { %1154 = vmatprep.subr.bf16.mxu0 %v1241_v48 }
  0x31   :  { %1175 = vmatpush3.bf16.msra.mxu1 %v1241_v48 }
  0x32   :  { %1155 = vmatpush3.bf16.msra.mxu0 %v1241_v48 }
  0x33   :  { %567 = vmatmul.mubr.bf16.gmra.mrb[8].mxu0 %v1226_v45 }
  0x34   :  { %648 = vmatmul.mubr.bf16.gmra.mrb[8].mxu1 %v1227_v46  ;;  %574 = vmatprep.mubr.bf16.mxu0 %v1228_v47 }
  0x35   :  { %655 = vmatprep.mubr.bf16.mxu1 %v1230_v49 }
  0x3b   :  { %575 = vmatmul.mubr.bf16.gmra.mrb[12].mxu0 %v1232_v50 }
  0x3c   :  { %656 = vmatmul.mubr.bf16.gmra.mrb[12].mxu1 %v1233_v51  ;;  %582 = vmatprep.mubr.bf16.mxu0 %v1235_v52 }
  0x3d   :  { %663 = vmatprep.mubr.bf16.mxu1 %v1237_v53 }
  0x43   :  { %583 = vmatmul.mubr.bf16.gmra.mrb[16].mxu0 %v1239_v54 }
  0x44   :  { %664 = vmatmul.mubr.bf16.gmra.mrb[16].mxu1 %v1240_v55  ;;  %590 = vmatprep.mubr.bf16.mxu0 %v1242_v56 }
  0x45   :  { %671 = vmatprep.mubr.bf16.mxu1 %v1244_v57 }
  0x4b   :  { %591 = vmatmul.mubr.bf16.gmra.mrb[20].mxu0 %v1246_v58 }
  0x4c   :  { %672 = vmatmul.mubr.bf16.gmra.mrb[20].mxu1 %v1247_v59  ;;  %1156 = vmatprep.mubr.msk.bf16.mxu0 %vm499_vm0, %v1248_v60 }
  0x4d   :  { %1160 = vmatprep.mubr.msk.bf16.mxu1 %vm499_vm0, %v1249_v61 }
  0x53   :  { %1157 = vmatmul.mubr.msk.bf16.vlgmr.msra.gmra.mrb[24].mxu0 %vm499_vm0, %v1250_v62 }
  0x54   :  { %1161 = vmatmul.mubr.msk.bf16.vlgmr.msra.gmra.mrb[24].mxu1 %vm499_vm0, %v1251_v63 }
  0x55   :  { %1164 = vmatprep.mubr.msk.bf16.mxu1 %vm499_vm0, %v1252_v0 }
  0x5c   :  { %1165 = vmatmul.mubr.msk.bf16.gmra.mrb[28].mxu1 %vm499_vm0, %v1253_v1 }
  0xf6   :  { %v1050_v2 = vpop.f32.mrb[0].mxu0 }
  0xf7   :  { %v1102_v3 = vpop.f32.mrb[0].mxu1  ;;  %v1051_v5 = vpop.f32.mrb[1].mxu0 }
  0xf8   :  { %v1052_v6 = vadd.f32 %v1051_v5, %v1050_v2  ;;  %v1103_v7 = vpop.f32.mrb[1].mxu1  ;;  %v1053_v8 = vpop.f32.mrb[2].mxu0 }
  0xf9   :  { %v1104_v9 = vadd.f32 %v1103_v7, %v1102_v3  ;;  %v1105_v10 = vpop.f32.mrb[2].mxu1  ;;  %v1054_v11 = vpop.f32.mrb[3].mxu0 }
  0xfa   :  { %v553_v12 = vadd.f32 %v1052_v6, %v1480_v4  ;;  %v1055_v13 = vadd.f32 %v1054_v11, %v1053_v8  ;;  %v1106_v14 = vpop.f32.mrb[3].mxu1 }
  0xfb   :  { %v1107_v15 = vadd.f32 %v1106_v14, %v1105_v10 }
  0xfc   :  { %v556_v16 = vadd.f32 %v1055_v13, %v1480_v4  ;;  %v1484_v17 = vadd.f32 %v1104_v9, %v553_v12 }
  0xfe   :  { %v1056_v18 = vpop.f32.mrb[4].mxu0  ;;  %v1486_v19 = vadd.f32 %v1107_v15, %v556_v16 }
  0xff   :  { %v1108_v20 = vpop.f32.mrb[4].mxu1  ;;  %v1057_v21 = vpop.f32.mrb[5].mxu0 }
 0x100   :  { %v1058_v22 = vadd.f32 %v1057_v21, %v1056_v18  ;;  %v1109_v23 = vpop.f32.mrb[5].mxu1  ;;  %v1059_v24 = vpop.f32.mrb[6].mxu0 }
 0x101   :  { %v1110_v25 = vadd.f32 %v1109_v23, %v1108_v20  ;;  %v1111_v26 = vpop.f32.mrb[6].mxu1  ;;  %v1060_v27 = vpop.f32.mrb[7].mxu0 }
 0x102   :  { %v561_v28 = vadd.f32 %v1058_v22, %v1480_v4  ;;  %v1061_v29 = vadd.f32 %v1060_v27, %v1059_v24  ;;  %v1112_v30 = vpop.f32.mrb[7].mxu1 }
 0x103   :  { %v1113_v31 = vadd.f32 %v1112_v30, %v1111_v26 }
 0x104   :  { %v564_v32 = vadd.f32 %v1061_v29, %v1480_v4  ;;  %v1490_v33 = vadd.f32 %v1110_v25, %v561_v28 }
 0x106   :  { %v1062_v34 = vpop.f32.mrb[8].mxu0  ;;  %v1492_v35 = vadd.f32 %v1113_v31, %v564_v32 }
 0x107   :  { %v1114_v36 = vpop.f32.mrb[8].mxu1  ;;  %v1063_v37 = vpop.f32.mrb[9].mxu0 }
 0x108   :  { %v1064_v38 = vadd.f32 %v1063_v37, %v1062_v34  ;;  %v1115_v39 = vpop.f32.mrb[9].mxu1  ;;  %v1065_v40 = vpop.f32.mrb[10].mxu0  ;;  %v1024_v37 = vld [vmem:[%s1557_s3 + $0x8] sm:$0xff]  }
 0x109   :  { %v1116_v41 = vadd.f32 %v1115_v39, %v1114_v36  ;;  %v1117_v42 = vpop.f32.mrb[10].mxu1  ;;  %v1066_v43 = vpop.f32.mrb[11].mxu0  ;;  %v1026_v39 = vld [vmem:[%s1557_s3 + $0x18] sm:$0xff]  }
 0x10a   :  { %v569_v44 = vadd.f32 %v1064_v38, %v1480_v4  ;;  %v1067_v45 = vadd.f32 %v1066_v43, %v1065_v40  ;;  %v1118_v46 = vpop.f32.mrb[11].mxu1  ;;  %v971_v40 = vld [vmem:[%s1557_s3] sm:$0xff]  }
 0x10b   :  { %v1119_v47 = vadd.f32 %v1118_v46, %v1117_v42 }
 0x10c   :  { %v572_v48 = vadd.f32 %v1067_v45, %v1480_v4  ;;  %v1496_v49 = vadd.f32 %v1116_v41, %v569_v44  ;;  %v1025_v41 = vld [vmem:[%s1557_s3 + $0x10] sm:$0xff]   ;;  %v976_v44 = vunpack.c.l.bf16 %v1024_v37 }
 0x10e   :  { %v1068_v50 = vpop.f32.mrb[12].mxu0  ;;  %v1498_v51 = vadd.f32 %v1119_v47, %v572_v48 }
 0x10f   :  { %v1120_v52 = vpop.f32.mrb[12].mxu1  ;;  %v1069_v53 = vpop.f32.mrb[13].mxu0 }
 0x110   :  { %v1070_v54 = vadd.f32 %v1069_v53, %v1068_v50  ;;  %v1121_v55 = vpop.f32.mrb[13].mxu1  ;;  %v1071_v56 = vpop.f32.mrb[14].mxu0  ;;  %v972_v50 = vunpack.c.l.bf16 %v971_v40 }
 0x111   :  { %v1122_v57 = vadd.f32 %v1121_v55, %v1120_v52  ;;  %v1123_v58 = vpop.f32.mrb[14].mxu1  ;;  %v1072_v59 = vpop.f32.mrb[15].mxu0  ;;  %v980_v52 = vunpack.c.l.bf16 %v1025_v41 }
 0x112   :  { %v577_v60 = vadd.f32 %v1070_v54, %v1480_v4  ;;  %v1073_v61 = vadd.f32 %v1072_v59, %v1071_v56  ;;  %v1124_v62 = vpop.f32.mrb[15].mxu1 }
 0x113   :  { %v1125_v63 = vadd.f32 %v1124_v62, %v1123_v58  ;;  %v985_v58 = vunpack.c.h.bf16 %v1026_v39 }
 0x114   :  { %v580_v0 = vadd.f32 %v1073_v61, %v1480_v4  ;;  %v658_v1 = vadd.f32 %v1122_v57, %v577_v60  ;;  %v977_v57 = vunpack.c.h.bf16 %v1024_v37 }
 0x116   :  { %v1074_v2 = vpop.f32.mrb[16].mxu0  ;;  %v661_v3 = vadd.f32 %v1125_v63, %v580_v0 }
 0x117   :  { %v1126_v5 = vpop.f32.mrb[16].mxu1  ;;  %v1075_v6 = vpop.f32.mrb[17].mxu0 }
 0x118   :  { %v1076_v7 = vadd.f32 %v1075_v6, %v1074_v2  ;;  %v1127_v8 = vpop.f32.mrb[17].mxu1  ;;  %v1077_v9 = vpop.f32.mrb[18].mxu0 }
 0x119   :  { %v1128_v10 = vadd.f32 %v1127_v8, %v1126_v5  ;;  %v1129_v11 = vpop.f32.mrb[18].mxu1  ;;  %v1078_v12 = vpop.f32.mrb[19].mxu0 }
 0x11a   :  { %v585_v13 = vadd.f32 %v1076_v7, %v1480_v4  ;;  %v1079_v14 = vadd.f32 %v1078_v12, %v1077_v9  ;;  %v1130_v15 = vpop.f32.mrb[19].mxu1  ;;  %v981_v9 = vunpack.c.h.bf16 %v1025_v41 }
 0x11b   :  { %v1131_v16 = vadd.f32 %v1130_v15, %v1129_v11 }
 0x11c   :  { %v588_v18 = vadd.f32 %v1079_v14, %v1480_v4  ;;  %v1504_v20 = vadd.f32 %v1128_v10, %v585_v13 }
 0x11e   :  { %v1080_v21 = vpop.f32.mrb[20].mxu0  ;;  %v1506_v22 = vadd.f32 %v1131_v16, %v588_v18 }
 0x11f   :  { %v1132_v23 = vpop.f32.mrb[20].mxu1  ;;  %v1081_v24 = vpop.f32.mrb[21].mxu0 }
 0x120   :  { %v1082_v25 = vadd.f32 %v1081_v24, %v1080_v21  ;;  %v1133_v26 = vpop.f32.mrb[21].mxu1  ;;  %v1083_v27 = vpop.f32.mrb[22].mxu0 }
 0x121   :  { %v1134_v28 = vadd.f32 %v1133_v26, %v1132_v23  ;;  %v1135_v29 = vpop.f32.mrb[22].mxu1  ;;  %v1084_v30 = vpop.f32.mrb[23].mxu0 }
 0x122   :  { %v593_v31 = vadd.f32 %v1082_v25, %v1480_v4  ;;  %v1085_v32 = vadd.f32 %v1084_v30, %v1083_v27  ;;  %v1136_v34 = vpop.f32.mrb[23].mxu1  ;;  %v1027_v27 = vld [vmem:[%s1557_s3 + $0x20] sm:$0xff]  }
 0x123   :  { %v1137_v36 = vadd.f32 %v1136_v34, %v1135_v29 }
 0x124   :  { %v596_v38 = vadd.f32 %v1085_v32, %v1480_v4  ;;  %v674_v42 = vadd.f32 %v1134_v28, %v593_v31  ;;  %v984_v4 = vunpack.c.l.bf16 %v1026_v39 }
 0x126   :  { %v1158_v43 = vpop.f32.mrb[24].mxu0  ;;  %v677_v45 = vadd.f32 %v1137_v36, %v596_v38 }
 0x127   :  { %v723_v46 = vadd.f32 %v1158_v43, %v1490_v33  ;;  %v1162_v47 = vpop.f32.mrb[24].mxu1  ;;  %v714_v48 = vpop.f32.mrb[25].mxu0  ;;  %v973_v33 = vunpack.c.h.bf16 %v971_v40  ;;  %v989_v40 = vunpack.c.h.bf16 %v1027_v27 }
 0x128   :  { %v739_v53 = vadd.f32 %v1162_v47, %v658_v1  ;;  %v715_v54 = vadd.f32 %v714_v48, %v1484_v17  ;;  %v730_v55 = vpop.f32.mrb[25].mxu1  ;;  %v1159_v56 = vpop.f32.mrb[26].mxu0 }
 0x129   :  { %v763_v59 = vmax.f32 %v723_v46, 0.0  ;;  %v731_v60 = vadd.f32 %v730_v55, %v1496_v49  ;;  %v726_v61 = vadd.f32 %v1159_v56, %v1492_v35  ;;  %v1163_v62 = vpop.f32.mrb[26].mxu1  ;;  %v717_v63 = vpop.f32.mrb[27].mxu0 }
 0x12a   :  { %v767_v0 = vmax.f32 %v739_v53, 0.0  ;;  %v761_v2 = vmax.f32 %v715_v54, 0.0  ;;  %v742_v5 = vadd.f32 %v1163_v62, %v661_v3  ;;  %v718_v6 = vadd.f32 %v717_v63, %v1486_v19  ;;  %v733_v1 = vpop.f32.mrb[27].mxu1  ;;  %v1028_v19 = vld [vmem:[%s1557_s3 + $0x28] sm:$0xff]  }
 0x12b   :  { %v765_v7 = vmax.f32 %v731_v60, 0.0  ;;  %v764_v17 = vmax.f32 %v726_v61, 0.0  ;;  %v734_v8 = vadd.f32 %v733_v1, %v1498_v51  ;;  %v799_v12 = vadd.f32 %v976_v44, %v763_v59 }
 0x12c   :  { %v768_v10 = vmax.f32 %v742_v5, 0.0  ;;  %v762_v11 = vmax.f32 %v718_v6, 0.0  ;;  %v803_v35 = vadd.f32 %v984_v4, %v767_v0  ;;  %v797_v14 = vadd.f32 %v972_v50, %v761_v2 }
 0x12d   :  { %v800_v49 = vadd.f32 %v977_v57, %v764_v17  ;;  %v766_v13 = vmax.f32 %v734_v8, 0.0  ;;  %v801_v18 = vadd.f32 %v980_v52, %v765_v7  ;;  %v992_v32 = vunpack.c.l.bf16 %v1028_v19 }
 0x12e   :  { %v804_v15 = vadd.f32 %v985_v58, %v768_v10  ;;  %v798_v16 = vadd.f32 %v973_v33, %v762_v11  ;;  %v993_v36 = vunpack.c.h.bf16 %v1028_v19 }
 0x12f   :  { %v1002_v21 = vpack.c.bf16 %v800_v49, %v799_v12  ;;  %v802_v3 = vadd.f32 %v981_v9, %v766_v13  ;;  %v1166_v23 = vpop.f32.mrb[28].mxu1 }
 0x130   :  { %v1012_v24 = vpack.c.bf16 %v804_v15, %v803_v35  ;;  %v997_v51 = vpack.c.bf16 %v798_v16, %v797_v14  ;;  %v755_v25 = vadd.f32 %v1166_v23, %v674_v42  ;;  %v746_v26 = vpop.f32.mrb[29].mxu1 }
 0x131   :  { %1029 = vst [vmem:[%s1558_s4 + $0x8] sm:$0xff] %v1002_v21   ;;  %v1007_v28 = vpack.c.bf16 %v802_v3, %v801_v18  ;;  %v747_v29 = vadd.f32 %v746_v26, %v1504_v20  ;;  %v1167_v30 = vpop.f32.mrb[30].mxu1  ;;  %v988_v20 = vunpack.c.l.bf16 %v1027_v27 }
 0x132   :  { %1031 = vst [vmem:[%s1558_s4 + $0x18] sm:$0xff] %v1012_v24   ;;  %998 = vst [vmem:[%s1558_s4] sm:$0xff] %v997_v51   ;;  %v771_v31 = vmax.f32 %v755_v25, 0.0  ;;  %v758_v34 = vadd.f32 %v1167_v30, %v677_v45  ;;  %v749_v37 = vpop.f32.mrb[31].mxu1 }
 0x133   :  { %1030 = vst [vmem:[%s1558_s4 + $0x10] sm:$0xff] %v1007_v28   ;;  %v769_v38 = vmax.f32 %v747_v29, 0.0  ;;  %v750_v39 = vadd.f32 %v749_v37, %v1506_v22 }
 0x134   :  { %v772_v41 = vmax.f32 %v758_v34, 0.0  ;;  %v807_v43 = vadd.f32 %v992_v32, %v771_v31 }
 0x135   :  { %v770_v42 = vmax.f32 %v750_v39, 0.0  ;;  %v805_v46 = vadd.f32 %v988_v20, %v769_v38 }
 0x136   :  { %v808_v44 = vadd.f32 %v993_v36, %v772_v41 }
 0x137   :  { %v806_v47 = vadd.f32 %v989_v40, %v770_v42 }
 0x138   :  { %v1022_v4 = vpack.c.bf16 %v808_v44, %v807_v43 }
 0x139   :  { %v1017_v48 = vpack.c.bf16 %v806_v47, %v805_v46 }
 0x13a   :  { %1033 = vst [vmem:[%s1558_s4 + $0x28] sm:$0xff] %v1022_v4  }
 0x13b   :  { %1032 = vst [vmem:[%s1558_s4 + $0x20] sm:$0xff] %v1017_v48  }

// kernel: _lambda_.20
= control target key start
LH: loop header
LB: loop body
LE: loop exit
PB: predicated region body
PF: predicated region fallthrough
CT: control target
= control target key end

     0   :  { %vm361_vm0 = vcmask 523264   ;;  %s878_s1 = inlined_call_operand.vmem [shape: bf16[576,128], index: 1, kind: input, shape index: {}]   ;;  %s879_s0 = inlined_call_operand.vmem [shape: bf16[24,576], index: 0, kind: input, shape index: {}]   ;;  %s880_s2 = inlined_call_operand.vmem [shape: f32[1,128], index: 2, kind: input, shape index: {}]   ;;  %s881_s3 = inlined_call_operand.vmem [shape: bf16[24,128], index: 3, kind: output, shape index: {}]  }
   0x1   :  { %v669_v0 = vld [vmem:[%s878_s1 + $0x40] sm:$0xff]   ;;  %v673_v4 = vld [vmem:[%s878_s1 + $0x48] sm:$0xff]   ;;  %v677_v8 = vld [vmem:[%s878_s1 + $0x50] sm:$0xff]  }
   0x2   :  { %v670_v1 = vld [vmem:[%s878_s1] sm:$0xff]   ;;  %595 = vmatprep.subr.bf16.mxu0 %v669_v0  ;;  %v674_v5 = vld [vmem:[%s878_s1 + $0x8] sm:$0xff]   ;;  %v678_v9 = vld [vmem:[%s878_s1 + $0x10] sm:$0xff]  }
   0x3   :  { %v671_v2 = vld [vmem:[%s878_s1 + $0xc0] sm:$0xff]   ;;  %596 = vmatpush3.bf16.msra.mxu0 %v670_v1  ;;  %v675_v6 = vld [vmem:[%s878_s1 + $0xc8] sm:$0xff]   ;;  %v679_v10 = vld [vmem:[%s878_s1 + $0xd0] sm:$0xff]  }
   0x4   :  { %v672_v3 = vld [vmem:[%s878_s1 + $0x80] sm:$0xff]   ;;  %623 = vmatprep.subr.bf16.mxu1 %v671_v2  ;;  %597 = vmatprep.subr.bf16.mxu0 %v673_v4  ;;  %v676_v7 = vld [vmem:[%s878_s1 + $0x88] sm:$0xff]   ;;  %v680_v11 = vld [vmem:[%s878_s1 + $0x90] sm:$0xff]  }
   0x5   :  { %624 = vmatpush3.bf16.msra.mxu1 %v672_v3  ;;  %v681_v12 = vld [vmem:[%s878_s1 + $0x58] sm:$0xff]   ;;  %v685_v16 = vld [vmem:[%s878_s1 + $0x60] sm:$0xff]   ;;  %v689_v20 = vld [vmem:[%s878_s1 + $0x68] sm:$0xff]  }
   0x6   :  { %625 = vmatprep.subr.bf16.mxu1 %v675_v6  ;;  %v682_v13 = vld [vmem:[%s878_s1 + $0x18] sm:$0xff]   ;;  %v686_v17 = vld [vmem:[%s878_s1 + $0x20] sm:$0xff]   ;;  %v690_v21 = vld [vmem:[%s878_s1 + $0x28] sm:$0xff]  }
   0x7   :  { %598 = vmatpush3.bf16.msra.mxu0 %v674_v5  ;;  %v683_v14 = vld [vmem:[%s878_s1 + $0xd8] sm:$0xff]   ;;  %v687_v18 = vld [vmem:[%s878_s1 + $0xe0] sm:$0xff]   ;;  %v691_v22 = vld [vmem:[%s878_s1 + $0xe8] sm:$0xff]  }
   0x8   :  { %599 = vmatprep.subr.bf16.mxu0 %v677_v8  ;;  %v684_v15 = vld [vmem:[%s878_s1 + $0x98] sm:$0xff]   ;;  %v688_v19 = vld [vmem:[%s878_s1 + $0xa0] sm:$0xff]   ;;  %v692_v23 = vld [vmem:[%s878_s1 + $0xa8] sm:$0xff]  }
   0x9   :  { %626 = vmatpush3.bf16.msra.mxu1 %v676_v7  ;;  %v693_v24 = vld [vmem:[%s878_s1 + $0x70] sm:$0xff]   ;;  %v697_v28 = vld [vmem:[%s878_s1 + $0x78] sm:$0xff]   ;;  %v704_v34 = vld [vmem:[%s878_s1 + $0x100] sm:$0xff]  }
   0xa   :  { %627 = vmatprep.subr.bf16.mxu1 %v679_v10  ;;  %v694_v25 = vld [vmem:[%s878_s1 + $0x30] sm:$0xff]   ;;  %v698_v29 = vld [vmem:[%s878_s1 + $0x38] sm:$0xff]   ;;  %v707_v36 = vld [vmem:[%s879_s0 + $0xc] ss:$20 sps:$4 sm:$0xff]  }
   0xb   :  { %600 = vmatpush3.bf16.msra.mxu0 %v678_v9  ;;  %v695_v26 = vld [vmem:[%s878_s1 + $0xf0] sm:$0xff]   ;;  %v699_v30 = vld [vmem:[%s878_s1 + $0xf8] sm:$0xff]   ;;  %v708_v37 = vld [vmem:[%s878_s1 + $0x108] sm:$0xff]   ;;  %448 = vmatprep.mubr.bf16.mxu1 %v707_v36 }
   0xc   :  { %601 = vmatprep.subr.bf16.mxu0 %v681_v12  ;;  %v696_v27 = vld [vmem:[%s878_s1 + $0xb0] sm:$0xff]   ;;  %v702_v32 = vld [vmem:[%s879_s0 + $0x4] ss:$20 sps:$4 sm:$0xff]   ;;  %v705_v35 = vld [vmem:[%s879_s0 + $0x8] ss:$20 sps:$4 sm:$0xff]  }
   0xd   :  { %628 = vmatpush3.bf16.msra.mxu1 %v680_v11  ;;  %v700_v31 = vld [vmem:[%s879_s0] ss:$20 sps:$4 sm:$0xff]   ;;  %v703_v33 = vld [vmem:[%s878_s1 + $0xb8] sm:$0xff]   ;;  %400 = vmatprep.mubr.bf16.mxu0 %v702_v32  ;;  %v21_v38 = vld [vmem:[%s879_s0 + $0x28] sm:$0xff] }
   0xe   :  { %629 = vmatprep.subr.bf16.mxu1 %v683_v14  ;;  %v542_v39 = vcombine.high %v21_v38, %v21_v38  ;;  %v711_v40 = vld [vmem:[%s878_s1 + $0x110] sm:$0xff]   ;;  %v541_v42 = vcombine.low %v21_v38, %v21_v38  ;;  %v714_v46 = vld [vmem:[%s878_s1 + $0x118] sm:$0xff]   ;;  %v535_v49 = vld [vmem:[%s880_s2] ss:$0 sm:$0xff] }
   0xf   :  { %602 = vmatpush3.bf16.msra.mxu0 %v682_v13  ;;  %v22_v41 = vld [vmem:[%s879_s0 + $0x30] sm:$0xff]  ;;  %v716_v47 = vld [vmem:[%s879_s0 + $0x38] ss:$0 sps:$4 sm:$0xff]  }
  0x10   :  { %603 = vmatprep.subr.bf16.mxu0 %v685_v16  ;;  %v544_v43 = vcombine.high %v22_v41, %v22_v41  ;;  %v715_v44 = vld [vmem:[%s879_s0 + $0x10] ss:$20 sps:$4 sm:$0xff]   ;;  %v543_v45 = vcombine.low %v22_v41, %v22_v41 }
  0x11   :  { %630 = vmatpush3.bf16.msra.mxu1 %v684_v15 }
  0x12   :  { %631 = vmatprep.subr.bf16.mxu1 %v687_v18 }
  0x13   :  { %604 = vmatpush3.bf16.msra.mxu0 %v686_v17 }
  0x14   :  { %605 = vmatprep.subr.bf16.mxu0 %v689_v20 }
  0x15   :  { %632 = vmatpush3.bf16.msra.mxu1 %v688_v19 }
  0x16   :  { %633 = vmatprep.subr.bf16.mxu1 %v691_v22 }
  0x17   :  { %606 = vmatpush3.bf16.msra.mxu0 %v690_v21 }
  0x18   :  { %607 = vmatprep.subr.bf16.mxu0 %v693_v24 }
  0x19   :  { %634 = vmatpush3.bf16.msra.mxu1 %v692_v23 }
  0x1a   :  { %635 = vmatprep.subr.bf16.mxu1 %v695_v26 }
  0x1b   :  { %608 = vmatpush3.bf16.msra.mxu0 %v694_v25 }
  0x1c   :  { %609 = vmatprep.subr.bf16.mxu0 %v697_v28 }
  0x1d   :  { %636 = vmatpush3.bf16.msra.mxu1 %v696_v27 }
  0x1e   :  { %637 = vmatprep.subr.bf16.mxu1 %v699_v30 }
  0x1f   :  { %610 = vmatpush3.bf16.msra.mxu0 %v698_v29 }
  0x20   :  { %657 = vmatprep.subr.bf16.mxu0 %v704_v34 }
  0x21   :  { %638 = vmatpush3.bf16.msra.mxu1 %v703_v33 }
  0x22   :  { %401 = vmatmul.mubr.bf16.vlgmr.msra.gmra.mrb[0].mxu0 %v700_v31 }
  0x23   :  { %658 = vmatpush3.bf16.msra.mxu0 %v704_v34  ;;  %408 = vmatprep.mubr.bf16.mxu0 %v542_v39 }
  0x24   :  { %449 = vmatmul.mubr.bf16.vlgmr.msra.gmra.mrb[0].mxu1 %v705_v35  ;;  %659 = vmatprep.subr.bf16.mxu0 %v708_v37 }
  0x25   :  { %456 = vmatprep.mubr.bf16.mxu1 %v544_v43 }
  0x27   :  { %660 = vmatpush3.bf16.msra.mxu0 %v708_v37 }
  0x28   :  { %661 = vmatprep.subr.bf16.mxu0 %v711_v40 }
  0x2a   :  { %409 = vmatmul.mubr.bf16.gmra.mrb[4].mxu0 %v541_v42 }
  0x2b   :  { %665 = vmatprep.mubr.msk.bf16.mxu0 %vm361_vm0, %v715_v44  ;;  %662 = vmatpush3.bf16.msra.mxu0 %v711_v40 }
  0x2c   :  { %457 = vmatmul.mubr.bf16.gmra.mrb[4].mxu1 %v543_v45  ;;  %663 = vmatprep.subr.bf16.mxu0 %v714_v46 }
  0x2f   :  { %664 = vmatpush3.bf16.msra.mxu0 %v714_v46 }
  0x32   :  { %666 = vmatmul.mubr.msk.bf16.vlgmr.msra.gmra.mrb[8].mxu0 %vm361_vm0, %v716_v47 }
  0xf5   :  { %v611_v48 = vpop.f32.mrb[0].mxu0 }
  0xf6   :  { %v612_v50 = vpop.f32.mrb[1].mxu0 }
  0xf7   :  { %v613_v51 = vadd.f32 %v612_v50, %v611_v48  ;;  %v614_v52 = vpop.f32.mrb[2].mxu0  ;;  %v639_v53 = vpop.f32.mrb[0].mxu1 }
  0xf8   :  { %v615_v54 = vpop.f32.mrb[3].mxu0  ;;  %v640_v57 = vpop.f32.mrb[1].mxu1 }
  0xf9   :  { %v403_v55 = vadd.f32 %v613_v51, %v535_v49  ;;  %v616_v56 = vadd.f32 %v615_v54, %v614_v52  ;;  %v641_v58 = vadd.f32 %v640_v57, %v639_v53  ;;  %v642_v59 = vpop.f32.mrb[2].mxu1 }
  0xfa   :  { %v643_v61 = vpop.f32.mrb[3].mxu1 }
  0xfb   :  { %v406_v60 = vadd.f32 %v616_v56, %v535_v49  ;;  %v644_v62 = vadd.f32 %v643_v61, %v642_v59  ;;  %v451_v63 = vadd.f32 %v641_v58, %v403_v55 }
  0xfd   :  { %v617_v0 = vpop.f32.mrb[4].mxu0  ;;  %v454_v2 = vadd.f32 %v644_v62, %v406_v60 }
  0xfe   :  { %v618_v1 = vpop.f32.mrb[5].mxu0 }
  0xff   :  { %v619_v3 = vadd.f32 %v618_v1, %v617_v0  ;;  %v620_v4 = vpop.f32.mrb[6].mxu0  ;;  %v645_v5 = vpop.f32.mrb[4].mxu1 }
 0x100   :  { %v621_v6 = vpop.f32.mrb[7].mxu0  ;;  %v646_v8 = vpop.f32.mrb[5].mxu1 }
 0x101   :  { %v411_v7 = vadd.f32 %v619_v3, %v535_v49  ;;  %v647_v9 = vadd.f32 %v646_v8, %v645_v5  ;;  %v648_v10 = vpop.f32.mrb[6].mxu1 }
 0x102   :  { %v649_v11 = vpop.f32.mrb[7].mxu1 }
 0x103   :  { %v459_v12 = vadd.f32 %v647_v9, %v411_v7 }
 0x105   :  { %v667_v13 = vpop.f32.mrb[8].mxu0 }
 0x106   :  { %v507_v14 = vadd.f32 %v667_v13, %v459_v12  ;;  %v498_v15 = vpop.f32.mrb[9].mxu0 }
 0x107   :  { %v499_v16 = vadd.f32 %v498_v15, %v451_v63  ;;  %v668_v17 = vpop.f32.mrb[10].mxu0 }
 0x108   :  { %v514_v18 = vmax.f32 %v507_v14, 0.0  ;;  %v501_v19 = vpop.f32.mrb[11].mxu0 }
 0x109   :  { %v502_v20 = vadd.f32 %v501_v19, %v454_v2  ;;  %v512_v22 = vmax.f32 %v499_v16, 0.0 }
 0x10a   :  { %v589_v21 = vpack.c.bf16 %v514_v18, %v514_v18 }
 0x10b   :  { %v513_v23 = vmax.f32 %v502_v20, 0.0 }
 0x10c   :  { %530 = vst [vmem:[%s881_s3 + $0x8] sm:$0xf] %v589_v21 }
 0x10d   :  { %v593_v24 = vpack.c.bf16 %v513_v23, %v512_v22 }
 0x10f   :  { %594 = vst [vmem:[%s881_s3] sm:$0xff] %v593_v24  }

// kernel: _lambda_.21
= control target key start
LH: loop header
LB: loop body
LE: loop exit
PB: predicated region body
PF: predicated region fallthrough
CT: control target
= control target key end

     0   :  { %vm364_vm0 = vcmask 523264   ;;  %s905_s1 = inlined_call_operand.vmem [shape: bf16[576,128], index: 1, kind: input, shape index: {}]   ;;  %s906_s0 = inlined_call_operand.vmem [shape: bf16[24,576], index: 0, kind: input, shape index: {}]   ;;  %s907_s2 = inlined_call_operand.vmem [shape: f32[1,128], index: 2, kind: input, shape index: {}]   ;;  %s908_s3 = inlined_call_operand.vmem [shape: bf16[24,128], index: 3, kind: input, shape index: {}]   ;;  %s909_s4 = inlined_call_operand.vmem [shape: bf16[24,128], index: 4, kind: output, shape index: {}]  }
   0x1   :  { %v685_v0 = vld [vmem:[%s905_s1 + $0x40] sm:$0xff]   ;;  %v689_v4 = vld [vmem:[%s905_s1 + $0x48] sm:$0xff]   ;;  %v693_v8 = vld [vmem:[%s905_s1 + $0x50] sm:$0xff]  }
   0x2   :  { %v686_v1 = vld [vmem:[%s905_s1] sm:$0xff]   ;;  %611 = vmatprep.subr.bf16.mxu0 %v685_v0  ;;  %v690_v5 = vld [vmem:[%s905_s1 + $0x8] sm:$0xff]   ;;  %v694_v9 = vld [vmem:[%s905_s1 + $0x10] sm:$0xff]  }
   0x3   :  { %v687_v2 = vld [vmem:[%s905_s1 + $0xc0] sm:$0xff]   ;;  %612 = vmatpush3.bf16.msra.mxu0 %v686_v1  ;;  %v691_v6 = vld [vmem:[%s905_s1 + $0xc8] sm:$0xff]   ;;  %v695_v10 = vld [vmem:[%s905_s1 + $0xd0] sm:$0xff]  }
   0x4   :  { %v688_v3 = vld [vmem:[%s905_s1 + $0x80] sm:$0xff]   ;;  %639 = vmatprep.subr.bf16.mxu1 %v687_v2  ;;  %613 = vmatprep.subr.bf16.mxu0 %v689_v4  ;;  %v692_v7 = vld [vmem:[%s905_s1 + $0x88] sm:$0xff]   ;;  %v696_v11 = vld [vmem:[%s905_s1 + $0x90] sm:$0xff]  }
   0x5   :  { %640 = vmatpush3.bf16.msra.mxu1 %v688_v3  ;;  %v697_v12 = vld [vmem:[%s905_s1 + $0x58] sm:$0xff]   ;;  %v701_v16 = vld [vmem:[%s905_s1 + $0x60] sm:$0xff]   ;;  %v705_v20 = vld [vmem:[%s905_s1 + $0x68] sm:$0xff]  }
   0x6   :  { %641 = vmatprep.subr.bf16.mxu1 %v691_v6  ;;  %v698_v13 = vld [vmem:[%s905_s1 + $0x18] sm:$0xff]   ;;  %v702_v17 = vld [vmem:[%s905_s1 + $0x20] sm:$0xff]   ;;  %v706_v21 = vld [vmem:[%s905_s1 + $0x28] sm:$0xff]  }
   0x7   :  { %614 = vmatpush3.bf16.msra.mxu0 %v690_v5  ;;  %v699_v14 = vld [vmem:[%s905_s1 + $0xd8] sm:$0xff]   ;;  %v703_v18 = vld [vmem:[%s905_s1 + $0xe0] sm:$0xff]   ;;  %v707_v22 = vld [vmem:[%s905_s1 + $0xe8] sm:$0xff]  }
   0x8   :  { %615 = vmatprep.subr.bf16.mxu0 %v693_v8  ;;  %v700_v15 = vld [vmem:[%s905_s1 + $0x98] sm:$0xff]   ;;  %v704_v19 = vld [vmem:[%s905_s1 + $0xa0] sm:$0xff]   ;;  %v708_v23 = vld [vmem:[%s905_s1 + $0xa8] sm:$0xff]  }
   0x9   :  { %642 = vmatpush3.bf16.msra.mxu1 %v692_v7  ;;  %v709_v24 = vld [vmem:[%s905_s1 + $0x70] sm:$0xff]   ;;  %v713_v28 = vld [vmem:[%s905_s1 + $0x78] sm:$0xff]   ;;  %v720_v34 = vld [vmem:[%s905_s1 + $0x100] sm:$0xff]  }
   0xa   :  { %643 = vmatprep.subr.bf16.mxu1 %v695_v10  ;;  %v710_v25 = vld [vmem:[%s905_s1 + $0x30] sm:$0xff]   ;;  %v714_v29 = vld [vmem:[%s905_s1 + $0x38] sm:$0xff]   ;;  %v723_v36 = vld [vmem:[%s906_s0 + $0xc] ss:$20 sps:$4 sm:$0xff]  }
   0xb   :  { %616 = vmatpush3.bf16.msra.mxu0 %v694_v9  ;;  %v711_v26 = vld [vmem:[%s905_s1 + $0xf0] sm:$0xff]   ;;  %v715_v30 = vld [vmem:[%s905_s1 + $0xf8] sm:$0xff]   ;;  %v724_v37 = vld [vmem:[%s905_s1 + $0x108] sm:$0xff]   ;;  %451 = vmatprep.mubr.bf16.mxu1 %v723_v36 }
   0xc   :  { %617 = vmatprep.subr.bf16.mxu0 %v697_v12  ;;  %v712_v27 = vld [vmem:[%s905_s1 + $0xb0] sm:$0xff]   ;;  %v718_v32 = vld [vmem:[%s906_s0 + $0x4] ss:$20 sps:$4 sm:$0xff]   ;;  %v721_v35 = vld [vmem:[%s906_s0 + $0x8] ss:$20 sps:$4 sm:$0xff]  }
   0xd   :  { %644 = vmatpush3.bf16.msra.mxu1 %v696_v11  ;;  %v716_v31 = vld [vmem:[%s906_s0] ss:$20 sps:$4 sm:$0xff]   ;;  %v719_v33 = vld [vmem:[%s905_s1 + $0xb8] sm:$0xff]   ;;  %403 = vmatprep.mubr.bf16.mxu0 %v718_v32  ;;  %v24_v38 = vld [vmem:[%s906_s0 + $0x28] sm:$0xff] }
   0xe   :  { %645 = vmatprep.subr.bf16.mxu1 %v699_v14  ;;  %v554_v39 = vcombine.high %v24_v38, %v24_v38  ;;  %v727_v40 = vld [vmem:[%s905_s1 + $0x110] sm:$0xff]   ;;  %v553_v42 = vcombine.low %v24_v38, %v24_v38  ;;  %v730_v46 = vld [vmem:[%s905_s1 + $0x118] sm:$0xff]   ;;  %v547_v49 = vld [vmem:[%s907_s2] ss:$0 sm:$0xff] }
   0xf   :  { %618 = vmatpush3.bf16.msra.mxu0 %v698_v13  ;;  %v25_v41 = vld [vmem:[%s906_s0 + $0x30] sm:$0xff]  ;;  %v732_v47 = vld [vmem:[%s906_s0 + $0x38] ss:$0 sps:$4 sm:$0xff]   ;;  %v520_v13 = vld [vmem:[%s908_s3 + $0x8] sm:$0xf] }
  0x10   :  { %619 = vmatprep.subr.bf16.mxu0 %v701_v16  ;;  %v556_v43 = vcombine.high %v25_v41, %v25_v41  ;;  %v731_v44 = vld [vmem:[%s906_s0 + $0x10] ss:$20 sps:$4 sm:$0xff]   ;;  %v555_v45 = vcombine.low %v25_v41, %v25_v41  ;;  %v523_v16 = vunpack.c.l.bf16 %v520_v13 }
  0x11   :  { %646 = vmatpush3.bf16.msra.mxu1 %v700_v15 }
  0x12   :  { %647 = vmatprep.subr.bf16.mxu1 %v703_v18  ;;  %v603_v18 = vld [vmem:[%s908_s3] sm:$0xff]  }
  0x13   :  { %620 = vmatpush3.bf16.msra.mxu0 %v702_v17 }
  0x14   :  { %621 = vmatprep.subr.bf16.mxu0 %v705_v20 }
  0x15   :  { %648 = vmatpush3.bf16.msra.mxu1 %v704_v19 }
  0x16   :  { %649 = vmatprep.subr.bf16.mxu1 %v707_v22 }
  0x17   :  { %622 = vmatpush3.bf16.msra.mxu0 %v706_v21 }
  0x18   :  { %623 = vmatprep.subr.bf16.mxu0 %v709_v24  ;;  %v604_v24 = vunpack.c.l.bf16 %v603_v18 }
  0x19   :  { %650 = vmatpush3.bf16.msra.mxu1 %v708_v23 }
  0x1a   :  { %651 = vmatprep.subr.bf16.mxu1 %v711_v26  ;;  %v605_v26 = vunpack.c.h.bf16 %v603_v18 }
  0x1b   :  { %624 = vmatpush3.bf16.msra.mxu0 %v710_v25 }
  0x1c   :  { %625 = vmatprep.subr.bf16.mxu0 %v713_v28 }
  0x1d   :  { %652 = vmatpush3.bf16.msra.mxu1 %v712_v27 }
  0x1e   :  { %653 = vmatprep.subr.bf16.mxu1 %v715_v30 }
  0x1f   :  { %626 = vmatpush3.bf16.msra.mxu0 %v714_v29 }
  0x20   :  { %673 = vmatprep.subr.bf16.mxu0 %v720_v34 }
  0x21   :  { %654 = vmatpush3.bf16.msra.mxu1 %v719_v33 }
  0x22   :  { %404 = vmatmul.mubr.bf16.vlgmr.msra.gmra.mrb[0].mxu0 %v716_v31 }
  0x23   :  { %674 = vmatpush3.bf16.msra.mxu0 %v720_v34  ;;  %411 = vmatprep.mubr.bf16.mxu0 %v554_v39 }
  0x24   :  { %452 = vmatmul.mubr.bf16.vlgmr.msra.gmra.mrb[0].mxu1 %v721_v35  ;;  %675 = vmatprep.subr.bf16.mxu0 %v724_v37 }
  0x25   :  { %459 = vmatprep.mubr.bf16.mxu1 %v556_v43 }
  0x27   :  { %676 = vmatpush3.bf16.msra.mxu0 %v724_v37 }
  0x28   :  { %677 = vmatprep.subr.bf16.mxu0 %v727_v40 }
  0x2a   :  { %412 = vmatmul.mubr.bf16.gmra.mrb[4].mxu0 %v553_v42 }
  0x2b   :  { %681 = vmatprep.mubr.msk.bf16.mxu0 %vm364_vm0, %v731_v44  ;;  %678 = vmatpush3.bf16.msra.mxu0 %v727_v40 }
  0x2c   :  { %460 = vmatmul.mubr.bf16.gmra.mrb[4].mxu1 %v555_v45  ;;  %679 = vmatprep.subr.bf16.mxu0 %v730_v46 }
  0x2f   :  { %680 = vmatpush3.bf16.msra.mxu0 %v730_v46 }
  0x32   :  { %682 = vmatmul.mubr.msk.bf16.vlgmr.msra.gmra.mrb[8].mxu0 %vm364_vm0, %v732_v47 }
  0xf5   :  { %v627_v48 = vpop.f32.mrb[0].mxu0 }
  0xf6   :  { %v628_v50 = vpop.f32.mrb[1].mxu0 }
  0xf7   :  { %v629_v51 = vadd.f32 %v628_v50, %v627_v48  ;;  %v630_v52 = vpop.f32.mrb[2].mxu0  ;;  %v655_v53 = vpop.f32.mrb[0].mxu1 }
  0xf8   :  { %v631_v54 = vpop.f32.mrb[3].mxu0  ;;  %v656_v57 = vpop.f32.mrb[1].mxu1 }
  0xf9   :  { %v406_v55 = vadd.f32 %v629_v51, %v547_v49  ;;  %v632_v56 = vadd.f32 %v631_v54, %v630_v52  ;;  %v657_v58 = vadd.f32 %v656_v57, %v655_v53  ;;  %v658_v59 = vpop.f32.mrb[2].mxu1 }
  0xfa   :  { %v659_v61 = vpop.f32.mrb[3].mxu1 }
  0xfb   :  { %v409_v60 = vadd.f32 %v632_v56, %v547_v49  ;;  %v660_v62 = vadd.f32 %v659_v61, %v658_v59  ;;  %v454_v63 = vadd.f32 %v657_v58, %v406_v55 }
  0xfd   :  { %v633_v0 = vpop.f32.mrb[4].mxu0  ;;  %v457_v2 = vadd.f32 %v660_v62, %v409_v60 }
  0xfe   :  { %v634_v1 = vpop.f32.mrb[5].mxu0 }
  0xff   :  { %v635_v3 = vadd.f32 %v634_v1, %v633_v0  ;;  %v636_v4 = vpop.f32.mrb[6].mxu0  ;;  %v661_v5 = vpop.f32.mrb[4].mxu1 }
 0x100   :  { %v637_v6 = vpop.f32.mrb[7].mxu0  ;;  %v662_v8 = vpop.f32.mrb[5].mxu1 }
 0x101   :  { %v414_v7 = vadd.f32 %v635_v3, %v547_v49  ;;  %v663_v9 = vadd.f32 %v662_v8, %v661_v5  ;;  %v664_v10 = vpop.f32.mrb[6].mxu1 }
 0x102   :  { %v665_v11 = vpop.f32.mrb[7].mxu1 }
 0x103   :  { %v462_v12 = vadd.f32 %v663_v9, %v414_v7 }
 0x105   :  { %v683_v14 = vpop.f32.mrb[8].mxu0 }
 0x106   :  { %v510_v15 = vadd.f32 %v683_v14, %v462_v12  ;;  %v501_v17 = vpop.f32.mrb[9].mxu0 }
 0x107   :  { %v502_v19 = vadd.f32 %v501_v17, %v454_v63  ;;  %v684_v20 = vpop.f32.mrb[10].mxu0 }
 0x108   :  { %v517_v21 = vmax.f32 %v510_v15, 0.0  ;;  %v504_v22 = vpop.f32.mrb[11].mxu0 }
 0x109   :  { %v515_v23 = vmax.f32 %v502_v19, 0.0  ;;  %v505_v25 = vadd.f32 %v504_v22, %v457_v2 }
 0x10a   :  { %v526_v27 = vadd.f32 %v523_v16, %v517_v21 }
 0x10b   :  { %v516_v28 = vmax.f32 %v505_v25, 0.0  ;;  %v524_v30 = vadd.f32 %v604_v24, %v515_v23 }
 0x10c   :  { %v601_v29 = vpack.c.bf16 %v526_v27, %v526_v27 }
 0x10d   :  { %v525_v31 = vadd.f32 %v605_v26, %v516_v28 }
 0x10e   :  { %542 = vst [vmem:[%s909_s4 + $0x8] sm:$0xf] %v601_v29 }
 0x10f   :  { %v609_v32 = vpack.c.bf16 %v525_v31, %v524_v30 }
 0x111   :  { %610 = vst [vmem:[%s909_s4] sm:$0xff] %v609_v32  }

// kernel: _lambda_.22
= control target key start
LH: loop header
LB: loop body
LE: loop exit
PB: predicated region body
PF: predicated region fallthrough
CT: control target
= control target key end

     0   :  { %v608_v35 = vmov 0.0   ;;  %vm609_vm0 = vmmov 0   ;;  %vm330_vm1 = vcmask 523264   ;;  %s753_s1 = inlined_call_operand.vmem [shape: bf16[576,128], index: 1, kind: input, shape index: {}]   ;;  %s754_s0 = inlined_call_operand.vmem [shape: bf16[8,576], index: 0, kind: input, shape index: {}]   ;;  %s755_s2 = inlined_call_operand.vmem [shape: f32[1,128], index: 2, kind: input, shape index: {}]   ;;  %s756_s3 = inlined_call_operand.vmem [shape: bf16[8,128], index: 3, kind: output, shape index: {}]  }
   0x1   :  { %v567_v0 = vld [vmem:[%s753_s1 + $0x40] sm:$0xff]   ;;  %v571_v4 = vld [vmem:[%s753_s1 + $0x48] sm:$0xff]   ;;  %v575_v8 = vld [vmem:[%s753_s1 + $0x50] sm:$0xff]  }
   0x2   :  { %v568_v1 = vld [vmem:[%s753_s1] sm:$0xff]   ;;  %504 = vmatprep.subr.bf16.mxu0 %v567_v0  ;;  %v572_v5 = vld [vmem:[%s753_s1 + $0x8] sm:$0xff]   ;;  %v576_v9 = vld [vmem:[%s753_s1 + $0x10] sm:$0xff]  }
   0x3   :  { %v569_v2 = vld [vmem:[%s753_s1 + $0xc0] sm:$0xff]   ;;  %505 = vmatpush3.bf16.msra.mxu0 %v568_v1  ;;  %v573_v6 = vld [vmem:[%s753_s1 + $0xc8] sm:$0xff]   ;;  %v577_v10 = vld [vmem:[%s753_s1 + $0xd0] sm:$0xff]  }
   0x4   :  { %v570_v3 = vld [vmem:[%s753_s1 + $0x80] sm:$0xff]   ;;  %526 = vmatprep.subr.bf16.mxu1 %v569_v2  ;;  %506 = vmatprep.subr.bf16.mxu0 %v571_v4  ;;  %v574_v7 = vld [vmem:[%s753_s1 + $0x88] sm:$0xff]   ;;  %v578_v11 = vld [vmem:[%s753_s1 + $0x90] sm:$0xff]  }
   0x5   :  { %527 = vmatpush3.bf16.msra.mxu1 %v570_v3  ;;  %v579_v12 = vld [vmem:[%s753_s1 + $0x58] sm:$0xff]   ;;  %v583_v16 = vld [vmem:[%s753_s1 + $0x60] sm:$0xff]   ;;  %v587_v20 = vld [vmem:[%s753_s1 + $0x68] sm:$0xff]  }
   0x6   :  { %528 = vmatprep.subr.bf16.mxu1 %v573_v6  ;;  %v580_v13 = vld [vmem:[%s753_s1 + $0x18] sm:$0xff]   ;;  %v584_v17 = vld [vmem:[%s753_s1 + $0x20] sm:$0xff]   ;;  %v588_v21 = vld [vmem:[%s753_s1 + $0x28] sm:$0xff]  }
   0x7   :  { %507 = vmatpush3.bf16.msra.mxu0 %v572_v5  ;;  %v581_v14 = vld [vmem:[%s753_s1 + $0xd8] sm:$0xff]   ;;  %v585_v18 = vld [vmem:[%s753_s1 + $0xe0] sm:$0xff]   ;;  %v589_v22 = vld [vmem:[%s753_s1 + $0xe8] sm:$0xff]  }
   0x8   :  { %508 = vmatprep.subr.bf16.mxu0 %v575_v8  ;;  %v582_v15 = vld [vmem:[%s753_s1 + $0x98] sm:$0xff]   ;;  %v586_v19 = vld [vmem:[%s753_s1 + $0xa0] sm:$0xff]   ;;  %v590_v23 = vld [vmem:[%s753_s1 + $0xa8] sm:$0xff]  }
   0x9   :  { %529 = vmatpush3.bf16.msra.mxu1 %v574_v7  ;;  %v591_v24 = vld [vmem:[%s753_s1 + $0x70] sm:$0xff]   ;;  %v595_v28 = vld [vmem:[%s753_s1 + $0x78] sm:$0xff]   ;;  %v15_v31 = vld [vmem:[%s754_s0] sm:$0xff] }
   0xa   :  { %530 = vmatprep.subr.bf16.mxu1 %v577_v10  ;;  %v592_v25 = vld [vmem:[%s753_s1 + $0x30] sm:$0xff]   ;;  %v596_v29 = vld [vmem:[%s753_s1 + $0x38] sm:$0xff]   ;;  %v462_v32 = vcombine.low %v15_v31, %v15_v31  ;;  %v463_v33 = vcombine.high %v15_v31, %v15_v31  ;;  %v16_v36 = vld [vmem:[%s754_s0 + $0x8] sm:$0xff] }
   0xb   :  { %509 = vmatpush3.bf16.msra.mxu0 %v576_v9  ;;  %v593_v26 = vld [vmem:[%s753_s1 + $0xf0] sm:$0xff]   ;;  %v597_v30 = vld [vmem:[%s753_s1 + $0xf8] sm:$0xff]   ;;  %v464_v37 = vcombine.low %v16_v36, %v16_v36  ;;  %v465_v38 = vcombine.high %v16_v36, %v16_v36  ;;  %v604_v39 = vld [vmem:[%s753_s1 + $0x100] sm:$0xff]  }
   0xc   :  { %510 = vmatprep.subr.bf16.mxu0 %v579_v12  ;;  %v594_v27 = vld [vmem:[%s753_s1 + $0xb0] sm:$0xff]   ;;  %v601_v34 = vld [vmem:[%s753_s1 + $0xb8] sm:$0xff]   ;;  %366 = vmatprep.mubr.bf16.mxu0 %v463_v33  ;;  %v605_v40 = vld [vmem:[%s753_s1 + $0x108] sm:$0xff]  }
   0xd   :  { %531 = vmatpush3.bf16.msra.mxu1 %v578_v11  ;;  %406 = vmatprep.mubr.bf16.mxu1 %v465_v38  ;;  %v606_v41 = vld [vmem:[%s753_s1 + $0x110] sm:$0xff]   ;;  %v607_v42 = vld [vmem:[%s753_s1 + $0x118] sm:$0xff]   ;;  %v461_v45 = vld [vmem:[%s755_s2] ss:$0 sm:$0xff] }
   0xe   :  { %532 = vmatprep.subr.bf16.mxu1 %v581_v14  ;;  %v600_v43 = vld [vmem:[%s754_s0 + $0x10] ss:$0 sps:$4 sm:$0xff]  }
   0xf   :  { %511 = vmatpush3.bf16.msra.mxu0 %v580_v13 }
  0x10   :  { %512 = vmatprep.subr.bf16.mxu0 %v583_v16 }
  0x11   :  { %533 = vmatpush3.bf16.msra.mxu1 %v582_v15 }
  0x12   :  { %534 = vmatprep.subr.bf16.mxu1 %v585_v18 }
  0x13   :  { %513 = vmatpush3.bf16.msra.mxu0 %v584_v17 }
  0x14   :  { %514 = vmatprep.subr.bf16.mxu0 %v587_v20 }
  0x15   :  { %535 = vmatpush3.bf16.msra.mxu1 %v586_v19 }
  0x16   :  { %536 = vmatprep.subr.bf16.mxu1 %v589_v22 }
  0x17   :  { %515 = vmatpush3.bf16.msra.mxu0 %v588_v21 }
  0x18   :  { %516 = vmatprep.subr.bf16.mxu0 %v591_v24 }
  0x19   :  { %537 = vmatpush3.bf16.msra.mxu1 %v590_v23 }
  0x1a   :  { %538 = vmatprep.subr.bf16.mxu1 %v593_v26 }
  0x1b   :  { %517 = vmatpush3.bf16.msra.mxu0 %v592_v25 }
  0x1c   :  { %518 = vmatprep.subr.bf16.mxu0 %v595_v28 }
  0x1d   :  { %539 = vmatpush3.bf16.msra.mxu1 %v594_v27 }
  0x1e   :  { %540 = vmatprep.subr.bf16.mxu1 %v597_v30 }
  0x1f   :  { %519 = vmatpush3.bf16.msra.mxu0 %v596_v29 }
  0x20   :  { %553 = vmatprep.subr.bf16.mxu0 %v608_v35 }
  0x21   :  { %541 = vmatpush3.bf16.msra.mxu1 %v601_v34 }
  0x22   :  { %367 = vmatmul.mubr.bf16.vlgmr.msra.gmra.mrb[0].mxu0 %v462_v32 }
  0x23   :  { %554 = vmatpush3.bf16.msra.mxu0 %v604_v39  ;;  %561 = vmatprep.mubr.msk.bf16.mxu0 %vm609_vm0, %v608_v35 }
  0x24   :  { %407 = vmatmul.mubr.bf16.vlgmr.msra.gmra.mrb[0].mxu1 %v464_v37  ;;  %555 = vmatprep.subr.bf16.mxu0 %v608_v35 }
  0x27   :  { %556 = vmatpush3.bf16.msra.mxu0 %v605_v40 }
  0x28   :  { %557 = vmatprep.subr.bf16.mxu0 %v608_v35 }
  0x2b   :  { %558 = vmatpush3.bf16.msra.mxu0 %v606_v41 }
  0x2c   :  { %559 = vmatprep.subr.bf16.mxu0 %v608_v35 }
  0x2f   :  { %560 = vmatpush3.bf16.msra.mxu0 %v607_v42 }
  0x32   :  { %562 = vmatmul.mubr.msk.bf16.vlgmr.msra.gmra.mrb[4].mxu0 %vm330_vm1, %v600_v43 }
  0xf5   :  { %v520_v44 = vpop.f32.mrb[0].mxu0 }
  0xf6   :  { %v521_v46 = vpop.f32.mrb[1].mxu0 }
  0xf7   :  { %v522_v47 = vadd.f32 %v521_v46, %v520_v44  ;;  %v523_v48 = vpop.f32.mrb[2].mxu0  ;;  %v542_v49 = vpop.f32.mrb[0].mxu1 }
  0xf8   :  { %v524_v50 = vpop.f32.mrb[3].mxu0  ;;  %v543_v51 = vpop.f32.mrb[1].mxu1 }
  0xf9   :  { %v369_v52 = vadd.f32 %v522_v47, %v461_v45  ;;  %v544_v53 = vadd.f32 %v543_v51, %v542_v49  ;;  %v545_v54 = vpop.f32.mrb[2].mxu1 }
  0xfa   :  { %v546_v55 = vpop.f32.mrb[3].mxu1 }
  0xfb   :  { %v409_v56 = vadd.f32 %v544_v53, %v369_v52 }
 0x105   :  { %v448_v57 = vpop.f32.mrb[4].mxu0 }
 0x106   :  { %v449_v58 = vadd.f32 %v448_v57, %v409_v56  ;;  %v563_v59 = vpop.f32.mrb[5].mxu0 }
 0x107   :  { %v451_v60 = vpop.f32.mrb[6].mxu0 }
 0x108   :  { %v454_v61 = vmax.f32 %v449_v58, 0.0  ;;  %v564_v62 = vpop.f32.mrb[7].mxu0 }
 0x10a   :  { %v455_v63 = vpack.c.bf16 %v454_v61, %v454_v61 }
 0x10c   :  { %456 = vst [vmem:[%s756_s3] sm:$0xf] %v455_v63 }

// kernel: _lambda_.23
= control target key start
LH: loop header
LB: loop body
LE: loop exit
PB: predicated region body
PF: predicated region fallthrough
CT: control target
= control target key end

     0   :  { %v650_v35 = vmov 0.0   ;;  %vm651_vm0 = vmmov 0   ;;  %s813_s0 = inlined_call_operand.vmem [shape: bf16[8,576], index: 0, kind: input, shape index: {}]   ;;  %s814_s1 = inlined_call_operand.vmem [shape: bf16[576,128], index: 1, kind: input, shape index: {}]   ;;  %s815_s2 = inlined_call_operand.vmem [shape: f32[1,128], index: 2, kind: input, shape index: {}]   ;;  %s816_s3 = inlined_call_operand.vmem [shape: bf16[8,128], index: 3, kind: input, shape index: {}]   ;;  %s817_s4 = inlined_call_operand.hbm [shape: bf16[8,128], index: 4, kind: output, shape index: {}]  }
   0x1   :  { %v585_v0 = vld [vmem:[%s814_s1 + $0x40] sm:$0xff]   ;;  %v589_v4 = vld [vmem:[%s814_s1 + $0x48] sm:$0xff]   ;;  %v593_v8 = vld [vmem:[%s814_s1 + $0x50] sm:$0xff]  }
   0x2   :  { %v586_v1 = vld [vmem:[%s814_s1] sm:$0xff]   ;;  %521 = vmatprep.subr.bf16.mxu0 %v585_v0  ;;  %v590_v5 = vld [vmem:[%s814_s1 + $0x8] sm:$0xff]   ;;  %v594_v9 = vld [vmem:[%s814_s1 + $0x10] sm:$0xff]  }
   0x3   :  { %v587_v2 = vld [vmem:[%s814_s1 + $0xc0] sm:$0xff]   ;;  %522 = vmatpush3.bf16.msra.mxu0 %v586_v1  ;;  %v591_v6 = vld [vmem:[%s814_s1 + $0xc8] sm:$0xff]   ;;  %v595_v10 = vld [vmem:[%s814_s1 + $0xd0] sm:$0xff]  }
   0x4   :  { %v588_v3 = vld [vmem:[%s814_s1 + $0x80] sm:$0xff]   ;;  %543 = vmatprep.subr.bf16.mxu1 %v587_v2  ;;  %523 = vmatprep.subr.bf16.mxu0 %v589_v4  ;;  %v592_v7 = vld [vmem:[%s814_s1 + $0x88] sm:$0xff]   ;;  %v596_v11 = vld [vmem:[%s814_s1 + $0x90] sm:$0xff]  }
   0x5   :  { %544 = vmatpush3.bf16.msra.mxu1 %v588_v3  ;;  %v597_v12 = vld [vmem:[%s814_s1 + $0x58] sm:$0xff]   ;;  %v601_v16 = vld [vmem:[%s814_s1 + $0x60] sm:$0xff]   ;;  %v605_v20 = vld [vmem:[%s814_s1 + $0x68] sm:$0xff]  }
   0x6   :  { %545 = vmatprep.subr.bf16.mxu1 %v591_v6  ;;  %v598_v13 = vld [vmem:[%s814_s1 + $0x18] sm:$0xff]   ;;  %v602_v17 = vld [vmem:[%s814_s1 + $0x20] sm:$0xff]   ;;  %v606_v21 = vld [vmem:[%s814_s1 + $0x28] sm:$0xff]  }
   0x7   :  { %524 = vmatpush3.bf16.msra.mxu0 %v590_v5  ;;  %v599_v14 = vld [vmem:[%s814_s1 + $0xd8] sm:$0xff]   ;;  %v603_v18 = vld [vmem:[%s814_s1 + $0xe0] sm:$0xff]   ;;  %v607_v22 = vld [vmem:[%s814_s1 + $0xe8] sm:$0xff]  }
   0x8   :  { %525 = vmatprep.subr.bf16.mxu0 %v593_v8  ;;  %v600_v15 = vld [vmem:[%s814_s1 + $0x98] sm:$0xff]   ;;  %v604_v19 = vld [vmem:[%s814_s1 + $0xa0] sm:$0xff]   ;;  %v608_v23 = vld [vmem:[%s814_s1 + $0xa8] sm:$0xff]  }
   0x9   :  { %546 = vmatpush3.bf16.msra.mxu1 %v592_v7  ;;  %v609_v24 = vld [vmem:[%s814_s1 + $0x70] sm:$0xff]   ;;  %v613_v28 = vld [vmem:[%s814_s1 + $0x78] sm:$0xff]   ;;  %v19_v31 = vld [vmem:[%s813_s0] sm:$0xff] }
   0xa   :  { %547 = vmatprep.subr.bf16.mxu1 %v595_v10  ;;  %v610_v25 = vld [vmem:[%s814_s1 + $0x30] sm:$0xff]   ;;  %v614_v29 = vld [vmem:[%s814_s1 + $0x38] sm:$0xff]   ;;  %v479_v32 = vcombine.low %v19_v31, %v19_v31  ;;  %v480_v33 = vcombine.high %v19_v31, %v19_v31  ;;  %v20_v36 = vld [vmem:[%s813_s0 + $0x8] sm:$0xff] }
   0xb   :  { %526 = vmatpush3.bf16.msra.mxu0 %v594_v9  ;;  %v611_v26 = vld [vmem:[%s814_s1 + $0xf0] sm:$0xff]   ;;  %v615_v30 = vld [vmem:[%s814_s1 + $0xf8] sm:$0xff]   ;;  %v481_v37 = vcombine.low %v20_v36, %v20_v36  ;;  %v482_v38 = vcombine.high %v20_v36, %v20_v36  ;;  %v621_v39 = vld [vmem:[%s814_s1 + $0x100] sm:$0xff]  }
   0xc   :  { %527 = vmatprep.subr.bf16.mxu0 %v597_v12  ;;  %v612_v27 = vld [vmem:[%s814_s1 + $0xb0] sm:$0xff]   ;;  %v618_v34 = vld [vmem:[%s814_s1 + $0xb8] sm:$0xff]   ;;  %370 = vmatprep.mubr.bf16.mxu0 %v480_v33  ;;  %v622_v40 = vld [vmem:[%s814_s1 + $0x108] sm:$0xff]  }
   0xd   :  { %548 = vmatpush3.bf16.msra.mxu1 %v596_v11  ;;  %410 = vmatprep.mubr.bf16.mxu1 %v482_v38 }
   0xe   :  { %549 = vmatprep.subr.bf16.mxu1 %v599_v14 }
   0xf   :  { %528 = vmatpush3.bf16.msra.mxu0 %v598_v13 }
  0x10   :  { %529 = vmatprep.subr.bf16.mxu0 %v601_v16 }
  0x11   :  { %550 = vmatpush3.bf16.msra.mxu1 %v600_v15 }
  0x12   :  { %551 = vmatprep.subr.bf16.mxu1 %v603_v18 }
  0x13   :  { %530 = vmatpush3.bf16.msra.mxu0 %v602_v17 }
  0x14   :  { %531 = vmatprep.subr.bf16.mxu0 %v605_v20 }
  0x15   :  { %552 = vmatpush3.bf16.msra.mxu1 %v604_v19 }
  0x16   :  { %553 = vmatprep.subr.bf16.mxu1 %v607_v22 }
  0x17   :  { %532 = vmatpush3.bf16.msra.mxu0 %v606_v21 }
  0x18   :  { %533 = vmatprep.subr.bf16.mxu0 %v609_v24 }
  0x19   :  { %554 = vmatpush3.bf16.msra.mxu1 %v608_v23 }
  0x1a   :  { %555 = vmatprep.subr.bf16.mxu1 %v611_v26 }
  0x1b   :  { %534 = vmatpush3.bf16.msra.mxu0 %v610_v25 }
  0x1c   :  { %535 = vmatprep.subr.bf16.mxu0 %v613_v28 }
  0x1d   :  { %556 = vmatpush3.bf16.msra.mxu1 %v612_v27 }
  0x1e   :  { %557 = vmatprep.subr.bf16.mxu1 %v615_v30 }
  0x1f   :  { %536 = vmatpush3.bf16.msra.mxu0 %v614_v29 }
  0x20   :  { %570 = vmatprep.subr.bf16.mxu0 %v650_v35 }
  0x21   :  { %558 = vmatpush3.bf16.msra.mxu1 %v618_v34 }
  0x22   :  { %371 = vmatmul.mubr.bf16.vlgmr.msra.gmra.mrb[0].mxu0 %v479_v32 }
  0x23   :  { %571 = vmatpush3.bf16.msra.mxu0 %v621_v39  ;;  %578 = vmatprep.mubr.msk.bf16.mxu0 %vm651_vm0, %v650_v35 }
  0x24   :  { %411 = vmatmul.mubr.bf16.vlgmr.msra.gmra.mrb[0].mxu1 %v481_v37  ;;  %572 = vmatprep.subr.bf16.mxu0 %v650_v35 }
  0x25   :  { %9 = vsyncpa [#allocation3], 0  ;;  %v623_v41 = vld [vmem:[%s814_s1 + $0x110] sm:$0xff]   ;;  %v624_v42 = vld [vmem:[%s814_s1 + $0x118] sm:$0xff]   ;;  %vm334_vm1 = vcmask 523264  }
  0x26   :  { %v625_v43 = vld [vmem:[%s813_s0 + $0x10] ss:$0 sps:$4 sm:$0xff]   ;;  %v478_v45 = vld [vmem:[%s815_s2] ss:$0 sm:$0xff]  ;;  %s652_s2 = smov [#allocation2]  }
  0x27   :  { %573 = vmatpush3.bf16.msra.mxu0 %v622_v40  ;;  %v459_v57 = vld [vmem:[%s816_s3] sm:$0xf]  ;;  %s470_s17 = sshll.u32 %s652_s2, 4  ;;  %s471_s17 = int_to_ptr.vmem [resolvable:$true] %s470_s17 }
  0x28   :  { %574 = vmatprep.subr.bf16.mxu0 %v650_v35  ;;  %v460_v61 = vunpack.c.l.bf16 %v459_v57  ;;  %s626_s18 = scalar_lea.vmem %s471_s17, 64  ;;  %p631_p1 = scmp.lt.s32.totalorder %s471_s17, %s471_s17 }
  0x29   :  { %p627_p0 = scmp.ne.s32.totalorder %s471_s17, %s626_s18  ;;  %p632_p2 = scmp.lt.s32.totalorder %s626_s18, %s626_s18 }
  0x2b   :  { %575 = vmatpush3.bf16.msra.mxu0 %v623_v41  ;;  %p633_p3 = por %p632_p2, %p631_p1 }
  0x2c   :  { %576 = vmatprep.subr.bf16.mxu0 %v650_v35 }
  0x2d   :  { %p634_p4 = pnand %p633_p3, %p627_p0 }
  0x2f   :  { %577 = vmatpush3.bf16.msra.mxu0 %v624_v42 }
  0x32   :  { %579 = vmatmul.mubr.msk.bf16.vlgmr.msra.gmra.mrb[4].mxu0 %vm334_vm1, %v625_v43 }
  0xf5   :  { %v537_v44 = vpop.f32.mrb[0].mxu0 }
  0xf6   :  { %v538_v46 = vpop.f32.mrb[1].mxu0 }
  0xf7   :  { %v539_v47 = vadd.f32 %v538_v46, %v537_v44  ;;  %v540_v48 = vpop.f32.mrb[2].mxu0  ;;  %v559_v49 = vpop.f32.mrb[0].mxu1 }
  0xf8   :  { %v541_v50 = vpop.f32.mrb[3].mxu0  ;;  %v560_v51 = vpop.f32.mrb[1].mxu1 }
  0xf9   :  { %v373_v52 = vadd.f32 %v539_v47, %v478_v45  ;;  %v561_v53 = vadd.f32 %v560_v51, %v559_v49  ;;  %v562_v54 = vpop.f32.mrb[2].mxu1 }
  0xfa   :  { %v563_v55 = vpop.f32.mrb[3].mxu1 }
  0xfb   :  { %v413_v56 = vadd.f32 %v561_v53, %v373_v52 }
 0x105   :  { %v452_v58 = vpop.f32.mrb[4].mxu0 }
 0x106   :  { %v453_v59 = vadd.f32 %v452_v58, %v413_v56  ;;  %v580_v60 = vpop.f32.mrb[5].mxu0 }
 0x107   :  { %v455_v62 = vpop.f32.mrb[6].mxu0 }
 0x108   :  { %v458_v63 = vmax.f32 %v453_v59, 0.0  ;;  %v581_v0 = vpop.f32.mrb[7].mxu0 }
 0x10a   :  { %v461_v1 = vadd.f32 %v460_v61, %v458_v63 }
 0x10c   :  { %v462_v2 = vpack.c.bf16 %v461_v1, %v461_v1 }
 0x10e   :  { %463 = vst [vmem:[#allocation2] sm:$0xf] %v462_v2 }
 0x10f   :  { %637 = shalt.err (!%p634_p4)
}
 0x110   :  { %s638_s20 = scalar_lea.hbm %s817_s4, 64 }
 0x111   :  { %p639_p5 = scmp.ne.s32.totalorder %s817_s4, %s638_s20  ;;  %p642_p6 = scmp.lt.u32.totalorder %s638_s20, %s817_s4 }
 0x113   :  { %p644_p7 = pnand %p642_p6, %p639_p5 }
 0x115   :  { %647 = shalt.err (!%p644_p7)
}
 0x116   :  { %473 = dma.vmem_to_hbm [thread:$0]  %s471_s17, 64, %s817_s4, [#allocation3]  }
 0x117   :  { %648 = dma.done.wait [#allocation3], 64  }
 0x118   :  { %649 = vsyncadd [#allocation3], 4294967232 }
 0x119   :  { %477 = vsyncpa [#allocation3], 1 }

</bundles_post_ra>
